<compile_context>
chip_gen: v6e
topology: v6e:2x2x1
jax: 0.10.0
libtpu: 0.0.40
codegen_flags: <defaults>
</compile_context>

<pallas_src>
import functools

import jax
import jax.numpy as jnp
from jax.experimental import pallas as pl
from jax.experimental.pallas import tpu as pltpu


# ---------------------------------------------------------------------------
# Tiled fused matmul kernel (conv + folded-BN bias + optional residual + ReLU)
# ---------------------------------------------------------------------------

def _matmul_kernel(*refs, relu, has_residual):
    if has_residual:
        a_ref, b_ref, shift_ref, res_ref, o_ref, acc_ref = refs
    else:
        a_ref, b_ref, shift_ref, o_ref, acc_ref = refs
        res_ref = None
    k = pl.program_id(2)

    @pl.when(k == 0)
    def _():
        acc_ref[...] = jnp.zeros_like(acc_ref)

    acc_ref[...] += jnp.dot(a_ref[...], b_ref[...],
                            preferred_element_type=jnp.float32)

    @pl.when(k == pl.num_programs(2) - 1)
    def _():
        out = acc_ref[...] + shift_ref[...]
        if has_residual:
            out = out + res_ref[...].astype(jnp.float32)
        if relu:
            out = jnp.maximum(out, 0.0)
        o_ref[...] = out.astype(o_ref.dtype)


def _round_up(x, m):
    return (x + m - 1) // m * m


def _pick_tile(dim, unit, max_tile):
    """Return (padded_dim, tile): tile multiple of `unit`, <= max_tile,
    padded_dim a multiple of tile, minimizing padding (prefer larger tiles)."""
    dp = _round_up(max(dim, unit), unit)
    if dp <= max_tile:
        return dp, dp
    best_pad, best_tile = None, None
    t = max_tile
    while t >= unit:
        p = _round_up(dp, t)
        if best_pad is None or p < best_pad:
            best_pad, best_tile = p, t
        t -= unit
    return best_pad, best_tile


def matmul_bias_act(a, b, shift, *, residual=None, relu=False,
                    out_dtype=jnp.bfloat16):
    """(M,K) @ (K,N) + shift[N] (+ residual[M,N]) (+ ReLU), tiled on the MXU."""
    M, K = a.shape
    K2, N = b.shape
    assert K == K2
    Mp, tm = _pick_tile(M, 8, 256)      # sublane-aligned row tiles
    Kp, tk = _pick_tile(K, 128, 512)    # lane-aligned reduction tiles
    Np, tn = _pick_tile(N, 128, 512)    # lane-dense (>=128) output stores

    a_p = jnp.pad(a.astype(jnp.bfloat16), ((0, Mp - M), (0, Kp - K)))
    b_p = jnp.pad(b.astype(jnp.bfloat16), ((0, Kp - K), (0, Np - N)))
    shift_p = jnp.pad(shift.reshape(1, N).astype(jnp.float32),
                      ((0, 0), (0, Np - N)))

    operands = [a_p, b_p, shift_p]
    in_specs = [
        pl.BlockSpec((tm, tk), lambda i, j, k: (i, k)),
        pl.BlockSpec((tk, tn), lambda i, j, k: (k, j)),
        pl.BlockSpec((1, tn), lambda i, j, k: (0, j)),
    ]
    has_residual = residual is not None
    if has_residual:
        res_p = jnp.pad(residual.astype(jnp.bfloat16),
                        ((0, Mp - M), (0, Np - N)))
        operands.append(res_p)
        in_specs.append(pl.BlockSpec((tm, tn), lambda i, j, k: (i, j)))

    out = pl.pallas_call(
        functools.partial(_matmul_kernel, relu=relu, has_residual=has_residual),
        out_shape=jax.ShapeDtypeStruct((Mp, Np), out_dtype),
        grid=(Mp // tm, Np // tn, Kp // tk),
        in_specs=in_specs,
        out_specs=pl.BlockSpec((tm, tn), lambda i, j, k: (i, j)),
        scratch_shapes=[pltpu.VMEM((tm, tn), jnp.float32)],
        compiler_params=pltpu.CompilerParams(
            dimension_semantics=("parallel", "parallel", "arbitrary")),
    )(*operands)
    return out[:M, :N]


# ---------------------------------------------------------------------------
# Maxpool reduction kernel and fused (GAP + fc1..fc6 + softmax) head kernel
# ---------------------------------------------------------------------------

def _max_reduce_kernel(*refs):
    # refs = (tap_0, ..., tap_{T-1}, out); elementwise max over the taps.
    taps, o_ref = refs[:-1], refs[-1]
    out = taps[0][...]
    for t in taps[1:]:
        out = jnp.maximum(out, t[...])
    o_ref[...] = out


def _head_kernel(*refs, rotation):
    if rotation:
        (x_ref, w1, b1, w2, b2, w3, b3,
         w4, b4, w5, b5, w6, b6, pos_ref, rot_ref) = refs
    else:
        (x_ref, w1, b1, w2, b2, w3, b3, pos_ref) = refs

    # Global average pool over the flattened spatial axis.
    lat = jnp.mean(x_ref[...].astype(jnp.float32), axis=1)        # (N, 512)

    def dense(h, w_ref, b_ref, act):
        y = jnp.dot(h, w_ref[...], preferred_element_type=jnp.float32) + b_ref[...]
        return jnp.maximum(y, 0.0) if act else y

    h = dense(lat, w1, b1, True)
    h = dense(h, w2, b2, True)
    pos_ref[...] = dense(h, w3, b3, False)                        # (N, 2*seekers)

    if rotation:
        g = dense(lat, w4, b4, True)
        g = dense(g, w5, b5, True)
        g = dense(g, w6, b6, False)                               # (N, 3)
        m = jnp.max(g, axis=1, keepdims=True)
        e = jnp.exp(g - m)
        rot_ref[...] = e / jnp.sum(e, axis=1, keepdims=True)


def mlp_heads(x_spatial, params, rotation=True):
    """x_spatial: (N, H*W, 512) bf16. Fused GAP + both MLP heads + softmax."""
    n = x_spatial.shape[0]

    def wb(name):
        w, b = params[name]
        return w.astype(jnp.float32), b.reshape(1, -1).astype(jnp.float32)

    w1, b1 = wb("fc1"); w2, b2 = wb("fc2"); w3, b3 = wb("fc3")
    operands = [x_spatial, w1, b1, w2, b2, w3, b3]
    out_shapes = [jax.ShapeDtypeStruct((n, w3.shape[1]), jnp.float32)]
    if rotation:
        w4, b4 = wb("fc4"); w5, b5 = wb("fc5"); w6, b6 = wb("fc6")
        operands += [w4, b4, w5, b5, w6, b6]
        out_shapes.append(jax.ShapeDtypeStruct((n, w6.shape[1]), jnp.float32))

    outs = pl.pallas_call(
        functools.partial(_head_kernel, rotation=rotation),
        out_shape=tuple(out_shapes) if rotation else out_shapes[0],
    )(*operands)

    if rotation:
        pos, rot = outs
        return jnp.concatenate([pos, rot], axis=1)
    return outs


# ---------------------------------------------------------------------------
# Conv / pooling wrappers (patch extraction is plain-JAX glue, in bf16)
# ---------------------------------------------------------------------------

def _extract_patches(xp, kh, kw, stride, N, OH, OW, C):
    taps = []
    for i in range(kh):
        for j in range(kw):
            taps.append(
                jax.lax.slice(
                    xp,
                    (0, i, j, 0),
                    (N, i + stride * (OH - 1) + 1, j + stride * (OW - 1) + 1, C),
                    (1, stride, stride, 1),
                )
            )  # each: (N, OH, OW, C)
    return taps


def conv2d_bn(x, w, scale, shift, *, stride, pad, relu, residual=None):
    """x: (N,H,W,Cin) NHWC bf16, w: (kh,kw,Cin,Cout). Conv + folded-BN affine
    (+ fused residual add) (+ ReLU)."""
    N, H, W, C = x.shape
    kh, kw, _, Cout = w.shape
    OH = (H + 2 * pad - kh) // stride + 1
    OW = (W + 2 * pad - kw) // stride + 1
    xp = jnp.pad(x.astype(jnp.bfloat16), ((0, 0), (pad, pad), (pad, pad), (0, 0)))
    taps = _extract_patches(xp, kh, kw, stride, N, OH, OW, C)
    a = jnp.stack(taps, axis=3).reshape(N * OH * OW, kh * kw * C)
    # Fold the BN scale into the (small) weight tensor so the kernel epilogue
    # only needs the shift; conv(x) * scale + shift == conv_{w*scale}(x) + shift.
    b = (w.astype(jnp.float32) * scale.astype(jnp.float32)).reshape(kh * kw * C, Cout)
    res2d = None
    if residual is not None:
        res2d = residual.reshape(N * OH * OW, Cout)
    out = matmul_bias_act(a, b, shift, residual=res2d, relu=relu)
    return out.reshape(N, OH, OW, Cout)


def maxpool2d_3x3s2(x):
    """3x3 / stride 2 / pad 1 max pool (torchvision ResNet stem)."""
    N, H, W, C = x.shape
    pad, k, stride = 1, 3, 2
    OH = (H + 2 * pad - k) // stride + 1
    OW = (W + 2 * pad - k) // stride + 1
    xp = jnp.pad(x, ((0, 0), (pad, pad), (pad, pad), (0, 0)),
                 constant_values=-jnp.inf)
    taps = _extract_patches(xp, k, k, stride, N, OH, OW, C)
    taps2d = [t.reshape(N * OH * OW, C) for t in taps]
    out = pl.pallas_call(
        _max_reduce_kernel,
        out_shape=jax.ShapeDtypeStruct((N * OH * OW, C), x.dtype),
    )(*taps2d)
    return out.reshape(N, OH, OW, C)


# ---------------------------------------------------------------------------
# Parameter initialisation (deterministic, synthetic)
# ---------------------------------------------------------------------------

def _init_conv(key, kh, kw, cin, cout):
    std = (2.0 / (kh * kw * cin)) ** 0.5
    return jax.random.normal(key, (kh, kw, cin, cout), jnp.float32) * std


def _init_bn(key, c, eps=1e-5):
    k1, k2, k3, k4 = jax.random.split(key, 4)
    gamma = jax.random.uniform(k1, (c,), minval=0.5, maxval=1.5)
    beta = jax.random.normal(k2, (c,)) * 0.1
    mean = jax.random.normal(k3, (c,)) * 0.1
    var = jax.random.uniform(k4, (c,), minval=0.5, maxval=1.5)
    scale = gamma / jnp.sqrt(var + eps)
    shift = beta - mean * scale
    return scale.astype(jnp.float32), shift.astype(jnp.float32)


def _init_linear(key, cin, cout):
    k1, k2 = jax.random.split(key)
    bound = 1.0 / (cin ** 0.5)
    w = jax.random.uniform(k1, (cin, cout), minval=-bound, maxval=bound)
    b = jax.random.uniform(k2, (cout,), minval=-bound, maxval=bound)
    return w.astype(jnp.float32), b.astype(jnp.float32)


def make_params(key, num_of_frames=1, num_seekers=1):
    keys = iter(jax.random.split(key, 64))
    params = {}
    cin0 = 4 * num_of_frames
    params["conv1_w"] = _init_conv(next(keys), 7, 7, cin0, 64)
    params["bn1"] = _init_bn(next(keys), 64)

    layers = []
    in_c = 64
    for out_c, first_stride in [(64, 1), (128, 2), (256, 2), (512, 2)]:
        blocks = []
        for bi in range(2):
            s = first_stride if bi == 0 else 1
            bp = {
                "conv1_w": _init_conv(next(keys), 3, 3, in_c, out_c),
                "bn1": _init_bn(next(keys), out_c),
                "conv2_w": _init_conv(next(keys), 3, 3, out_c, out_c),
                "bn2": _init_bn(next(keys), out_c),
            }
            if s != 1 or in_c != out_c:
                bp["down_w"] = _init_conv(next(keys), 1, 1, in_c, out_c)
                bp["down_bn"] = _init_bn(next(keys), out_c)
            blocks.append(bp)
            in_c = out_c
        layers.append(blocks)
    params["layers"] = layers

    params["fc1"] = _init_linear(next(keys), 512, 256)
    params["fc2"] = _init_linear(next(keys), 256, 128)
    params["fc3"] = _init_linear(next(keys), 128, 2 * num_seekers)
    params["fc4"] = _init_linear(next(keys), 512, 256)
    params["fc5"] = _init_linear(next(keys), 256, 128)
    params["fc6"] = _init_linear(next(keys), 128, 3)
    return params


# ---------------------------------------------------------------------------
# Forward pass
# ---------------------------------------------------------------------------

def _basic_block(x, bp, stride):
    identity = x
    out = conv2d_bn(x, bp["conv1_w"], *bp["bn1"], stride=stride, pad=1, relu=True)
    if "down_w" in bp:
        identity = conv2d_bn(x, bp["down_w"], *bp["down_bn"],
                             stride=stride, pad=0, relu=False)
    # Second conv with the residual add + ReLU fused into the matmul epilogue.
    out = conv2d_bn(out, bp["conv2_w"], *bp["bn2"], stride=1, pad=1, relu=True,
                    residual=identity)
    return out


def forward(params, x_nchw, rotation=True):
    # NCHW (PyTorch) -> NHWC (kernel layout), bf16 activations for the MXU.
    x = jnp.transpose(x_nchw, (0, 2, 3, 1)).astype(jnp.bfloat16)

    # ResNet-18 stem
    x = conv2d_bn(x, params["conv1_w"], *params["bn1"], stride=2, pad=3, relu=True)
    x = maxpool2d_3x3s2(x)

    # Residual stages
    first_strides = [1, 2, 2, 2]
    for blocks, s0 in zip(params["layers"], first_strides):
        x = _basic_block(x, blocks[0], s0)
        x = _basic_block(x, blocks[1], 1)

    # Fused: global average pool + fc1..fc3 (+ fc4..fc6 + softmax)
    N, H, W, C = x.shape
    return mlp_heads(x.reshape(N, H * W, C), params, rotation=rotation)


# ---------------------------------------------------------------------------

if __name__ == "__main__":
    num_of_frames = 1
    num_seekers = 1

    key = jax.random.PRNGKey(0)
    pkey, xkey = jax.random.split(key)
    params = make_params(pkey, num_of_frames=num_of_frames, num_seekers=num_seekers)

    # PyTorch-convention NCHW input: (batch=2, 4*num_of_frames=4, 32, 32)
    x = jax.random.normal(xkey, (2, 4 * num_of_frames, 32, 32), jnp.float32)

    fwd = jax.jit(functools.partial(forward, rotation=True))
    out = jax.block_until_ready(fwd(params, x))

    assert out.shape == (2, 2 * num_seekers + 3), out.shape
    assert bool(jnp.all(jnp.isfinite(out)))
    print("KERNEL_OK")
</pallas_src>

<mosaic_0001>
module attributes {stable_mosaic.version = 11 : i64} {
  func.func @_matmul_kernel(%arg0: i32, %arg1: i32, %arg2: i32, %arg3: memref<256x256xbf16, #tpu.memory_space<vmem>>, %arg4: memref<256x128xbf16, #tpu.memory_space<vmem>>, %arg5: memref<1x128xf32, #tpu.memory_space<vmem>>, %arg6: memref<256x128xbf16, #tpu.memory_space<vmem>>, %arg7: memref<256x128xf32, #tpu.memory_space<vmem>>) attributes {dimension_semantics = [#tpu.dimension_semantics<parallel>, #tpu.dimension_semantics<parallel>, #tpu.dimension_semantics<arbitrary>], iteration_bounds = array<i64: 2, 1, 1>, scalar_prefetch = 0 : i64, scratch_operands = 1 : i64, tpu.core_type = #tpu.core_type<tc>, window_params = [{transform_indices = @transform_0, window_bounds = array<i64: 256, 256>}, {transform_indices = @transform_1, window_bounds = array<i64: 256, 128>}, {transform_indices = @transform_2, window_bounds = array<i64: 1, 128>}, {transform_indices = @transform_3, window_bounds = array<i64: 256, 128>}]} {
    %c0_i32 = arith.constant 0 : i32
    %0 = arith.cmpi eq, %arg2, %c0_i32 : i32
    %1 = arith.extui %0 : i1 to i32
    %c0_i32_0 = arith.constant 0 : i32
    %2 = arith.cmpi ne, %1, %c0_i32_0 : i32
    scf.if %2 {
      %cst_10 = arith.constant 0.000000e+00 : f32
      %12 = vector.broadcast %cst_10 : f32 to vector<256x128xf32>
      %c0_11 = arith.constant 0 : index
      %c0_12 = arith.constant 0 : index
      %13 = vector.load %arg7[%c0_11, %c0_12] : memref<256x128xf32, #tpu.memory_space<vmem>>, vector<256x128xf32>
      tpu.vector_store %arg7[%c0_11, %c0_12], %12 {strides = array<i32>} : memref<256x128xf32, #tpu.memory_space<vmem>>, vector<256x128xf32>,
    } else {
    }
    %c0 = arith.constant 0 : index
    %c0_1 = arith.constant 0 : index
    %3 = vector.load %arg7[%c0, %c0_1] : memref<256x128xf32, #tpu.memory_space<vmem>>, vector<256x128xf32>
    %c0_2 = arith.constant 0 : index
    %c0_3 = arith.constant 0 : index
    %4 = vector.load %arg3[%c0_2, %c0_3] : memref<256x256xbf16, #tpu.memory_space<vmem>>, vector<256x256xbf16>
    %c0_4 = arith.constant 0 : index
    %c0_5 = arith.constant 0 : index
    %5 = vector.load %arg4[%c0_4, %c0_5] : memref<256x128xbf16, #tpu.memory_space<vmem>>, vector<256x128xbf16>
    %cst = arith.constant dense<0.000000e+00> : vector<256x128xf32>
    %6 = tpu.matmul %4, %5, %cst {dimension_numbers = #tpu.dot_dimension_numbers<[1], [0], [0], [1], [0, 0, 1, 1], [], []>} : vector<256x256xbf16>, vector<256x128xbf16>, vector<256x128xf32> -> vector<256x128xf32>
    %7 = arith.addf %3, %6 : vector<256x128xf32>
    %c0_6 = arith.constant 0 : index
    %c0_7 = arith.constant 0 : index
    %8 = vector.load %arg7[%c0_6, %c0_7] : memref<256x128xf32, #tpu.memory_space<vmem>>, vector<256x128xf32>
    tpu.vector_store %arg7[%c0_6, %c0_7], %7 {strides = array<i32>} : memref<256x128xf32, #tpu.memory_space<vmem>>, vector<256x128xf32>,
    %c0_i32_8 = arith.constant 0 : i32
    %9 = arith.cmpi eq, %arg2, %c0_i32_8 : i32
    %10 = arith.extui %9 : i1 to i32
    %c0_i32_9 = arith.constant 0 : i32
    %11 = arith.cmpi ne, %10, %c0_i32_9 : i32
    scf.if %11 {
      %c0_10 = arith.constant 0 : index
      %c0_11 = arith.constant 0 : index
      %12 = vector.load %arg7[%c0_10, %c0_11] : memref<256x128xf32, #tpu.memory_space<vmem>>, vector<256x128xf32>
      %c0_12 = arith.constant 0 : index
      %c0_13 = arith.constant 0 : index
      %13 = vector.load %arg5[%c0_12, %c0_13] : memref<1x128xf32, #tpu.memory_space<vmem>>, vector<1x128xf32>
      %14 = vector.broadcast %13 : vector<1x128xf32> to vector<256x128xf32>
      %15 = arith.addf %12, %14 : vector<256x128xf32>
      %cst_14 = arith.constant 0.000000e+00 : f32
      %16 = vector.broadcast %cst_14 : f32 to vector<256x128xf32>
      %17 = arith.maximumf %15, %16 : vector<256x128xf32>
      %18 = arith.truncf %17 : vector<256x128xf32> to vector<256x128xbf16>
      %c0_15 = arith.constant 0 : index
      %c0_16 = arith.constant 0 : index
      %19 = vector.load %arg6[%c0_15, %c0_16] : memref<256x128xbf16, #tpu.memory_space<vmem>>, vector<256x128xbf16>
      tpu.vector_store %arg6[%c0_15, %c0_16], %18 {strides = array<i32>} : memref<256x128xbf16, #tpu.memory_space<vmem>>, vector<256x128xbf16>,
    } else {
    }
    return
  }
  func.func @transform_0(%arg0: i32, %arg1: i32, %arg2: i32) -> (i32, i32) {
    %c0_i32 = arith.constant 0 : i32
    return %arg0, %arg2 : i32, i32
  }
  func.func @transform_1(%arg0: i32, %arg1: i32, %arg2: i32) -> (i32, i32) {
    %c0_i32 = arith.constant 0 : i32
    return %arg2, %arg1 : i32, i32
  }
  func.func @transform_2(%arg0: i32, %arg1: i32, %arg2: i32) -> (i32, i32) {
    %c0_i32 = arith.constant 0 : i32
    %c0_i32_0 = arith.constant 0 : i32
    return %c0_i32, %arg1 : i32, i32
  }
  func.func @transform_3(%arg0: i32, %arg1: i32, %arg2: i32) -> (i32, i32) {
    %c0_i32 = arith.constant 0 : i32
    return %arg0, %arg1 : i32, i32
  }
}

module attributes {stable_mosaic.version = 11 : i64} {
  func.func @_max_reduce_kernel(%arg0: memref<128x64xbf16, #tpu.memory_space<vmem>>, %arg1: memref<128x64xbf16, #tpu.memory_space<vmem>>, %arg2: memref<128x64xbf16, #tpu.memory_space<vmem>>, %arg3: memref<128x64xbf16, #tpu.memory_space<vmem>>, %arg4: memref<128x64xbf16, #tpu.memory_space<vmem>>, %arg5: memref<128x64xbf16, #tpu.memory_space<vmem>>, %arg6: memref<128x64xbf16, #tpu.memory_space<vmem>>, %arg7: memref<128x64xbf16, #tpu.memory_space<vmem>>, %arg8: memref<128x64xbf16, #tpu.memory_space<vmem>>, %arg9: memref<128x64xbf16, #tpu.memory_space<vmem>>) attributes {dimension_semantics = [], scalar_prefetch = 0 : i64, scratch_operands = 0 : i64, tpu.core_type = #tpu.core_type<tc>} {
    %c0 = arith.constant 0 : index
    %c0_0 = arith.constant 0 : index
    %0 = vector.load %arg0[%c0, %c0_0] : memref<128x64xbf16, #tpu.memory_space<vmem>>, vector<128x64xbf16>
    %c0_1 = arith.constant 0 : index
    %c0_2 = arith.constant 0 : index
    %1 = vector.load %arg1[%c0_1, %c0_2] : memref<128x64xbf16, #tpu.memory_space<vmem>>, vector<128x64xbf16>
    %2 = arith.maximumf %0, %1 : vector<128x64xbf16>
    %c0_3 = arith.constant 0 : index
    %c0_4 = arith.constant 0 : index
    %3 = vector.load %arg2[%c0_3, %c0_4] : memref<128x64xbf16, #tpu.memory_space<vmem>>, vector<128x64xbf16>
    %4 = arith.maximumf %2, %3 : vector<128x64xbf16>
    %c0_5 = arith.constant 0 : index
    %c0_6 = arith.constant 0 : index
    %5 = vector.load %arg3[%c0_5, %c0_6] : memref<128x64xbf16, #tpu.memory_space<vmem>>, vector<128x64xbf16>
    %6 = arith.maximumf %4, %5 : vector<128x64xbf16>
    %c0_7 = arith.constant 0 : index
    %c0_8 = arith.constant 0 : index
    %7 = vector.load %arg4[%c0_7, %c0_8] : memref<128x64xbf16, #tpu.memory_space<vmem>>, vector<128x64xbf16>
    %8 = arith.maximumf %6, %7 : vector<128x64xbf16>
    %c0_9 = arith.constant 0 : index
    %c0_10 = arith.constant 0 : index
    %9 = vector.load %arg5[%c0_9, %c0_10] : memref<128x64xbf16, #tpu.memory_space<vmem>>, vector<128x64xbf16>
    %10 = arith.maximumf %8, %9 : vector<128x64xbf16>
    %c0_11 = arith.constant 0 : index
    %c0_12 = arith.constant 0 : index
    %11 = vector.load %arg6[%c0_11, %c0_12] : memref<128x64xbf16, #tpu.memory_space<vmem>>, vector<128x64xbf16>
    %12 = arith.maximumf %10, %11 : vector<128x64xbf16>
    %c0_13 = arith.constant 0 : index
    %c0_14 = arith.constant 0 : index
    %13 = vector.load %arg7[%c0_13, %c0_14] : memref<128x64xbf16, #tpu.memory_space<vmem>>, vector<128x64xbf16>
    %14 = arith.maximumf %12, %13 : vector<128x64xbf16>
    %c0_15 = arith.constant 0 : index
    %c0_16 = arith.constant 0 : index
    %15 = vector.load %arg8[%c0_15, %c0_16] : memref<128x64xbf16, #tpu.memory_space<vmem>>, vector<128x64xbf16>
    %16 = arith.maximumf %14, %15 : vector<128x64xbf16>
    %c0_17 = arith.constant 0 : index
    %c0_18 = arith.constant 0 : index
    %17 = vector.load %arg9[%c0_17, %c0_18] : memref<128x64xbf16, #tpu.memory_space<vmem>>, vector<128x64xbf16>
    tpu.vector_store %arg9[%c0_17, %c0_18], %16 {strides = array<i32>} : memref<128x64xbf16, #tpu.memory_space<vmem>>, vector<128x64xbf16>,
    return
  }
}

module attributes {stable_mosaic.version = 11 : i64} {
  func.func @_matmul_kernel(%arg0: i32, %arg1: i32, %arg2: i32, %arg3: memref<128x128xbf16, #tpu.memory_space<vmem>>, %arg4: memref<128x128xbf16, #tpu.memory_space<vmem>>, %arg5: memref<1x128xf32, #tpu.memory_space<vmem>>, %arg6: memref<128x128xbf16, #tpu.memory_space<vmem>>, %arg7: memref<128x128xf32, #tpu.memory_space<vmem>>) attributes {dimension_semantics = [#tpu.dimension_semantics<parallel>, #tpu.dimension_semantics<parallel>, #tpu.dimension_semantics<arbitrary>], iteration_bounds = array<i64: 1, 1, 5>, scalar_prefetch = 0 : i64, scratch_operands = 1 : i64, tpu.core_type = #tpu.core_type<tc>, window_params = [{transform_indices = @transform_0, window_bounds = array<i64: 128, 128>}, {transform_indices = @transform_1, window_bounds = array<i64: 128, 128>}, {transform_indices = @transform_2, window_bounds = array<i64: 1, 128>}, {transform_indices = @transform_3, window_bounds = array<i64: 128, 128>}]} {
    %c0_i32 = arith.constant 0 : i32
    %0 = arith.cmpi eq, %arg2, %c0_i32 : i32
    %1 = arith.extui %0 : i1 to i32
    %c0_i32_0 = arith.constant 0 : i32
    %2 = arith.cmpi ne, %1, %c0_i32_0 : i32
    scf.if %2 {
      %cst_9 = arith.constant 0.000000e+00 : f32
      %12 = vector.broadcast %cst_9 : f32 to vector<128x128xf32>
      %c0_10 = arith.constant 0 : index
      %c0_11 = arith.constant 0 : index
      %13 = vector.load %arg7[%c0_10, %c0_11] : memref<128x128xf32, #tpu.memory_space<vmem>>, vector<128x128xf32>
      tpu.vector_store %arg7[%c0_10, %c0_11], %12 {strides = array<i32>} : memref<128x128xf32, #tpu.memory_space<vmem>>, vector<128x128xf32>,
    } else {
    }
    %c0 = arith.constant 0 : index
    %c0_1 = arith.constant 0 : index
    %3 = vector.load %arg7[%c0, %c0_1] : memref<128x128xf32, #tpu.memory_space<vmem>>, vector<128x128xf32>
    %c0_2 = arith.constant 0 : index
    %c0_3 = arith.constant 0 : index
    %4 = vector.load %arg3[%c0_2, %c0_3] : memref<128x128xbf16, #tpu.memory_space<vmem>>, vector<128x128xbf16>
    %c0_4 = arith.constant 0 : index
    %c0_5 = arith.constant 0 : index
    %5 = vector.load %arg4[%c0_4, %c0_5] : memref<128x128xbf16, #tpu.memory_space<vmem>>, vector<128x128xbf16>
    %cst = arith.constant dense<0.000000e+00> : vector<128x128xf32>
    %6 = tpu.matmul %4, %5, %cst {dimension_numbers = #tpu.dot_dimension_numbers<[1], [0], [0], [1], [0, 0, 1, 1], [], []>} : vector<128x128xbf16>, vector<128x128xbf16>, vector<128x128xf32> -> vector<128x128xf32>
    %7 = arith.addf %3, %6 : vector<128x128xf32>
    %c0_6 = arith.constant 0 : index
    %c0_7 = arith.constant 0 : index
    %8 = vector.load %arg7[%c0_6, %c0_7] : memref<128x128xf32, #tpu.memory_space<vmem>>, vector<128x128xf32>
    tpu.vector_store %arg7[%c0_6, %c0_7], %7 {strides = array<i32>} : memref<128x128xf32, #tpu.memory_space<vmem>>, vector<128x128xf32>,
    %c4_i32 = arith.constant 4 : i32
    %9 = arith.cmpi eq, %arg2, %c4_i32 : i32
    %10 = arith.extui %9 : i1 to i32
    %c0_i32_8 = arith.constant 0 : i32
    %11 = arith.cmpi ne, %10, %c0_i32_8 : i32
    scf.if %11 {
      %c0_9 = arith.constant 0 : index
      %c0_10 = arith.constant 0 : index
      %12 = vector.load %arg7[%c0_9, %c0_10] : memref<128x128xf32, #tpu.memory_space<vmem>>, vector<128x128xf32>
      %c0_11 = arith.constant 0 : index
      %c0_12 = arith.constant 0 : index
      %13 = vector.load %arg5[%c0_11, %c0_12] : memref<1x128xf32, #tpu.memory_space<vmem>>, vector<1x128xf32>
      %14 = vector.broadcast %13 : vector<1x128xf32> to vector<128x128xf32>
      %15 = arith.addf %12, %14 : vector<128x128xf32>
      %cst_13 = arith.constant 0.000000e+00 : f32
      %16 = vector.broadcast %cst_13 : f32 to vector<128x128xf32>
      %17 = arith.maximumf %15, %16 : vector<128x128xf32>
      %18 = arith.truncf %17 : vector<128x128xf32> to vector<128x128xbf16>
      %c0_14 = arith.constant 0 : index
      %c0_15 = arith.constant 0 : index
      %19 = vector.load %arg6[%c0_14, %c0_15] : memref<128x128xbf16, #tpu.memory_space<vmem>>, vector<128x128xbf16>
      tpu.vector_store %arg6[%c0_14, %c0_15], %18 {strides = array<i32>} : memref<128x128xbf16, #tpu.memory_space<vmem>>, vector<128x128xbf16>,
    } else {
    }
    return
  }
  func.func @transform_0(%arg0: i32, %arg1: i32, %arg2: i32) -> (i32, i32) {
    %c0_i32 = arith.constant 0 : i32
    return %arg0, %arg2 : i32, i32
  }
  func.func @transform_1(%arg0: i32, %arg1: i32, %arg2: i32) -> (i32, i32) {
    %c0_i32 = arith.constant 0 : i32
    return %arg2, %arg1 : i32, i32
  }
  func.func @transform_2(%arg0: i32, %arg1: i32, %arg2: i32) -> (i32, i32) {
    %c0_i32 = arith.constant 0 : i32
    %c0_i32_0 = arith.constant 0 : i32
    return %c0_i32, %arg1 : i32, i32
  }
  func.func @transform_3(%arg0: i32, %arg1: i32, %arg2: i32) -> (i32, i32) {
    %c0_i32 = arith.constant 0 : i32
    return %arg0, %arg1 : i32, i32
  }
}

module attributes {stable_mosaic.version = 11 : i64} {
  func.func @_matmul_kernel(%arg0: i32, %arg1: i32, %arg2: i32, %arg3: memref<128x128xbf16, #tpu.memory_space<vmem>>, %arg4: memref<128x128xbf16, #tpu.memory_space<vmem>>, %arg5: memref<1x128xf32, #tpu.memory_space<vmem>>, %arg6: memref<128x128xbf16, #tpu.memory_space<vmem>>, %arg7: memref<128x128xbf16, #tpu.memory_space<vmem>>, %arg8: memref<128x128xf32, #tpu.memory_space<vmem>>) attributes {dimension_semantics = [#tpu.dimension_semantics<parallel>, #tpu.dimension_semantics<parallel>, #tpu.dimension_semantics<arbitrary>], iteration_bounds = array<i64: 1, 1, 5>, scalar_prefetch = 0 : i64, scratch_operands = 1 : i64, tpu.core_type = #tpu.core_type<tc>, window_params = [{transform_indices = @transform_0, window_bounds = array<i64: 128, 128>}, {transform_indices = @transform_1, window_bounds = array<i64: 128, 128>}, {transform_indices = @transform_2, window_bounds = array<i64: 1, 128>}, {transform_indices = @transform_3, window_bounds = array<i64: 128, 128>}, {transform_indices = @transform_4, window_bounds = array<i64: 128, 128>}]} {
    %c0_i32 = arith.constant 0 : i32
    %0 = arith.cmpi eq, %arg2, %c0_i32 : i32
    %1 = arith.extui %0 : i1 to i32
    %c0_i32_0 = arith.constant 0 : i32
    %2 = arith.cmpi ne, %1, %c0_i32_0 : i32
    scf.if %2 {
      %cst_9 = arith.constant 0.000000e+00 : f32
      %12 = vector.broadcast %cst_9 : f32 to vector<128x128xf32>
      %c0_10 = arith.constant 0 : index
      %c0_11 = arith.constant 0 : index
      %13 = vector.load %arg8[%c0_10, %c0_11] : memref<128x128xf32, #tpu.memory_space<vmem>>, vector<128x128xf32>
      tpu.vector_store %arg8[%c0_10, %c0_11], %12 {strides = array<i32>} : memref<128x128xf32, #tpu.memory_space<vmem>>, vector<128x128xf32>,
    } else {
    }
    %c0 = arith.constant 0 : index
    %c0_1 = arith.constant 0 : index
    %3 = vector.load %arg8[%c0, %c0_1] : memref<128x128xf32, #tpu.memory_space<vmem>>, vector<128x128xf32>
    %c0_2 = arith.constant 0 : index
    %c0_3 = arith.constant 0 : index
    %4 = vector.load %arg3[%c0_2, %c0_3] : memref<128x128xbf16, #tpu.memory_space<vmem>>, vector<128x128xbf16>
    %c0_4 = arith.constant 0 : index
    %c0_5 = arith.constant 0 : index
    %5 = vector.load %arg4[%c0_4, %c0_5] : memref<128x128xbf16, #tpu.memory_space<vmem>>, vector<128x128xbf16>
    %cst = arith.constant dense<0.000000e+00> : vector<128x128xf32>
    %6 = tpu.matmul %4, %5, %cst {dimension_numbers = #tpu.dot_dimension_numbers<[1], [0], [0], [1], [0, 0, 1, 1], [], []>} : vector<128x128xbf16>, vector<128x128xbf16>, vector<128x128xf32> -> vector<128x128xf32>
    %7 = arith.addf %3, %6 : vector<128x128xf32>
    %c0_6 = arith.constant 0 : index
    %c0_7 = arith.constant 0 : index
    %8 = vector.load %arg8[%c0_6, %c0_7] : memref<128x128xf32, #tpu.memory_space<vmem>>, vector<128x128xf32>
    tpu.vector_store %arg8[%c0_6, %c0_7], %7 {strides = array<i32>} : memref<128x128xf32, #tpu.memory_space<vmem>>, vector<128x128xf32>,
    %c4_i32 = arith.constant 4 : i32
    %9 = arith.cmpi eq, %arg2, %c4_i32 : i32
    %10 = arith.extui %9 : i1 to i32
    %c0_i32_8 = arith.constant 0 : i32
    %11 = arith.cmpi ne, %10, %c0_i32_8 : i32
    scf.if %11 {
      %c0_9 = arith.constant 0 : index
      %c0_10 = arith.constant 0 : index
      %12 = vector.load %arg8[%c0_9, %c0_10] : memref<128x128xf32, #tpu.memory_space<vmem>>, vector<128x128xf32>
      %c0_11 = arith.constant 0 : index
      %c0_12 = arith.constant 0 : index
      %13 = vector.load %arg5[%c0_11, %c0_12] : memref<1x128xf32, #tpu.memory_space<vmem>>, vector<1x128xf32>
      %14 = vector.broadcast %13 : vector<1x128xf32> to vector<128x128xf32>
      %15 = arith.addf %12, %14 : vector<128x128xf32>
      %c0_13 = arith.constant 0 : index
      %c0_14 = arith.constant 0 : index
      %16 = vector.load %arg6[%c0_13, %c0_14] : memref<128x128xbf16, #tpu.memory_space<vmem>>, vector<128x128xbf16>
      %17 = arith.extf %16 : vector<128x128xbf16> to vector<128x128xf32>
      %18 = arith.addf %15, %17 : vector<128x128xf32>
      %cst_15 = arith.constant 0.000000e+00 : f32
      %19 = vector.broadcast %cst_15 : f32 to vector<128x128xf32>
      %20 = arith.maximumf %18, %19 : vector<128x128xf32>
      %21 = arith.truncf %20 : vector<128x128xf32> to vector<128x128xbf16>
      %c0_16 = arith.constant 0 : index
      %c0_17 = arith.constant 0 : index
      %22 = vector.load %arg7[%c0_16, %c0_17] : memref<128x128xbf16, #tpu.memory_space<vmem>>, vector<128x128xbf16>
      tpu.vector_store %arg7[%c0_16, %c0_17], %21 {strides = array<i32>} : memref<128x128xbf16, #tpu.memory_space<vmem>>, vector<128x128xbf16>,
    } else {
    }
    return
  }
  func.func @transform_0(%arg0: i32, %arg1: i32, %arg2: i32) -> (i32, i32) {
    %c0_i32 = arith.constant 0 : i32
    return %arg0, %arg2 : i32, i32
  }
  func.func @transform_1(%arg0: i32, %arg1: i32, %arg2: i32) -> (i32, i32) {
    %c0_i32 = arith.constant 0 : i32
    return %arg2, %arg1 : i32, i32
  }
  func.func @transform_2(%arg0: i32, %arg1: i32, %arg2: i32) -> (i32, i32) {
    %c0_i32 = arith.constant 0 : i32
    %c0_i32_0 = arith.constant 0 : i32
    return %c0_i32, %arg1 : i32, i32
  }
  func.func @transform_3(%arg0: i32, %arg1: i32, %arg2: i32) -> (i32, i32) {
    %c0_i32 = arith.constant 0 : i32
    return %arg0, %arg1 : i32, i32
  }
  func.func @transform_4(%arg0: i32, %arg1: i32, %arg2: i32) -> (i32, i32) {
    %c0_i32 = arith.constant 0 : i32
    return %arg0, %arg1 : i32, i32
  }
}

module attributes {stable_mosaic.version = 11 : i64} {
  func.func @_matmul_kernel(%arg0: i32, %arg1: i32, %arg2: i32, %arg3: memref<32x128xbf16, #tpu.memory_space<vmem>>, %arg4: memref<128x128xbf16, #tpu.memory_space<vmem>>, %arg5: memref<1x128xf32, #tpu.memory_space<vmem>>, %arg6: memref<32x128xbf16, #tpu.memory_space<vmem>>, %arg7: memref<32x128xf32, #tpu.memory_space<vmem>>) attributes {dimension_semantics = [#tpu.dimension_semantics<parallel>, #tpu.dimension_semantics<parallel>, #tpu.dimension_semantics<arbitrary>], iteration_bounds = array<i64: 1, 1, 5>, scalar_prefetch = 0 : i64, scratch_operands = 1 : i64, tpu.core_type = #tpu.core_type<tc>, window_params = [{transform_indices = @transform_0, window_bounds = array<i64: 32, 128>}, {transform_indices = @transform_1, window_bounds = array<i64: 128, 128>}, {transform_indices = @transform_2, window_bounds = array<i64: 1, 128>}, {transform_indices = @transform_3, window_bounds = array<i64: 32, 128>}]} {
    %c0_i32 = arith.constant 0 : i32
    %0 = arith.cmpi eq, %arg2, %c0_i32 : i32
    %1 = arith.extui %0 : i1 to i32
    %c0_i32_0 = arith.constant 0 : i32
    %2 = arith.cmpi ne, %1, %c0_i32_0 : i32
    scf.if %2 {
      %cst_9 = arith.constant 0.000000e+00 : f32
      %12 = vector.broadcast %cst_9 : f32 to vector<32x128xf32>
      %c0_10 = arith.constant 0 : index
      %c0_11 = arith.constant 0 : index
      %13 = vector.load %arg7[%c0_10, %c0_11] : memref<32x128xf32, #tpu.memory_space<vmem>>, vector<32x128xf32>
      tpu.vector_store %arg7[%c0_10, %c0_11], %12 {strides = array<i32>} : memref<32x128xf32, #tpu.memory_space<vmem>>, vector<32x128xf32>,
    } else {
    }
    %c0 = arith.constant 0 : index
    %c0_1 = arith.constant 0 : index
    %3 = vector.load %arg7[%c0, %c0_1] : memref<32x128xf32, #tpu.memory_space<vmem>>, vector<32x128xf32>
    %c0_2 = arith.constant 0 : index
    %c0_3 = arith.constant 0 : index
    %4 = vector.load %arg3[%c0_2, %c0_3] : memref<32x128xbf16, #tpu.memory_space<vmem>>, vector<32x128xbf16>
    %c0_4 = arith.constant 0 : index
    %c0_5 = arith.constant 0 : index
    %5 = vector.load %arg4[%c0_4, %c0_5] : memref<128x128xbf16, #tpu.memory_space<vmem>>, vector<128x128xbf16>
    %cst = arith.constant dense<0.000000e+00> : vector<32x128xf32>
    %6 = tpu.matmul %4, %5, %cst {dimension_numbers = #tpu.dot_dimension_numbers<[1], [0], [0], [1], [0, 0, 1, 1], [], []>} : vector<32x128xbf16>, vector<128x128xbf16>, vector<32x128xf32> -> vector<32x128xf32>
    %7 = arith.addf %3, %6 : vector<32x128xf32>
    %c0_6 = arith.constant 0 : index
    %c0_7 = arith.constant 0 : index
    %8 = vector.load %arg7[%c0_6, %c0_7] : memref<32x128xf32, #tpu.memory_space<vmem>>, vector<32x128xf32>
    tpu.vector_store %arg7[%c0_6, %c0_7], %7 {strides = array<i32>} : memref<32x128xf32, #tpu.memory_space<vmem>>, vector<32x128xf32>,
    %c4_i32 = arith.constant 4 : i32
    %9 = arith.cmpi eq, %arg2, %c4_i32 : i32
    %10 = arith.extui %9 : i1 to i32
    %c0_i32_8 = arith.constant 0 : i32
    %11 = arith.cmpi ne, %10, %c0_i32_8 : i32
    scf.if %11 {
      %c0_9 = arith.constant 0 : index
      %c0_10 = arith.constant 0 : index
      %12 = vector.load %arg7[%c0_9, %c0_10] : memref<32x128xf32, #tpu.memory_space<vmem>>, vector<32x128xf32>
      %c0_11 = arith.constant 0 : index
      %c0_12 = arith.constant 0 : index
      %13 = vector.load %arg5[%c0_11, %c0_12] : memref<1x128xf32, #tpu.memory_space<vmem>>, vector<1x128xf32>
      %14 = vector.broadcast %13 : vector<1x128xf32> to vector<32x128xf32>
      %15 = arith.addf %12, %14 : vector<32x128xf32>
      %cst_13 = arith.constant 0.000000e+00 : f32
      %16 = vector.broadcast %cst_13 : f32 to vector<32x128xf32>
      %17 = arith.maximumf %15, %16 : vector<32x128xf32>
      %18 = arith.truncf %17 : vector<32x128xf32> to vector<32x128xbf16>
      %c0_14 = arith.constant 0 : index
      %c0_15 = arith.constant 0 : index
      %19 = vector.load %arg6[%c0_14, %c0_15] : memref<32x128xbf16, #tpu.memory_space<vmem>>, vector<32x128xbf16>
      tpu.vector_store %arg6[%c0_14, %c0_15], %18 {strides = array<i32>} : memref<32x128xbf16, #tpu.memory_space<vmem>>, vector<32x128xbf16>,
    } else {
    }
    return
  }
  func.func @transform_0(%arg0: i32, %arg1: i32, %arg2: i32) -> (i32, i32) {
    %c0_i32 = arith.constant 0 : i32
    return %arg0, %arg2 : i32, i32
  }
  func.func @transform_1(%arg0: i32, %arg1: i32, %arg2: i32) -> (i32, i32) {
    %c0_i32 = arith.constant 0 : i32
    return %arg2, %arg1 : i32, i32
  }
  func.func @transform_2(%arg0: i32, %arg1: i32, %arg2: i32) -> (i32, i32) {
    %c0_i32 = arith.constant 0 : i32
    %c0_i32_0 = arith.constant 0 : i32
    return %c0_i32, %arg1 : i32, i32
  }
  func.func @transform_3(%arg0: i32, %arg1: i32, %arg2: i32) -> (i32, i32) {
    %c0_i32 = arith.constant 0 : i32
    return %arg0, %arg1 : i32, i32
  }
}

module attributes {stable_mosaic.version = 11 : i64} {
  func.func @_matmul_kernel(%arg0: i32, %arg1: i32, %arg2: i32, %arg3: memref<32x128xbf16, #tpu.memory_space<vmem>>, %arg4: memref<128x128xbf16, #tpu.memory_space<vmem>>, %arg5: memref<1x128xf32, #tpu.memory_space<vmem>>, %arg6: memref<32x128xbf16, #tpu.memory_space<vmem>>, %arg7: memref<32x128xf32, #tpu.memory_space<vmem>>) attributes {dimension_semantics = [#tpu.dimension_semantics<parallel>, #tpu.dimension_semantics<parallel>, #tpu.dimension_semantics<arbitrary>], iteration_bounds = array<i64: 1, 1, 1>, scalar_prefetch = 0 : i64, scratch_operands = 1 : i64, tpu.core_type = #tpu.core_type<tc>, window_params = [{transform_indices = @transform_0, window_bounds = array<i64: 32, 128>}, {transform_indices = @transform_1, window_bounds = array<i64: 128, 128>}, {transform_indices = @transform_2, window_bounds = array<i64: 1, 128>}, {transform_indices = @transform_3, window_bounds = array<i64: 32, 128>}]} {
    %c0_i32 = arith.constant 0 : i32
    %0 = arith.cmpi eq, %arg2, %c0_i32 : i32
    %1 = arith.extui %0 : i1 to i32
    %c0_i32_0 = arith.constant 0 : i32
    %2 = arith.cmpi ne, %1, %c0_i32_0 : i32
    scf.if %2 {
      %cst_10 = arith.constant 0.000000e+00 : f32
      %12 = vector.broadcast %cst_10 : f32 to vector<32x128xf32>
      %c0_11 = arith.constant 0 : index
      %c0_12 = arith.constant 0 : index
      %13 = vector.load %arg7[%c0_11, %c0_12] : memref<32x128xf32, #tpu.memory_space<vmem>>, vector<32x128xf32>
      tpu.vector_store %arg7[%c0_11, %c0_12], %12 {strides = array<i32>} : memref<32x128xf32, #tpu.memory_space<vmem>>, vector<32x128xf32>,
    } else {
    }
    %c0 = arith.constant 0 : index
    %c0_1 = arith.constant 0 : index
    %3 = vector.load %arg7[%c0, %c0_1] : memref<32x128xf32, #tpu.memory_space<vmem>>, vector<32x128xf32>
    %c0_2 = arith.constant 0 : index
    %c0_3 = arith.constant 0 : index
    %4 = vector.load %arg3[%c0_2, %c0_3] : memref<32x128xbf16, #tpu.memory_space<vmem>>, vector<32x128xbf16>
    %c0_4 = arith.constant 0 : index
    %c0_5 = arith.constant 0 : index
    %5 = vector.load %arg4[%c0_4, %c0_5] : memref<128x128xbf16, #tpu.memory_space<vmem>>, vector<128x128xbf16>
    %cst = arith.constant dense<0.000000e+00> : vector<32x128xf32>
    %6 = tpu.matmul %4, %5, %cst {dimension_numbers = #tpu.dot_dimension_numbers<[1], [0], [0], [1], [0, 0, 1, 1], [], []>} : vector<32x128xbf16>, vector<128x128xbf16>, vector<32x128xf32> -> vector<32x128xf32>
    %7 = arith.addf %3, %6 : vector<32x128xf32>
    %c0_6 = arith.constant 0 : index
    %c0_7 = arith.constant 0 : index
    %8 = vector.load %arg7[%c0_6, %c0_7] : memref<32x128xf32, #tpu.memory_space<vmem>>, vector<32x128xf32>
    tpu.vector_store %arg7[%c0_6, %c0_7], %7 {strides = array<i32>} : memref<32x128xf32, #tpu.memory_space<vmem>>, vector<32x128xf32>,
    %c0_i32_8 = arith.constant 0 : i32
    %9 = arith.cmpi eq, %arg2, %c0_i32_8 : i32
    %10 = arith.extui %9 : i1 to i32
    %c0_i32_9 = arith.constant 0 : i32
    %11 = arith.cmpi ne, %10, %c0_i32_9 : i32
    scf.if %11 {
      %c0_10 = arith.constant 0 : index
      %c0_11 = arith.constant 0 : index
      %12 = vector.load %arg7[%c0_10, %c0_11] : memref<32x128xf32, #tpu.memory_space<vmem>>, vector<32x128xf32>
      %c0_12 = arith.constant 0 : index
      %c0_13 = arith.constant 0 : index
      %13 = vector.load %arg5[%c0_12, %c0_13] : memref<1x128xf32, #tpu.memory_space<vmem>>, vector<1x128xf32>
      %14 = vector.broadcast %13 : vector<1x128xf32> to vector<32x128xf32>
      %15 = arith.addf %12, %14 : vector<32x128xf32>
      %16 = arith.truncf %15 : vector<32x128xf32> to vector<32x128xbf16>
      %c0_14 = arith.constant 0 : index
      %c0_15 = arith.constant 0 : index
      %17 = vector.load %arg6[%c0_14, %c0_15] : memref<32x128xbf16, #tpu.memory_space<vmem>>, vector<32x128xbf16>
      tpu.vector_store %arg6[%c0_14, %c0_15], %16 {strides = array<i32>} : memref<32x128xbf16, #tpu.memory_space<vmem>>, vector<32x128xbf16>,
    } else {
    }
    return
  }
  func.func @transform_0(%arg0: i32, %arg1: i32, %arg2: i32) -> (i32, i32) {
    %c0_i32 = arith.constant 0 : i32
    return %arg0, %arg2 : i32, i32
  }
  func.func @transform_1(%arg0: i32, %arg1: i32, %arg2: i32) -> (i32, i32) {
    %c0_i32 = arith.constant 0 : i32
    return %arg2, %arg1 : i32, i32
  }
  func.func @transform_2(%arg0: i32, %arg1: i32, %arg2: i32) -> (i32, i32) {
    %c0_i32 = arith.constant 0 : i32
    %c0_i32_0 = arith.constant 0 : i32
    return %c0_i32, %arg1 : i32, i32
  }
  func.func @transform_3(%arg0: i32, %arg1: i32, %arg2: i32) -> (i32, i32) {
    %c0_i32 = arith.constant 0 : i32
    return %arg0, %arg1 : i32, i32
  }
}

module attributes {stable_mosaic.version = 11 : i64} {
  func.func @_matmul_kernel(%arg0: i32, %arg1: i32, %arg2: i32, %arg3: memref<32x384xbf16, #tpu.memory_space<vmem>>, %arg4: memref<384x128xbf16, #tpu.memory_space<vmem>>, %arg5: memref<1x128xf32, #tpu.memory_space<vmem>>, %arg6: memref<32x128xbf16, #tpu.memory_space<vmem>>, %arg7: memref<32x128xbf16, #tpu.memory_space<vmem>>, %arg8: memref<32x128xf32, #tpu.memory_space<vmem>>) attributes {dimension_semantics = [#tpu.dimension_semantics<parallel>, #tpu.dimension_semantics<parallel>, #tpu.dimension_semantics<arbitrary>], iteration_bounds = array<i64: 1, 1, 3>, scalar_prefetch = 0 : i64, scratch_operands = 1 : i64, tpu.core_type = #tpu.core_type<tc>, window_params = [{transform_indices = @transform_0, window_bounds = array<i64: 32, 384>}, {transform_indices = @transform_1, window_bounds = array<i64: 384, 128>}, {transform_indices = @transform_2, window_bounds = array<i64: 1, 128>}, {transform_indices = @transform_3, window_bounds = array<i64: 32, 128>}, {transform_indices = @transform_4, window_bounds = array<i64: 32, 128>}]} {
    %c0_i32 = arith.constant 0 : i32
    %0 = arith.cmpi eq, %arg2, %c0_i32 : i32
    %1 = arith.extui %0 : i1 to i32
    %c0_i32_0 = arith.constant 0 : i32
    %2 = arith.cmpi ne, %1, %c0_i32_0 : i32
    scf.if %2 {
      %cst_9 = arith.constant 0.000000e+00 : f32
      %12 = vector.broadcast %cst_9 : f32 to vector<32x128xf32>
      %c0_10 = arith.constant 0 : index
      %c0_11 = arith.constant 0 : index
      %13 = vector.load %arg8[%c0_10, %c0_11] : memref<32x128xf32, #tpu.memory_space<vmem>>, vector<32x128xf32>
      tpu.vector_store %arg8[%c0_10, %c0_11], %12 {strides = array<i32>} : memref<32x128xf32, #tpu.memory_space<vmem>>, vector<32x128xf32>,
    } else {
    }
    %c0 = arith.constant 0 : index
    %c0_1 = arith.constant 0 : index
    %3 = vector.load %arg8[%c0, %c0_1] : memref<32x128xf32, #tpu.memory_space<vmem>>, vector<32x128xf32>
    %c0_2 = arith.constant 0 : index
    %c0_3 = arith.constant 0 : index
    %4 = vector.load %arg3[%c0_2, %c0_3] : memref<32x384xbf16, #tpu.memory_space<vmem>>, vector<32x384xbf16>
    %c0_4 = arith.constant 0 : index
    %c0_5 = arith.constant 0 : index
    %5 = vector.load %arg4[%c0_4, %c0_5] : memref<384x128xbf16, #tpu.memory_space<vmem>>, vector<384x128xbf16>
    %cst = arith.constant dense<0.000000e+00> : vector<32x128xf32>
    %6 = tpu.matmul %4, %5, %cst {dimension_numbers = #tpu.dot_dimension_numbers<[1], [0], [0], [1], [0, 0, 1, 1], [], []>} : vector<32x384xbf16>, vector<384x128xbf16>, vector<32x128xf32> -> vector<32x128xf32>
    %7 = arith.addf %3, %6 : vector<32x128xf32>
    %c0_6 = arith.constant 0 : index
    %c0_7 = arith.constant 0 : index
    %8 = vector.load %arg8[%c0_6, %c0_7] : memref<32x128xf32, #tpu.memory_space<vmem>>, vector<32x128xf32>
    tpu.vector_store %arg8[%c0_6, %c0_7], %7 {strides = array<i32>} : memref<32x128xf32, #tpu.memory_space<vmem>>, vector<32x128xf32>,
    %c2_i32 = arith.constant 2 : i32
    %9 = arith.cmpi eq, %arg2, %c2_i32 : i32
    %10 = arith.extui %9 : i1 to i32
    %c0_i32_8 = arith.constant 0 : i32
    %11 = arith.cmpi ne, %10, %c0_i32_8 : i32
    scf.if %11 {
      %c0_9 = arith.constant 0 : index
      %c0_10 = arith.constant 0 : index
      %12 = vector.load %arg8[%c0_9, %c0_10] : memref<32x128xf32, #tpu.memory_space<vmem>>, vector<32x128xf32>
      %c0_11 = arith.constant 0 : index
      %c0_12 = arith.constant 0 : index
      %13 = vector.load %arg5[%c0_11, %c0_12] : memref<1x128xf32, #tpu.memory_space<vmem>>, vector<1x128xf32>
      %14 = vector.broadcast %13 : vector<1x128xf32> to vector<32x128xf32>
      %15 = arith.addf %12, %14 : vector<32x128xf32>
      %c0_13 = arith.constant 0 : index
      %c0_14 = arith.constant 0 : index
      %16 = vector.load %arg6[%c0_13, %c0_14] : memref<32x128xbf16, #tpu.memory_space<vmem>>, vector<32x128xbf16>
      %17 = arith.extf %16 : vector<32x128xbf16> to vector<32x128xf32>
      %18 = arith.addf %15, %17 : vector<32x128xf32>
      %cst_15 = arith.constant 0.000000e+00 : f32
      %19 = vector.broadcast %cst_15 : f32 to vector<32x128xf32>
      %20 = arith.maximumf %18, %19 : vector<32x128xf32>
      %21 = arith.truncf %20 : vector<32x128xf32> to vector<32x128xbf16>
      %c0_16 = arith.constant 0 : index
      %c0_17 = arith.constant 0 : index
      %22 = vector.load %arg7[%c0_16, %c0_17] : memref<32x128xbf16, #tpu.memory_space<vmem>>, vector<32x128xbf16>
      tpu.vector_store %arg7[%c0_16, %c0_17], %21 {strides = array<i32>} : memref<32x128xbf16, #tpu.memory_space<vmem>>, vector<32x128xbf16>,
    } else {
    }
    return
  }
  func.func @transform_0(%arg0: i32, %arg1: i32, %arg2: i32) -> (i32, i32) {
    %c0_i32 = arith.constant 0 : i32
    return %arg0, %arg2 : i32, i32
  }
  func.func @transform_1(%arg0: i32, %arg1: i32, %arg2: i32) -> (i32, i32) {
    %c0_i32 = arith.constant 0 : i32
    return %arg2, %arg1 : i32, i32
  }
  func.func @transform_2(%arg0: i32, %arg1: i32, %arg2: i32) -> (i32, i32) {
    %c0_i32 = arith.constant 0 : i32
    %c0_i32_0 = arith.constant 0 : i32
    return %c0_i32, %arg1 : i32, i32
  }
  func.func @transform_3(%arg0: i32, %arg1: i32, %arg2: i32) -> (i32, i32) {
    %c0_i32 = arith.constant 0 : i32
    return %arg0, %arg1 : i32, i32
  }
  func.func @transform_4(%arg0: i32, %arg1: i32, %arg2: i32) -> (i32, i32) {
    %c0_i32 = arith.constant 0 : i32
    return %arg0, %arg1 : i32, i32
  }
}

module attributes {stable_mosaic.version = 11 : i64} {
  func.func @_matmul_kernel(%arg0: i32, %arg1: i32, %arg2: i32, %arg3: memref<32x384xbf16, #tpu.memory_space<vmem>>, %arg4: memref<384x128xbf16, #tpu.memory_space<vmem>>, %arg5: memref<1x128xf32, #tpu.memory_space<vmem>>, %arg6: memref<32x128xbf16, #tpu.memory_space<vmem>>, %arg7: memref<32x128xf32, #tpu.memory_space<vmem>>) attributes {dimension_semantics = [#tpu.dimension_semantics<parallel>, #tpu.dimension_semantics<parallel>, #tpu.dimension_semantics<arbitrary>], iteration_bounds = array<i64: 1, 1, 3>, scalar_prefetch = 0 : i64, scratch_operands = 1 : i64, tpu.core_type = #tpu.core_type<tc>, window_params = [{transform_indices = @transform_0, window_bounds = array<i64: 32, 384>}, {transform_indices = @transform_1, window_bounds = array<i64: 384, 128>}, {transform_indices = @transform_2, window_bounds = array<i64: 1, 128>}, {transform_indices = @transform_3, window_bounds = array<i64: 32, 128>}]} {
    %c0_i32 = arith.constant 0 : i32
    %0 = arith.cmpi eq, %arg2, %c0_i32 : i32
    %1 = arith.extui %0 : i1 to i32
    %c0_i32_0 = arith.constant 0 : i32
    %2 = arith.cmpi ne, %1, %c0_i32_0 : i32
    scf.if %2 {
      %cst_9 = arith.constant 0.000000e+00 : f32
      %12 = vector.broadcast %cst_9 : f32 to vector<32x128xf32>
      %c0_10 = arith.constant 0 : index
      %c0_11 = arith.constant 0 : index
      %13 = vector.load %arg7[%c0_10, %c0_11] : memref<32x128xf32, #tpu.memory_space<vmem>>, vector<32x128xf32>
      tpu.vector_store %arg7[%c0_10, %c0_11], %12 {strides = array<i32>} : memref<32x128xf32, #tpu.memory_space<vmem>>, vector<32x128xf32>,
    } else {
    }
    %c0 = arith.constant 0 : index
    %c0_1 = arith.constant 0 : index
    %3 = vector.load %arg7[%c0, %c0_1] : memref<32x128xf32, #tpu.memory_space<vmem>>, vector<32x128xf32>
    %c0_2 = arith.constant 0 : index
    %c0_3 = arith.constant 0 : index
    %4 = vector.load %arg3[%c0_2, %c0_3] : memref<32x384xbf16, #tpu.memory_space<vmem>>, vector<32x384xbf16>
    %c0_4 = arith.constant 0 : index
    %c0_5 = arith.constant 0 : index
    %5 = vector.load %arg4[%c0_4, %c0_5] : memref<384x128xbf16, #tpu.memory_space<vmem>>, vector<384x128xbf16>
    %cst = arith.constant dense<0.000000e+00> : vector<32x128xf32>
    %6 = tpu.matmul %4, %5, %cst {dimension_numbers = #tpu.dot_dimension_numbers<[1], [0], [0], [1], [0, 0, 1, 1], [], []>} : vector<32x384xbf16>, vector<384x128xbf16>, vector<32x128xf32> -> vector<32x128xf32>
    %7 = arith.addf %3, %6 : vector<32x128xf32>
    %c0_6 = arith.constant 0 : index
    %c0_7 = arith.constant 0 : index
    %8 = vector.load %arg7[%c0_6, %c0_7] : memref<32x128xf32, #tpu.memory_space<vmem>>, vector<32x128xf32>
    tpu.vector_store %arg7[%c0_6, %c0_7], %7 {strides = array<i32>} : memref<32x128xf32, #tpu.memory_space<vmem>>, vector<32x128xf32>,
    %c2_i32 = arith.constant 2 : i32
    %9 = arith.cmpi eq, %arg2, %c2_i32 : i32
    %10 = arith.extui %9 : i1 to i32
    %c0_i32_8 = arith.constant 0 : i32
    %11 = arith.cmpi ne, %10, %c0_i32_8 : i32
    scf.if %11 {
      %c0_9 = arith.constant 0 : index
      %c0_10 = arith.constant 0 : index
      %12 = vector.load %arg7[%c0_9, %c0_10] : memref<32x128xf32, #tpu.memory_space<vmem>>, vector<32x128xf32>
      %c0_11 = arith.constant 0 : index
      %c0_12 = arith.constant 0 : index
      %13 = vector.load %arg5[%c0_11, %c0_12] : memref<1x128xf32, #tpu.memory_space<vmem>>, vector<1x128xf32>
      %14 = vector.broadcast %13 : vector<1x128xf32> to vector<32x128xf32>
      %15 = arith.addf %12, %14 : vector<32x128xf32>
      %cst_13 = arith.constant 0.000000e+00 : f32
      %16 = vector.broadcast %cst_13 : f32 to vector<32x128xf32>
      %17 = arith.maximumf %15, %16 : vector<32x128xf32>
      %18 = arith.truncf %17 : vector<32x128xf32> to vector<32x128xbf16>
      %c0_14 = arith.constant 0 : index
      %c0_15 = arith.constant 0 : index
      %19 = vector.load %arg6[%c0_14, %c0_15] : memref<32x128xbf16, #tpu.memory_space<vmem>>, vector<32x128xbf16>
      tpu.vector_store %arg6[%c0_14, %c0_15], %18 {strides = array<i32>} : memref<32x128xbf16, #tpu.memory_space<vmem>>, vector<32x128xbf16>,
    } else {
    }
    return
  }
  func.func @transform_0(%arg0: i32, %arg1: i32, %arg2: i32) -> (i32, i32) {
    %c0_i32 = arith.constant 0 : i32
    return %arg0, %arg2 : i32, i32
  }
  func.func @transform_1(%arg0: i32, %arg1: i32, %arg2: i32) -> (i32, i32) {
    %c0_i32 = arith.constant 0 : i32
    return %arg2, %arg1 : i32, i32
  }
  func.func @transform_2(%arg0: i32, %arg1: i32, %arg2: i32) -> (i32, i32) {
    %c0_i32 = arith.constant 0 : i32
    %c0_i32_0 = arith.constant 0 : i32
    return %c0_i32, %arg1 : i32, i32
  }
  func.func @transform_3(%arg0: i32, %arg1: i32, %arg2: i32) -> (i32, i32) {
    %c0_i32 = arith.constant 0 : i32
    return %arg0, %arg1 : i32, i32
  }
}

module attributes {stable_mosaic.version = 11 : i64} {
  func.func @_matmul_kernel(%arg0: i32, %arg1: i32, %arg2: i32, %arg3: memref<8x384xbf16, #tpu.memory_space<vmem>>, %arg4: memref<384x256xbf16, #tpu.memory_space<vmem>>, %arg5: memref<1x256xf32, #tpu.memory_space<vmem>>, %arg6: memref<8x256xbf16, #tpu.memory_space<vmem>>, %arg7: memref<8x256xf32, #tpu.memory_space<vmem>>) attributes {dimension_semantics = [#tpu.dimension_semantics<parallel>, #tpu.dimension_semantics<parallel>, #tpu.dimension_semantics<arbitrary>], iteration_bounds = array<i64: 1, 1, 3>, scalar_prefetch = 0 : i64, scratch_operands = 1 : i64, tpu.core_type = #tpu.core_type<tc>, window_params = [{transform_indices = @transform_0, window_bounds = array<i64: 8, 384>}, {transform_indices = @transform_1, window_bounds = array<i64: 384, 256>}, {transform_indices = @transform_2, window_bounds = array<i64: 1, 256>}, {transform_indices = @transform_3, window_bounds = array<i64: 8, 256>}]} {
    %c0_i32 = arith.constant 0 : i32
    %0 = arith.cmpi eq, %arg2, %c0_i32 : i32
    %1 = arith.extui %0 : i1 to i32
    %c0_i32_0 = arith.constant 0 : i32
    %2 = arith.cmpi ne, %1, %c0_i32_0 : i32
    scf.if %2 {
      %cst_9 = arith.constant 0.000000e+00 : f32
      %12 = vector.broadcast %cst_9 : f32 to vector<8x256xf32>
      %c0_10 = arith.constant 0 : index
      %c0_11 = arith.constant 0 : index
      %13 = vector.load %arg7[%c0_10, %c0_11] : memref<8x256xf32, #tpu.memory_space<vmem>>, vector<8x256xf32>
      tpu.vector_store %arg7[%c0_10, %c0_11], %12 {strides = array<i32>} : memref<8x256xf32, #tpu.memory_space<vmem>>, vector<8x256xf32>,
    } else {
    }
    %c0 = arith.constant 0 : index
    %c0_1 = arith.constant 0 : index
    %3 = vector.load %arg7[%c0, %c0_1] : memref<8x256xf32, #tpu.memory_space<vmem>>, vector<8x256xf32>
    %c0_2 = arith.constant 0 : index
    %c0_3 = arith.constant 0 : index
    %4 = vector.load %arg3[%c0_2, %c0_3] : memref<8x384xbf16, #tpu.memory_space<vmem>>, vector<8x384xbf16>
    %c0_4 = arith.constant 0 : index
    %c0_5 = arith.constant 0 : index
    %5 = vector.load %arg4[%c0_4, %c0_5] : memref<384x256xbf16, #tpu.memory_space<vmem>>, vector<384x256xbf16>
    %cst = arith.constant dense<0.000000e+00> : vector<8x256xf32>
    %6 = tpu.matmul %4, %5, %cst {dimension_numbers = #tpu.dot_dimension_numbers<[1], [0], [0], [1], [0, 0, 1, 1], [], []>} : vector<8x384xbf16>, vector<384x256xbf16>, vector<8x256xf32> -> vector<8x256xf32>
    %7 = arith.addf %3, %6 : vector<8x256xf32>
    %c0_6 = arith.constant 0 : index
    %c0_7 = arith.constant 0 : index
    %8 = vector.load %arg7[%c0_6, %c0_7] : memref<8x256xf32, #tpu.memory_space<vmem>>, vector<8x256xf32>
    tpu.vector_store %arg7[%c0_6, %c0_7], %7 {strides = array<i32>} : memref<8x256xf32, #tpu.memory_space<vmem>>, vector<8x256xf32>,
    %c2_i32 = arith.constant 2 : i32
    %9 = arith.cmpi eq, %arg2, %c2_i32 : i32
    %10 = arith.extui %9 : i1 to i32
    %c0_i32_8 = arith.constant 0 : i32
    %11 = arith.cmpi ne, %10, %c0_i32_8 : i32
    scf.if %11 {
      %c0_9 = arith.constant 0 : index
      %c0_10 = arith.constant 0 : index
      %12 = vector.load %arg7[%c0_9, %c0_10] : memref<8x256xf32, #tpu.memory_space<vmem>>, vector<8x256xf32>
      %c0_11 = arith.constant 0 : index
      %c0_12 = arith.constant 0 : index
      %13 = vector.load %arg5[%c0_11, %c0_12] : memref<1x256xf32, #tpu.memory_space<vmem>>, vector<1x256xf32>
      %14 = vector.broadcast %13 : vector<1x256xf32> to vector<8x256xf32>
      %15 = arith.addf %12, %14 : vector<8x256xf32>
      %cst_13 = arith.constant 0.000000e+00 : f32
      %16 = vector.broadcast %cst_13 : f32 to vector<8x256xf32>
      %17 = arith.maximumf %15, %16 : vector<8x256xf32>
      %18 = arith.truncf %17 : vector<8x256xf32> to vector<8x256xbf16>
      %c0_14 = arith.constant 0 : index
      %c0_15 = arith.constant 0 : index
      %19 = vector.load %arg6[%c0_14, %c0_15] : memref<8x256xbf16, #tpu.memory_space<vmem>>, vector<8x256xbf16>
      tpu.vector_store %arg6[%c0_14, %c0_15], %18 {strides = array<i32>} : memref<8x256xbf16, #tpu.memory_space<vmem>>, vector<8x256xbf16>,
    } else {
    }
    return
  }
  func.func @transform_0(%arg0: i32, %arg1: i32, %arg2: i32) -> (i32, i32) {
    %c0_i32 = arith.constant 0 : i32
    return %arg0, %arg2 : i32, i32
  }
  func.func @transform_1(%arg0: i32, %arg1: i32, %arg2: i32) -> (i32, i32) {
    %c0_i32 = arith.constant 0 : i32
    return %arg2, %arg1 : i32, i32
  }
  func.func @transform_2(%arg0: i32, %arg1: i32, %arg2: i32) -> (i32, i32) {
    %c0_i32 = arith.constant 0 : i32
    %c0_i32_0 = arith.constant 0 : i32
    return %c0_i32, %arg1 : i32, i32
  }
  func.func @transform_3(%arg0: i32, %arg1: i32, %arg2: i32) -> (i32, i32) {
    %c0_i32 = arith.constant 0 : i32
    return %arg0, %arg1 : i32, i32
  }
}

module attributes {stable_mosaic.version = 11 : i64} {
  func.func @_matmul_kernel(%arg0: i32, %arg1: i32, %arg2: i32, %arg3: memref<8x128xbf16, #tpu.memory_space<vmem>>, %arg4: memref<128x256xbf16, #tpu.memory_space<vmem>>, %arg5: memref<1x256xf32, #tpu.memory_space<vmem>>, %arg6: memref<8x256xbf16, #tpu.memory_space<vmem>>, %arg7: memref<8x256xf32, #tpu.memory_space<vmem>>) attributes {dimension_semantics = [#tpu.dimension_semantics<parallel>, #tpu.dimension_semantics<parallel>, #tpu.dimension_semantics<arbitrary>], iteration_bounds = array<i64: 1, 1, 1>, scalar_prefetch = 0 : i64, scratch_operands = 1 : i64, tpu.core_type = #tpu.core_type<tc>, window_params = [{transform_indices = @transform_0, window_bounds = array<i64: 8, 128>}, {transform_indices = @transform_1, window_bounds = array<i64: 128, 256>}, {transform_indices = @transform_2, window_bounds = array<i64: 1, 256>}, {transform_indices = @transform_3, window_bounds = array<i64: 8, 256>}]} {
    %c0_i32 = arith.constant 0 : i32
    %0 = arith.cmpi eq, %arg2, %c0_i32 : i32
    %1 = arith.extui %0 : i1 to i32
    %c0_i32_0 = arith.constant 0 : i32
    %2 = arith.cmpi ne, %1, %c0_i32_0 : i32
    scf.if %2 {
      %cst_10 = arith.constant 0.000000e+00 : f32
      %12 = vector.broadcast %cst_10 : f32 to vector<8x256xf32>
      %c0_11 = arith.constant 0 : index
      %c0_12 = arith.constant 0 : index
      %13 = vector.load %arg7[%c0_11, %c0_12] : memref<8x256xf32, #tpu.memory_space<vmem>>, vector<8x256xf32>
      tpu.vector_store %arg7[%c0_11, %c0_12], %12 {strides = array<i32>} : memref<8x256xf32, #tpu.memory_space<vmem>>, vector<8x256xf32>,
    } else {
    }
    %c0 = arith.constant 0 : index
    %c0_1 = arith.constant 0 : index
    %3 = vector.load %arg7[%c0, %c0_1] : memref<8x256xf32, #tpu.memory_space<vmem>>, vector<8x256xf32>
    %c0_2 = arith.constant 0 : index
    %c0_3 = arith.constant 0 : index
    %4 = vector.load %arg3[%c0_2, %c0_3] : memref<8x128xbf16, #tpu.memory_space<vmem>>, vector<8x128xbf16>
    %c0_4 = arith.constant 0 : index
    %c0_5 = arith.constant 0 : index
    %5 = vector.load %arg4[%c0_4, %c0_5] : memref<128x256xbf16, #tpu.memory_space<vmem>>, vector<128x256xbf16>
    %cst = arith.constant dense<0.000000e+00> : vector<8x256xf32>
    %6 = tpu.matmul %4, %5, %cst {dimension_numbers = #tpu.dot_dimension_numbers<[1], [0], [0], [1], [0, 0, 1, 1], [], []>} : vector<8x128xbf16>, vector<128x256xbf16>, vector<8x256xf32> -> vector<8x256xf32>
    %7 = arith.addf %3, %6 : vector<8x256xf32>
    %c0_6 = arith.constant 0 : index
    %c0_7 = arith.constant 0 : index
    %8 = vector.load %arg7[%c0_6, %c0_7] : memref<8x256xf32, #tpu.memory_space<vmem>>, vector<8x256xf32>
    tpu.vector_store %arg7[%c0_6, %c0_7], %7 {strides = array<i32>} : memref<8x256xf32, #tpu.memory_space<vmem>>, vector<8x256xf32>,
    %c0_i32_8 = arith.constant 0 : i32
    %9 = arith.cmpi eq, %arg2, %c0_i32_8 : i32
    %10 = arith.extui %9 : i1 to i32
    %c0_i32_9 = arith.constant 0 : i32
    %11 = arith.cmpi ne, %10, %c0_i32_9 : i32
    scf.if %11 {
      %c0_10 = arith.constant 0 : index
      %c0_11 = arith.constant 0 : index
      %12 = vector.load %arg7[%c0_10, %c0_11] : memref<8x256xf32, #tpu.memory_space<vmem>>, vector<8x256xf32>
      %c0_12 = arith.constant 0 : index
      %c0_13 = arith.constant 0 : index
      %13 = vector.load %arg5[%c0_12, %c0_13] : memref<1x256xf32, #tpu.memory_space<vmem>>, vector<1x256xf32>
      %14 = vector.broadcast %13 : vector<1x256xf32> to vector<8x256xf32>
      %15 = arith.addf %12, %14 : vector<8x256xf32>
      %16 = arith.truncf %15 : vector<8x256xf32> to vector<8x256xbf16>
      %c0_14 = arith.constant 0 : index
      %c0_15 = arith.constant 0 : index
      %17 = vector.load %arg6[%c0_14, %c0_15] : memref<8x256xbf16, #tpu.memory_space<vmem>>, vector<8x256xbf16>
      tpu.vector_store %arg6[%c0_14, %c0_15], %16 {strides = array<i32>} : memref<8x256xbf16, #tpu.memory_space<vmem>>, vector<8x256xbf16>,
    } else {
    }
    return
  }
  func.func @transform_0(%arg0: i32, %arg1: i32, %arg2: i32) -> (i32, i32) {
    %c0_i32 = arith.constant 0 : i32
    return %arg0, %arg2 : i32, i32
  }
  func.func @transform_1(%arg0: i32, %arg1: i32, %arg2: i32) -> (i32, i32) {
    %c0_i32 = arith.constant 0 : i32
    return %arg2, %arg1 : i32, i32
  }
  func.func @transform_2(%arg0: i32, %arg1: i32, %arg2: i32) -> (i32, i32) {
    %c0_i32 = arith.constant 0 : i32
    %c0_i32_0 = arith.constant 0 : i32
    return %c0_i32, %arg1 : i32, i32
  }
  func.func @transform_3(%arg0: i32, %arg1: i32, %arg2: i32) -> (i32, i32) {
    %c0_i32 = arith.constant 0 : i32
    return %arg0, %arg1 : i32, i32
  }
}

module attributes {stable_mosaic.version = 11 : i64} {
  func.func @_matmul_kernel(%arg0: i32, %arg1: i32, %arg2: i32, %arg3: memref<8x384xbf16, #tpu.memory_space<vmem>>, %arg4: memref<384x256xbf16, #tpu.memory_space<vmem>>, %arg5: memref<1x256xf32, #tpu.memory_space<vmem>>, %arg6: memref<8x256xbf16, #tpu.memory_space<vmem>>, %arg7: memref<8x256xbf16, #tpu.memory_space<vmem>>, %arg8: memref<8x256xf32, #tpu.memory_space<vmem>>) attributes {dimension_semantics = [#tpu.dimension_semantics<parallel>, #tpu.dimension_semantics<parallel>, #tpu.dimension_semantics<arbitrary>], iteration_bounds = array<i64: 1, 1, 6>, scalar_prefetch = 0 : i64, scratch_operands = 1 : i64, tpu.core_type = #tpu.core_type<tc>, window_params = [{transform_indices = @transform_0, window_bounds = array<i64: 8, 384>}, {transform_indices = @transform_1, window_bounds = array<i64: 384, 256>}, {transform_indices = @transform_2, window_bounds = array<i64: 1, 256>}, {transform_indices = @transform_3, window_bounds = array<i64: 8, 256>}, {transform_indices = @transform_4, window_bounds = array<i64: 8, 256>}]} {
    %c0_i32 = arith.constant 0 : i32
    %0 = arith.cmpi eq, %arg2, %c0_i32 : i32
    %1 = arith.extui %0 : i1 to i32
    %c0_i32_0 = arith.constant 0 : i32
    %2 = arith.cmpi ne, %1, %c0_i32_0 : i32
    scf.if %2 {
      %cst_9 = arith.constant 0.000000e+00 : f32
      %12 = vector.broadcast %cst_9 : f32 to vector<8x256xf32>
      %c0_10 = arith.constant 0 : index
      %c0_11 = arith.constant 0 : index
      %13 = vector.load %arg8[%c0_10, %c0_11] : memref<8x256xf32, #tpu.memory_space<vmem>>, vector<8x256xf32>
      tpu.vector_store %arg8[%c0_10, %c0_11], %12 {strides = array<i32>} : memref<8x256xf32, #tpu.memory_space<vmem>>, vector<8x256xf32>,
    } else {
    }
    %c0 = arith.constant 0 : index
    %c0_1 = arith.constant 0 : index
    %3 = vector.load %arg8[%c0, %c0_1] : memref<8x256xf32, #tpu.memory_space<vmem>>, vector<8x256xf32>
    %c0_2 = arith.constant 0 : index
    %c0_3 = arith.constant 0 : index
    %4 = vector.load %arg3[%c0_2, %c0_3] : memref<8x384xbf16, #tpu.memory_space<vmem>>, vector<8x384xbf16>
    %c0_4 = arith.constant 0 : index
    %c0_5 = arith.constant 0 : index
    %5 = vector.load %arg4[%c0_4, %c0_5] : memref<384x256xbf16, #tpu.memory_space<vmem>>, vector<384x256xbf16>
    %cst = arith.constant dense<0.000000e+00> : vector<8x256xf32>
    %6 = tpu.matmul %4, %5, %cst {dimension_numbers = #tpu.dot_dimension_numbers<[1], [0], [0], [1], [0, 0, 1, 1], [], []>} : vector<8x384xbf16>, vector<384x256xbf16>, vector<8x256xf32> -> vector<8x256xf32>
    %7 = arith.addf %3, %6 : vector<8x256xf32>
    %c0_6 = arith.constant 0 : index
    %c0_7 = arith.constant 0 : index
    %8 = vector.load %arg8[%c0_6, %c0_7] : memref<8x256xf32, #tpu.memory_space<vmem>>, vector<8x256xf32>
    tpu.vector_store %arg8[%c0_6, %c0_7], %7 {strides = array<i32>} : memref<8x256xf32, #tpu.memory_space<vmem>>, vector<8x256xf32>,
    %c5_i32 = arith.constant 5 : i32
    %9 = arith.cmpi eq, %arg2, %c5_i32 : i32
    %10 = arith.extui %9 : i1 to i32
    %c0_i32_8 = arith.constant 0 : i32
    %11 = arith.cmpi ne, %10, %c0_i32_8 : i32
    scf.if %11 {
      %c0_9 = arith.constant 0 : index
      %c0_10 = arith.constant 0 : index
      %12 = vector.load %arg8[%c0_9, %c0_10] : memref<8x256xf32, #tpu.memory_space<vmem>>, vector<8x256xf32>
      %c0_11 = arith.constant 0 : index
      %c0_12 = arith.constant 0 : index
      %13 = vector.load %arg5[%c0_11, %c0_12] : memref<1x256xf32, #tpu.memory_space<vmem>>, vector<1x256xf32>
      %14 = vector.broadcast %13 : vector<1x256xf32> to vector<8x256xf32>
      %15 = arith.addf %12, %14 : vector<8x256xf32>
      %c0_13 = arith.constant 0 : index
      %c0_14 = arith.constant 0 : index
      %16 = vector.load %arg6[%c0_13, %c0_14] : memref<8x256xbf16, #tpu.memory_space<vmem>>, vector<8x256xbf16>
      %17 = arith.extf %16 : vector<8x256xbf16> to vector<8x256xf32>
      %18 = arith.addf %15, %17 : vector<8x256xf32>
      %cst_15 = arith.constant 0.000000e+00 : f32
      %19 = vector.broadcast %cst_15 : f32 to vector<8x256xf32>
      %20 = arith.maximumf %18, %19 : vector<8x256xf32>
      %21 = arith.truncf %20 : vector<8x256xf32> to vector<8x256xbf16>
      %c0_16 = arith.constant 0 : index
      %c0_17 = arith.constant 0 : index
      %22 = vector.load %arg7[%c0_16, %c0_17] : memref<8x256xbf16, #tpu.memory_space<vmem>>, vector<8x256xbf16>
      tpu.vector_store %arg7[%c0_16, %c0_17], %21 {strides = array<i32>} : memref<8x256xbf16, #tpu.memory_space<vmem>>, vector<8x256xbf16>,
    } else {
    }
    return
  }
  func.func @transform_0(%arg0: i32, %arg1: i32, %arg2: i32) -> (i32, i32) {
    %c0_i32 = arith.constant 0 : i32
    return %arg0, %arg2 : i32, i32
  }
  func.func @transform_1(%arg0: i32, %arg1: i32, %arg2: i32) -> (i32, i32) {
    %c0_i32 = arith.constant 0 : i32
    return %arg2, %arg1 : i32, i32
  }
  func.func @transform_2(%arg0: i32, %arg1: i32, %arg2: i32) -> (i32, i32) {
    %c0_i32 = arith.constant 0 : i32
    %c0_i32_0 = arith.constant 0 : i32
    return %c0_i32, %arg1 : i32, i32
  }
  func.func @transform_3(%arg0: i32, %arg1: i32, %arg2: i32) -> (i32, i32) {
    %c0_i32 = arith.constant 0 : i32
    return %arg0, %arg1 : i32, i32
  }
  func.func @transform_4(%arg0: i32, %arg1: i32, %arg2: i32) -> (i32, i32) {
    %c0_i32 = arith.constant 0 : i32
    return %arg0, %arg1 : i32, i32
  }
}

module attributes {stable_mosaic.version = 11 : i64} {
  func.func @_matmul_kernel(%arg0: i32, %arg1: i32, %arg2: i32, %arg3: memref<8x384xbf16, #tpu.memory_space<vmem>>, %arg4: memref<384x256xbf16, #tpu.memory_space<vmem>>, %arg5: memref<1x256xf32, #tpu.memory_space<vmem>>, %arg6: memref<8x256xbf16, #tpu.memory_space<vmem>>, %arg7: memref<8x256xf32, #tpu.memory_space<vmem>>) attributes {dimension_semantics = [#tpu.dimension_semantics<parallel>, #tpu.dimension_semantics<parallel>, #tpu.dimension_semantics<arbitrary>], iteration_bounds = array<i64: 1, 1, 6>, scalar_prefetch = 0 : i64, scratch_operands = 1 : i64, tpu.core_type = #tpu.core_type<tc>, window_params = [{transform_indices = @transform_0, window_bounds = array<i64: 8, 384>}, {transform_indices = @transform_1, window_bounds = array<i64: 384, 256>}, {transform_indices = @transform_2, window_bounds = array<i64: 1, 256>}, {transform_indices = @transform_3, window_bounds = array<i64: 8, 256>}]} {
    %c0_i32 = arith.constant 0 : i32
    %0 = arith.cmpi eq, %arg2, %c0_i32 : i32
    %1 = arith.extui %0 : i1 to i32
    %c0_i32_0 = arith.constant 0 : i32
    %2 = arith.cmpi ne, %1, %c0_i32_0 : i32
    scf.if %2 {
      %cst_9 = arith.constant 0.000000e+00 : f32
      %12 = vector.broadcast %cst_9 : f32 to vector<8x256xf32>
      %c0_10 = arith.constant 0 : index
      %c0_11 = arith.constant 0 : index
      %13 = vector.load %arg7[%c0_10, %c0_11] : memref<8x256xf32, #tpu.memory_space<vmem>>, vector<8x256xf32>
      tpu.vector_store %arg7[%c0_10, %c0_11], %12 {strides = array<i32>} : memref<8x256xf32, #tpu.memory_space<vmem>>, vector<8x256xf32>,
    } else {
    }
    %c0 = arith.constant 0 : index
    %c0_1 = arith.constant 0 : index
    %3 = vector.load %arg7[%c0, %c0_1] : memref<8x256xf32, #tpu.memory_space<vmem>>, vector<8x256xf32>
    %c0_2 = arith.constant 0 : index
    %c0_3 = arith.constant 0 : index
    %4 = vector.load %arg3[%c0_2, %c0_3] : memref<8x384xbf16, #tpu.memory_space<vmem>>, vector<8x384xbf16>
    %c0_4 = arith.constant 0 : index
    %c0_5 = arith.constant 0 : index
    %5 = vector.load %arg4[%c0_4, %c0_5] : memref<384x256xbf16, #tpu.memory_space<vmem>>, vector<384x256xbf16>
    %cst = arith.constant dense<0.000000e+00> : vector<8x256xf32>
    %6 = tpu.matmul %4, %5, %cst {dimension_numbers = #tpu.dot_dimension_numbers<[1], [0], [0], [1], [0, 0, 1, 1], [], []>} : vector<8x384xbf16>, vector<384x256xbf16>, vector<8x256xf32> -> vector<8x256xf32>
    %7 = arith.addf %3, %6 : vector<8x256xf32>
    %c0_6 = arith.constant 0 : index
    %c0_7 = arith.constant 0 : index
    %8 = vector.load %arg7[%c0_6, %c0_7] : memref<8x256xf32, #tpu.memory_space<vmem>>, vector<8x256xf32>
    tpu.vector_store %arg7[%c0_6, %c0_7], %7 {strides = array<i32>} : memref<8x256xf32, #tpu.memory_space<vmem>>, vector<8x256xf32>,
    %c5_i32 = arith.constant 5 : i32
    %9 = arith.cmpi eq, %arg2, %c5_i32 : i32
    %10 = arith.extui %9 : i1 to i32
    %c0_i32_8 = arith.constant 0 : i32
    %11 = arith.cmpi ne, %10, %c0_i32_8 : i32
    scf.if %11 {
      %c0_9 = arith.constant 0 : index
      %c0_10 = arith.constant 0 : index
      %12 = vector.load %arg7[%c0_9, %c0_10] : memref<8x256xf32, #tpu.memory_space<vmem>>, vector<8x256xf32>
      %c0_11 = arith.constant 0 : index
      %c0_12 = arith.constant 0 : index
      %13 = vector.load %arg5[%c0_11, %c0_12] : memref<1x256xf32, #tpu.memory_space<vmem>>, vector<1x256xf32>
      %14 = vector.broadcast %13 : vector<1x256xf32> to vector<8x256xf32>
      %15 = arith.addf %12, %14 : vector<8x256xf32>
      %cst_13 = arith.constant 0.000000e+00 : f32
      %16 = vector.broadcast %cst_13 : f32 to vector<8x256xf32>
      %17 = arith.maximumf %15, %16 : vector<8x256xf32>
      %18 = arith.truncf %17 : vector<8x256xf32> to vector<8x256xbf16>
      %c0_14 = arith.constant 0 : index
      %c0_15 = arith.constant 0 : index
      %19 = vector.load %arg6[%c0_14, %c0_15] : memref<8x256xbf16, #tpu.memory_space<vmem>>, vector<8x256xbf16>
      tpu.vector_store %arg6[%c0_14, %c0_15], %18 {strides = array<i32>} : memref<8x256xbf16, #tpu.memory_space<vmem>>, vector<8x256xbf16>,
    } else {
    }
    return
  }
  func.func @transform_0(%arg0: i32, %arg1: i32, %arg2: i32) -> (i32, i32) {
    %c0_i32 = arith.constant 0 : i32
    return %arg0, %arg2 : i32, i32
  }
  func.func @transform_1(%arg0: i32, %arg1: i32, %arg2: i32) -> (i32, i32) {
    %c0_i32 = arith.constant 0 : i32
    return %arg2, %arg1 : i32, i32
  }
  func.func @transform_2(%arg0: i32, %arg1: i32, %arg2: i32) -> (i32, i32) {
    %c0_i32 = arith.constant 0 : i32
    %c0_i32_0 = arith.constant 0 : i32
    return %c0_i32, %arg1 : i32, i32
  }
  func.func @transform_3(%arg0: i32, %arg1: i32, %arg2: i32) -> (i32, i32) {
    %c0_i32 = arith.constant 0 : i32
    return %arg0, %arg1 : i32, i32
  }
}

module attributes {stable_mosaic.version = 11 : i64} {
  func.func @_matmul_kernel(%arg0: i32, %arg1: i32, %arg2: i32, %arg3: memref<8x384xbf16, #tpu.memory_space<vmem>>, %arg4: memref<384x512xbf16, #tpu.memory_space<vmem>>, %arg5: memref<1x512xf32, #tpu.memory_space<vmem>>, %arg6: memref<8x512xbf16, #tpu.memory_space<vmem>>, %arg7: memref<8x512xf32, #tpu.memory_space<vmem>>) attributes {dimension_semantics = [#tpu.dimension_semantics<parallel>, #tpu.dimension_semantics<parallel>, #tpu.dimension_semantics<arbitrary>], iteration_bounds = array<i64: 1, 1, 6>, scalar_prefetch = 0 : i64, scratch_operands = 1 : i64, tpu.core_type = #tpu.core_type<tc>, window_params = [{transform_indices = @transform_0, window_bounds = array<i64: 8, 384>}, {transform_indices = @transform_1, window_bounds = array<i64: 384, 512>}, {transform_indices = @transform_2, window_bounds = array<i64: 1, 512>}, {transform_indices = @transform_3, window_bounds = array<i64: 8, 512>}]} {
    %c0_i32 = arith.constant 0 : i32
    %0 = arith.cmpi eq, %arg2, %c0_i32 : i32
    %1 = arith.extui %0 : i1 to i32
    %c0_i32_0 = arith.constant 0 : i32
    %2 = arith.cmpi ne, %1, %c0_i32_0 : i32
    scf.if %2 {
      %cst_9 = arith.constant 0.000000e+00 : f32
      %12 = vector.broadcast %cst_9 : f32 to vector<8x512xf32>
      %c0_10 = arith.constant 0 : index
      %c0_11 = arith.constant 0 : index
      %13 = vector.load %arg7[%c0_10, %c0_11] : memref<8x512xf32, #tpu.memory_space<vmem>>, vector<8x512xf32>
      tpu.vector_store %arg7[%c0_10, %c0_11], %12 {strides = array<i32>} : memref<8x512xf32, #tpu.memory_space<vmem>>, vector<8x512xf32>,
    } else {
    }
    %c0 = arith.constant 0 : index
    %c0_1 = arith.constant 0 : index
    %3 = vector.load %arg7[%c0, %c0_1] : memref<8x512xf32, #tpu.memory_space<vmem>>, vector<8x512xf32>
    %c0_2 = arith.constant 0 : index
    %c0_3 = arith.constant 0 : index
    %4 = vector.load %arg3[%c0_2, %c0_3] : memref<8x384xbf16, #tpu.memory_space<vmem>>, vector<8x384xbf16>
    %c0_4 = arith.constant 0 : index
    %c0_5 = arith.constant 0 : index
    %5 = vector.load %arg4[%c0_4, %c0_5] : memref<384x512xbf16, #tpu.memory_space<vmem>>, vector<384x512xbf16>
    %cst = arith.constant dense<0.000000e+00> : vector<8x512xf32>
    %6 = tpu.matmul %4, %5, %cst {dimension_numbers = #tpu.dot_dimension_numbers<[1], [0], [0], [1], [0, 0, 1, 1], [], []>} : vector<8x384xbf16>, vector<384x512xbf16>, vector<8x512xf32> -> vector<8x512xf32>
    %7 = arith.addf %3, %6 : vector<8x512xf32>
    %c0_6 = arith.constant 0 : index
    %c0_7 = arith.constant 0 : index
    %8 = vector.load %arg7[%c0_6, %c0_7] : memref<8x512xf32, #tpu.memory_space<vmem>>, vector<8x512xf32>
    tpu.vector_store %arg7[%c0_6, %c0_7], %7 {strides = array<i32>} : memref<8x512xf32, #tpu.memory_space<vmem>>, vector<8x512xf32>,
    %c5_i32 = arith.constant 5 : i32
    %9 = arith.cmpi eq, %arg2, %c5_i32 : i32
    %10 = arith.extui %9 : i1 to i32
    %c0_i32_8 = arith.constant 0 : i32
    %11 = arith.cmpi ne, %10, %c0_i32_8 : i32
    scf.if %11 {
      %c0_9 = arith.constant 0 : index
      %c0_10 = arith.constant 0 : index
      %12 = vector.load %arg7[%c0_9, %c0_10] : memref<8x512xf32, #tpu.memory_space<vmem>>, vector<8x512xf32>
      %c0_11 = arith.constant 0 : index
      %c0_12 = arith.constant 0 : index
      %13 = vector.load %arg5[%c0_11, %c0_12] : memref<1x512xf32, #tpu.memory_space<vmem>>, vector<1x512xf32>
      %14 = vector.broadcast %13 : vector<1x512xf32> to vector<8x512xf32>
      %15 = arith.addf %12, %14 : vector<8x512xf32>
      %cst_13 = arith.constant 0.000000e+00 : f32
      %16 = vector.broadcast %cst_13 : f32 to vector<8x512xf32>
      %17 = arith.maximumf %15, %16 : vector<8x512xf32>
      %18 = arith.truncf %17 : vector<8x512xf32> to vector<8x512xbf16>
      %c0_14 = arith.constant 0 : index
      %c0_15 = arith.constant 0 : index
      %19 = vector.load %arg6[%c0_14, %c0_15] : memref<8x512xbf16, #tpu.memory_space<vmem>>, vector<8x512xbf16>
      tpu.vector_store %arg6[%c0_14, %c0_15], %18 {strides = array<i32>} : memref<8x512xbf16, #tpu.memory_space<vmem>>, vector<8x512xbf16>,
    } else {
    }
    return
  }
  func.func @transform_0(%arg0: i32, %arg1: i32, %arg2: i32) -> (i32, i32) {
    %c0_i32 = arith.constant 0 : i32
    return %arg0, %arg2 : i32, i32
  }
  func.func @transform_1(%arg0: i32, %arg1: i32, %arg2: i32) -> (i32, i32) {
    %c0_i32 = arith.constant 0 : i32
    return %arg2, %arg1 : i32, i32
  }
  func.func @transform_2(%arg0: i32, %arg1: i32, %arg2: i32) -> (i32, i32) {
    %c0_i32 = arith.constant 0 : i32
    %c0_i32_0 = arith.constant 0 : i32
    return %c0_i32, %arg1 : i32, i32
  }
  func.func @transform_3(%arg0: i32, %arg1: i32, %arg2: i32) -> (i32, i32) {
    %c0_i32 = arith.constant 0 : i32
    return %arg0, %arg1 : i32, i32
  }
}

module attributes {stable_mosaic.version = 11 : i64} {
  func.func @_matmul_kernel(%arg0: i32, %arg1: i32, %arg2: i32, %arg3: memref<8x256xbf16, #tpu.memory_space<vmem>>, %arg4: memref<256x512xbf16, #tpu.memory_space<vmem>>, %arg5: memref<1x512xf32, #tpu.memory_space<vmem>>, %arg6: memref<8x512xbf16, #tpu.memory_space<vmem>>, %arg7: memref<8x512xf32, #tpu.memory_space<vmem>>) attributes {dimension_semantics = [#tpu.dimension_semantics<parallel>, #tpu.dimension_semantics<parallel>, #tpu.dimension_semantics<arbitrary>], iteration_bounds = array<i64: 1, 1, 1>, scalar_prefetch = 0 : i64, scratch_operands = 1 : i64, tpu.core_type = #tpu.core_type<tc>, window_params = [{transform_indices = @transform_0, window_bounds = array<i64: 8, 256>}, {transform_indices = @transform_1, window_bounds = array<i64: 256, 512>}, {transform_indices = @transform_2, window_bounds = array<i64: 1, 512>}, {transform_indices = @transform_3, window_bounds = array<i64: 8, 512>}]} {
    %c0_i32 = arith.constant 0 : i32
    %0 = arith.cmpi eq, %arg2, %c0_i32 : i32
    %1 = arith.extui %0 : i1 to i32
    %c0_i32_0 = arith.constant 0 : i32
    %2 = arith.cmpi ne, %1, %c0_i32_0 : i32
    scf.if %2 {
      %cst_10 = arith.constant 0.000000e+00 : f32
      %12 = vector.broadcast %cst_10 : f32 to vector<8x512xf32>
      %c0_11 = arith.constant 0 : index
      %c0_12 = arith.constant 0 : index
      %13 = vector.load %arg7[%c0_11, %c0_12] : memref<8x512xf32, #tpu.memory_space<vmem>>, vector<8x512xf32>
      tpu.vector_store %arg7[%c0_11, %c0_12], %12 {strides = array<i32>} : memref<8x512xf32, #tpu.memory_space<vmem>>, vector<8x512xf32>,
    } else {
    }
    %c0 = arith.constant 0 : index
    %c0_1 = arith.constant 0 : index
    %3 = vector.load %arg7[%c0, %c0_1] : memref<8x512xf32, #tpu.memory_space<vmem>>, vector<8x512xf32>
    %c0_2 = arith.constant 0 : index
    %c0_3 = arith.constant 0 : index
    %4 = vector.load %arg3[%c0_2, %c0_3] : memref<8x256xbf16, #tpu.memory_space<vmem>>, vector<8x256xbf16>
    %c0_4 = arith.constant 0 : index
    %c0_5 = arith.constant 0 : index
    %5 = vector.load %arg4[%c0_4, %c0_5] : memref<256x512xbf16, #tpu.memory_space<vmem>>, vector<256x512xbf16>
    %cst = arith.constant dense<0.000000e+00> : vector<8x512xf32>
    %6 = tpu.matmul %4, %5, %cst {dimension_numbers = #tpu.dot_dimension_numbers<[1], [0], [0], [1], [0, 0, 1, 1], [], []>} : vector<8x256xbf16>, vector<256x512xbf16>, vector<8x512xf32> -> vector<8x512xf32>
    %7 = arith.addf %3, %6 : vector<8x512xf32>
    %c0_6 = arith.constant 0 : index
    %c0_7 = arith.constant 0 : index
    %8 = vector.load %arg7[%c0_6, %c0_7] : memref<8x512xf32, #tpu.memory_space<vmem>>, vector<8x512xf32>
    tpu.vector_store %arg7[%c0_6, %c0_7], %7 {strides = array<i32>} : memref<8x512xf32, #tpu.memory_space<vmem>>, vector<8x512xf32>,
    %c0_i32_8 = arith.constant 0 : i32
    %9 = arith.cmpi eq, %arg2, %c0_i32_8 : i32
    %10 = arith.extui %9 : i1 to i32
    %c0_i32_9 = arith.constant 0 : i32
    %11 = arith.cmpi ne, %10, %c0_i32_9 : i32
    scf.if %11 {
      %c0_10 = arith.constant 0 : index
      %c0_11 = arith.constant 0 : index
      %12 = vector.load %arg7[%c0_10, %c0_11] : memref<8x512xf32, #tpu.memory_space<vmem>>, vector<8x512xf32>
      %c0_12 = arith.constant 0 : index
      %c0_13 = arith.constant 0 : index
      %13 = vector.load %arg5[%c0_12, %c0_13] : memref<1x512xf32, #tpu.memory_space<vmem>>, vector<1x512xf32>
      %14 = vector.broadcast %13 : vector<1x512xf32> to vector<8x512xf32>
      %15 = arith.addf %12, %14 : vector<8x512xf32>
      %16 = arith.truncf %15 : vector<8x512xf32> to vector<8x512xbf16>
      %c0_14 = arith.constant 0 : index
      %c0_15 = arith.constant 0 : index
      %17 = vector.load %arg6[%c0_14, %c0_15] : memref<8x512xbf16, #tpu.memory_space<vmem>>, vector<8x512xbf16>
      tpu.vector_store %arg6[%c0_14, %c0_15], %16 {strides = array<i32>} : memref<8x512xbf16, #tpu.memory_space<vmem>>, vector<8x512xbf16>,
    } else {
    }
    return
  }
  func.func @transform_0(%arg0: i32, %arg1: i32, %arg2: i32) -> (i32, i32) {
    %c0_i32 = arith.constant 0 : i32
    return %arg0, %arg2 : i32, i32
  }
  func.func @transform_1(%arg0: i32, %arg1: i32, %arg2: i32) -> (i32, i32) {
    %c0_i32 = arith.constant 0 : i32
    return %arg2, %arg1 : i32, i32
  }
  func.func @transform_2(%arg0: i32, %arg1: i32, %arg2: i32) -> (i32, i32) {
    %c0_i32 = arith.constant 0 : i32
    %c0_i32_0 = arith.constant 0 : i32
    return %c0_i32, %arg1 : i32, i32
  }
  func.func @transform_3(%arg0: i32, %arg1: i32, %arg2: i32) -> (i32, i32) {
    %c0_i32 = arith.constant 0 : i32
    return %arg0, %arg1 : i32, i32
  }
}

module attributes {stable_mosaic.version = 11 : i64} {
  func.func @_matmul_kernel(%arg0: i32, %arg1: i32, %arg2: i32, %arg3: memref<8x512xbf16, #tpu.memory_space<vmem>>, %arg4: memref<512x512xbf16, #tpu.memory_space<vmem>>, %arg5: memref<1x512xf32, #tpu.memory_space<vmem>>, %arg6: memref<8x512xbf16, #tpu.memory_space<vmem>>, %arg7: memref<8x512xbf16, #tpu.memory_space<vmem>>, %arg8: memref<8x512xf32, #tpu.memory_space<vmem>>) attributes {dimension_semantics = [#tpu.dimension_semantics<parallel>, #tpu.dimension_semantics<parallel>, #tpu.dimension_semantics<arbitrary>], iteration_bounds = array<i64: 1, 1, 9>, scalar_prefetch = 0 : i64, scratch_operands = 1 : i64, tpu.core_type = #tpu.core_type<tc>, window_params = [{transform_indices = @transform_0, window_bounds = array<i64: 8, 512>}, {transform_indices = @transform_1, window_bounds = array<i64: 512, 512>}, {transform_indices = @transform_2, window_bounds = array<i64: 1, 512>}, {transform_indices = @transform_3, window_bounds = array<i64: 8, 512>}, {transform_indices = @transform_4, window_bounds = array<i64: 8, 512>}]} {
    %c0_i32 = arith.constant 0 : i32
    %0 = arith.cmpi eq, %arg2, %c0_i32 : i32
    %1 = arith.extui %0 : i1 to i32
    %c0_i32_0 = arith.constant 0 : i32
    %2 = arith.cmpi ne, %1, %c0_i32_0 : i32
    scf.if %2 {
      %cst_9 = arith.constant 0.000000e+00 : f32
      %12 = vector.broadcast %cst_9 : f32 to vector<8x512xf32>
      %c0_10 = arith.constant 0 : index
      %c0_11 = arith.constant 0 : index
      %13 = vector.load %arg8[%c0_10, %c0_11] : memref<8x512xf32, #tpu.memory_space<vmem>>, vector<8x512xf32>
      tpu.vector_store %arg8[%c0_10, %c0_11], %12 {strides = array<i32>} : memref<8x512xf32, #tpu.memory_space<vmem>>, vector<8x512xf32>,
    } else {
    }
    %c0 = arith.constant 0 : index
    %c0_1 = arith.constant 0 : index
    %3 = vector.load %arg8[%c0, %c0_1] : memref<8x512xf32, #tpu.memory_space<vmem>>, vector<8x512xf32>
    %c0_2 = arith.constant 0 : index
    %c0_3 = arith.constant 0 : index
    %4 = vector.load %arg3[%c0_2, %c0_3] : memref<8x512xbf16, #tpu.memory_space<vmem>>, vector<8x512xbf16>
    %c0_4 = arith.constant 0 : index
    %c0_5 = arith.constant 0 : index
    %5 = vector.load %arg4[%c0_4, %c0_5] : memref<512x512xbf16, #tpu.memory_space<vmem>>, vector<512x512xbf16>
    %cst = arith.constant dense<0.000000e+00> : vector<8x512xf32>
    %6 = tpu.matmul %4, %5, %cst {dimension_numbers = #tpu.dot_dimension_numbers<[1], [0], [0], [1], [0, 0, 1, 1], [], []>} : vector<8x512xbf16>, vector<512x512xbf16>, vector<8x512xf32> -> vector<8x512xf32>
    %7 = arith.addf %3, %6 : vector<8x512xf32>
    %c0_6 = arith.constant 0 : index
    %c0_7 = arith.constant 0 : index
    %8 = vector.load %arg8[%c0_6, %c0_7] : memref<8x512xf32, #tpu.memory_space<vmem>>, vector<8x512xf32>
    tpu.vector_store %arg8[%c0_6, %c0_7], %7 {strides = array<i32>} : memref<8x512xf32, #tpu.memory_space<vmem>>, vector<8x512xf32>,
    %c8_i32 = arith.constant 8 : i32
    %9 = arith.cmpi eq, %arg2, %c8_i32 : i32
    %10 = arith.extui %9 : i1 to i32
    %c0_i32_8 = arith.constant 0 : i32
    %11 = arith.cmpi ne, %10, %c0_i32_8 : i32
    scf.if %11 {
      %c0_9 = arith.constant 0 : index
      %c0_10 = arith.constant 0 : index
      %12 = vector.load %arg8[%c0_9, %c0_10] : memref<8x512xf32, #tpu.memory_space<vmem>>, vector<8x512xf32>
      %c0_11 = arith.constant 0 : index
      %c0_12 = arith.constant 0 : index
      %13 = vector.load %arg5[%c0_11, %c0_12] : memref<1x512xf32, #tpu.memory_space<vmem>>, vector<1x512xf32>
      %14 = vector.broadcast %13 : vector<1x512xf32> to vector<8x512xf32>
      %15 = arith.addf %12, %14 : vector<8x512xf32>
      %c0_13 = arith.constant 0 : index
      %c0_14 = arith.constant 0 : index
      %16 = vector.load %arg6[%c0_13, %c0_14] : memref<8x512xbf16, #tpu.memory_space<vmem>>, vector<8x512xbf16>
      %17 = arith.extf %16 : vector<8x512xbf16> to vector<8x512xf32>
      %18 = arith.addf %15, %17 : vector<8x512xf32>
      %cst_15 = arith.constant 0.000000e+00 : f32
      %19 = vector.broadcast %cst_15 : f32 to vector<8x512xf32>
      %20 = arith.maximumf %18, %19 : vector<8x512xf32>
      %21 = arith.truncf %20 : vector<8x512xf32> to vector<8x512xbf16>
      %c0_16 = arith.constant 0 : index
      %c0_17 = arith.constant 0 : index
      %22 = vector.load %arg7[%c0_16, %c0_17] : memref<8x512xbf16, #tpu.memory_space<vmem>>, vector<8x512xbf16>
      tpu.vector_store %arg7[%c0_16, %c0_17], %21 {strides = array<i32>} : memref<8x512xbf16, #tpu.memory_space<vmem>>, vector<8x512xbf16>,
    } else {
    }
    return
  }
  func.func @transform_0(%arg0: i32, %arg1: i32, %arg2: i32) -> (i32, i32) {
    %c0_i32 = arith.constant 0 : i32
    return %arg0, %arg2 : i32, i32
  }
  func.func @transform_1(%arg0: i32, %arg1: i32, %arg2: i32) -> (i32, i32) {
    %c0_i32 = arith.constant 0 : i32
    return %arg2, %arg1 : i32, i32
  }
  func.func @transform_2(%arg0: i32, %arg1: i32, %arg2: i32) -> (i32, i32) {
    %c0_i32 = arith.constant 0 : i32
    %c0_i32_0 = arith.constant 0 : i32
    return %c0_i32, %arg1 : i32, i32
  }
  func.func @transform_3(%arg0: i32, %arg1: i32, %arg2: i32) -> (i32, i32) {
    %c0_i32 = arith.constant 0 : i32
    return %arg0, %arg1 : i32, i32
  }
  func.func @transform_4(%arg0: i32, %arg1: i32, %arg2: i32) -> (i32, i32) {
    %c0_i32 = arith.constant 0 : i32
    return %arg0, %arg1 : i32, i32
  }
}

module attributes {stable_mosaic.version = 11 : i64} {
  func.func @_matmul_kernel(%arg0: i32, %arg1: i32, %arg2: i32, %arg3: memref<8x512xbf16, #tpu.memory_space<vmem>>, %arg4: memref<512x512xbf16, #tpu.memory_space<vmem>>, %arg5: memref<1x512xf32, #tpu.memory_space<vmem>>, %arg6: memref<8x512xbf16, #tpu.memory_space<vmem>>, %arg7: memref<8x512xf32, #tpu.memory_space<vmem>>) attributes {dimension_semantics = [#tpu.dimension_semantics<parallel>, #tpu.dimension_semantics<parallel>, #tpu.dimension_semantics<arbitrary>], iteration_bounds = array<i64: 1, 1, 9>, scalar_prefetch = 0 : i64, scratch_operands = 1 : i64, tpu.core_type = #tpu.core_type<tc>, window_params = [{transform_indices = @transform_0, window_bounds = array<i64: 8, 512>}, {transform_indices = @transform_1, window_bounds = array<i64: 512, 512>}, {transform_indices = @transform_2, window_bounds = array<i64: 1, 512>}, {transform_indices = @transform_3, window_bounds = array<i64: 8, 512>}]} {
    %c0_i32 = arith.constant 0 : i32
    %0 = arith.cmpi eq, %arg2, %c0_i32 : i32
    %1 = arith.extui %0 : i1 to i32
    %c0_i32_0 = arith.constant 0 : i32
    %2 = arith.cmpi ne, %1, %c0_i32_0 : i32
    scf.if %2 {
      %cst_9 = arith.constant 0.000000e+00 : f32
      %12 = vector.broadcast %cst_9 : f32 to vector<8x512xf32>
      %c0_10 = arith.constant 0 : index
      %c0_11 = arith.constant 0 : index
      %13 = vector.load %arg7[%c0_10, %c0_11] : memref<8x512xf32, #tpu.memory_space<vmem>>, vector<8x512xf32>
      tpu.vector_store %arg7[%c0_10, %c0_11], %12 {strides = array<i32>} : memref<8x512xf32, #tpu.memory_space<vmem>>, vector<8x512xf32>,
    } else {
    }
    %c0 = arith.constant 0 : index
    %c0_1 = arith.constant 0 : index
    %3 = vector.load %arg7[%c0, %c0_1] : memref<8x512xf32, #tpu.memory_space<vmem>>, vector<8x512xf32>
    %c0_2 = arith.constant 0 : index
    %c0_3 = arith.constant 0 : index
    %4 = vector.load %arg3[%c0_2, %c0_3] : memref<8x512xbf16, #tpu.memory_space<vmem>>, vector<8x512xbf16>
    %c0_4 = arith.constant 0 : index
    %c0_5 = arith.constant 0 : index
    %5 = vector.load %arg4[%c0_4, %c0_5] : memref<512x512xbf16, #tpu.memory_space<vmem>>, vector<512x512xbf16>
    %cst = arith.constant dense<0.000000e+00> : vector<8x512xf32>
    %6 = tpu.matmul %4, %5, %cst {dimension_numbers = #tpu.dot_dimension_numbers<[1], [0], [0], [1], [0, 0, 1, 1], [], []>} : vector<8x512xbf16>, vector<512x512xbf16>, vector<8x512xf32> -> vector<8x512xf32>
    %7 = arith.addf %3, %6 : vector<8x512xf32>
    %c0_6 = arith.constant 0 : index
    %c0_7 = arith.constant 0 : index
    %8 = vector.load %arg7[%c0_6, %c0_7] : memref<8x512xf32, #tpu.memory_space<vmem>>, vector<8x512xf32>
    tpu.vector_store %arg7[%c0_6, %c0_7], %7 {strides = array<i32>} : memref<8x512xf32, #tpu.memory_space<vmem>>, vector<8x512xf32>,
    %c8_i32 = arith.constant 8 : i32
    %9 = arith.cmpi eq, %arg2, %c8_i32 : i32
    %10 = arith.extui %9 : i1 to i32
    %c0_i32_8 = arith.constant 0 : i32
    %11 = arith.cmpi ne, %10, %c0_i32_8 : i32
    scf.if %11 {
      %c0_9 = arith.constant 0 : index
      %c0_10 = arith.constant 0 : index
      %12 = vector.load %arg7[%c0_9, %c0_10] : memref<8x512xf32, #tpu.memory_space<vmem>>, vector<8x512xf32>
      %c0_11 = arith.constant 0 : index
      %c0_12 = arith.constant 0 : index
      %13 = vector.load %arg5[%c0_11, %c0_12] : memref<1x512xf32, #tpu.memory_space<vmem>>, vector<1x512xf32>
      %14 = vector.broadcast %13 : vector<1x512xf32> to vector<8x512xf32>
      %15 = arith.addf %12, %14 : vector<8x512xf32>
      %cst_13 = arith.constant 0.000000e+00 : f32
      %16 = vector.broadcast %cst_13 : f32 to vector<8x512xf32>
      %17 = arith.maximumf %15, %16 : vector<8x512xf32>
      %18 = arith.truncf %17 : vector<8x512xf32> to vector<8x512xbf16>
      %c0_14 = arith.constant 0 : index
      %c0_15 = arith.constant 0 : index
      %19 = vector.load %arg6[%c0_14, %c0_15] : memref<8x512xbf16, #tpu.memory_space<vmem>>, vector<8x512xbf16>
      tpu.vector_store %arg6[%c0_14, %c0_15], %18 {strides = array<i32>} : memref<8x512xbf16, #tpu.memory_space<vmem>>, vector<8x512xbf16>,
    } else {
    }
    return
  }
  func.func @transform_0(%arg0: i32, %arg1: i32, %arg2: i32) -> (i32, i32) {
    %c0_i32 = arith.constant 0 : i32
    return %arg0, %arg2 : i32, i32
  }
  func.func @transform_1(%arg0: i32, %arg1: i32, %arg2: i32) -> (i32, i32) {
    %c0_i32 = arith.constant 0 : i32
    return %arg2, %arg1 : i32, i32
  }
  func.func @transform_2(%arg0: i32, %arg1: i32, %arg2: i32) -> (i32, i32) {
    %c0_i32 = arith.constant 0 : i32
    %c0_i32_0 = arith.constant 0 : i32
    return %c0_i32, %arg1 : i32, i32
  }
  func.func @transform_3(%arg0: i32, %arg1: i32, %arg2: i32) -> (i32, i32) {
    %c0_i32 = arith.constant 0 : i32
    return %arg0, %arg1 : i32, i32
  }
}

module attributes {stable_mosaic.version = 11 : i64} {
  func.func @_head_kernel(%arg0: memref<2x1x512xbf16, #tpu.memory_space<vmem>>, %arg1: memref<512x256xf32, #tpu.memory_space<vmem>>, %arg2: memref<1x256xf32, #tpu.memory_space<vmem>>, %arg3: memref<256x128xf32, #tpu.memory_space<vmem>>, %arg4: memref<1x128xf32, #tpu.memory_space<vmem>>, %arg5: memref<128x2xf32, #tpu.memory_space<vmem>>, %arg6: memref<1x2xf32, #tpu.memory_space<vmem>>, %arg7: memref<512x256xf32, #tpu.memory_space<vmem>>, %arg8: memref<1x256xf32, #tpu.memory_space<vmem>>, %arg9: memref<256x128xf32, #tpu.memory_space<vmem>>, %arg10: memref<1x128xf32, #tpu.memory_space<vmem>>, %arg11: memref<128x3xf32, #tpu.memory_space<vmem>>, %arg12: memref<1x3xf32, #tpu.memory_space<vmem>>, %arg13: memref<2x2xf32, #tpu.memory_space<vmem>>, %arg14: memref<2x3xf32, #tpu.memory_space<vmem>>) attributes {dimension_semantics = [], scalar_prefetch = 0 : i64, scratch_operands = 0 : i64, tpu.core_type = #tpu.core_type<tc>} {
    %c0 = arith.constant 0 : index
    %c0_0 = arith.constant 0 : index
    %c0_1 = arith.constant 0 : index
    %0 = vector.load %arg0[%c0, %c0_0, %c0_1] : memref<2x1x512xbf16, #tpu.memory_space<vmem>>, vector<2x1x512xbf16>
    %1 = arith.extf %0 : vector<2x1x512xbf16> to vector<2x1x512xf32>
    %cst = arith.constant dense<0.000000e+00> : vector<2x512xf32>
    %2 = vector.multi_reduction <add>, %1, %cst [1] : vector<2x1x512xf32> to vector<2x512xf32>
    %cst_2 = arith.constant 1.000000e+00 : f32
    %3 = vector.broadcast %cst_2 : f32 to vector<2x512xf32>
    %4 = arith.divf %2, %3 : vector<2x512xf32>
    %c0_3 = arith.constant 0 : index
    %c0_4 = arith.constant 0 : index
    %5 = vector.load %arg1[%c0_3, %c0_4] : memref<512x256xf32, #tpu.memory_space<vmem>>, vector<512x256xf32>
    %cst_5 = arith.constant dense<0.000000e+00> : vector<2x256xf32>
    %6 = tpu.matmul %4, %5, %cst_5 {dimension_numbers = #tpu.dot_dimension_numbers<[1], [0], [0], [1], [0, 0, 1, 1], [], []>} : vector<2x512xf32>, vector<512x256xf32>, vector<2x256xf32> -> vector<2x256xf32>
    %c0_6 = arith.constant 0 : index
    %c0_7 = arith.constant 0 : index
    %7 = vector.load %arg2[%c0_6, %c0_7] : memref<1x256xf32, #tpu.memory_space<vmem>>, vector<1x256xf32>
    %8 = vector.broadcast %7 : vector<1x256xf32> to vector<2x256xf32>
    %9 = arith.addf %6, %8 : vector<2x256xf32>
    %cst_8 = arith.constant 0.000000e+00 : f32
    %10 = vector.broadcast %cst_8 : f32 to vector<2x256xf32>
    %11 = arith.maximumf %9, %10 : vector<2x256xf32>
    %c0_9 = arith.constant 0 : index
    %c0_10 = arith.constant 0 : index
    %12 = vector.load %arg3[%c0_9, %c0_10] : memref<256x128xf32, #tpu.memory_space<vmem>>, vector<256x128xf32>
    %cst_11 = arith.constant dense<0.000000e+00> : vector<2x128xf32>
    %13 = tpu.matmul %11, %12, %cst_11 {dimension_numbers = #tpu.dot_dimension_numbers<[1], [0], [0], [1], [0, 0, 1, 1], [], []>} : vector<2x256xf32>, vector<256x128xf32>, vector<2x128xf32> -> vector<2x128xf32>
    %c0_12 = arith.constant 0 : index
    %c0_13 = arith.constant 0 : index
    %14 = vector.load %arg4[%c0_12, %c0_13] : memref<1x128xf32, #tpu.memory_space<vmem>>, vector<1x128xf32>
    %15 = vector.broadcast %14 : vector<1x128xf32> to vector<2x128xf32>
    %16 = arith.addf %13, %15 : vector<2x128xf32>
    %cst_14 = arith.constant 0.000000e+00 : f32
    %17 = vector.broadcast %cst_14 : f32 to vector<2x128xf32>
    %18 = arith.maximumf %16, %17 : vector<2x128xf32>
    %c0_15 = arith.constant 0 : index
    %c0_16 = arith.constant 0 : index
    %19 = vector.load %arg5[%c0_15, %c0_16] : memref<128x2xf32, #tpu.memory_space<vmem>>, vector<128x2xf32>
    %cst_17 = arith.constant dense<0.000000e+00> : vector<2x2xf32>
    %20 = tpu.matmul %18, %19, %cst_17 {dimension_numbers = #tpu.dot_dimension_numbers<[1], [0], [0], [1], [0, 0, 1, 1], [], []>} : vector<2x128xf32>, vector<128x2xf32>, vector<2x2xf32> -> vector<2x2xf32>
    %c0_18 = arith.constant 0 : index
    %c0_19 = arith.constant 0 : index
    %21 = vector.load %arg6[%c0_18, %c0_19] : memref<1x2xf32, #tpu.memory_space<vmem>>, vector<1x2xf32>
    %22 = vector.broadcast %21 : vector<1x2xf32> to vector<2x2xf32>
    %23 = arith.addf %20, %22 : vector<2x2xf32>
    %c0_20 = arith.constant 0 : index
    %c0_21 = arith.constant 0 : index
    %24 = vector.load %arg13[%c0_20, %c0_21] : memref<2x2xf32, #tpu.memory_space<vmem>>, vector<2x2xf32>
    tpu.vector_store %arg13[%c0_20, %c0_21], %23 {strides = array<i32>} : memref<2x2xf32, #tpu.memory_space<vmem>>, vector<2x2xf32>,
    %c0_22 = arith.constant 0 : index
    %c0_23 = arith.constant 0 : index
    %25 = vector.load %arg7[%c0_22, %c0_23] : memref<512x256xf32, #tpu.memory_space<vmem>>, vector<512x256xf32>
    %cst_24 = arith.constant dense<0.000000e+00> : vector<2x256xf32>
    %26 = tpu.matmul %4, %25, %cst_24 {dimension_numbers = #tpu.dot_dimension_numbers<[1], [0], [0], [1], [0, 0, 1, 1], [], []>} : vector<2x512xf32>, vector<512x256xf32>, vector<2x256xf32> -> vector<2x256xf32>
    %c0_25 = arith.constant 0 : index
    %c0_26 = arith.constant 0 : index
    %27 = vector.load %arg8[%c0_25, %c0_26] : memref<1x256xf32, #tpu.memory_space<vmem>>, vector<1x256xf32>
    %28 = vector.broadcast %27 : vector<1x256xf32> to vector<2x256xf32>
    %29 = arith.addf %26, %28 : vector<2x256xf32>
    %cst_27 = arith.constant 0.000000e+00 : f32
    %30 = vector.broadcast %cst_27 : f32 to vector<2x256xf32>
    %31 = arith.maximumf %29, %30 : vector<2x256xf32>
    %c0_28 = arith.constant 0 : index
    %c0_29 = arith.constant 0 : index
    %32 = vector.load %arg9[%c0_28, %c0_29] : memref<256x128xf32, #tpu.memory_space<vmem>>, vector<256x128xf32>
    %cst_30 = arith.constant dense<0.000000e+00> : vector<2x128xf32>
    %33 = tpu.matmul %31, %32, %cst_30 {dimension_numbers = #tpu.dot_dimension_numbers<[1], [0], [0], [1], [0, 0, 1, 1], [], []>} : vector<2x256xf32>, vector<256x128xf32>, vector<2x128xf32> -> vector<2x128xf32>
    %c0_31 = arith.constant 0 : index
    %c0_32 = arith.constant 0 : index
    %34 = vector.load %arg10[%c0_31, %c0_32] : memref<1x128xf32, #tpu.memory_space<vmem>>, vector<1x128xf32>
    %35 = vector.broadcast %34 : vector<1x128xf32> to vector<2x128xf32>
    %36 = arith.addf %33, %35 : vector<2x128xf32>
    %cst_33 = arith.constant 0.000000e+00 : f32
    %37 = vector.broadcast %cst_33 : f32 to vector<2x128xf32>
    %38 = arith.maximumf %36, %37 : vector<2x128xf32>
    %c0_34 = arith.constant 0 : index
    %c0_35 = arith.constant 0 : index
    %39 = vector.load %arg11[%c0_34, %c0_35] : memref<128x3xf32, #tpu.memory_space<vmem>>, vector<128x3xf32>
    %cst_36 = arith.constant dense<0.000000e+00> : vector<2x3xf32>
    %40 = tpu.matmul %38, %39, %cst_36 {dimension_numbers = #tpu.dot_dimension_numbers<[1], [0], [0], [1], [0, 0, 1, 1], [], []>} : vector<2x128xf32>, vector<128x3xf32>, vector<2x3xf32> -> vector<2x3xf32>
    %c0_37 = arith.constant 0 : index
    %c0_38 = arith.constant 0 : index
    %41 = vector.load %arg12[%c0_37, %c0_38] : memref<1x3xf32, #tpu.memory_space<vmem>>, vector<1x3xf32>
    %42 = vector.broadcast %41 : vector<1x3xf32> to vector<2x3xf32>
    %43 = arith.addf %40, %42 : vector<2x3xf32>
    %cst_39 = arith.constant dense<0xFF800000> : vector<2xf32>
    %44 = vector.multi_reduction <maximumf>, %43, %cst_39 [1] : vector<2x3xf32> to vector<2xf32>
    %45 = vector.shape_cast %44 : vector<2xf32> to vector<2x1xf32>
    %46 = vector.broadcast %45 : vector<2x1xf32> to vector<2x3xf32>
    %47 = arith.subf %43, %46 : vector<2x3xf32>
    %48 = math.exp %47 : vector<2x3xf32>
    %cst_40 = arith.constant dense<0.000000e+00> : vector<2xf32>
    %49 = vector.multi_reduction <add>, %48, %cst_40 [1] : vector<2x3xf32> to vector<2xf32>
    %50 = vector.shape_cast %49 : vector<2xf32> to vector<2x1xf32>
    %51 = vector.broadcast %50 : vector<2x1xf32> to vector<2x3xf32>
    %52 = arith.divf %48, %51 : vector<2x3xf32>
    %c0_41 = arith.constant 0 : index
    %c0_42 = arith.constant 0 : index
    %53 = vector.load %arg14[%c0_41, %c0_42] : memref<2x3xf32, #tpu.memory_space<vmem>>, vector<2x3xf32>
    tpu.vector_store %arg14[%c0_41, %c0_42], %52 {strides = array<i32>} : memref<2x3xf32, #tpu.memory_space<vmem>>, vector<2x3xf32>,
    return
  }
}

</mosaic_0001>

<bundles_post_ra>
// kernel: forward.22
= control target key start
LH: loop header
LB: loop body
LE: loop exit
PB: predicated region body
PF: predicated region fallthrough
CT: control target
= control target key end

     0   :  { %s1744_s12 = smov 0   ;;  %s1746_s13 = smov 0   ;;  %s1918_s0 = inlined_call_operand.vmem [shape: bf16[512,256], index: 0, kind: input, shape index: {}]   ;;  %s1919_s1 = inlined_call_operand.vmem [shape: bf16[256,128], index: 1, kind: input, shape index: {}]   ;;  %s1920_s2 = inlined_call_operand.vmem [shape: f32[1,128], index: 2, kind: input, shape index: {}]   ;;  %s1921_s3 = inlined_call_operand.vmem [shape: bf16[512,128], index: 3, kind: output, shape index: {}]  }
   0x1   :  { %s1748_s14 = smov 0  }
   0x2 LB: > { %s32_s15 = sadd.s32 1, %s1718_s13  ;;  %p1267_p0 = scmp.ge.s32.totalorder %s1722_s14, 1  ;;  %s1722_s14 = sphi %s1748_s14, %s13_s14   ;;  %s1718_s13 = sphi %s1746_s13, %s1923_s13   ;;  %s1714_s12 = sphi %s1744_s12, %s1922_s12  }
   0x3   : > { %p34_p1 = scmp.ge.s32.totalorder %s32_s15, 2  ;;  %p191_p2 = scmp.lt.s32.totalorder %s1722_s14, 3 }
   0x5   : > { %s1925_s15 = smov (%p34_p1, %s32_s15), 0  ;;  %p192_p3 = pnand %p1267_p0, %p191_p2 }
   0x6   : > { %s1268_s18 = sshll.u32 (!%p192_p3), %s1714_s12, 5 }
   0x7   : > { %195 = sbr.rel (%p192_p3) target bundleno = 309 (0x135), region = 32  ;;  %p236_p4 = scmp.lt.s32.totalorder (!%p192_p3), %s1268_s18, 63 }
   0xc   : > { %v1636_v0 = vld [vmem:[%s1919_s1 + $0x78] sm:$0xff]   ;;  %v1638_v2 = vld [vmem:[%s1919_s1 + $0x70] sm:$0xff]   ;;  %v1640_v4 = vld [vmem:[%s1919_s1 + $0x68] sm:$0xff]   ;;  %s1927_s18 = smov (!%p236_p4, %s1268_s18), 63 }
   0xd   : > { %v1637_v1 = vld [vmem:[%s1919_s1 + $0x38] sm:$0xff]   ;;  %1484 = vmatprep.subr.bf16.mxu0 %v1636_v0  ;;  %1596 = vmatprep.subr.bf16.mxu1 %v1636_v0  ;;  %v1639_v3 = vld [vmem:[%s1919_s1 + $0x30] sm:$0xff]   ;;  %v1641_v5 = vld [vmem:[%s1919_s1 + $0x28] sm:$0xff]   ;;  %s1356_s6 = sshll.u32 %s1927_s18, 3  ;;  %s1272_s5 = sshll.u32 %s1927_s18, 2 }
   0xe   : > { %1485 = vmatpush3.bf16.msra.mxu0 %v1637_v1  ;;  %1604 = vmatpush3.bf16.msra.mxu1 %v1637_v1  ;;  %v1642_v6 = vld [vmem:[%s1919_s1 + $0x60] sm:$0xff]   ;;  %v1644_v8 = vld [vmem:[%s1919_s1 + $0x58] sm:$0xff]   ;;  %s1795_s11 = scalar_lea.vmem %s1918_s0, %s1356_s6  ;;  %v1646_v10 = vld [vmem:[%s1919_s1 + $0x50] sm:$0xff]   ;;  %s1863_s8 = scalar_lea.vmem %s1921_s3, %s1272_s5 }
   0xf   : > { %1486 = vmatprep.subr.bf16.mxu0 %v1638_v2  ;;  %1597 = vmatprep.subr.bf16.mxu1 %v1638_v2  ;;  %v1643_v7 = vld [vmem:[%s1919_s1 + $0x20] sm:$0xff]   ;;  %v1645_v9 = vld [vmem:[%s1919_s1 + $0x18] sm:$0xff]   ;;  %v1647_v13 = vld [vmem:[%s1919_s1 + $0x10] sm:$0xff]  }
  0x10   : > { %v1654_v11 = vld [vmem:[%s1795_s11 + $0x4] ss:$8 sps:$4 sm:$0xff]   ;;  %v1652_v18 = vld [vmem:[%s1795_s11] ss:$8 sps:$4 sm:$0xff]   ;;  %v1658_v20 = vld [vmem:[%s1795_s11 + $0x14] ss:$8 sps:$4 sm:$0xff]  }
  0x11   : > { %v1657_v12 = vld [vmem:[%s1795_s11 + $0x84] ss:$8 sps:$4 sm:$0xff]   ;;  %688 = vmatprep.mubr.bf16.mxu0 %v1654_v11  ;;  %v1655_v19 = vld [vmem:[%s1795_s11 + $0x80] ss:$8 sps:$4 sm:$0xff]   ;;  %v1660_v21 = vld [vmem:[%s1795_s11 + $0x94] ss:$8 sps:$4 sm:$0xff]  }
  0x12   : > { %1487 = vmatpush3.bf16.msra.mxu0 %v1639_v3  ;;  %1605 = vmatpush3.bf16.msra.mxu1 %v1639_v3  ;;  %v1648_v14 = vld [vmem:[%s1919_s1 + $0x48] sm:$0xff]   ;;  %v1650_v16 = vld [vmem:[%s1919_s1 + $0x40] sm:$0xff]   ;;  %v1662_v22 = vld [vmem:[%s1795_s11 + $0x10] ss:$8 sps:$4 sm:$0xff]  }
  0x13   : > { %1488 = vmatprep.subr.bf16.mxu0 %v1640_v4  ;;  %1598 = vmatprep.subr.bf16.mxu1 %v1640_v4  ;;  %v1649_v15 = vld [vmem:[%s1919_s1 + $0x8] sm:$0xff]   ;;  %v1651_v17 = vld [vmem:[%s1919_s1] sm:$0xff]   ;;  %v1663_v23 = vld [vmem:[%s1795_s11 + $0x90] ss:$8 sps:$4 sm:$0xff]  }
  0x14   : > { %752 = vmatprep.mubr.bf16.mxu1 %v1657_v12  ;;  %v1664_v24 = vld [vmem:[%s1795_s11 + $0x24] ss:$8 sps:$4 sm:$0xff]   ;;  %v1668_v26 = vld [vmem:[%s1795_s11 + $0x20] ss:$8 sps:$4 sm:$0xff]   ;;  %v1670_v28 = vld [vmem:[%s1795_s11 + $0x34] ss:$8 sps:$4 sm:$0xff]  }
  0x15   : > { %v1666_v25 = vld [vmem:[%s1795_s11 + $0xa4] ss:$8 sps:$4 sm:$0xff]   ;;  %v1669_v27 = vld [vmem:[%s1795_s11 + $0xa0] ss:$8 sps:$4 sm:$0xff]   ;;  %v1672_v29 = vld [vmem:[%s1795_s11 + $0xb4] ss:$8 sps:$4 sm:$0xff]  }
  0x16   : > { %1489 = vmatpush3.bf16.msra.mxu0 %v1641_v5  ;;  %1606 = vmatpush3.bf16.msra.mxu1 %v1641_v5  ;;  %v1674_v30 = vld [vmem:[%s1795_s11 + $0x30] ss:$8 sps:$4 sm:$0xff]   ;;  %v1676_v32 = vld [vmem:[%s1795_s11 + $0x44] ss:$8 sps:$4 sm:$0xff]   ;;  %v1680_v34 = vld [vmem:[%s1795_s11 + $0x40] ss:$8 sps:$4 sm:$0xff]  }
  0x17   : > { %1490 = vmatprep.subr.bf16.mxu0 %v1642_v6  ;;  %1599 = vmatprep.subr.bf16.mxu1 %v1642_v6  ;;  %v1675_v31 = vld [vmem:[%s1795_s11 + $0xb0] ss:$8 sps:$4 sm:$0xff]   ;;  %v1678_v33 = vld [vmem:[%s1795_s11 + $0xc4] ss:$8 sps:$4 sm:$0xff]   ;;  %v1681_v35 = vld [vmem:[%s1795_s11 + $0xc0] ss:$8 sps:$4 sm:$0xff]  }
  0x18   : > { %v1682_v36 = vld [vmem:[%s1795_s11 + $0x54] ss:$8 sps:$4 sm:$0xff]   ;;  %v1686_v38 = vld [vmem:[%s1795_s11 + $0x50] ss:$8 sps:$4 sm:$0xff]   ;;  %v1688_v40 = vld [vmem:[%s1795_s11 + $0x64] ss:$8 sps:$4 sm:$0xff]  }
  0x19   : > { %v1684_v37 = vld [vmem:[%s1795_s11 + $0xd4] ss:$8 sps:$4 sm:$0xff]   ;;  %v1687_v39 = vld [vmem:[%s1795_s11 + $0xd0] ss:$8 sps:$4 sm:$0xff]   ;;  %v1690_v41 = vld [vmem:[%s1795_s11 + $0xe4] ss:$8 sps:$4 sm:$0xff]  }
  0x1a   : > { %1491 = vmatpush3.bf16.msra.mxu0 %v1643_v7  ;;  %1607 = vmatpush3.bf16.msra.mxu1 %v1643_v7  ;;  %v1692_v42 = vld [vmem:[%s1795_s11 + $0x60] ss:$8 sps:$4 sm:$0xff]   ;;  %v1694_v44 = vld [vmem:[%s1795_s11 + $0x74] ss:$8 sps:$4 sm:$0xff]   ;;  %v1698_v46 = vld [vmem:[%s1795_s11 + $0x70] ss:$8 sps:$4 sm:$0xff]  }
  0x1b   : > { %1492 = vmatprep.subr.bf16.mxu0 %v1644_v8  ;;  %1600 = vmatprep.subr.bf16.mxu1 %v1644_v8  ;;  %v1693_v43 = vld [vmem:[%s1795_s11 + $0xe0] ss:$8 sps:$4 sm:$0xff]   ;;  %v1696_v45 = vld [vmem:[%s1795_s11 + $0xf4] ss:$8 sps:$4 sm:$0xff]   ;;  %v1699_v47 = vld [vmem:[%s1795_s11 + $0xf0] ss:$8 sps:$4 sm:$0xff]  }
  0x1c   : > { %v1853_v53 = vld [vmem:[%s1920_s2] ss:$0 sm:$0xff] }
  0x1e   : > { %1493 = vmatpush3.bf16.msra.mxu0 %v1645_v9  ;;  %1608 = vmatpush3.bf16.msra.mxu1 %v1645_v9 }
  0x1f   : > { %1494 = vmatprep.subr.bf16.mxu0 %v1646_v10  ;;  %1601 = vmatprep.subr.bf16.mxu1 %v1646_v10 }
  0x22   : > { %1495 = vmatpush3.bf16.msra.mxu0 %v1647_v13  ;;  %1609 = vmatpush3.bf16.msra.mxu1 %v1647_v13 }
  0x23   : > { %1496 = vmatprep.subr.bf16.mxu0 %v1648_v14  ;;  %1602 = vmatprep.subr.bf16.mxu1 %v1648_v14 }
  0x26   : > { %1497 = vmatpush3.bf16.msra.mxu0 %v1649_v15  ;;  %1610 = vmatpush3.bf16.msra.mxu1 %v1649_v15 }
  0x27   : > { %1498 = vmatprep.subr.bf16.mxu0 %v1650_v16  ;;  %1603 = vmatprep.subr.bf16.mxu1 %v1650_v16 }
  0x2a   : > { %1499 = vmatpush3.bf16.msra.mxu0 %v1651_v17  ;;  %1611 = vmatpush3.bf16.msra.mxu1 %v1651_v17 }
  0x2d   : > { %689 = vmatmul.mubr.bf16.vlgmr.msra.gmra.mxu0 %v1652_v18  ;;  %753 = vmatmul.mubr.bf16.vlgmr.msra.gmra.mxu1 %v1655_v19 }
  0x2e   : > { %696 = vmatprep.mubr.bf16.mxu0 %v1658_v20  ;;  %760 = vmatprep.mubr.bf16.mxu1 %v1660_v21 }
  0x35   : > { %697 = vmatmul.mubr.bf16.gmra.mxu0 %v1662_v22  ;;  %761 = vmatmul.mubr.bf16.gmra.mxu1 %v1663_v23 }
  0x36   : > { %704 = vmatprep.mubr.bf16.mxu0 %v1664_v24  ;;  %768 = vmatprep.mubr.bf16.mxu1 %v1666_v25 }
  0x3d   : > { %705 = vmatmul.mubr.bf16.gmra.mxu0 %v1668_v26  ;;  %769 = vmatmul.mubr.bf16.gmra.mxu1 %v1669_v27 }
  0x3e   : > { %712 = vmatprep.mubr.bf16.mxu0 %v1670_v28  ;;  %776 = vmatprep.mubr.bf16.mxu1 %v1672_v29 }
  0x45   : > { %713 = vmatmul.mubr.bf16.gmra.mxu0 %v1674_v30  ;;  %777 = vmatmul.mubr.bf16.gmra.mxu1 %v1675_v31 }
  0x46   : > { %720 = vmatprep.mubr.bf16.mxu0 %v1676_v32  ;;  %784 = vmatprep.mubr.bf16.mxu1 %v1678_v33 }
  0x4d   : > { %721 = vmatmul.mubr.bf16.gmra.mxu0 %v1680_v34  ;;  %785 = vmatmul.mubr.bf16.gmra.mxu1 %v1681_v35 }
  0x4e   : > { %728 = vmatprep.mubr.bf16.mxu0 %v1682_v36  ;;  %792 = vmatprep.mubr.bf16.mxu1 %v1684_v37 }
  0x55   : > { %729 = vmatmul.mubr.bf16.gmra.mxu0 %v1686_v38  ;;  %793 = vmatmul.mubr.bf16.gmra.mxu1 %v1687_v39 }
  0x56   : > { %736 = vmatprep.mubr.bf16.mxu0 %v1688_v40  ;;  %800 = vmatprep.mubr.bf16.mxu1 %v1690_v41 }
  0x5d   : > { %737 = vmatmul.mubr.bf16.gmra.mxu0 %v1692_v42  ;;  %801 = vmatmul.mubr.bf16.gmra.mxu1 %v1693_v43 }
  0x5e   : > { %744 = vmatprep.mubr.bf16.mxu0 %v1694_v44  ;;  %808 = vmatprep.mubr.bf16.mxu1 %v1696_v45 }
  0x65   : > { %745 = vmatmul.mubr.bf16.gmra.mxu0 %v1698_v46  ;;  %809 = vmatmul.mubr.bf16.gmra.mxu1 %v1699_v47 }
  0xed   : > { %v1500_v48 = vpop.f32.mrf.mxu0  ;;  %v1548_v49 = vpop.f32.mrf.mxu1 }
  0xef   : > { %v1501_v50 = vpop.f32.mrf.mxu0  ;;  %v1549_v51 = vpop.f32.mrf.mxu1 }
  0xf0   : > { %v1502_v52 = vadd.f32 %v1501_v50, %v1500_v48  ;;  %v1550_v54 = vadd.f32 %v1549_v51, %v1548_v49 }
  0xf1   : > { %v1503_v55 = vpop.f32.mrf.mxu0  ;;  %v1551_v56 = vpop.f32.mrf.mxu1 }
  0xf2   : > { %v923_v57 = vadd.f32 %v1502_v52, %v1853_v53  ;;  %v939_v58 = vadd.f32 %v1550_v54, %v1853_v53 }
  0xf3   : > { %v1504_v59 = vpop.f32.mrf.mxu0  ;;  %v1552_v60 = vpop.f32.mrf.mxu1 }
  0xf4   : > { %v1505_v61 = vadd.f32 %v1504_v59, %v1503_v55  ;;  %v1553_v62 = vadd.f32 %v1552_v60, %v1551_v56  ;;  %v955_v3 = vmax.f32 %v923_v57, 0.0  ;;  %v971_v4 = vmax.f32 %v939_v58, 0.0 }
  0xf5   : > { %v1506_v63 = vpop.f32.mrf.mxu0  ;;  %v1554_v0 = vpop.f32.mrf.mxu1 }
  0xf6   : > { %v924_v1 = vadd.f32 %v1505_v61, %v1853_v53  ;;  %v940_v2 = vadd.f32 %v1553_v62, %v1853_v53 }
  0xf7   : > { %v1507_v5 = vpop.f32.mrf.mxu0  ;;  %v1555_v6 = vpop.f32.mrf.mxu1 }
  0xf8   : > { %v956_v7 = vmax.f32 %v924_v1, 0.0  ;;  %v972_v8 = vmax.f32 %v940_v2, 0.0  ;;  %v1508_v9 = vadd.f32 %v1507_v5, %v1506_v63  ;;  %v1556_v10 = vadd.f32 %v1555_v6, %v1554_v0 }
  0xf9   : > { %v1509_v11 = vpop.f32.mrf.mxu0  ;;  %v1557_v12 = vpop.f32.mrf.mxu1 }
  0xfa   : > { %v1392_v13 = vpack.c.bf16 %v956_v7, %v955_v3  ;;  %v1432_v14 = vpack.c.bf16 %v972_v8, %v971_v4  ;;  %v925_v15 = vadd.f32 %v1508_v9, %v1853_v53  ;;  %v941_v16 = vadd.f32 %v1556_v10, %v1853_v53 }
  0xfb   : > { %v1510_v17 = vpop.f32.mrf.mxu0  ;;  %v1558_v18 = vpop.f32.mrf.mxu1 }
  0xfc   : > { %1393 = vst [vmem:[%s1863_s8] sm:$0xff] %v1392_v13   ;;  %1476 = vst [vmem:[%s1863_s8 + $0x40] sm:$0xff] %v1432_v14   ;;  %v1511_v19 = vadd.f32 %v1510_v17, %v1509_v11  ;;  %v1559_v20 = vadd.f32 %v1558_v18, %v1557_v12  ;;  %v957_v25 = vmax.f32 %v925_v15, 0.0  ;;  %v973_v26 = vmax.f32 %v941_v16, 0.0 }
  0xfd   : > { %v1512_v21 = vpop.f32.mrf.mxu0  ;;  %v1560_v22 = vpop.f32.mrf.mxu1 }
  0xfe   : > { %v926_v23 = vadd.f32 %v1511_v19, %v1853_v53  ;;  %v942_v24 = vadd.f32 %v1559_v20, %v1853_v53 }
  0xff   : > { %v1513_v27 = vpop.f32.mrf.mxu0  ;;  %v1561_v28 = vpop.f32.mrf.mxu1 }
 0x100   : > { %v958_v29 = vmax.f32 %v926_v23, 0.0  ;;  %v974_v30 = vmax.f32 %v942_v24, 0.0  ;;  %v1514_v31 = vadd.f32 %v1513_v27, %v1512_v21  ;;  %v1562_v32 = vadd.f32 %v1561_v28, %v1560_v22 }
 0x101   : > { %v1515_v33 = vpop.f32.mrf.mxu0  ;;  %v1563_v34 = vpop.f32.mrf.mxu1 }
 0x102   : > { %v1397_v35 = vpack.c.bf16 %v958_v29, %v957_v25  ;;  %v1437_v36 = vpack.c.bf16 %v974_v30, %v973_v26  ;;  %v927_v37 = vadd.f32 %v1514_v31, %v1853_v53  ;;  %v943_v38 = vadd.f32 %v1562_v32, %v1853_v53 }
 0x103   : > { %v1516_v39 = vpop.f32.mrf.mxu0  ;;  %v1564_v40 = vpop.f32.mrf.mxu1 }
 0x104   : > { %1469 = vst [vmem:[%s1863_s8 + $0x8] sm:$0xff] %v1397_v35   ;;  %1477 = vst [vmem:[%s1863_s8 + $0x48] sm:$0xff] %v1437_v36   ;;  %v1517_v41 = vadd.f32 %v1516_v39, %v1515_v33  ;;  %v1565_v42 = vadd.f32 %v1564_v40, %v1563_v34  ;;  %v959_v47 = vmax.f32 %v927_v37, 0.0  ;;  %v975_v48 = vmax.f32 %v943_v38, 0.0 }
 0x105   : > { %v1518_v43 = vpop.f32.mrf.mxu0  ;;  %v1566_v44 = vpop.f32.mrf.mxu1 }
 0x106   : > { %v928_v45 = vadd.f32 %v1517_v41, %v1853_v53  ;;  %v944_v46 = vadd.f32 %v1565_v42, %v1853_v53 }
 0x107   : > { %v1519_v49 = vpop.f32.mrf.mxu0  ;;  %v1567_v50 = vpop.f32.mrf.mxu1 }
 0x108   : > { %v960_v51 = vmax.f32 %v928_v45, 0.0  ;;  %v976_v52 = vmax.f32 %v944_v46, 0.0  ;;  %v1520_v54 = vadd.f32 %v1519_v49, %v1518_v43  ;;  %v1568_v55 = vadd.f32 %v1567_v50, %v1566_v44 }
 0x109   : > { %v1521_v56 = vpop.f32.mrf.mxu0  ;;  %v1569_v57 = vpop.f32.mrf.mxu1 }
 0x10a   : > { %v1402_v58 = vpack.c.bf16 %v960_v51, %v959_v47  ;;  %v1442_v59 = vpack.c.bf16 %v976_v52, %v975_v48  ;;  %v929_v60 = vadd.f32 %v1520_v54, %v1853_v53  ;;  %v945_v61 = vadd.f32 %v1568_v55, %v1853_v53 }
 0x10b   : > { %v1522_v62 = vpop.f32.mrf.mxu0  ;;  %v1570_v63 = vpop.f32.mrf.mxu1 }
 0x10c   : > { %1470 = vst [vmem:[%s1863_s8 + $0x10] sm:$0xff] %v1402_v58   ;;  %1478 = vst [vmem:[%s1863_s8 + $0x50] sm:$0xff] %v1442_v59   ;;  %v1523_v0 = vadd.f32 %v1522_v62, %v1521_v56  ;;  %v1571_v1 = vadd.f32 %v1570_v63, %v1569_v57  ;;  %v961_v6 = vmax.f32 %v929_v60, 0.0  ;;  %v977_v7 = vmax.f32 %v945_v61, 0.0 }
 0x10d   : > { %v1524_v2 = vpop.f32.mrf.mxu0  ;;  %v1572_v3 = vpop.f32.mrf.mxu1 }
 0x10e   : > { %v930_v4 = vadd.f32 %v1523_v0, %v1853_v53  ;;  %v946_v5 = vadd.f32 %v1571_v1, %v1853_v53 }
 0x10f   : > { %v1525_v8 = vpop.f32.mrf.mxu0  ;;  %v1573_v9 = vpop.f32.mrf.mxu1 }
 0x110   : > { %v962_v10 = vmax.f32 %v930_v4, 0.0  ;;  %v978_v11 = vmax.f32 %v946_v5, 0.0  ;;  %v1526_v12 = vadd.f32 %v1525_v8, %v1524_v2  ;;  %v1574_v13 = vadd.f32 %v1573_v9, %v1572_v3 }
 0x111   : > { %v1527_v14 = vpop.f32.mrf.mxu0  ;;  %v1575_v15 = vpop.f32.mrf.mxu1 }
 0x112   : > { %v1407_v16 = vpack.c.bf16 %v962_v10, %v961_v6  ;;  %v1447_v17 = vpack.c.bf16 %v978_v11, %v977_v7  ;;  %v931_v18 = vadd.f32 %v1526_v12, %v1853_v53  ;;  %v947_v19 = vadd.f32 %v1574_v13, %v1853_v53 }
 0x113   : > { %v1528_v20 = vpop.f32.mrf.mxu0  ;;  %v1576_v21 = vpop.f32.mrf.mxu1 }
 0x114   : > { %1471 = vst [vmem:[%s1863_s8 + $0x18] sm:$0xff] %v1407_v16   ;;  %1479 = vst [vmem:[%s1863_s8 + $0x58] sm:$0xff] %v1447_v17   ;;  %v1529_v22 = vadd.f32 %v1528_v20, %v1527_v14  ;;  %v1577_v23 = vadd.f32 %v1576_v21, %v1575_v15  ;;  %v963_v28 = vmax.f32 %v931_v18, 0.0  ;;  %v979_v29 = vmax.f32 %v947_v19, 0.0 }
 0x115   : > { %v1530_v24 = vpop.f32.mrf.mxu0  ;;  %v1578_v25 = vpop.f32.mrf.mxu1 }
 0x116   : > { %v932_v26 = vadd.f32 %v1529_v22, %v1853_v53  ;;  %v948_v27 = vadd.f32 %v1577_v23, %v1853_v53 }
 0x117   : > { %v1531_v30 = vpop.f32.mrf.mxu0  ;;  %v1579_v31 = vpop.f32.mrf.mxu1 }
 0x118   : > { %v964_v32 = vmax.f32 %v932_v26, 0.0  ;;  %v980_v33 = vmax.f32 %v948_v27, 0.0  ;;  %v1532_v34 = vadd.f32 %v1531_v30, %v1530_v24  ;;  %v1580_v35 = vadd.f32 %v1579_v31, %v1578_v25 }
 0x119   : > { %v1533_v36 = vpop.f32.mrf.mxu0  ;;  %v1581_v37 = vpop.f32.mrf.mxu1 }
 0x11a   : > { %v1412_v38 = vpack.c.bf16 %v964_v32, %v963_v28  ;;  %v1452_v39 = vpack.c.bf16 %v980_v33, %v979_v29  ;;  %v933_v40 = vadd.f32 %v1532_v34, %v1853_v53  ;;  %v949_v41 = vadd.f32 %v1580_v35, %v1853_v53 }
 0x11b   : > { %v1534_v42 = vpop.f32.mrf.mxu0  ;;  %v1582_v43 = vpop.f32.mrf.mxu1 }
 0x11c   : > { %1472 = vst [vmem:[%s1863_s8 + $0x20] sm:$0xff] %v1412_v38   ;;  %1480 = vst [vmem:[%s1863_s8 + $0x60] sm:$0xff] %v1452_v39   ;;  %v1535_v44 = vadd.f32 %v1534_v42, %v1533_v36  ;;  %v1583_v45 = vadd.f32 %v1582_v43, %v1581_v37  ;;  %v965_v50 = vmax.f32 %v933_v40, 0.0  ;;  %v981_v51 = vmax.f32 %v949_v41, 0.0 }
 0x11d   : > { %v1536_v46 = vpop.f32.mrf.mxu0  ;;  %v1584_v47 = vpop.f32.mrf.mxu1 }
 0x11e   : > { %v934_v48 = vadd.f32 %v1535_v44, %v1853_v53  ;;  %v950_v49 = vadd.f32 %v1583_v45, %v1853_v53 }
 0x11f   : > { %v1537_v52 = vpop.f32.mrf.mxu0  ;;  %v1585_v54 = vpop.f32.mrf.mxu1 }
 0x120   : > { %v966_v55 = vmax.f32 %v934_v48, 0.0  ;;  %v982_v56 = vmax.f32 %v950_v49, 0.0  ;;  %v1538_v57 = vadd.f32 %v1537_v52, %v1536_v46  ;;  %v1586_v58 = vadd.f32 %v1585_v54, %v1584_v47 }
 0x121   : > { %v1539_v59 = vpop.f32.mrf.mxu0  ;;  %v1587_v60 = vpop.f32.mrf.mxu1 }
 0x122   : > { %v1417_v61 = vpack.c.bf16 %v966_v55, %v965_v50  ;;  %v1457_v62 = vpack.c.bf16 %v982_v56, %v981_v51  ;;  %v935_v63 = vadd.f32 %v1538_v57, %v1853_v53  ;;  %v951_v0 = vadd.f32 %v1586_v58, %v1853_v53 }
 0x123   : > { %v1540_v1 = vpop.f32.mrf.mxu0  ;;  %v1588_v2 = vpop.f32.mrf.mxu1 }
 0x124   : > { %1473 = vst [vmem:[%s1863_s8 + $0x28] sm:$0xff] %v1417_v61   ;;  %1481 = vst [vmem:[%s1863_s8 + $0x68] sm:$0xff] %v1457_v62   ;;  %v1541_v3 = vadd.f32 %v1540_v1, %v1539_v59  ;;  %v1589_v4 = vadd.f32 %v1588_v2, %v1587_v60  ;;  %v967_v9 = vmax.f32 %v935_v63, 0.0  ;;  %v983_v10 = vmax.f32 %v951_v0, 0.0 }
 0x125   : > { %v1542_v5 = vpop.f32.mrf.mxu0  ;;  %v1590_v6 = vpop.f32.mrf.mxu1 }
 0x126   : > { %v936_v7 = vadd.f32 %v1541_v3, %v1853_v53  ;;  %v952_v8 = vadd.f32 %v1589_v4, %v1853_v53 }
 0x127   : > { %v1543_v11 = vpop.f32.mrf.mxu0  ;;  %v1591_v12 = vpop.f32.mrf.mxu1 }
 0x128   : > { %v968_v13 = vmax.f32 %v936_v7, 0.0  ;;  %v984_v14 = vmax.f32 %v952_v8, 0.0  ;;  %v1544_v15 = vadd.f32 %v1543_v11, %v1542_v5  ;;  %v1592_v16 = vadd.f32 %v1591_v12, %v1590_v6 }
 0x129   : > { %v1545_v17 = vpop.f32.mrf.mxu0  ;;  %v1593_v18 = vpop.f32.mrf.mxu1 }
 0x12a   : > { %v1422_v19 = vpack.c.bf16 %v968_v13, %v967_v9  ;;  %v1462_v20 = vpack.c.bf16 %v984_v14, %v983_v10  ;;  %v937_v23 = vadd.f32 %v1544_v15, %v1853_v53  ;;  %v953_v24 = vadd.f32 %v1592_v16, %v1853_v53 }
 0x12b   : > { %v1546_v21 = vpop.f32.mrf.mxu0  ;;  %v1594_v22 = vpop.f32.mrf.mxu1 }
 0x12c   : > { %1474 = vst [vmem:[%s1863_s8 + $0x30] sm:$0xff] %v1422_v19   ;;  %1482 = vst [vmem:[%s1863_s8 + $0x70] sm:$0xff] %v1462_v20   ;;  %v1547_v25 = vadd.f32 %v1546_v21, %v1545_v17  ;;  %v1595_v26 = vadd.f32 %v1594_v22, %v1593_v18  ;;  %v969_v29 = vmax.f32 %v937_v23, 0.0  ;;  %v985_v30 = vmax.f32 %v953_v24, 0.0 }
 0x12e   : > { %v938_v27 = vadd.f32 %v1547_v25, %v1853_v53  ;;  %v954_v28 = vadd.f32 %v1595_v26, %v1853_v53 }
 0x130   : > { %v970_v31 = vmax.f32 %v938_v27, 0.0  ;;  %v986_v32 = vmax.f32 %v954_v28, 0.0 }
 0x132   : > { %v1427_v33 = vpack.c.bf16 %v970_v31, %v969_v29  ;;  %v1467_v34 = vpack.c.bf16 %v986_v32, %v985_v30 }
 0x134   : > { %1475 = vst [vmem:[%s1863_s8 + $0x38] sm:$0xff] %v1427_v33   ;;  %1483 = vst [vmem:[%s1863_s8 + $0x78] sm:$0xff] %v1467_v34  }
 0x135 PF: > { %s13_s14 = sadd.s32 1, %s1722_s14   ;;  %s1922_s12 = smov %s1718_s13 }
 0x136   : > { %p10_p5 = scmp.ge.s32.totalorder %s13_s14, 4   ;;  %s1923_s13 = smov %s1925_s15 }
 0x138   :  { %12 = sbr.rel (!%p10_p5) target bundleno = 2 (0x2), region = 76 }

// kernel: forward.23
= control target key start
LH: loop header
LB: loop body
LE: loop exit
PB: predicated region body
PF: predicated region fallthrough
CT: control target
= control target key end

     0   :  { %vm304_vm0 = vcmask 519168   ;;  %s871_s0 = inlined_call_operand.vmem [shape: bf16[128,64], index: 0, kind: input, shape index: {}]   ;;  %s872_s1 = inlined_call_operand.vmem [shape: bf16[128,64], index: 1, kind: input, shape index: {}]   ;;  %s873_s2 = inlined_call_operand.vmem [shape: bf16[128,64], index: 2, kind: input, shape index: {}]   ;;  %s874_s3 = inlined_call_operand.vmem [shape: bf16[128,64], index: 3, kind: input, shape index: {}]   ;;  %s875_s4 = inlined_call_operand.vmem [shape: bf16[128,64], index: 4, kind: input, shape index: {}]   ;;  %s876_s5 = inlined_call_operand.vmem [shape: bf16[128,64], index: 5, kind: input, shape index: {}]   ;;  %s877_s6 = inlined_call_operand.vmem [shape: bf16[128,64], index: 6, kind: input, shape index: {}]   ;;  %s878_s7 = inlined_call_operand.vmem [shape: bf16[128,64], index: 7, kind: input, shape index: {}]   ;;  %s879_s8 = inlined_call_operand.vmem [shape: bf16[128,64], index: 8, kind: input, shape index: {}]   ;;  %s880_s9 = inlined_call_operand.vmem [shape: bf16[128,64], index: 9, kind: output, shape index: {}]  }
   0x1   :  { %v32_v0 = vld [vmem:[%s871_s0] sm:$0xf]  ;;  %v33_v6 = vld [vmem:[%s871_s0 + $0x4] sm:$0xf]  ;;  %v34_v15 = vld [vmem:[%s871_s0 + $0x8] sm:$0xf] }
   0x2   :  { %v48_v1 = vld [vmem:[%s872_s1] sm:$0xf]  ;;  %v49_v7 = vld [vmem:[%s872_s1 + $0x4] sm:$0xf]  ;;  %v50_v16 = vld [vmem:[%s872_s1 + $0x8] sm:$0xf] }
   0x3   :  { %v80_v2 = vld [vmem:[%s873_s2] sm:$0xf]  ;;  %v64_v3 = vmax.bf16 %v48_v1, %v32_v0  ;;  %v81_v8 = vld [vmem:[%s873_s2 + $0x4] sm:$0xf]  ;;  %v65_v10 = vmax.bf16 %v49_v7, %v33_v6  ;;  %v82_v17 = vld [vmem:[%s873_s2 + $0x8] sm:$0xf]  ;;  %v66_v20 = vmax.bf16 %v50_v16, %v34_v15 }
   0x4   :  { %v112_v4 = vld [vmem:[%s874_s3] sm:$0xf]  ;;  %v113_v13 = vld [vmem:[%s874_s3 + $0x4] sm:$0xf]  ;;  %v114_v24 = vld [vmem:[%s874_s3 + $0x8] sm:$0xf] }
   0x5   :  { %v96_v5 = vmax.bf16 %v80_v2, %v64_v3  ;;  %v144_v9 = vld [vmem:[%s875_s4] sm:$0xf]  ;;  %v97_v14 = vmax.bf16 %v81_v8, %v65_v10  ;;  %v145_v19 = vld [vmem:[%s875_s4 + $0x4] sm:$0xf]  ;;  %v98_v26 = vmax.bf16 %v82_v17, %v66_v20  ;;  %v35_v27 = vld [vmem:[%s871_s0 + $0xc] sm:$0xf] }
   0x6   :  { %v176_v12 = vld [vmem:[%s876_s5] sm:$0xf]  ;;  %v177_v23 = vld [vmem:[%s876_s5 + $0x4] sm:$0xf]  ;;  %v51_v28 = vld [vmem:[%s872_s1 + $0xc] sm:$0xf] }
   0x7   :  { %v128_v11 = vmax.bf16 %v112_v4, %v96_v5  ;;  %v208_v21 = vld [vmem:[%s877_s6] sm:$0xf]  ;;  %v129_v22 = vmax.bf16 %v113_v13, %v97_v14  ;;  %v83_v29 = vld [vmem:[%s873_s2 + $0xc] sm:$0xf]  ;;  %v146_v33 = vld [vmem:[%s875_s4 + $0x8] sm:$0xf]  ;;  %v67_v34 = vmax.bf16 %v51_v28, %v35_v27  ;;  %v130_v37 = vmax.bf16 %v114_v24, %v98_v26 }
   0x8   :  { %v240_v30 = vld [vmem:[%s878_s7] sm:$0xf]  ;;  %v209_v36 = vld [vmem:[%s877_s6 + $0x4] sm:$0xf]  ;;  %v178_v38 = vld [vmem:[%s876_s5 + $0x8] sm:$0xf] }
   0x9   :  { %v160_v18 = vmax.bf16 %v144_v9, %v128_v11  ;;  %v272_v31 = vld [vmem:[%s879_s8] sm:$0xf]  ;;  %v161_v32 = vmax.bf16 %v145_v19, %v129_v22  ;;  %v115_v39 = vld [vmem:[%s874_s3 + $0xc] sm:$0xf]  ;;  %v99_v41 = vmax.bf16 %v83_v29, %v67_v34  ;;  %v36_v42 = vld [vmem:[%s871_s0 + $0x10] sm:$0xf]  ;;  %v162_v48 = vmax.bf16 %v146_v33, %v130_v37 }
   0xa   :  { %v52_v43 = vld [vmem:[%s872_s1 + $0x10] sm:$0xf]  ;;  %v241_v46 = vld [vmem:[%s878_s7 + $0x4] sm:$0xf]  ;;  %v147_v49 = vld [vmem:[%s875_s4 + $0xc] sm:$0xf] }
   0xb   :  { %v192_v25 = vmax.bf16 %v176_v12, %v160_v18  ;;  %v193_v40 = vmax.bf16 %v177_v23, %v161_v32  ;;  %v84_v44 = vld [vmem:[%s873_s2 + $0x10] sm:$0xf]  ;;  %v273_v47 = vld [vmem:[%s879_s8 + $0x4] sm:$0xf]  ;;  %v68_v50 = vmax.bf16 %v52_v43, %v36_v42  ;;  %v210_v52 = vld [vmem:[%s877_s6 + $0x8] sm:$0xf]  ;;  %v131_v53 = vmax.bf16 %v115_v39, %v99_v41 }
   0xc   :  { %v179_v54 = vld [vmem:[%s876_s5 + $0xc] sm:$0xf]  ;;  %v116_v55 = vld [vmem:[%s874_s3 + $0x10] sm:$0xf]  ;;  %v194_v57 = vmax.bf16 %v178_v38, %v162_v48  ;;  %v37_v59 = vld [vmem:[%s871_s0 + $0x14] sm:$0xf] }
   0xd   :  { %v224_v35 = vmax.bf16 %v208_v21, %v192_v25  ;;  %v225_v51 = vmax.bf16 %v209_v36, %v193_v40  ;;  %v100_v58 = vmax.bf16 %v84_v44, %v68_v50  ;;  %v53_v60 = vld [vmem:[%s872_s1 + $0x14] sm:$0xf]  ;;  %v242_v63 = vld [vmem:[%s878_s7 + $0x8] sm:$0xf]  ;;  %v163_v1 = vmax.bf16 %v147_v49, %v131_v53  ;;  %v148_v2 = vld [vmem:[%s875_s4 + $0x10] sm:$0xf] }
   0xe   :  { %v85_v61 = vld [vmem:[%s873_s2 + $0x14] sm:$0xf]  ;;  %v274_v0 = vld [vmem:[%s879_s8 + $0x8] sm:$0xf]  ;;  %v69_v3 = vmax.bf16 %v53_v60, %v37_v59  ;;  %v226_v4 = vmax.bf16 %v210_v52, %v194_v57  ;;  %v211_v5 = vld [vmem:[%s877_s6 + $0xc] sm:$0xf] }
   0xf   :  { %v256_v45 = vmax.bf16 %v240_v30, %v224_v35  ;;  %v257_v62 = vmax.bf16 %v241_v46, %v225_v51  ;;  %v132_v6 = vmax.bf16 %v116_v55, %v100_v58  ;;  %v180_v7 = vld [vmem:[%s876_s5 + $0x10] sm:$0xf]  ;;  %v117_v8 = vld [vmem:[%s874_s3 + $0x14] sm:$0xf]  ;;  %v195_v10 = vmax.bf16 %v179_v54, %v163_v1  ;;  %v38_v12 = vld [vmem:[%s871_s0 + $0x18] sm:$0xf] }
  0x10   :  { %v101_v11 = vmax.bf16 %v85_v61, %v69_v3  ;;  %v54_v13 = vld [vmem:[%s872_s1 + $0x18] sm:$0xf]  ;;  %v258_v15 = vmax.bf16 %v242_v63, %v226_v4  ;;  %v243_v16 = vld [vmem:[%s878_s7 + $0xc] sm:$0xf]  ;;  %v149_v19 = vld [vmem:[%s875_s4 + $0x14] sm:$0xf] }
  0x11   :  { %v288_v56 = vmax.bf16 %v272_v31, %v256_v45  ;;  %v289_v9 = vmax.bf16 %v273_v47, %v257_v62  ;;  %v86_v14 = vld [vmem:[%s873_s2 + $0x18] sm:$0xf]  ;;  %v275_v17 = vld [vmem:[%s879_s8 + $0xc] sm:$0xf]  ;;  %v164_v18 = vmax.bf16 %v148_v2, %v132_v6  ;;  %v70_v20 = vmax.bf16 %v54_v13, %v38_v12  ;;  %v212_v22 = vld [vmem:[%s877_s6 + $0x10] sm:$0xf] }
  0x12   :  { %v227_v21 = vmax.bf16 %v211_v5, %v195_v10  ;;  %v133_v23 = vmax.bf16 %v117_v8, %v101_v11  ;;  %v181_v24 = vld [vmem:[%s876_s5 + $0x14] sm:$0xf]  ;;  %v118_v25 = vld [vmem:[%s874_s3 + $0x18] sm:$0xf]  ;;  %v290_v26 = vmax.bf16 %v274_v0, %v258_v15  ;;  %v39_v29 = vld [vmem:[%s871_s0 + $0x1c] sm:$0xf] }
  0x13   :  { %305 = vst.msk [vmem:[%s880_s9] sm:$0xf] %vm304_vm0, %v288_v56  ;;  %306 = vst.msk [vmem:[%s880_s9 + $0x4] sm:$0xf] %vm304_vm0, %v289_v9  ;;  %v196_v27 = vmax.bf16 %v180_v7, %v164_v18  ;;  %v102_v28 = vmax.bf16 %v86_v14, %v70_v20  ;;  %v55_v30 = vld [vmem:[%s872_s1 + $0x1c] sm:$0xf] }
  0x14   :  { %v87_v31 = vld [vmem:[%s873_s2 + $0x1c] sm:$0xf]  ;;  %v259_v32 = vmax.bf16 %v243_v16, %v227_v21  ;;  %v244_v33 = vld [vmem:[%s878_s7 + $0x10] sm:$0xf]  ;;  %v165_v35 = vmax.bf16 %v149_v19, %v133_v23  ;;  %v150_v36 = vld [vmem:[%s875_s4 + $0x18] sm:$0xf]  ;;  %v71_v37 = vmax.bf16 %v55_v30, %v39_v29 }
  0x15   :  { %v276_v34 = vld [vmem:[%s879_s8 + $0x10] sm:$0xf]  ;;  %307 = vst.msk [vmem:[%s880_s9 + $0x8] sm:$0xf] %vm304_vm0, %v290_v26  ;;  %v228_v38 = vmax.bf16 %v212_v22, %v196_v27  ;;  %v213_v39 = vld [vmem:[%s877_s6 + $0x14] sm:$0xf]  ;;  %v134_v40 = vmax.bf16 %v118_v25, %v102_v28 }
  0x16   :  { %v182_v41 = vld [vmem:[%s876_s5 + $0x18] sm:$0xf]  ;;  %v119_v42 = vld [vmem:[%s874_s3 + $0x1c] sm:$0xf]  ;;  %v291_v43 = vmax.bf16 %v275_v17, %v259_v32  ;;  %v197_v44 = vmax.bf16 %v181_v24, %v165_v35  ;;  %v103_v45 = vmax.bf16 %v87_v31, %v71_v37  ;;  %v40_v46 = vld [vmem:[%s871_s0 + $0x20] sm:$0xf] }
  0x17   :  { %v56_v47 = vld [vmem:[%s872_s1 + $0x20] sm:$0xf]  ;;  %v260_v49 = vmax.bf16 %v244_v33, %v228_v38  ;;  %v245_v50 = vld [vmem:[%s878_s7 + $0x14] sm:$0xf]  ;;  %v166_v52 = vmax.bf16 %v150_v36, %v134_v40  ;;  %v151_v53 = vld [vmem:[%s875_s4 + $0x1c] sm:$0xf] }
  0x18   :  { %v88_v48 = vld [vmem:[%s873_s2 + $0x20] sm:$0xf]  ;;  %v277_v51 = vld [vmem:[%s879_s8 + $0x14] sm:$0xf]  ;;  %v72_v54 = vmax.bf16 %v56_v47, %v40_v46  ;;  %308 = vst.msk [vmem:[%s880_s9 + $0xc] sm:$0xf] %vm304_vm0, %v291_v43  ;;  %v229_v55 = vmax.bf16 %v213_v39, %v197_v44  ;;  %v135_v57 = vmax.bf16 %v119_v42, %v103_v45 }
  0x19   :  { %v214_v56 = vld [vmem:[%s877_s6 + $0x18] sm:$0xf]  ;;  %v183_v58 = vld [vmem:[%s876_s5 + $0x1c] sm:$0xf]  ;;  %v120_v59 = vld [vmem:[%s874_s3 + $0x20] sm:$0xf]  ;;  %v292_v60 = vmax.bf16 %v276_v34, %v260_v49  ;;  %v198_v61 = vmax.bf16 %v182_v41, %v166_v52 }
  0x1a   :  { %v104_v62 = vmax.bf16 %v88_v48, %v72_v54  ;;  %v41_v63 = vld [vmem:[%s871_s0 + $0x24] sm:$0xf]  ;;  %v261_v2 = vmax.bf16 %v245_v50, %v229_v55  ;;  %v246_v3 = vld [vmem:[%s878_s7 + $0x18] sm:$0xf]  ;;  %v167_v5 = vmax.bf16 %v151_v53, %v135_v57  ;;  %v152_v6 = vld [vmem:[%s875_s4 + $0x20] sm:$0xf] }
  0x1b   :  { %v57_v0 = vld [vmem:[%s872_s1 + $0x24] sm:$0xf]  ;;  %v278_v4 = vld [vmem:[%s879_s8 + $0x18] sm:$0xf]  ;;  %309 = vst.msk [vmem:[%s880_s9 + $0x10] sm:$0xf] %vm304_vm0, %v292_v60  ;;  %v230_v8 = vmax.bf16 %v214_v56, %v198_v61 }
  0x1c   :  { %v89_v1 = vld [vmem:[%s873_s2 + $0x24] sm:$0xf]  ;;  %v73_v7 = vmax.bf16 %v57_v0, %v41_v63  ;;  %v215_v9 = vld [vmem:[%s877_s6 + $0x1c] sm:$0xf]  ;;  %v136_v10 = vmax.bf16 %v120_v59, %v104_v62  ;;  %v184_v11 = vld [vmem:[%s876_s5 + $0x20] sm:$0xf]  ;;  %v293_v13 = vmax.bf16 %v277_v51, %v261_v2  ;;  %v199_v14 = vmax.bf16 %v183_v58, %v167_v5 }
  0x1d   :  { %v121_v12 = vld [vmem:[%s874_s3 + $0x24] sm:$0xf]  ;;  %v42_v16 = vld [vmem:[%s871_s0 + $0x28] sm:$0xf]  ;;  %v262_v19 = vmax.bf16 %v246_v3, %v230_v8  ;;  %v247_v20 = vld [vmem:[%s878_s7 + $0x1c] sm:$0xf] }
  0x1e   :  { %v105_v15 = vmax.bf16 %v89_v1, %v73_v7  ;;  %v58_v17 = vld [vmem:[%s872_s1 + $0x28] sm:$0xf]  ;;  %v279_v21 = vld [vmem:[%s879_s8 + $0x1c] sm:$0xf]  ;;  %v168_v22 = vmax.bf16 %v152_v6, %v136_v10  ;;  %v153_v23 = vld [vmem:[%s875_s4 + $0x24] sm:$0xf]  ;;  %v231_v25 = vmax.bf16 %v215_v9, %v199_v14 }
  0x1f   :  { %v90_v18 = vld [vmem:[%s873_s2 + $0x28] sm:$0xf]  ;;  %v74_v24 = vmax.bf16 %v58_v17, %v42_v16  ;;  %310 = vst.msk [vmem:[%s880_s9 + $0x14] sm:$0xf] %vm304_vm0, %v293_v13  ;;  %v216_v26 = vld [vmem:[%s877_s6 + $0x20] sm:$0xf]  ;;  %v294_v30 = vmax.bf16 %v278_v4, %v262_v19 }
  0x20   :  { %v137_v27 = vmax.bf16 %v121_v12, %v105_v15  ;;  %v185_v28 = vld [vmem:[%s876_s5 + $0x24] sm:$0xf]  ;;  %v122_v29 = vld [vmem:[%s874_s3 + $0x28] sm:$0xf]  ;;  %v200_v31 = vmax.bf16 %v184_v11, %v168_v22  ;;  %v43_v33 = vld [vmem:[%s871_s0 + $0x2c] sm:$0xf]  ;;  %v263_v36 = vmax.bf16 %v247_v20, %v231_v25 }
  0x21   :  { %v106_v32 = vmax.bf16 %v90_v18, %v74_v24  ;;  %v59_v34 = vld [vmem:[%s872_s1 + $0x2c] sm:$0xf]  ;;  %v248_v37 = vld [vmem:[%s878_s7 + $0x20] sm:$0xf]  ;;  %v154_v40 = vld [vmem:[%s875_s4 + $0x28] sm:$0xf] }
  0x22   :  { %v91_v35 = vld [vmem:[%s873_s2 + $0x2c] sm:$0xf]  ;;  %v280_v38 = vld [vmem:[%s879_s8 + $0x20] sm:$0xf]  ;;  %v169_v39 = vmax.bf16 %v153_v23, %v137_v27  ;;  %v75_v41 = vmax.bf16 %v59_v34, %v43_v33  ;;  %311 = vst.msk [vmem:[%s880_s9 + $0x18] sm:$0xf] %vm304_vm0, %v294_v30  ;;  %v232_v42 = vmax.bf16 %v216_v26, %v200_v31  ;;  %v295_v47 = vmax.bf16 %v279_v21, %v263_v36 }
  0x23   :  { %v217_v43 = vld [vmem:[%s877_s6 + $0x24] sm:$0xf]  ;;  %v138_v44 = vmax.bf16 %v122_v29, %v106_v32  ;;  %v186_v45 = vld [vmem:[%s876_s5 + $0x28] sm:$0xf]  ;;  %v123_v46 = vld [vmem:[%s874_s3 + $0x2c] sm:$0xf] }
  0x24   :  { %v201_v48 = vmax.bf16 %v185_v28, %v169_v39  ;;  %v107_v49 = vmax.bf16 %v91_v35, %v75_v41  ;;  %v44_v50 = vld [vmem:[%s871_s0 + $0x30] sm:$0xf]  ;;  %v264_v53 = vmax.bf16 %v248_v37, %v232_v42  ;;  %v249_v54 = vld [vmem:[%s878_s7 + $0x24] sm:$0xf]  ;;  %v155_v57 = vld [vmem:[%s875_s4 + $0x2c] sm:$0xf] }
  0x25   :  { %v60_v51 = vld [vmem:[%s872_s1 + $0x30] sm:$0xf]  ;;  %v281_v55 = vld [vmem:[%s879_s8 + $0x24] sm:$0xf]  ;;  %v170_v56 = vmax.bf16 %v154_v40, %v138_v44  ;;  %312 = vst.msk [vmem:[%s880_s9 + $0x1c] sm:$0xf] %vm304_vm0, %v295_v47 }
  0x26   :  { %v92_v52 = vld [vmem:[%s873_s2 + $0x30] sm:$0xf]  ;;  %v76_v58 = vmax.bf16 %v60_v51, %v44_v50  ;;  %v233_v59 = vmax.bf16 %v217_v43, %v201_v48  ;;  %v218_v60 = vld [vmem:[%s877_s6 + $0x28] sm:$0xf]  ;;  %v139_v61 = vmax.bf16 %v123_v46, %v107_v49  ;;  %v187_v62 = vld [vmem:[%s876_s5 + $0x2c] sm:$0xf]  ;;  %v296_v0 = vmax.bf16 %v280_v38, %v264_v53 }
  0x27   :  { %v124_v63 = vld [vmem:[%s874_s3 + $0x30] sm:$0xf]  ;;  %v202_v1 = vmax.bf16 %v186_v45, %v170_v56  ;;  %v45_v3 = vld [vmem:[%s871_s0 + $0x34] sm:$0xf]  ;;  %v250_v7 = vld [vmem:[%s878_s7 + $0x28] sm:$0xf] }
  0x28   :  { %v108_v2 = vmax.bf16 %v92_v52, %v76_v58  ;;  %v61_v4 = vld [vmem:[%s872_s1 + $0x34] sm:$0xf]  ;;  %v265_v6 = vmax.bf16 %v249_v54, %v233_v59  ;;  %v282_v8 = vld [vmem:[%s879_s8 + $0x28] sm:$0xf]  ;;  %v171_v9 = vmax.bf16 %v155_v57, %v139_v61  ;;  %v156_v10 = vld [vmem:[%s875_s4 + $0x30] sm:$0xf] }
  0x29   :  { %v93_v5 = vld [vmem:[%s873_s2 + $0x34] sm:$0xf]  ;;  %v77_v11 = vmax.bf16 %v61_v4, %v45_v3  ;;  %313 = vst.msk [vmem:[%s880_s9 + $0x20] sm:$0xf] %vm304_vm0, %v296_v0  ;;  %v234_v12 = vmax.bf16 %v218_v60, %v202_v1  ;;  %v219_v13 = vld [vmem:[%s877_s6 + $0x2c] sm:$0xf] }
  0x2a   :  { %v140_v14 = vmax.bf16 %v124_v63, %v108_v2  ;;  %v188_v15 = vld [vmem:[%s876_s5 + $0x30] sm:$0xf]  ;;  %v125_v16 = vld [vmem:[%s874_s3 + $0x34] sm:$0xf]  ;;  %v297_v17 = vmax.bf16 %v281_v55, %v265_v6  ;;  %v203_v18 = vmax.bf16 %v187_v62, %v171_v9  ;;  %v46_v20 = vld [vmem:[%s871_s0 + $0x38] sm:$0xf] }
  0x2b   :  { %v109_v19 = vmax.bf16 %v93_v5, %v77_v11  ;;  %v62_v21 = vld [vmem:[%s872_s1 + $0x38] sm:$0xf]  ;;  %v266_v23 = vmax.bf16 %v250_v7, %v234_v12  ;;  %v251_v24 = vld [vmem:[%s878_s7 + $0x2c] sm:$0xf]  ;;  %v157_v27 = vld [vmem:[%s875_s4 + $0x34] sm:$0xf] }
  0x2c   :  { %v94_v22 = vld [vmem:[%s873_s2 + $0x38] sm:$0xf]  ;;  %v283_v25 = vld [vmem:[%s879_s8 + $0x2c] sm:$0xf]  ;;  %v172_v26 = vmax.bf16 %v156_v10, %v140_v14  ;;  %v78_v28 = vmax.bf16 %v62_v21, %v46_v20  ;;  %314 = vst.msk [vmem:[%s880_s9 + $0x24] sm:$0xf] %vm304_vm0, %v297_v17  ;;  %v235_v29 = vmax.bf16 %v219_v13, %v203_v18 }
  0x2d   :  { %v220_v30 = vld [vmem:[%s877_s6 + $0x30] sm:$0xf]  ;;  %v141_v31 = vmax.bf16 %v125_v16, %v109_v19  ;;  %v189_v32 = vld [vmem:[%s876_s5 + $0x34] sm:$0xf]  ;;  %v126_v33 = vld [vmem:[%s874_s3 + $0x38] sm:$0xf]  ;;  %v298_v34 = vmax.bf16 %v282_v8, %v266_v23 }
  0x2e   :  { %v204_v35 = vmax.bf16 %v188_v15, %v172_v26  ;;  %v110_v36 = vmax.bf16 %v94_v22, %v78_v28  ;;  %v47_v37 = vld [vmem:[%s871_s0 + $0x3c] sm:$0xf]  ;;  %v267_v40 = vmax.bf16 %v251_v24, %v235_v29  ;;  %v252_v41 = vld [vmem:[%s878_s7 + $0x30] sm:$0xf]  ;;  %v158_v43 = vld [vmem:[%s875_s4 + $0x38] sm:$0xf] }
  0x2f   :  { %v63_v38 = vld [vmem:[%s872_s1 + $0x3c] sm:$0xf]  ;;  %v173_v42 = vmax.bf16 %v157_v27, %v141_v31  ;;  %315 = vst.msk [vmem:[%s880_s9 + $0x28] sm:$0xf] %vm304_vm0, %v298_v34  ;;  %v221_v46 = vld [vmem:[%s877_s6 + $0x34] sm:$0xf] }
  0x30   :  { %v95_v39 = vld [vmem:[%s873_s2 + $0x3c] sm:$0xf]  ;;  %v79_v44 = vmax.bf16 %v63_v38, %v47_v37  ;;  %v236_v45 = vmax.bf16 %v220_v30, %v204_v35  ;;  %v142_v47 = vmax.bf16 %v126_v33, %v110_v36  ;;  %v299_v49 = vmax.bf16 %v283_v25, %v267_v40  ;;  %v284_v50 = vld [vmem:[%s879_s8 + $0x30] sm:$0xf]  ;;  %v190_v52 = vld [vmem:[%s876_s5 + $0x38] sm:$0xf] }
  0x31   :  { %v127_v48 = vld [vmem:[%s874_s3 + $0x3c] sm:$0xf]  ;;  %v205_v51 = vmax.bf16 %v189_v32, %v173_v42  ;;  %v253_v55 = vld [vmem:[%s878_s7 + $0x34] sm:$0xf]  ;;  %v222_v59 = vld [vmem:[%s877_s6 + $0x38] sm:$0xf] }
  0x32   :  { %v111_v53 = vmax.bf16 %v95_v39, %v79_v44  ;;  %v268_v54 = vmax.bf16 %v252_v41, %v236_v45  ;;  %v174_v56 = vmax.bf16 %v158_v43, %v142_v47  ;;  %v159_v57 = vld [vmem:[%s875_s4 + $0x3c] sm:$0xf]  ;;  %316 = vst.msk [vmem:[%s880_s9 + $0x2c] sm:$0xf] %vm304_vm0, %v299_v49  ;;  %v285_v62 = vld [vmem:[%s879_s8 + $0x34] sm:$0xf] }
  0x33   :  { %v237_v58 = vmax.bf16 %v221_v46, %v205_v51  ;;  %v191_v0 = vld [vmem:[%s876_s5 + $0x3c] sm:$0xf]  ;;  %v254_v2 = vld [vmem:[%s878_s7 + $0x38] sm:$0xf] }
  0x34   :  { %v143_v60 = vmax.bf16 %v127_v48, %v111_v53  ;;  %v300_v61 = vmax.bf16 %v284_v50, %v268_v54  ;;  %v206_v63 = vmax.bf16 %v190_v52, %v174_v56  ;;  %v223_v5 = vld [vmem:[%s877_s6 + $0x3c] sm:$0xf]  ;;  %v286_v7 = vld [vmem:[%s879_s8 + $0x38] sm:$0xf] }
  0x35   :  { %v269_v1 = vmax.bf16 %v253_v55, %v237_v58  ;;  %v255_v10 = vld [vmem:[%s878_s7 + $0x3c] sm:$0xf] }
  0x36   :  { %v175_v3 = vmax.bf16 %v159_v57, %v143_v60  ;;  %317 = vst.msk [vmem:[%s880_s9 + $0x30] sm:$0xf] %vm304_vm0, %v300_v61  ;;  %v238_v4 = vmax.bf16 %v222_v59, %v206_v63  ;;  %v287_v13 = vld [vmem:[%s879_s8 + $0x3c] sm:$0xf] }
  0x37   :  { %v301_v6 = vmax.bf16 %v285_v62, %v269_v1 }
  0x38   :  { %v207_v8 = vmax.bf16 %v191_v0, %v175_v3  ;;  %v270_v9 = vmax.bf16 %v254_v2, %v238_v4 }
  0x39   :  { %318 = vst.msk [vmem:[%s880_s9 + $0x34] sm:$0xf] %vm304_vm0, %v301_v6 }
  0x3a   :  { %v239_v11 = vmax.bf16 %v223_v5, %v207_v8  ;;  %v302_v12 = vmax.bf16 %v286_v7, %v270_v9 }
  0x3c   :  { %v271_v14 = vmax.bf16 %v255_v10, %v239_v11  ;;  %319 = vst.msk [vmem:[%s880_s9 + $0x38] sm:$0xf] %vm304_vm0, %v302_v12 }
  0x3e   :  { %v303_v15 = vmax.bf16 %v287_v13, %v271_v14 }
  0x40   :  { %320 = vst.msk [vmem:[%s880_s9 + $0x3c] sm:$0xf] %vm304_vm0, %v303_v15 }

// kernel: forward.24
= control target key start
LH: loop header
LB: loop body
LE: loop exit
PB: predicated region body
PF: predicated region fallthrough
CT: control target
= control target key end

     0   :  { %s1192_s12 = smov 0   ;;  %s1194_s13 = smov 0   ;;  %s1324_s0 = inlined_call_operand.vmem [shape: bf16[128,640], index: 0, kind: input, shape index: {}]   ;;  %s1325_s1 = inlined_call_operand.vmem [shape: bf16[640,128], index: 1, kind: input, shape index: {}]   ;;  %s1326_s2 = inlined_call_operand.vmem [shape: f32[1,128], index: 2, kind: input, shape index: {}]   ;;  %s1327_s3 = inlined_call_operand.vmem [shape: bf16[128,128], index: 3, kind: output, shape index: {}]  }
   0x1   :  { %s1196_s14 = smov 0   ;;  %s1198_s15 = smov 0  }
   0x2   :  { %s1200_s16 = smov 0  }
   0x3 LB: > { %s25_s17 = sadd.s32 1, %s1165_s15  ;;  %p48_p1 = scmp.ne.s32.totalorder %s1157_s13, %s1153_s12  ;;  %s1169_s16 = sphi %s1200_s16, %s13_s16   ;;  %s1165_s15 = sphi %s1198_s15, %s1331_s15   ;;  %s1161_s14 = sphi %s1196_s14, %s1330_s14   ;;  %s1157_s13 = sphi %s1194_s13, %s1329_s13   ;;  %s1153_s12 = sphi %s1192_s12, %s1328_s12  }
   0x4   : > { %p26_p0 = scmp.ge.s32.totalorder %s25_s17, 5  ;;  %p49_p2 = scmp.eq.s32.totalorder %s1169_s16, 0 }
   0x5   : > { %s41_s19 = sadd.s32 1, %s1157_s13  ;;  %p901_p5 = scmp.ge.s32.totalorder %s1169_s16, 5 }
   0x6   : > { %s1333_s17 = smov (%p26_p0, %s25_s17), 0  ;;  %p50_p3 = por %p49_p2, %p48_p1 }
   0x7   : > { %s37_s18 = ssub.s32 %s1165_s15, %s1333_s17  ;;  %162 = sbr.rel (%p901_p5) target bundleno = 26 (0x1a), region = 20 }
   0x8   : > { %p39_p4 = scmp.eq.s32.totalorder %s37_s18, 0 }
   0xa   : > { %s1227_s20 = scalar_select %p39_p4, %s1157_s13, %s41_s19  }
   0xc   : > { %165 = sbr.rel (!%p50_p3) target bundleno = 26 (0x1a), region = 24  ;;  %s167_s21 = sand.u32 (%p50_p3), 1, %s1157_s13  }
   0xd   : > { %s903_s22 = sshll.u32 (%p50_p3), %s1165_s15, 2  ;;  %s902_s23 = sshll.u32 (%p50_p3), %s167_s21, 6 }
   0xe   : > { %s1235_s26 = scalar_lea.vmem (%p50_p3), %s1324_s0, %s903_s22  ;;  %s169_s27 = scalar_lea.vmem (%p50_p3), [#allocation3], %s902_s23 }
   0xf   : > { %v191_v0 = vld [vmem:[%s1235_s26] sm:$0xf] (%p50_p3)  ;;  %v193_v1 = vld [vmem:[%s1235_s26 + $0x14] sm:$0xf] (%p50_p3)  ;;  %v195_v2 = vld [vmem:[%s1235_s26 + $0x28] sm:$0xf] (%p50_p3) }
  0x10   : > { %192 = vst [vmem:[%s169_s27] sm:$0xf] (%p50_p3), %v191_v0  ;;  %194 = vst [vmem:[%s169_s27 + $0x4] sm:$0xf] (%p50_p3), %v193_v1  ;;  %v197_v3 = vld [vmem:[%s1235_s26 + $0x3c] sm:$0xf] (%p50_p3) }
  0x11   : > { %v199_v4 = vld [vmem:[%s1235_s26 + $0x50] sm:$0xf]  ;;  %196 = vst [vmem:[%s169_s27 + $0x8] sm:$0xf] %v195_v2  ;;  %198 = vst [vmem:[%s169_s27 + $0xc] sm:$0xf] %v197_v3 }
  0x12   : > { %200 = vst [vmem:[%s169_s27 + $0x10] sm:$0xf] %v199_v4  ;;  %v201_v5 = vld [vmem:[%s1235_s26 + $0x64] sm:$0xf]  ;;  %v203_v6 = vld [vmem:[%s1235_s26 + $0x78] sm:$0xf] }
  0x13   : > { %v205_v7 = vld [vmem:[%s1235_s26 + $0x8c] sm:$0xf]  ;;  %202 = vst [vmem:[%s169_s27 + $0x14] sm:$0xf] %v201_v5  ;;  %204 = vst [vmem:[%s169_s27 + $0x18] sm:$0xf] %v203_v6 }
  0x14   : > { %206 = vst [vmem:[%s169_s27 + $0x1c] sm:$0xf] %v205_v7  ;;  %v207_v8 = vld [vmem:[%s1235_s26 + $0xa0] sm:$0xf]  ;;  %v209_v9 = vld [vmem:[%s1235_s26 + $0xb4] sm:$0xf] }
  0x15   : > { %v211_v10 = vld [vmem:[%s1235_s26 + $0xc8] sm:$0xf]  ;;  %208 = vst [vmem:[%s169_s27 + $0x20] sm:$0xf] %v207_v8  ;;  %210 = vst [vmem:[%s169_s27 + $0x24] sm:$0xf] %v209_v9 }
  0x16   : > { %212 = vst [vmem:[%s169_s27 + $0x28] sm:$0xf] %v211_v10  ;;  %v213_v11 = vld [vmem:[%s1235_s26 + $0xdc] sm:$0xf]  ;;  %v215_v12 = vld [vmem:[%s1235_s26 + $0xf0] sm:$0xf] }
  0x17   : > { %v217_v13 = vld [vmem:[%s1235_s26 + $0x104] sm:$0xf]  ;;  %214 = vst [vmem:[%s169_s27 + $0x2c] sm:$0xf] %v213_v11  ;;  %216 = vst [vmem:[%s169_s27 + $0x30] sm:$0xf] %v215_v12 }
  0x18   : > { %218 = vst [vmem:[%s169_s27 + $0x34] sm:$0xf] %v217_v13  ;;  %v219_v14 = vld [vmem:[%s1235_s26 + $0x118] sm:$0xf]  ;;  %v221_v15 = vld [vmem:[%s1235_s26 + $0x12c] sm:$0xf] }
  0x19   : > { %220 = vst [vmem:[%s169_s27 + $0x38] sm:$0xf] %v219_v14  ;;  %222 = vst [vmem:[%s169_s27 + $0x3c] sm:$0xf] %v221_v15 }
  0x1a PF: > { %p904_p6 = scmp.ge.s32.totalorder %s1169_s16, 1  ;;  %p289_p7 = scmp.lt.s32.totalorder %s1169_s16, 6 }
  0x1c   : > { %p290_p8 = pnand %p904_p6, %p289_p7 }
  0x1d   : > { %s296_s28 = sand.u32 (!%p290_p8), 1, %s1153_s12   ;;  %s906_s29 = sshll.u32 (!%p290_p8), %s1161_s14, 4 }
  0x1e   : > { %293 = sbr.rel (%p290_p8) target bundleno = 308 (0x134), region = 69  ;;  %s905_s30 = sshll.u32 (!%p290_p8), %s296_s28, 6 }
  0x1f   : > { %p335_p9 = scmp.lt.s32.totalorder (!%p290_p8), %s906_s29, 79  ;;  %s1262_s8 = scalar_lea.vmem (!%p290_p8), [#allocation3], %s905_s30 }
  0x20   : > { %p908_p10 = scmp.ne.s32.totalorder (!%p290_p8), %s1161_s14, 0 }
  0x23   : > { %s1335_s29 = smov (!%p335_p9, %s906_s29), 79  ;;  %359 = sbr.rel (%p908_p10) target bundleno = 49 (0x31), region = 77 }
  0x24   : > { %s907_s4 = sshll.u32 %s1335_s29, 2 }
  0x25   : > { %s1260_s7 = scalar_lea.vmem %s1325_s1, %s907_s4 }
  0x28   : > { %v1171_v16 = vmov 0.0  }
  0x29   : > { %360 = vst [vmem:[#allocation2 + $0x30] sm:$0xff] %v1171_v16  ;;  %361 = vst [vmem:[#allocation2] sm:$0xff] %v1171_v16 }
  0x2a   : > { %362 = vst [vmem:[#allocation2 + $0x58] sm:$0xff] %v1171_v16  ;;  %363 = vst [vmem:[#allocation2 + $0x18] sm:$0xff] %v1171_v16 }
  0x2b   : > { %364 = vst [vmem:[#allocation2 + $0x50] sm:$0xff] %v1171_v16  ;;  %365 = vst [vmem:[#allocation2 + $0x68] sm:$0xff] %v1171_v16 }
  0x2c   : > { %366 = vst [vmem:[#allocation2 + $0x8] sm:$0xff] %v1171_v16  ;;  %367 = vst [vmem:[#allocation2 + $0x48] sm:$0xff] %v1171_v16 }
  0x2d   : > { %368 = vst [vmem:[#allocation2 + $0x40] sm:$0xff] %v1171_v16  ;;  %369 = vst [vmem:[#allocation2 + $0x20] sm:$0xff] %v1171_v16 }
  0x2e   : > { %370 = vst [vmem:[#allocation2 + $0x10] sm:$0xff] %v1171_v16  ;;  %371 = vst [vmem:[#allocation2 + $0x38] sm:$0xff] %v1171_v16 }
  0x2f   : > { %372 = vst [vmem:[#allocation2 + $0x60] sm:$0xff] %v1171_v16  ;;  %373 = vst [vmem:[#allocation2 + $0x70] sm:$0xff] %v1171_v16 }
  0x30   : > { %374 = vst [vmem:[#allocation2 + $0x78] sm:$0xff] %v1171_v16  ;;  %375 = vst [vmem:[#allocation2 + $0x28] sm:$0xff] %v1171_v16 }
  0x31 PF: > { %v1115_v17 = vld [vmem:[%s1260_s7 + $0x38] sm:$0xff]   ;;  %v1116_v18 = vld [vmem:[%s1260_s7 + $0x30] sm:$0xff]   ;;  %v1117_v19 = vld [vmem:[%s1260_s7 + $0x28] sm:$0xff]   ;;  %p925_p11 = scmp.ne.s32.totalorder %s1161_s14, 4 }
  0x32   : > { %1026 = vmatprep.subr.bf16.mxu0 %v1115_v17  ;;  %1058 = vmatprep.subr.bf16.mxu1 %v1115_v17  ;;  %v1118_v20 = vld [vmem:[%s1260_s7 + $0x20] sm:$0xff]   ;;  %v1119_v23 = vld [vmem:[%s1260_s7 + $0x18] sm:$0xff]   ;;  %v1120_v24 = vld [vmem:[%s1260_s7 + $0x10] sm:$0xff]  }
  0x33   : > { %1027 = vmatpush3.bf16.msra.mxu0 %v1115_v17  ;;  %1066 = vmatpush3.bf16.msra.mxu1 %v1115_v17  ;;  %v1123_v21 = vld [vmem:[%s1262_s8] sm:$0xff]   ;;  %v1121_v25 = vld [vmem:[%s1260_s7 + $0x8] sm:$0xff]   ;;  %v1127_v29 = vld [vmem:[%s1262_s8 + $0x10] sm:$0xff]  }
  0x34   : > { %1028 = vmatprep.subr.bf16.mxu0 %v1116_v18  ;;  %1059 = vmatprep.subr.bf16.mxu1 %v1116_v18  ;;  %v1124_v22 = vld [vmem:[%s1262_s8 + $0x20] sm:$0xff]   ;;  %v1125_v27 = vld [vmem:[%s1262_s8 + $0x8] sm:$0xff]   ;;  %v1128_v30 = vld [vmem:[%s1262_s8 + $0x30] sm:$0xff]  }
  0x35   : > { %1042 = vmatprep.mubr.bf16.mxu0 %v1123_v21  ;;  %1050 = vmatprep.mubr.bf16.mxu1 %v1124_v22  ;;  %v1122_v26 = vld [vmem:[%s1260_s7] sm:$0xff]   ;;  %v1126_v28 = vld [vmem:[%s1262_s8 + $0x28] sm:$0xff]   ;;  %v1129_v31 = vld [vmem:[%s1262_s8 + $0x18] sm:$0xff]  }
  0x36   : > { %v1130_v32 = vld [vmem:[%s1262_s8 + $0x38] sm:$0xff]   ;;  %v386_v34 = vld [vmem:[#allocation2 + $0x10] sm:$0xff]  ;;  %v384_v38 = vld [vmem:[#allocation2 + $0x40] sm:$0xff] }
  0x37   : > { %1029 = vmatpush3.bf16.msra.mxu0 %v1116_v18  ;;  %1067 = vmatpush3.bf16.msra.mxu1 %v1116_v18  ;;  %v378_v33 = vld [vmem:[#allocation2 + $0x58] sm:$0xff]  ;;  %v376_v37 = vld [vmem:[#allocation2 + $0x30] sm:$0xff]  ;;  %v377_v49 = vld [vmem:[#allocation2] sm:$0xff] }
  0x38   : > { %1030 = vmatprep.subr.bf16.mxu0 %v1117_v19  ;;  %1060 = vmatprep.subr.bf16.mxu1 %v1117_v19  ;;  %v379_v43 = vld [vmem:[#allocation2 + $0x18] sm:$0xff]  ;;  %v385_v50 = vld [vmem:[#allocation2 + $0x20] sm:$0xff]  ;;  %v382_v55 = vld [vmem:[#allocation2 + $0x8] sm:$0xff] }
  0x39   : > { %v387_v44 = vld [vmem:[#allocation2 + $0x38] sm:$0xff]  ;;  %v380_v61 = vld [vmem:[#allocation2 + $0x50] sm:$0xff]  ;;  %v388_v62 = vld [vmem:[#allocation2 + $0x60] sm:$0xff] }
  0x3a   : > { %v390_v56 = vld [vmem:[#allocation2 + $0x78] sm:$0xff]  ;;  %v383_v3 = vld [vmem:[#allocation2 + $0x48] sm:$0xff]  ;;  %v389_v10 = vld [vmem:[#allocation2 + $0x70] sm:$0xff] }
  0x3b   : > { %1031 = vmatpush3.bf16.msra.mxu0 %v1117_v19  ;;  %1068 = vmatpush3.bf16.msra.mxu1 %v1117_v19  ;;  %v391_v4 = vld [vmem:[#allocation2 + $0x28] sm:$0xff] }
  0x3c   : > { %1032 = vmatprep.subr.bf16.mxu0 %v1118_v20  ;;  %1061 = vmatprep.subr.bf16.mxu1 %v1118_v20  ;;  %v381_v9 = vld [vmem:[#allocation2 + $0x68] sm:$0xff] }
  0x3f   : > { %1033 = vmatpush3.bf16.msra.mxu0 %v1118_v20  ;;  %1069 = vmatpush3.bf16.msra.mxu1 %v1118_v20 }
  0x40   : > { %1034 = vmatprep.subr.bf16.mxu0 %v1119_v23  ;;  %1062 = vmatprep.subr.bf16.mxu1 %v1119_v23 }
  0x43   : > { %1035 = vmatpush3.bf16.msra.mxu0 %v1119_v23  ;;  %1070 = vmatpush3.bf16.msra.mxu1 %v1119_v23 }
  0x44   : > { %1036 = vmatprep.subr.bf16.mxu0 %v1120_v24  ;;  %1063 = vmatprep.subr.bf16.mxu1 %v1120_v24 }
  0x47   : > { %1037 = vmatpush3.bf16.msra.mxu0 %v1120_v24  ;;  %1071 = vmatpush3.bf16.msra.mxu1 %v1120_v24 }
  0x48   : > { %1038 = vmatprep.subr.bf16.mxu0 %v1121_v25  ;;  %1064 = vmatprep.subr.bf16.mxu1 %v1121_v25 }
  0x4b   : > { %1039 = vmatpush3.bf16.msra.mxu0 %v1121_v25  ;;  %1072 = vmatpush3.bf16.msra.mxu1 %v1121_v25 }
  0x4c   : > { %1040 = vmatprep.subr.bf16.mxu0 %v1122_v26  ;;  %1065 = vmatprep.subr.bf16.mxu1 %v1122_v26 }
  0x4f   : > { %1041 = vmatpush3.bf16.msra.mxu0 %v1122_v26  ;;  %1073 = vmatpush3.bf16.msra.mxu1 %v1122_v26 }
  0x52   : > { %1043 = vmatmul.mubr.bf16.vlgmr.msra.gmra.mxu0 %v1125_v27  ;;  %1051 = vmatmul.mubr.bf16.vlgmr.msra.gmra.mxu1 %v1126_v28 }
  0x53   : > { %1046 = vmatprep.mubr.bf16.mxu0 %v1127_v29  ;;  %1054 = vmatprep.mubr.bf16.mxu1 %v1128_v30 }
  0x5a   : > { %1047 = vmatmul.mubr.bf16.gmra.mxu0 %v1129_v31  ;;  %1055 = vmatmul.mubr.bf16.gmra.mxu1 %v1130_v32 }
 0x112   : > { %v1044_v35 = vpop.f32.mrf.mxu0  ;;  %v1052_v36 = vpop.f32.mrf.mxu1 }
 0x113   : > { %v619_v39 = vadd.f32 %v1044_v35, %v378_v33  ;;  %v627_v40 = vadd.f32 %v1052_v36, %v386_v34 }
 0x114   : > { %v554_v41 = vpop.f32.mrf.mxu0  ;;  %v586_v42 = vpop.f32.mrf.mxu1 }
 0x115   : > { %635 = vst [vmem:[#allocation2 + $0x58] sm:$0xff] %v619_v39  ;;  %643 = vst [vmem:[#allocation2 + $0x10] sm:$0xff] %v627_v40  ;;  %v617_v45 = vadd.f32 %v554_v41, %v376_v37  ;;  %v625_v46 = vadd.f32 %v586_v42, %v384_v38 }
 0x116   : > { %v1045_v47 = vpop.f32.mrf.mxu0  ;;  %v1053_v48 = vpop.f32.mrf.mxu1 }
 0x117   : > { %633 = vst [vmem:[#allocation2 + $0x30] sm:$0xff] %v617_v45  ;;  %641 = vst [vmem:[#allocation2 + $0x40] sm:$0xff] %v625_v46  ;;  %v620_v51 = vadd.f32 %v1045_v47, %v379_v43  ;;  %v628_v52 = vadd.f32 %v1053_v48, %v387_v44 }
 0x118   : > { %v557_v53 = vpop.f32.mrf.mxu0  ;;  %v589_v54 = vpop.f32.mrf.mxu1 }
 0x119   : > { %636 = vst [vmem:[#allocation2 + $0x18] sm:$0xff] %v620_v51  ;;  %644 = vst [vmem:[#allocation2 + $0x38] sm:$0xff] %v628_v52  ;;  %v618_v57 = vadd.f32 %v557_v53, %v377_v49  ;;  %v626_v58 = vadd.f32 %v589_v54, %v385_v50 }
 0x11a   : > { %v1048_v59 = vpop.f32.mrf.mxu0  ;;  %v1056_v60 = vpop.f32.mrf.mxu1 }
 0x11b   : > { %634 = vst [vmem:[#allocation2] sm:$0xff] %v618_v57  ;;  %642 = vst [vmem:[#allocation2 + $0x20] sm:$0xff] %v626_v58  ;;  %v623_v63 = vadd.f32 %v1048_v59, %v382_v55  ;;  %v631_v0 = vadd.f32 %v1056_v60, %v390_v56 }
 0x11c   : > { %v570_v1 = vpop.f32.mrf.mxu0  ;;  %v602_v2 = vpop.f32.mrf.mxu1 }
 0x11d   : > { %639 = vst [vmem:[#allocation2 + $0x8] sm:$0xff] %v623_v63  ;;  %647 = vst [vmem:[#allocation2 + $0x78] sm:$0xff] %v631_v0  ;;  %v621_v5 = vadd.f32 %v570_v1, %v380_v61  ;;  %v629_v6 = vadd.f32 %v602_v2, %v388_v62 }
 0x11e   : > { %v1049_v7 = vpop.f32.mrf.mxu0  ;;  %v1057_v8 = vpop.f32.mrf.mxu1 }
 0x11f   : > { %637 = vst [vmem:[#allocation2 + $0x50] sm:$0xff] %v621_v5  ;;  %645 = vst [vmem:[#allocation2 + $0x60] sm:$0xff] %v629_v6  ;;  %v624_v11 = vadd.f32 %v1049_v7, %v383_v3  ;;  %v632_v12 = vadd.f32 %v1057_v8, %v391_v4  ;;  %652 = sbr.rel (%p925_p11) target bundleno = 308 (0x134), region = 81 }
 0x120   : > { %v573_v13 = vpop.f32.mrf.mxu0  ;;  %v605_v14 = vpop.f32.mrf.mxu1 }
 0x121   : > { %640 = vst [vmem:[#allocation2 + $0x48] sm:$0xff] %v624_v11  ;;  %648 = vst [vmem:[#allocation2 + $0x28] sm:$0xff] %v632_v12  ;;  %v622_v15 = vadd.f32 %v573_v13, %v381_v9  ;;  %v630_v16 = vadd.f32 %v605_v14, %v389_v10 }
 0x123   : > { %638 = vst [vmem:[#allocation2 + $0x68] sm:$0xff] %v622_v15  ;;  %646 = vst [vmem:[#allocation2 + $0x70] sm:$0xff] %v630_v16 }
 0x124   : > { %v653_v17 = vld [vmem:[#allocation2 + $0x30] sm:$0xff]  ;;  %v654_v18 = vld [vmem:[#allocation2] sm:$0xff]  ;;  %v655_v22 = vld [vmem:[#allocation2 + $0x58] sm:$0xff] }
 0x125   : > { %v926_v19 = vld [vmem:[%s1326_s2] ss:$0 sm:$0xff]  ;;  %v656_v23 = vld [vmem:[#allocation2 + $0x18] sm:$0xff]  ;;  %v659_v29 = vld [vmem:[#allocation2 + $0x8] sm:$0xff] }
 0x126   : > { %v676_v20 = vadd.f32 %v926_v19, %v653_v17  ;;  %v677_v21 = vadd.f32 %v926_v19, %v654_v18  ;;  %v657_v24 = vld [vmem:[#allocation2 + $0x50] sm:$0xff]  ;;  %v678_v25 = vadd.f32 %v926_v19, %v655_v22  ;;  %v679_v26 = vadd.f32 %v926_v19, %v656_v23  ;;  %v661_v35 = vld [vmem:[#allocation2 + $0x40] sm:$0xff]  ;;  %v664_v42 = vld [vmem:[#allocation2 + $0x38] sm:$0xff] }
 0x127   : > { %v680_v28 = vadd.f32 %v926_v19, %v657_v24  ;;  %v682_v34 = vadd.f32 %v926_v19, %v659_v29  ;;  %v662_v36 = vld [vmem:[#allocation2 + $0x20] sm:$0xff]  ;;  %v663_v37 = vld [vmem:[#allocation2 + $0x10] sm:$0xff]  ;;  %v684_v47 = vadd.f32 %v926_v19, %v661_v35  ;;  %v667_v53 = vld [vmem:[#allocation2 + $0x78] sm:$0xff]  ;;  %v687_v57 = vadd.f32 %v926_v19, %v664_v42 }
 0x128   : > { %v660_v30 = vld [vmem:[#allocation2 + $0x48] sm:$0xff]  ;;  %v692_v31 = vmax.f32 %v676_v20, 0.0  ;;  %v693_v32 = vmax.f32 %v677_v21, 0.0  ;;  %v694_v38 = vmax.f32 %v678_v25, 0.0  ;;  %v695_v39 = vmax.f32 %v679_v26, 0.0  ;;  %v665_v43 = vld [vmem:[#allocation2 + $0x60] sm:$0xff] }
 0x129   : > { %v696_v40 = vmax.f32 %v680_v28, 0.0  ;;  %v683_v41 = vadd.f32 %v926_v19, %v660_v30  ;;  %v698_v46 = vmax.f32 %v682_v34, 0.0  ;;  %v685_v51 = vadd.f32 %v926_v19, %v662_v36  ;;  %v668_v54 = vld [vmem:[#allocation2 + $0x28] sm:$0xff] }
 0x12a   : > { %v658_v27 = vld [vmem:[#allocation2 + $0x68] sm:$0xff]  ;;  %v966_v44 = vpack.c.bf16 %v693_v32, %v692_v31  ;;  %v666_v48 = vld [vmem:[#allocation2 + $0x70] sm:$0xff]  ;;  %v971_v49 = vpack.c.bf16 %v695_v39, %v694_v38  ;;  %v686_v52 = vadd.f32 %v926_v19, %v663_v37  ;;  %v700_v56 = vmax.f32 %v684_v47, 0.0 }
 0x12b   : > { %v681_v33 = vadd.f32 %v926_v19, %v658_v27  ;;  %v699_v50 = vmax.f32 %v683_v41, 0.0  ;;  %v688_v58 = vadd.f32 %v926_v19, %v665_v43  ;;  %v701_v60 = vmax.f32 %v685_v51, 0.0 }
 0x12c   : > { %967 = vst [vmem:[%s1327_s3] sm:$0xff] %v966_v44   ;;  %1003 = vst [vmem:[%s1327_s3 + $0x8] sm:$0xff] %v971_v49   ;;  %v702_v61 = vmax.f32 %v686_v52, 0.0  ;;  %v689_v62 = vadd.f32 %v926_v19, %v666_v48  ;;  %v703_v63 = vmax.f32 %v687_v57, 0.0  ;;  %v690_v1 = vadd.f32 %v926_v19, %v667_v53 }
 0x12d   : > { %v697_v45 = vmax.f32 %v681_v33, 0.0  ;;  %v981_v59 = vpack.c.bf16 %v699_v50, %v698_v46  ;;  %v704_v0 = vmax.f32 %v688_v58, 0.0  ;;  %v691_v2 = vadd.f32 %v926_v19, %v668_v54 }
 0x12e   : > { %v986_v3 = vpack.c.bf16 %v701_v60, %v700_v56  ;;  %v705_v4 = vmax.f32 %v689_v62, 0.0  ;;  %v991_v5 = vpack.c.bf16 %v703_v63, %v702_v61  ;;  %v706_v6 = vmax.f32 %v690_v1, 0.0 }
 0x12f   : > { %v976_v55 = vpack.c.bf16 %v697_v45, %v696_v40  ;;  %1005 = vst [vmem:[%s1327_s3 + $0x18] sm:$0xff] %v981_v59   ;;  %v707_v7 = vmax.f32 %v691_v2, 0.0 }
 0x130   : > { %1006 = vst [vmem:[%s1327_s3 + $0x20] sm:$0xff] %v986_v3   ;;  %v996_v8 = vpack.c.bf16 %v705_v4, %v704_v0  ;;  %1007 = vst [vmem:[%s1327_s3 + $0x28] sm:$0xff] %v991_v5  }
 0x131   : > { %1004 = vst [vmem:[%s1327_s3 + $0x10] sm:$0xff] %v976_v55   ;;  %v1001_v9 = vpack.c.bf16 %v707_v7, %v706_v6 }
 0x132   : > { %1008 = vst [vmem:[%s1327_s3 + $0x30] sm:$0xff] %v996_v8  }
 0x133   : > { %1009 = vst [vmem:[%s1327_s3 + $0x38] sm:$0xff] %v1001_v9  }
 0x134 PF: > { %s13_s16 = sadd.s32 1, %s1169_s16   ;;  %s1328_s12 = smov %s1157_s13 }
 0x135   : > { %p10_p12 = scmp.ge.s32.totalorder %s13_s16, 7   ;;  %s1329_s13 = smov %s1227_s20 }
 0x136   : > { %s1330_s14 = smov %s1165_s15  ;;  %s1331_s15 = smov %s1333_s17 }
 0x137   :  { %12 = sbr.rel (!%p10_p12) target bundleno = 3 (0x3), region = 122 }

// kernel: forward.25
= control target key start
LH: loop header
LB: loop body
LE: loop exit
PB: predicated region body
PF: predicated region fallthrough
CT: control target
= control target key end

     0   :  { %s1363_s15 = smov 0   ;;  %s1365_s16 = smov 0   ;;  %s1537_s0 = inlined_call_operand.vmem [shape: bf16[128,640], index: 0, kind: input, shape index: {}]   ;;  %s1538_s1 = inlined_call_operand.vmem [shape: bf16[640,128], index: 1, kind: input, shape index: {}]   ;;  %s1539_s2 = inlined_call_operand.vmem [shape: f32[1,128], index: 2, kind: input, shape index: {}]   ;;  %s1540_s3 = inlined_call_operand.vmem [shape: bf16[128,128], index: 3, kind: input, shape index: {}]   ;;  %s1541_s4 = inlined_call_operand.vmem [shape: bf16[128,128], index: 4, kind: output, shape index: {}]  }
   0x1   :  { %s1367_s17 = smov 0   ;;  %s1369_s18 = smov 0  }
   0x2   :  { %s1371_s19 = smov 0  }
   0x3 LB: > { %s26_s20 = sadd.s32 1, %s1331_s18  ;;  %p49_p1 = scmp.ne.s32.totalorder %s1323_s16, %s1319_s15  ;;  %s1335_s19 = sphi %s1371_s19, %s14_s19   ;;  %s1331_s18 = sphi %s1369_s18, %s1545_s18   ;;  %s1327_s17 = sphi %s1367_s17, %s1544_s17   ;;  %s1323_s16 = sphi %s1365_s16, %s1543_s16   ;;  %s1319_s15 = sphi %s1363_s15, %s1542_s15  }
   0x4   : > { %p27_p0 = scmp.ge.s32.totalorder %s26_s20, 5  ;;  %p50_p2 = scmp.eq.s32.totalorder %s1335_s19, 0 }
   0x5   : > { %s42_s22 = sadd.s32 1, %s1323_s16  ;;  %p1028_p5 = scmp.ge.s32.totalorder %s1335_s19, 5 }
   0x6   : > { %s1547_s20 = smov (%p27_p0, %s26_s20), 0  ;;  %p51_p3 = por %p50_p2, %p49_p1 }
   0x7   : > { %s38_s21 = ssub.s32 %s1331_s18, %s1547_s20  ;;  %203 = sbr.rel (%p1028_p5) target bundleno = 26 (0x1a), region = 24 }
   0x8   : > { %p40_p4 = scmp.eq.s32.totalorder %s38_s21, 0 }
   0xa   : > { %s1398_s23 = scalar_select %p40_p4, %s1323_s16, %s42_s22  }
   0xc   : > { %206 = sbr.rel (!%p51_p3) target bundleno = 26 (0x1a), region = 28  ;;  %s208_s24 = sand.u32 (%p51_p3), 1, %s1323_s16  }
   0xd   : > { %s1030_s25 = sshll.u32 (%p51_p3), %s1331_s18, 2  ;;  %s1029_s26 = sshll.u32 (%p51_p3), %s208_s24, 6 }
   0xe   : > { %s1406_s29 = scalar_lea.vmem (%p51_p3), %s1537_s0, %s1030_s25  ;;  %s210_s30 = scalar_lea.vmem (%p51_p3), [#allocation3], %s1029_s26 }
   0xf   : > { %v232_v0 = vld [vmem:[%s1406_s29] sm:$0xf] (%p51_p3)  ;;  %v234_v1 = vld [vmem:[%s1406_s29 + $0x14] sm:$0xf] (%p51_p3)  ;;  %v236_v2 = vld [vmem:[%s1406_s29 + $0x28] sm:$0xf] (%p51_p3) }
  0x10   : > { %233 = vst [vmem:[%s210_s30] sm:$0xf] (%p51_p3), %v232_v0  ;;  %235 = vst [vmem:[%s210_s30 + $0x4] sm:$0xf] (%p51_p3), %v234_v1  ;;  %v238_v3 = vld [vmem:[%s1406_s29 + $0x3c] sm:$0xf] (%p51_p3) }
  0x11   : > { %v240_v4 = vld [vmem:[%s1406_s29 + $0x50] sm:$0xf]  ;;  %237 = vst [vmem:[%s210_s30 + $0x8] sm:$0xf] %v236_v2  ;;  %239 = vst [vmem:[%s210_s30 + $0xc] sm:$0xf] %v238_v3 }
  0x12   : > { %241 = vst [vmem:[%s210_s30 + $0x10] sm:$0xf] %v240_v4  ;;  %v242_v5 = vld [vmem:[%s1406_s29 + $0x64] sm:$0xf]  ;;  %v244_v6 = vld [vmem:[%s1406_s29 + $0x78] sm:$0xf] }
  0x13   : > { %v246_v7 = vld [vmem:[%s1406_s29 + $0x8c] sm:$0xf]  ;;  %243 = vst [vmem:[%s210_s30 + $0x14] sm:$0xf] %v242_v5  ;;  %245 = vst [vmem:[%s210_s30 + $0x18] sm:$0xf] %v244_v6 }
  0x14   : > { %247 = vst [vmem:[%s210_s30 + $0x1c] sm:$0xf] %v246_v7  ;;  %v248_v8 = vld [vmem:[%s1406_s29 + $0xa0] sm:$0xf]  ;;  %v250_v9 = vld [vmem:[%s1406_s29 + $0xb4] sm:$0xf] }
  0x15   : > { %v252_v10 = vld [vmem:[%s1406_s29 + $0xc8] sm:$0xf]  ;;  %249 = vst [vmem:[%s210_s30 + $0x20] sm:$0xf] %v248_v8  ;;  %251 = vst [vmem:[%s210_s30 + $0x24] sm:$0xf] %v250_v9 }
  0x16   : > { %253 = vst [vmem:[%s210_s30 + $0x28] sm:$0xf] %v252_v10  ;;  %v254_v11 = vld [vmem:[%s1406_s29 + $0xdc] sm:$0xf]  ;;  %v256_v12 = vld [vmem:[%s1406_s29 + $0xf0] sm:$0xf] }
  0x17   : > { %v258_v13 = vld [vmem:[%s1406_s29 + $0x104] sm:$0xf]  ;;  %255 = vst [vmem:[%s210_s30 + $0x2c] sm:$0xf] %v254_v11  ;;  %257 = vst [vmem:[%s210_s30 + $0x30] sm:$0xf] %v256_v12 }
  0x18   : > { %259 = vst [vmem:[%s210_s30 + $0x34] sm:$0xf] %v258_v13  ;;  %v260_v14 = vld [vmem:[%s1406_s29 + $0x118] sm:$0xf]  ;;  %v262_v15 = vld [vmem:[%s1406_s29 + $0x12c] sm:$0xf] }
  0x19   : > { %261 = vst [vmem:[%s210_s30 + $0x38] sm:$0xf] %v260_v14  ;;  %263 = vst [vmem:[%s210_s30 + $0x3c] sm:$0xf] %v262_v15 }
  0x1a PF: > { %p1031_p6 = scmp.ge.s32.totalorder %s1335_s19, 1  ;;  %p330_p7 = scmp.lt.s32.totalorder %s1335_s19, 6 }
  0x1c   : > { %p331_p8 = pnand %p1031_p6, %p330_p7 }
  0x1d   : > { %s337_s5 = sand.u32 (!%p331_p8), 1, %s1319_s15   ;;  %s1033_s6 = sshll.u32 (!%p331_p8), %s1327_s17, 4 }
  0x1e   : > { %334 = sbr.rel (%p331_p8) target bundleno = 318 (0x13e), region = 73  ;;  %s1032_s7 = sshll.u32 (!%p331_p8), %s337_s5, 6 }
  0x1f   : > { %p386_p9 = scmp.lt.s32.totalorder (!%p331_p8), %s1033_s6, 79  ;;  %s1433_s12 = scalar_lea.vmem (!%p331_p8), [#allocation3], %s1032_s7 }
  0x20   : > { %p1035_p10 = scmp.ne.s32.totalorder (!%p331_p8), %s1327_s17, 0 }
  0x23   : > { %s1549_s6 = smov (!%p386_p9, %s1033_s6), 79  ;;  %419 = sbr.rel (%p1035_p10) target bundleno = 49 (0x31), region = 81 }
  0x24   : > { %s1034_s8 = sshll.u32 %s1549_s6, 2 }
  0x25   : > { %s1431_s11 = scalar_lea.vmem %s1538_s1, %s1034_s8 }
  0x28   : > { %v1337_v16 = vmov 0.0  }
  0x29   : > { %420 = vst [vmem:[#allocation2 + $0x30] sm:$0xff] %v1337_v16  ;;  %421 = vst [vmem:[#allocation2] sm:$0xff] %v1337_v16 }
  0x2a   : > { %422 = vst [vmem:[#allocation2 + $0x58] sm:$0xff] %v1337_v16  ;;  %423 = vst [vmem:[#allocation2 + $0x18] sm:$0xff] %v1337_v16 }
  0x2b   : > { %424 = vst [vmem:[#allocation2 + $0x50] sm:$0xff] %v1337_v16  ;;  %425 = vst [vmem:[#allocation2 + $0x68] sm:$0xff] %v1337_v16 }
  0x2c   : > { %426 = vst [vmem:[#allocation2 + $0x8] sm:$0xff] %v1337_v16  ;;  %427 = vst [vmem:[#allocation2 + $0x48] sm:$0xff] %v1337_v16 }
  0x2d   : > { %428 = vst [vmem:[#allocation2 + $0x40] sm:$0xff] %v1337_v16  ;;  %429 = vst [vmem:[#allocation2 + $0x20] sm:$0xff] %v1337_v16 }
  0x2e   : > { %430 = vst [vmem:[#allocation2 + $0x10] sm:$0xff] %v1337_v16  ;;  %431 = vst [vmem:[#allocation2 + $0x38] sm:$0xff] %v1337_v16 }
  0x2f   : > { %432 = vst [vmem:[#allocation2 + $0x60] sm:$0xff] %v1337_v16  ;;  %433 = vst [vmem:[#allocation2 + $0x70] sm:$0xff] %v1337_v16 }
  0x30   : > { %434 = vst [vmem:[#allocation2 + $0x78] sm:$0xff] %v1337_v16  ;;  %435 = vst [vmem:[#allocation2 + $0x28] sm:$0xff] %v1337_v16 }
  0x31 PF: > { %v1281_v17 = vld [vmem:[%s1431_s11 + $0x38] sm:$0xff]   ;;  %v1282_v18 = vld [vmem:[%s1431_s11 + $0x30] sm:$0xff]   ;;  %v1283_v19 = vld [vmem:[%s1431_s11 + $0x28] sm:$0xff]   ;;  %p1052_p11 = scmp.ne.s32.totalorder %s1327_s17, 4 }
  0x32   : > { %1192 = vmatprep.subr.bf16.mxu0 %v1281_v17  ;;  %1224 = vmatprep.subr.bf16.mxu1 %v1281_v17  ;;  %v1284_v20 = vld [vmem:[%s1431_s11 + $0x20] sm:$0xff]   ;;  %v1285_v23 = vld [vmem:[%s1431_s11 + $0x18] sm:$0xff]   ;;  %v1286_v24 = vld [vmem:[%s1431_s11 + $0x10] sm:$0xff]  }
  0x33   : > { %1193 = vmatpush3.bf16.msra.mxu0 %v1281_v17  ;;  %1232 = vmatpush3.bf16.msra.mxu1 %v1281_v17  ;;  %v1289_v21 = vld [vmem:[%s1433_s12] sm:$0xff]   ;;  %v1287_v25 = vld [vmem:[%s1431_s11 + $0x8] sm:$0xff]   ;;  %v1293_v29 = vld [vmem:[%s1433_s12 + $0x10] sm:$0xff]  }
  0x34   : > { %1194 = vmatprep.subr.bf16.mxu0 %v1282_v18  ;;  %1225 = vmatprep.subr.bf16.mxu1 %v1282_v18  ;;  %v1290_v22 = vld [vmem:[%s1433_s12 + $0x20] sm:$0xff]   ;;  %v1291_v27 = vld [vmem:[%s1433_s12 + $0x8] sm:$0xff]   ;;  %v1294_v30 = vld [vmem:[%s1433_s12 + $0x30] sm:$0xff]  }
  0x35   : > { %1208 = vmatprep.mubr.bf16.mxu0 %v1289_v21  ;;  %1216 = vmatprep.mubr.bf16.mxu1 %v1290_v22  ;;  %v1288_v26 = vld [vmem:[%s1431_s11] sm:$0xff]   ;;  %v1292_v28 = vld [vmem:[%s1433_s12 + $0x28] sm:$0xff]   ;;  %v1295_v31 = vld [vmem:[%s1433_s12 + $0x18] sm:$0xff]  }
  0x36   : > { %v1296_v32 = vld [vmem:[%s1433_s12 + $0x38] sm:$0xff]   ;;  %v446_v34 = vld [vmem:[#allocation2 + $0x10] sm:$0xff]  ;;  %v444_v38 = vld [vmem:[#allocation2 + $0x40] sm:$0xff] }
  0x37   : > { %1195 = vmatpush3.bf16.msra.mxu0 %v1282_v18  ;;  %1233 = vmatpush3.bf16.msra.mxu1 %v1282_v18  ;;  %v438_v33 = vld [vmem:[#allocation2 + $0x58] sm:$0xff]  ;;  %v436_v37 = vld [vmem:[#allocation2 + $0x30] sm:$0xff]  ;;  %v437_v49 = vld [vmem:[#allocation2] sm:$0xff] }
  0x38   : > { %1196 = vmatprep.subr.bf16.mxu0 %v1283_v19  ;;  %1226 = vmatprep.subr.bf16.mxu1 %v1283_v19  ;;  %v439_v43 = vld [vmem:[#allocation2 + $0x18] sm:$0xff]  ;;  %v445_v50 = vld [vmem:[#allocation2 + $0x20] sm:$0xff]  ;;  %v442_v55 = vld [vmem:[#allocation2 + $0x8] sm:$0xff] }
  0x39   : > { %v447_v44 = vld [vmem:[#allocation2 + $0x38] sm:$0xff]  ;;  %v440_v61 = vld [vmem:[#allocation2 + $0x50] sm:$0xff]  ;;  %v448_v62 = vld [vmem:[#allocation2 + $0x60] sm:$0xff] }
  0x3a   : > { %v450_v56 = vld [vmem:[#allocation2 + $0x78] sm:$0xff]  ;;  %v443_v3 = vld [vmem:[#allocation2 + $0x48] sm:$0xff]  ;;  %v449_v10 = vld [vmem:[#allocation2 + $0x70] sm:$0xff] }
  0x3b   : > { %1197 = vmatpush3.bf16.msra.mxu0 %v1283_v19  ;;  %1234 = vmatpush3.bf16.msra.mxu1 %v1283_v19  ;;  %v451_v4 = vld [vmem:[#allocation2 + $0x28] sm:$0xff] }
  0x3c   : > { %1198 = vmatprep.subr.bf16.mxu0 %v1284_v20  ;;  %1227 = vmatprep.subr.bf16.mxu1 %v1284_v20  ;;  %v441_v9 = vld [vmem:[#allocation2 + $0x68] sm:$0xff] }
  0x3f   : > { %1199 = vmatpush3.bf16.msra.mxu0 %v1284_v20  ;;  %1235 = vmatpush3.bf16.msra.mxu1 %v1284_v20 }
  0x40   : > { %1200 = vmatprep.subr.bf16.mxu0 %v1285_v23  ;;  %1228 = vmatprep.subr.bf16.mxu1 %v1285_v23 }
  0x43   : > { %1201 = vmatpush3.bf16.msra.mxu0 %v1285_v23  ;;  %1236 = vmatpush3.bf16.msra.mxu1 %v1285_v23 }
  0x44   : > { %1202 = vmatprep.subr.bf16.mxu0 %v1286_v24  ;;  %1229 = vmatprep.subr.bf16.mxu1 %v1286_v24 }
  0x47   : > { %1203 = vmatpush3.bf16.msra.mxu0 %v1286_v24  ;;  %1237 = vmatpush3.bf16.msra.mxu1 %v1286_v24 }
  0x48   : > { %1204 = vmatprep.subr.bf16.mxu0 %v1287_v25  ;;  %1230 = vmatprep.subr.bf16.mxu1 %v1287_v25 }
  0x4b   : > { %1205 = vmatpush3.bf16.msra.mxu0 %v1287_v25  ;;  %1238 = vmatpush3.bf16.msra.mxu1 %v1287_v25 }
  0x4c   : > { %1206 = vmatprep.subr.bf16.mxu0 %v1288_v26  ;;  %1231 = vmatprep.subr.bf16.mxu1 %v1288_v26 }
  0x4f   : > { %1207 = vmatpush3.bf16.msra.mxu0 %v1288_v26  ;;  %1239 = vmatpush3.bf16.msra.mxu1 %v1288_v26 }
  0x52   : > { %1209 = vmatmul.mubr.bf16.vlgmr.msra.gmra.mxu0 %v1291_v27  ;;  %1217 = vmatmul.mubr.bf16.vlgmr.msra.gmra.mxu1 %v1292_v28 }
  0x53   : > { %1212 = vmatprep.mubr.bf16.mxu0 %v1293_v29  ;;  %1220 = vmatprep.mubr.bf16.mxu1 %v1294_v30 }
  0x5a   : > { %1213 = vmatmul.mubr.bf16.gmra.mxu0 %v1295_v31  ;;  %1221 = vmatmul.mubr.bf16.gmra.mxu1 %v1296_v32 }
 0x112   : > { %v1210_v35 = vpop.f32.mrf.mxu0  ;;  %v1218_v36 = vpop.f32.mrf.mxu1 }
 0x113   : > { %v679_v39 = vadd.f32 %v1210_v35, %v438_v33  ;;  %v687_v40 = vadd.f32 %v1218_v36, %v446_v34 }
 0x114   : > { %v614_v41 = vpop.f32.mrf.mxu0  ;;  %v646_v42 = vpop.f32.mrf.mxu1 }
 0x115   : > { %695 = vst [vmem:[#allocation2 + $0x58] sm:$0xff] %v679_v39  ;;  %703 = vst [vmem:[#allocation2 + $0x10] sm:$0xff] %v687_v40  ;;  %v677_v45 = vadd.f32 %v614_v41, %v436_v37  ;;  %v685_v46 = vadd.f32 %v646_v42, %v444_v38 }
 0x116   : > { %v1211_v47 = vpop.f32.mrf.mxu0  ;;  %v1219_v48 = vpop.f32.mrf.mxu1 }
 0x117   : > { %693 = vst [vmem:[#allocation2 + $0x30] sm:$0xff] %v677_v45  ;;  %701 = vst [vmem:[#allocation2 + $0x40] sm:$0xff] %v685_v46  ;;  %v680_v51 = vadd.f32 %v1211_v47, %v439_v43  ;;  %v688_v52 = vadd.f32 %v1219_v48, %v447_v44 }
 0x118   : > { %v617_v53 = vpop.f32.mrf.mxu0  ;;  %v649_v54 = vpop.f32.mrf.mxu1 }
 0x119   : > { %696 = vst [vmem:[#allocation2 + $0x18] sm:$0xff] %v680_v51  ;;  %704 = vst [vmem:[#allocation2 + $0x38] sm:$0xff] %v688_v52  ;;  %v678_v57 = vadd.f32 %v617_v53, %v437_v49  ;;  %v686_v58 = vadd.f32 %v649_v54, %v445_v50 }
 0x11a   : > { %v1214_v59 = vpop.f32.mrf.mxu0  ;;  %v1222_v60 = vpop.f32.mrf.mxu1 }
 0x11b   : > { %694 = vst [vmem:[#allocation2] sm:$0xff] %v678_v57  ;;  %702 = vst [vmem:[#allocation2 + $0x20] sm:$0xff] %v686_v58  ;;  %v683_v63 = vadd.f32 %v1214_v59, %v442_v55  ;;  %v691_v0 = vadd.f32 %v1222_v60, %v450_v56 }
 0x11c   : > { %v630_v1 = vpop.f32.mrf.mxu0  ;;  %v662_v2 = vpop.f32.mrf.mxu1 }
 0x11d   : > { %699 = vst [vmem:[#allocation2 + $0x8] sm:$0xff] %v683_v63  ;;  %707 = vst [vmem:[#allocation2 + $0x78] sm:$0xff] %v691_v0  ;;  %v681_v5 = vadd.f32 %v630_v1, %v440_v61  ;;  %v689_v6 = vadd.f32 %v662_v2, %v448_v62 }
 0x11e   : > { %v1215_v7 = vpop.f32.mrf.mxu0  ;;  %v1223_v8 = vpop.f32.mrf.mxu1 }
 0x11f   : > { %697 = vst [vmem:[#allocation2 + $0x50] sm:$0xff] %v681_v5  ;;  %705 = vst [vmem:[#allocation2 + $0x60] sm:$0xff] %v689_v6  ;;  %v684_v11 = vadd.f32 %v1215_v7, %v443_v3  ;;  %v692_v12 = vadd.f32 %v1223_v8, %v451_v4  ;;  %712 = sbr.rel (%p1052_p11) target bundleno = 318 (0x13e), region = 85 }
 0x120   : > { %v633_v13 = vpop.f32.mrf.mxu0  ;;  %v665_v14 = vpop.f32.mrf.mxu1 }
 0x121   : > { %700 = vst [vmem:[#allocation2 + $0x48] sm:$0xff] %v684_v11  ;;  %708 = vst [vmem:[#allocation2 + $0x28] sm:$0xff] %v692_v12  ;;  %v682_v15 = vadd.f32 %v633_v13, %v441_v9  ;;  %v690_v16 = vadd.f32 %v665_v14, %v449_v10 }
 0x123   : > { %698 = vst [vmem:[#allocation2 + $0x68] sm:$0xff] %v682_v15  ;;  %706 = vst [vmem:[#allocation2 + $0x70] sm:$0xff] %v690_v16 }
 0x124   : > { %v713_v17 = vld [vmem:[#allocation2 + $0x30] sm:$0xff]  ;;  %v714_v18 = vld [vmem:[#allocation2] sm:$0xff]  ;;  %v715_v23 = vld [vmem:[#allocation2 + $0x58] sm:$0xff] }
 0x125   : > { %v1456_v19 = vld [vmem:[%s1539_s2] ss:$0 sm:$0xff]  ;;  %v716_v24 = vld [vmem:[#allocation2 + $0x18] sm:$0xff]  ;;  %v1162_v29 = vld [vmem:[%s1540_s3 + $0x8] sm:$0xff]  }
 0x126   : > { %v736_v20 = vadd.f32 %v1456_v19, %v713_v17  ;;  %v737_v21 = vadd.f32 %v1456_v19, %v714_v18  ;;  %v1091_v22 = vld [vmem:[%s1540_s3] sm:$0xff]   ;;  %v738_v27 = vadd.f32 %v1456_v19, %v715_v23  ;;  %v739_v28 = vadd.f32 %v1456_v19, %v716_v24  ;;  %v717_v30 = vld [vmem:[#allocation2 + $0x50] sm:$0xff]  ;;  %v719_v37 = vld [vmem:[#allocation2 + $0x8] sm:$0xff] }
 0x127   : > { %v1092_v25 = vunpack.c.l.bf16 %v1091_v22  ;;  %v1093_v26 = vunpack.c.h.bf16 %v1091_v22  ;;  %v1096_v32 = vunpack.c.l.bf16 %v1162_v29  ;;  %v1097_v33 = vunpack.c.h.bf16 %v1162_v29  ;;  %v1163_v36 = vld [vmem:[%s1540_s3 + $0x10] sm:$0xff]   ;;  %v1164_v43 = vld [vmem:[%s1540_s3 + $0x18] sm:$0xff]   ;;  %v721_v48 = vld [vmem:[#allocation2 + $0x40] sm:$0xff] }
 0x128   : > { %v740_v34 = vadd.f32 %v1456_v19, %v717_v30  ;;  %v720_v38 = vld [vmem:[#allocation2 + $0x48] sm:$0xff]  ;;  %v1100_v41 = vunpack.c.l.bf16 %v1163_v36  ;;  %v1101_v42 = vunpack.c.h.bf16 %v1163_v36  ;;  %v742_v46 = vadd.f32 %v1456_v19, %v719_v37  ;;  %v722_v53 = vld [vmem:[#allocation2 + $0x20] sm:$0xff]  ;;  %v723_v59 = vld [vmem:[#allocation2 + $0x10] sm:$0xff] }
 0x129   : > { %v784_v39 = vadd.f32 %v1092_v25, %v736_v20  ;;  %v785_v40 = vadd.f32 %v1093_v26, %v737_v21  ;;  %v786_v44 = vadd.f32 %v1096_v32, %v738_v27  ;;  %v787_v45 = vadd.f32 %v1097_v33, %v739_v28  ;;  %v1165_v58 = vld [vmem:[%s1540_s3 + $0x20] sm:$0xff]   ;;  %v724_v0 = vld [vmem:[#allocation2 + $0x38] sm:$0xff]  ;;  %v1166_v1 = vld [vmem:[%s1540_s3 + $0x28] sm:$0xff]  }
 0x12a   : > { %v718_v31 = vld [vmem:[#allocation2 + $0x68] sm:$0xff]  ;;  %v743_v47 = vadd.f32 %v1456_v19, %v720_v38  ;;  %v788_v51 = vadd.f32 %v1100_v41, %v740_v34  ;;  %v1104_v56 = vunpack.c.l.bf16 %v1164_v43  ;;  %v1105_v57 = vunpack.c.h.bf16 %v1164_v43  ;;  %v725_v6 = vld [vmem:[#allocation2 + $0x60] sm:$0xff]  ;;  %v726_v11 = vld [vmem:[#allocation2 + $0x70] sm:$0xff] }
 0x12b   : > { %v741_v35 = vadd.f32 %v1456_v19, %v718_v31  ;;  %v800_v49 = vmax.f32 %v784_v39, 0.0  ;;  %v801_v50 = vmax.f32 %v785_v40, 0.0  ;;  %v802_v54 = vmax.f32 %v786_v44, 0.0  ;;  %v1167_v12 = vld [vmem:[%s1540_s3 + $0x30] sm:$0xff]   ;;  %v727_v22 = vld [vmem:[#allocation2 + $0x78] sm:$0xff]  ;;  %v728_v23 = vld [vmem:[#allocation2 + $0x28] sm:$0xff] }
 0x12c   : > { %v803_v55 = vmax.f32 %v787_v45, 0.0  ;;  %v804_v61 = vmax.f32 %v788_v51, 0.0  ;;  %v744_v63 = vadd.f32 %v1456_v19, %v721_v48  ;;  %v790_v3 = vadd.f32 %v1104_v56, %v742_v46  ;;  %v1168_v28 = vld [vmem:[%s1540_s3 + $0x38] sm:$0xff]  }
 0x12d   : > { %v789_v52 = vadd.f32 %v1101_v42, %v741_v35  ;;  %v1125_v60 = vpack.c.bf16 %v801_v50, %v800_v49  ;;  %v791_v4 = vadd.f32 %v1105_v57, %v743_v47  ;;  %v745_v5 = vadd.f32 %v1456_v19, %v722_v53 }
 0x12e   : > { %v1130_v2 = vpack.c.bf16 %v803_v55, %v802_v54  ;;  %v1108_v8 = vunpack.c.l.bf16 %v1165_v58  ;;  %v1109_v9 = vunpack.c.h.bf16 %v1165_v58  ;;  %v746_v10 = vadd.f32 %v1456_v19, %v723_v59 }
 0x12f   : > { %v805_v62 = vmax.f32 %v789_v52, 0.0  ;;  %1126 = vst [vmem:[%s1541_s4] sm:$0xff] %v1125_v60   ;;  %v806_v13 = vmax.f32 %v790_v3, 0.0  ;;  %v807_v14 = vmax.f32 %v791_v4, 0.0  ;;  %v747_v15 = vadd.f32 %v1456_v19, %v724_v0 }
 0x130   : > { %1169 = vst [vmem:[%s1541_s4 + $0x8] sm:$0xff] %v1130_v2   ;;  %v1112_v16 = vunpack.c.l.bf16 %v1166_v1  ;;  %v792_v17 = vadd.f32 %v1108_v8, %v744_v63  ;;  %v793_v18 = vadd.f32 %v1109_v9, %v745_v5  ;;  %v1113_v20 = vunpack.c.h.bf16 %v1166_v1 }
 0x131   : > { %v1135_v7 = vpack.c.bf16 %v805_v62, %v804_v61  ;;  %v748_v21 = vadd.f32 %v1456_v19, %v725_v6  ;;  %v1140_v24 = vpack.c.bf16 %v807_v14, %v806_v13  ;;  %v749_v26 = vadd.f32 %v1456_v19, %v726_v11 }
 0x132   : > { %v794_v25 = vadd.f32 %v1112_v16, %v746_v10  ;;  %v1116_v27 = vunpack.c.l.bf16 %v1167_v12  ;;  %v808_v29 = vmax.f32 %v792_v17, 0.0  ;;  %v809_v30 = vmax.f32 %v793_v18, 0.0 }
 0x133   : > { %1170 = vst [vmem:[%s1541_s4 + $0x10] sm:$0xff] %v1135_v7   ;;  %v795_v31 = vadd.f32 %v1113_v20, %v747_v15  ;;  %v1117_v32 = vunpack.c.h.bf16 %v1167_v12  ;;  %1171 = vst [vmem:[%s1541_s4 + $0x18] sm:$0xff] %v1140_v24   ;;  %v750_v35 = vadd.f32 %v1456_v19, %v727_v22  ;;  %v751_v36 = vadd.f32 %v1456_v19, %v728_v23 }
 0x134   : > { %v810_v33 = vmax.f32 %v794_v25, 0.0  ;;  %v796_v34 = vadd.f32 %v1116_v27, %v748_v21  ;;  %v1145_v37 = vpack.c.bf16 %v809_v30, %v808_v29  ;;  %v1120_v40 = vunpack.c.l.bf16 %v1168_v28 }
 0x135   : > { %v811_v38 = vmax.f32 %v795_v31, 0.0  ;;  %v797_v39 = vadd.f32 %v1117_v32, %v749_v26  ;;  %v1121_v42 = vunpack.c.h.bf16 %v1168_v28 }
 0x136   : > { %v812_v41 = vmax.f32 %v796_v34, 0.0  ;;  %1172 = vst [vmem:[%s1541_s4 + $0x20] sm:$0xff] %v1145_v37   ;;  %v798_v45 = vadd.f32 %v1120_v40, %v750_v35 }
 0x137   : > { %v1150_v43 = vpack.c.bf16 %v811_v38, %v810_v33  ;;  %v813_v44 = vmax.f32 %v797_v39, 0.0  ;;  %v799_v46 = vadd.f32 %v1121_v42, %v751_v36 }
 0x138   : > { %v814_v19 = vmax.f32 %v798_v45, 0.0 }
 0x139   : > { %1173 = vst [vmem:[%s1541_s4 + $0x28] sm:$0xff] %v1150_v43   ;;  %v1155_v47 = vpack.c.bf16 %v813_v44, %v812_v41  ;;  %v815_v48 = vmax.f32 %v799_v46, 0.0 }
 0x13b   : > { %1174 = vst [vmem:[%s1541_s4 + $0x30] sm:$0xff] %v1155_v47   ;;  %v1160_v49 = vpack.c.bf16 %v815_v48, %v814_v19 }
 0x13d   : > { %1175 = vst [vmem:[%s1541_s4 + $0x38] sm:$0xff] %v1160_v49  }
 0x13e PF: > { %s14_s19 = sadd.s32 1, %s1335_s19   ;;  %s1542_s15 = smov %s1323_s16 }
 0x13f   : > { %p11_p12 = scmp.ge.s32.totalorder %s14_s19, 7   ;;  %s1543_s16 = smov %s1398_s23 }
 0x140   : > { %s1544_s17 = smov %s1331_s18  ;;  %s1545_s18 = smov %s1547_s20 }
 0x141   :  { %13 = sbr.rel (!%p11_p12) target bundleno = 3 (0x3), region = 129 }

// kernel: forward.28
= control target key start
LH: loop header
LB: loop body
LE: loop exit
PB: predicated region body
PF: predicated region fallthrough
CT: control target
= control target key end

     0   :  { %s798_s12 = smov 0   ;;  %s800_s13 = smov 0   ;;  %s891_s0 = inlined_call_operand.vmem [shape: bf16[32,640], index: 0, kind: input, shape index: {}]   ;;  %s892_s1 = inlined_call_operand.vmem [shape: bf16[640,128], index: 1, kind: input, shape index: {}]   ;;  %s893_s2 = inlined_call_operand.vmem [shape: f32[1,128], index: 2, kind: input, shape index: {}]   ;;  %s894_s3 = inlined_call_operand.vmem [shape: bf16[32,128], index: 3, kind: output, shape index: {}]  }
   0x1   :  { %s802_s14 = smov 0   ;;  %s804_s15 = smov 0  }
   0x2   :  { %s806_s16 = smov 0  }
   0x3 LB: > { %s25_s17 = sadd.s32 1, %s771_s15  ;;  %p48_p1 = scmp.ne.s32.totalorder %s763_s13, %s759_s12  ;;  %s775_s16 = sphi %s806_s16, %s13_s16   ;;  %s771_s15 = sphi %s804_s15, %s898_s15   ;;  %s767_s14 = sphi %s802_s14, %s897_s14   ;;  %s763_s13 = sphi %s800_s13, %s896_s13   ;;  %s759_s12 = sphi %s798_s12, %s895_s12  }
   0x4   : > { %p26_p0 = scmp.ge.s32.totalorder %s25_s17, 5  ;;  %p49_p2 = scmp.eq.s32.totalorder %s775_s16, 0 }
   0x5   : > { %s41_s19 = sadd.s32 1, %s763_s13  ;;  %p613_p5 = scmp.ge.s32.totalorder %s775_s16, 5 }
   0x6   : > { %s900_s17 = smov (%p26_p0, %s25_s17), 0  ;;  %p50_p3 = por %p49_p2, %p48_p1 }
   0x7   : > { %s37_s18 = ssub.s32 %s771_s15, %s900_s17  ;;  %162 = sbr.rel (%p613_p5) target bundleno = 18 (0x12), region = 20 }
   0x8   : > { %p39_p4 = scmp.eq.s32.totalorder %s37_s18, 0 }
   0xa   : > { %s833_s20 = scalar_select %p39_p4, %s763_s13, %s41_s19  }
   0xc   : > { %165 = sbr.rel (!%p50_p3) target bundleno = 18 (0x12), region = 24  ;;  %s167_s21 = sand.u32 (%p50_p3), 1, %s763_s13  }
   0xd   : > { %s615_s22 = sshll.u32 (%p50_p3), %s771_s15, 2  ;;  %s614_s23 = sshll.u32 (%p50_p3), %s167_s21, 4 }
   0xe   : > { %s174_s26 = scalar_lea.vmem (%p50_p3), %s891_s0, %s615_s22  ;;  %s169_s27 = scalar_lea.vmem (%p50_p3), [#allocation3], %s614_s23 }
   0xf   : > { %v191_v0 = vld [vmem:[%s174_s26] sm:$0xf] (%p50_p3)  ;;  %v193_v1 = vld [vmem:[%s174_s26 + $0x14] sm:$0xf] (%p50_p3)  ;;  %v195_v2 = vld [vmem:[%s174_s26 + $0x28] sm:$0xf] (%p50_p3) }
  0x10   : > { %192 = vst [vmem:[%s169_s27] sm:$0xf] (%p50_p3), %v191_v0  ;;  %194 = vst [vmem:[%s169_s27 + $0x4] sm:$0xf] (%p50_p3), %v193_v1  ;;  %v197_v3 = vld [vmem:[%s174_s26 + $0x3c] sm:$0xf] (%p50_p3) }
  0x11   : > { %196 = vst [vmem:[%s169_s27 + $0x8] sm:$0xf] %v195_v2  ;;  %198 = vst [vmem:[%s169_s27 + $0xc] sm:$0xf] %v197_v3 }
  0x12 PF: > { %p616_p6 = scmp.ge.s32.totalorder %s775_s16, 1  ;;  %p241_p7 = scmp.lt.s32.totalorder %s775_s16, 6 }
  0x14   : > { %p242_p8 = pnand %p616_p6, %p241_p7 }
  0x15   : > { %s248_s28 = sand.u32 (!%p242_p8), 1, %s759_s12   ;;  %s618_s29 = sshll.u32 (!%p242_p8), %s767_s14, 4 }
  0x16   : > { %245 = sbr.rel (%p242_p8) target bundleno = 284 (0x11c), region = 69  ;;  %s845_s30 = sshll.u32 (!%p242_p8), %s248_s28, 4 }
  0x17   : > { %p287_p9 = scmp.lt.s32.totalorder (!%p242_p8), %s618_s29, 79  ;;  %s250_s8 = scalar_lea.vmem (!%p242_p8), [#allocation3], %s845_s30 }
  0x18   : > { %p620_p10 = scmp.ne.s32.totalorder (!%p242_p8), %s767_s14, 0 }
  0x1b   : > { %s902_s29 = smov (!%p287_p9, %s618_s29), 79  ;;  %311 = sbr.rel (%p620_p10) target bundleno = 35 (0x23), region = 77 }
  0x1c   : > { %s619_s4 = sshll.u32 %s902_s29, 2 }
  0x1d   : > { %s850_s7 = scalar_lea.vmem %s892_s1, %s619_s4 }
  0x20   : > { %v777_v4 = vmov 0.0  }
  0x21   : > { %312 = vst [vmem:[#allocation2 + $0x10] sm:$0xff] %v777_v4  ;;  %313 = vst [vmem:[#allocation2] sm:$0xff] %v777_v4 }
  0x22   : > { %314 = vst [vmem:[#allocation2 + $0x18] sm:$0xff] %v777_v4  ;;  %315 = vst [vmem:[#allocation2 + $0x8] sm:$0xff] %v777_v4 }
  0x23 PF: > { %v727_v5 = vld [vmem:[%s850_s7 + $0x38] sm:$0xff]   ;;  %v728_v6 = vld [vmem:[%s850_s7 + $0x30] sm:$0xff]   ;;  %v729_v7 = vld [vmem:[%s850_s7 + $0x28] sm:$0xff]   ;;  %p631_p11 = scmp.ne.s32.totalorder %s767_s14, 4 }
  0x24   : > { %666 = vmatprep.subr.bf16.mxu0 %v727_v5  ;;  %v730_v8 = vld [vmem:[%s850_s7 + $0x20] sm:$0xff]   ;;  %v731_v10 = vld [vmem:[%s850_s7 + $0x18] sm:$0xff]   ;;  %v732_v11 = vld [vmem:[%s850_s7 + $0x10] sm:$0xff]  }
  0x25   : > { %667 = vmatpush3.bf16.msra.mxu0 %v727_v5  ;;  %v735_v9 = vld [vmem:[%s250_s8] sm:$0xff]   ;;  %v733_v12 = vld [vmem:[%s850_s7 + $0x8] sm:$0xff]  }
  0x26   : > { %668 = vmatprep.subr.bf16.mxu0 %v728_v6  ;;  %682 = vmatprep.mubr.bf16.mxu0 %v735_v9  ;;  %v734_v13 = vld [vmem:[%s850_s7] sm:$0xff]   ;;  %v736_v14 = vld [vmem:[%s250_s8 + $0x8] sm:$0xff]  }
  0x28   : > { %v316_v17 = vld [vmem:[#allocation2 + $0x10] sm:$0xff]  ;;  %v317_v23 = vld [vmem:[#allocation2] sm:$0xff] }
  0x29   : > { %669 = vmatpush3.bf16.msra.mxu0 %v728_v6  ;;  %v318_v15 = vld [vmem:[#allocation2 + $0x18] sm:$0xff]  ;;  %v319_v20 = vld [vmem:[#allocation2 + $0x8] sm:$0xff] }
  0x2a   : > { %670 = vmatprep.subr.bf16.mxu0 %v729_v7 }
  0x2d   : > { %671 = vmatpush3.bf16.msra.mxu0 %v729_v7 }
  0x2e   : > { %672 = vmatprep.subr.bf16.mxu0 %v730_v8 }
  0x31   : > { %673 = vmatpush3.bf16.msra.mxu0 %v730_v8 }
  0x32   : > { %674 = vmatprep.subr.bf16.mxu0 %v731_v10 }
  0x35   : > { %675 = vmatpush3.bf16.msra.mxu0 %v731_v10 }
  0x36   : > { %676 = vmatprep.subr.bf16.mxu0 %v732_v11 }
  0x39   : > { %677 = vmatpush3.bf16.msra.mxu0 %v732_v11 }
  0x3a   : > { %678 = vmatprep.subr.bf16.mxu0 %v733_v12 }
  0x3d   : > { %679 = vmatpush3.bf16.msra.mxu0 %v733_v12 }
  0x3e   : > { %680 = vmatprep.subr.bf16.mxu0 %v734_v13 }
  0x41   : > { %681 = vmatpush3.bf16.msra.mxu0 %v734_v13 }
  0x44   : > { %683 = vmatmul.mubr.bf16.vlgmr.msra.gmra.mxu0 %v736_v14 }
 0x104   : > { %v684_v16 = vpop.f32.mrf.mxu0 }
 0x105   : > { %v451_v18 = vadd.f32 %v684_v16, %v318_v15 }
 0x106   : > { %v434_v19 = vpop.f32.mrf.mxu0 }
 0x107   : > { %455 = vst [vmem:[#allocation2 + $0x18] sm:$0xff] %v451_v18  ;;  %v449_v21 = vadd.f32 %v434_v19, %v316_v17 }
 0x108   : > { %v685_v22 = vpop.f32.mrf.mxu0 }
 0x109   : > { %453 = vst [vmem:[#allocation2 + $0x10] sm:$0xff] %v449_v21  ;;  %v452_v24 = vadd.f32 %v685_v22, %v319_v20  ;;  %460 = sbr.rel (%p631_p11) target bundleno = 284 (0x11c), region = 81 }
 0x10a   : > { %v437_v25 = vpop.f32.mrf.mxu0 }
 0x10b   : > { %456 = vst [vmem:[#allocation2 + $0x8] sm:$0xff] %v452_v24  ;;  %v450_v26 = vadd.f32 %v437_v25, %v317_v23 }
 0x10d   : > { %454 = vst [vmem:[#allocation2] sm:$0xff] %v450_v26 }
 0x10e   : > { %v632_v29 = vld [vmem:[%s893_s2] ss:$0 sm:$0xff]  ;;  %v463_v32 = vld [vmem:[#allocation2 + $0x18] sm:$0xff] }
 0x10f   : > { %v474_v34 = vadd.f32 %v632_v29, %v463_v32 }
 0x110   : > { %v461_v27 = vld [vmem:[#allocation2 + $0x10] sm:$0xff] }
 0x111   : > { %v472_v30 = vadd.f32 %v632_v29, %v461_v27  ;;  %v478_v38 = vmax.f32 %v474_v34, 0.0 }
 0x112   : > { %v464_v33 = vld [vmem:[#allocation2 + $0x8] sm:$0xff] }
 0x113   : > { %v475_v35 = vadd.f32 %v632_v29, %v464_v33  ;;  %v476_v36 = vmax.f32 %v472_v30, 0.0 }
 0x114   : > { %v462_v28 = vld [vmem:[#allocation2] sm:$0xff] }
 0x115   : > { %v473_v31 = vadd.f32 %v632_v29, %v462_v28  ;;  %v479_v39 = vmax.f32 %v475_v35, 0.0 }
 0x117   : > { %v477_v37 = vmax.f32 %v473_v31, 0.0  ;;  %v653_v41 = vpack.c.bf16 %v479_v39, %v478_v38 }
 0x119   : > { %v648_v40 = vpack.c.bf16 %v477_v37, %v476_v36  ;;  %655 = vst [vmem:[%s894_s3 + $0x8] sm:$0xff] %v653_v41  }
 0x11b   : > { %649 = vst [vmem:[%s894_s3] sm:$0xff] %v648_v40  }
 0x11c PF: > { %s13_s16 = sadd.s32 1, %s775_s16   ;;  %s895_s12 = smov %s763_s13 }
 0x11d   : > { %p10_p12 = scmp.ge.s32.totalorder %s13_s16, 7   ;;  %s896_s13 = smov %s833_s20 }
 0x11e   : > { %s897_s14 = smov %s771_s15  ;;  %s898_s15 = smov %s900_s17 }
 0x11f   :  { %12 = sbr.rel (!%p10_p12) target bundleno = 3 (0x3), region = 122 }

// kernel: forward.29
= control target key start
LH: loop header
LB: loop body
LE: loop exit
PB: predicated region body
PF: predicated region fallthrough
CT: control target
= control target key end

     0   :  { %s335_s1 = inlined_call_operand.vmem [shape: bf16[128,128], index: 1, kind: input, shape index: {}]   ;;  %s336_s0 = inlined_call_operand.vmem [shape: bf16[32,128], index: 0, kind: input, shape index: {}]   ;;  %s337_s2 = inlined_call_operand.vmem [shape: f32[1,128], index: 2, kind: input, shape index: {}]   ;;  %s338_s3 = inlined_call_operand.vmem [shape: bf16[32,128], index: 3, kind: output, shape index: {}]  }
   0x1   :  { %v266_v0 = vld [vmem:[%s335_s1 + $0x38] sm:$0xff]   ;;  %v267_v1 = vld [vmem:[%s335_s1 + $0x30] sm:$0xff]   ;;  %v268_v2 = vld [vmem:[%s335_s1 + $0x28] sm:$0xff]  }
   0x2   :  { %246 = vmatprep.subr.bf16.mxu0 %v266_v0  ;;  %v269_v3 = vld [vmem:[%s335_s1 + $0x20] sm:$0xff]   ;;  %v270_v5 = vld [vmem:[%s335_s1 + $0x18] sm:$0xff]   ;;  %v271_v6 = vld [vmem:[%s335_s1 + $0x10] sm:$0xff]  }
   0x3   :  { %247 = vmatpush3.bf16.msra.mxu0 %v266_v0  ;;  %v274_v4 = vld [vmem:[%s336_s0] sm:$0xff]   ;;  %v272_v7 = vld [vmem:[%s335_s1 + $0x8] sm:$0xff]  }
   0x4   :  { %248 = vmatprep.subr.bf16.mxu0 %v267_v1  ;;  %262 = vmatprep.mubr.bf16.mxu0 %v274_v4  ;;  %v273_v8 = vld [vmem:[%s335_s1] sm:$0xff]   ;;  %v275_v9 = vld [vmem:[%s336_s0 + $0x8] sm:$0xff]  }
   0x5   :  { %v216_v11 = vld [vmem:[%s337_s2] ss:$0 sm:$0xff] }
   0x7   :  { %249 = vmatpush3.bf16.msra.mxu0 %v267_v1 }
   0x8   :  { %250 = vmatprep.subr.bf16.mxu0 %v268_v2 }
   0xb   :  { %251 = vmatpush3.bf16.msra.mxu0 %v268_v2 }
   0xc   :  { %252 = vmatprep.subr.bf16.mxu0 %v269_v3 }
   0xf   :  { %253 = vmatpush3.bf16.msra.mxu0 %v269_v3 }
  0x10   :  { %254 = vmatprep.subr.bf16.mxu0 %v270_v5 }
  0x13   :  { %255 = vmatpush3.bf16.msra.mxu0 %v270_v5 }
  0x14   :  { %256 = vmatprep.subr.bf16.mxu0 %v271_v6 }
  0x17   :  { %257 = vmatpush3.bf16.msra.mxu0 %v271_v6 }
  0x18   :  { %258 = vmatprep.subr.bf16.mxu0 %v272_v7 }
  0x1b   :  { %259 = vmatpush3.bf16.msra.mxu0 %v272_v7 }
  0x1c   :  { %260 = vmatprep.subr.bf16.mxu0 %v273_v8 }
  0x1f   :  { %261 = vmatpush3.bf16.msra.mxu0 %v273_v8 }
  0x22   :  { %263 = vmatmul.mubr.bf16.vlgmr.msra.gmra.mxu0 %v275_v9 }
  0xe2   :  { %v264_v10 = vpop.f32.mrf.mxu0 }
  0xe3   :  { %v180_v14 = vadd.f32 %v264_v10, %v216_v11 }
  0xe4   :  { %v141_v12 = vpop.f32.mrf.mxu0 }
  0xe5   :  { %v178_v17 = vadd.f32 %v216_v11, %v141_v12 }
  0xe6   :  { %v265_v13 = vpop.f32.mrf.mxu0 }
  0xe7   :  { %v181_v15 = vadd.f32 %v265_v13, %v216_v11 }
  0xe8   :  { %v144_v16 = vpop.f32.mrf.mxu0 }
  0xe9   :  { %v233_v18 = vpack.c.bf16 %v181_v15, %v180_v14  ;;  %v179_v19 = vadd.f32 %v216_v11, %v144_v16 }
  0xeb   :  { %235 = vst [vmem:[%s338_s3 + $0x8] sm:$0xff] %v233_v18   ;;  %v228_v20 = vpack.c.bf16 %v179_v19, %v178_v17 }
  0xed   :  { %229 = vst [vmem:[%s338_s3] sm:$0xff] %v228_v20  }

// kernel: forward.30
= control target key start
LH: loop header
LB: loop body
LE: loop exit
PB: predicated region body
PF: predicated region fallthrough
CT: control target
= control target key end

     0   :  { %s1177_s15 = smov 0   ;;  %s1179_s16 = smov 0   ;;  %s1293_s0 = inlined_call_operand.vmem [shape: bf16[32,1152], index: 0, kind: input, shape index: {}]   ;;  %s1294_s1 = inlined_call_operand.vmem [shape: bf16[1152,128], index: 1, kind: input, shape index: {}]   ;;  %s1295_s2 = inlined_call_operand.vmem [shape: f32[1,128], index: 2, kind: input, shape index: {}]   ;;  %s1296_s3 = inlined_call_operand.vmem [shape: bf16[32,128], index: 3, kind: input, shape index: {}]   ;;  %s1297_s4 = inlined_call_operand.vmem [shape: bf16[32,128], index: 4, kind: output, shape index: {}]  }
   0x1   :  { %s1181_s17 = smov 0   ;;  %s1183_s18 = smov 0  }
   0x2   :  { %s1185_s19 = smov 0  }
   0x3 LB: > { %s26_s20 = sadd.s32 1, %s1145_s18  ;;  %p49_p1 = scmp.ne.s32.totalorder %s1137_s16, %s1133_s15  ;;  %s1149_s19 = sphi %s1185_s19, %s14_s19   ;;  %s1145_s18 = sphi %s1183_s18, %s1301_s18   ;;  %s1141_s17 = sphi %s1181_s17, %s1300_s17   ;;  %s1137_s16 = sphi %s1179_s16, %s1299_s16   ;;  %s1133_s15 = sphi %s1177_s15, %s1298_s15  }
   0x4   : > { %p27_p0 = scmp.ge.s32.totalorder %s26_s20, 3  ;;  %p50_p2 = scmp.eq.s32.totalorder %s1149_s19, 0 }
   0x5   : > { %s42_s22 = sadd.s32 1, %s1137_s16  ;;  %p900_p5 = scmp.ge.s32.totalorder %s1149_s19, 3 }
   0x6   : > { %s1303_s20 = smov (%p27_p0, %s26_s20), 0  ;;  %p51_p3 = por %p50_p2, %p49_p1 }
   0x7   : > { %s38_s21 = ssub.s32 %s1145_s18, %s1303_s20  ;;  %203 = sbr.rel (%p900_p5) target bundleno = 21 (0x15), region = 24 }
   0x8   : > { %p40_p4 = scmp.eq.s32.totalorder %s38_s21, 0 }
   0xa   : > { %s1212_s23 = scalar_select %p40_p4, %s1137_s16, %s42_s22  }
   0xc   : > { %206 = sbr.rel (!%p51_p3) target bundleno = 21 (0x15), region = 28  ;;  %s208_s24 = sand.u32 (%p51_p3), 1, %s1137_s16  }
   0xd   : > { %s953_s25 = smul.u32 (%p51_p3), 12, %s1145_s18 }
   0xe   : > { %s1036_s26 = smul.u32 (%p51_p3), 48, %s208_s24 }
   0xf   : > { %s216_s29 = scalar_lea.vmem (%p51_p3), %s1293_s0, %s953_s25 }
  0x10   : > { %v231_v0 = vld [vmem:[%s216_s29] sm:$0xff] (%p51_p3)  ;;  %v235_v2 = vld [vmem:[%s216_s29 + $0x48] sm:$0xff] (%p51_p3)  ;;  %s210_s30 = scalar_lea.vmem (%p51_p3), [#allocation3], %s1036_s26  ;;  %v906_v6 = vld [vmem:[%s216_s29 + $0x50] sm:$0xf] (%p51_p3) }
  0x11   : > { %v233_v1 = vld [vmem:[%s216_s29 + $0x24] sm:$0xff]  ;;  %232 = vst [vmem:[%s210_s30] sm:$0xff] %v231_v0  ;;  %236 = vst [vmem:[%s210_s30 + $0x18] sm:$0xff] %v235_v2  ;;  %v237_v3 = vld [vmem:[%s216_s29 + $0x6c] sm:$0xff] }
  0x12   : > { %234 = vst [vmem:[%s210_s30 + $0xc] sm:$0xff] %v233_v1  ;;  %v902_v4 = vld [vmem:[%s216_s29 + $0x8] sm:$0xf]  ;;  %v904_v5 = vld [vmem:[%s216_s29 + $0x2c] sm:$0xf]  ;;  %238 = vst [vmem:[%s210_s30 + $0x24] sm:$0xff] %v237_v3 }
  0x13   : > { %903 = vst [vmem:[%s210_s30 + $0x8] sm:$0xf] %v902_v4  ;;  %905 = vst [vmem:[%s210_s30 + $0x14] sm:$0xf] %v904_v5  ;;  %v908_v7 = vld [vmem:[%s216_s29 + $0x74] sm:$0xf] }
  0x14   : > { %907 = vst [vmem:[%s210_s30 + $0x20] sm:$0xf] %v906_v6  ;;  %909 = vst [vmem:[%s210_s30 + $0x2c] sm:$0xf] %v908_v7 }
  0x15 PF: > { %p910_p6 = scmp.ge.s32.totalorder %s1149_s19, 1  ;;  %p271_p7 = scmp.lt.s32.totalorder %s1149_s19, 4 }
  0x17   : > { %p272_p8 = pnand %p910_p6, %p271_p7 }
  0x18   : > { %s278_s5 = sand.u32 (!%p272_p8), 1, %s1133_s15   ;;  %s327_s6 = smul.u32 (!%p272_p8), 48, %s1141_s17 }
  0x19   : > { %275 = sbr.rel (%p272_p8) target bundleno = 301 (0x12d), region = 58  ;;  %p912_p10 = scmp.ne.s32.totalorder (!%p272_p8), %s1141_s17, 0 }
  0x1a   : > { %s1037_s7 = smul.u32 (!%p272_p8), 48, %s278_s5  ;;  %p328_p9 = scmp.lt.s32.totalorder (!%p272_p8), %s327_s6, 143 }
  0x1c   : > { %s1229_s12 = scalar_lea.vmem (!%p272_p8), [#allocation3], %s1037_s7 }
  0x1e   : > { %s1305_s6 = smov (!%p328_p9, %s327_s6), 143  ;;  %361 = sbr.rel (%p912_p10) target bundleno = 38 (0x26), region = 66 }
  0x1f   : > { %s911_s8 = sshll.u32 %s1305_s6, 2 }
  0x20   : > { %s1227_s11 = scalar_lea.vmem %s1294_s1, %s911_s8 }
  0x23   : > { %v1151_v8 = vmov 0.0  }
  0x24   : > { %362 = vst [vmem:[#allocation2 + $0x10] sm:$0xff] %v1151_v8  ;;  %363 = vst [vmem:[#allocation2] sm:$0xff] %v1151_v8 }
  0x25   : > { %364 = vst [vmem:[#allocation2 + $0x18] sm:$0xff] %v1151_v8  ;;  %365 = vst [vmem:[#allocation2 + $0x8] sm:$0xff] %v1151_v8 }
  0x26 PF: > { %v1079_v9 = vld [vmem:[%s1227_s11 + $0x78] sm:$0xff]   ;;  %v1082_v12 = vld [vmem:[%s1227_s11 + $0x70] sm:$0xff]   ;;  %v1085_v15 = vld [vmem:[%s1227_s11 + $0x68] sm:$0xff]   ;;  %p943_p11 = scmp.ne.s32.totalorder %s1141_s17, 2 }
  0x27   : > { %v1080_v10 = vld [vmem:[%s1227_s11 + $0x38] sm:$0xff]   ;;  %978 = vmatprep.subr.bf16.mxu0 %v1079_v9  ;;  %v1083_v13 = vld [vmem:[%s1227_s11 + $0x30] sm:$0xff]   ;;  %v1086_v16 = vld [vmem:[%s1227_s11 + $0x28] sm:$0xff]  }
  0x28   : > { %v1081_v11 = vld [vmem:[%s1227_s11 + $0xb8] sm:$0xff]   ;;  %979 = vmatpush3.bf16.msra.mxu0 %v1080_v10  ;;  %v1084_v14 = vld [vmem:[%s1227_s11 + $0xb0] sm:$0xff]   ;;  %v1087_v17 = vld [vmem:[%s1227_s11 + $0xa8] sm:$0xff]  }
  0x29   : > { %1016 = vmatprep.subr.bf16.mxu1 %v1081_v11  ;;  %980 = vmatprep.subr.bf16.mxu0 %v1082_v12  ;;  %v1088_v18 = vld [vmem:[%s1227_s11 + $0x60] sm:$0xff]   ;;  %v1091_v21 = vld [vmem:[%s1227_s11 + $0x58] sm:$0xff]   ;;  %v1094_v24 = vld [vmem:[%s1227_s11 + $0x50] sm:$0xff]  }
  0x2a   : > { %1017 = vmatpush3.bf16.msra.mxu1 %v1081_v11  ;;  %v1089_v19 = vld [vmem:[%s1227_s11 + $0x20] sm:$0xff]   ;;  %v1093_v22 = vld [vmem:[%s1227_s11 + $0x98] sm:$0xff]   ;;  %v1096_v25 = vld [vmem:[%s1227_s11 + $0x90] sm:$0xff]  }
  0x2b   : > { %1018 = vmatprep.subr.bf16.mxu1 %v1084_v14  ;;  %v1090_v20 = vld [vmem:[%s1227_s11 + $0xa0] sm:$0xff]   ;;  %v1092_v23 = vld [vmem:[%s1227_s11 + $0x18] sm:$0xff]   ;;  %v1095_v26 = vld [vmem:[%s1227_s11 + $0x10] sm:$0xff]  }
  0x2c   : > { %981 = vmatpush3.bf16.msra.mxu0 %v1083_v13  ;;  %v1097_v27 = vld [vmem:[%s1227_s11 + $0x48] sm:$0xff]   ;;  %v1100_v30 = vld [vmem:[%s1227_s11 + $0x40] sm:$0xff]   ;;  %v366_v44 = vld [vmem:[#allocation2 + $0x10] sm:$0xff] }
  0x2d   : > { %982 = vmatprep.subr.bf16.mxu0 %v1085_v15  ;;  %v1098_v28 = vld [vmem:[%s1227_s11 + $0x8] sm:$0xff]   ;;  %v1102_v31 = vld [vmem:[%s1227_s11 + $0x80] sm:$0xff]   ;;  %v368_v58 = vld [vmem:[#allocation2 + $0x18] sm:$0xff] }
  0x2e   : > { %1019 = vmatpush3.bf16.msra.mxu1 %v1084_v14  ;;  %v1099_v29 = vld [vmem:[%s1227_s11 + $0x88] sm:$0xff]   ;;  %v1105_v32 = vld [vmem:[%s1229_s12 + $0x4] ss:$12 sps:$4 sm:$0xff]  }
  0x2f   : > { %1020 = vmatprep.subr.bf16.mxu1 %v1087_v17  ;;  %v1106_v33 = vld [vmem:[%s1229_s12 + $0x8] ss:$12 sps:$4 sm:$0xff]   ;;  %634 = vmatprep.mubr.bf16.mxu0 %v1105_v32  ;;  %v1103_v35 = vld [vmem:[%s1229_s12] ss:$12 sps:$4 sm:$0xff]   ;;  %v1110_v38 = vld [vmem:[%s1229_s12 + $0x18] ss:$12 sps:$4 sm:$0xff]  }
  0x30   : > { %983 = vmatpush3.bf16.msra.mxu0 %v1086_v16  ;;  %v1101_v34 = vld [vmem:[%s1227_s11] sm:$0xff]   ;;  %1032 = vmatprep.mubr.bf16.mxu1 %v1106_v33  ;;  %v1108_v36 = vld [vmem:[%s1229_s12 + $0x1c] ss:$12 sps:$4 sm:$0xff]  }
  0x31   : > { %984 = vmatprep.subr.bf16.mxu0 %v1088_v18  ;;  %v1107_v37 = vld [vmem:[%s1229_s12 + $0x20] ss:$12 sps:$4 sm:$0xff]  }
  0x32   : > { %1021 = vmatpush3.bf16.msra.mxu1 %v1087_v17  ;;  %v367_v52 = vld [vmem:[#allocation2] sm:$0xff]  ;;  %v369_v0 = vld [vmem:[#allocation2 + $0x8] sm:$0xff] }
  0x33   : > { %1022 = vmatprep.subr.bf16.mxu1 %v1090_v20 }
  0x34   : > { %985 = vmatpush3.bf16.msra.mxu0 %v1089_v19 }
  0x35   : > { %986 = vmatprep.subr.bf16.mxu0 %v1091_v21 }
  0x36   : > { %1023 = vmatpush3.bf16.msra.mxu1 %v1090_v20 }
  0x37   : > { %1024 = vmatprep.subr.bf16.mxu1 %v1093_v22 }
  0x38   : > { %987 = vmatpush3.bf16.msra.mxu0 %v1092_v23 }
  0x39   : > { %988 = vmatprep.subr.bf16.mxu0 %v1094_v24 }
  0x3a   : > { %1025 = vmatpush3.bf16.msra.mxu1 %v1093_v22 }
  0x3b   : > { %1026 = vmatprep.subr.bf16.mxu1 %v1096_v25 }
  0x3c   : > { %989 = vmatpush3.bf16.msra.mxu0 %v1095_v26 }
  0x3d   : > { %990 = vmatprep.subr.bf16.mxu0 %v1097_v27 }
  0x3e   : > { %1027 = vmatpush3.bf16.msra.mxu1 %v1096_v25 }
  0x3f   : > { %1028 = vmatprep.subr.bf16.mxu1 %v1099_v29 }
  0x40   : > { %991 = vmatpush3.bf16.msra.mxu0 %v1098_v28 }
  0x41   : > { %992 = vmatprep.subr.bf16.mxu0 %v1100_v30 }
  0x42   : > { %1029 = vmatpush3.bf16.msra.mxu1 %v1099_v29 }
  0x43   : > { %1030 = vmatprep.subr.bf16.mxu1 %v1102_v31 }
  0x44   : > { %993 = vmatpush3.bf16.msra.mxu0 %v1101_v34 }
  0x46   : > { %1031 = vmatpush3.bf16.msra.mxu1 %v1102_v31 }
  0x47   : > { %635 = vmatmul.mubr.bf16.vlgmr.msra.gmra.mxu0 %v1103_v35 }
  0x48   : > { %642 = vmatprep.mubr.bf16.mxu0 %v1108_v36 }
  0x49   : > { %1033 = vmatmul.mubr.bf16.vlgmr.msra.gmra.mxu1 %v1107_v37 }
  0x4f   : > { %643 = vmatmul.mubr.bf16.gmra.mxu0 %v1110_v38 }
 0x107   : > { %v994_v39 = vpop.f32.mrf.mxu0 }
 0x109   : > { %v995_v40 = vpop.f32.mrf.mxu0  ;;  %v1034_v41 = vpop.f32.mrf.mxu1 }
 0x10a   : > { %v996_v42 = vadd.f32 %v995_v40, %v994_v39 }
 0x10b   : > { %v997_v43 = vpop.f32.mrf.mxu0  ;;  %v685_v45 = vpop.f32.mrf.mxu1 }
 0x10c   : > { %v686_v46 = vadd.f32 %v996_v42, %v685_v45 }
 0x10d   : > { %v998_v47 = vpop.f32.mrf.mxu0  ;;  %v1035_v48 = vpop.f32.mrf.mxu1 }
 0x10e   : > { %v700_v49 = vadd.f32 %v686_v46, %v366_v44  ;;  %v999_v50 = vadd.f32 %v998_v47, %v997_v43 }
 0x10f   : > { %v1000_v51 = vpop.f32.mrf.mxu0  ;;  %v688_v53 = vpop.f32.mrf.mxu1 }
 0x110   : > { %704 = vst [vmem:[#allocation2 + $0x10] sm:$0xff] %v700_v49  ;;  %v689_v54 = vadd.f32 %v999_v50, %v688_v53 }
 0x111   : > { %v1001_v55 = vpop.f32.mrf.mxu0 }
 0x112   : > { %v701_v56 = vadd.f32 %v689_v54, %v367_v52  ;;  %v1002_v57 = vadd.f32 %v1001_v55, %v1000_v51 }
 0x113   : > { %v1003_v59 = vpop.f32.mrf.mxu0 }
 0x114   : > { %705 = vst [vmem:[#allocation2] sm:$0xff] %v701_v56  ;;  %v694_v60 = vadd.f32 %v1034_v41, %v1002_v57 }
 0x115   : > { %v1004_v61 = vpop.f32.mrf.mxu0 }
 0x116   : > { %v702_v62 = vadd.f32 %v694_v60, %v368_v58  ;;  %v1005_v63 = vadd.f32 %v1004_v61, %v1003_v59 }
 0x118   : > { %706 = vst [vmem:[#allocation2 + $0x18] sm:$0xff] %v702_v62  ;;  %v697_v1 = vadd.f32 %v1035_v48, %v1005_v63  ;;  %711 = sbr.rel (%p943_p11) target bundleno = 301 (0x12d), region = 70 }
 0x11a   : > { %v703_v2 = vadd.f32 %v697_v1, %v369_v0 }
 0x11c   : > { %707 = vst [vmem:[#allocation2 + $0x8] sm:$0xff] %v703_v2 }
 0x11d   : > { %v712_v3 = vld [vmem:[#allocation2 + $0x10] sm:$0xff]  ;;  %v713_v4 = vld [vmem:[#allocation2] sm:$0xff]  ;;  %v976_v15 = vld [vmem:[%s1296_s3 + $0x8] sm:$0xff]  }
 0x11e   : > { %v944_v5 = vld [vmem:[%s1295_s2] ss:$0 sm:$0xff]  ;;  %v964_v16 = vunpack.c.l.bf16 %v976_v15  ;;  %v965_v17 = vunpack.c.h.bf16 %v976_v15 }
 0x11f   : > { %v723_v6 = vadd.f32 %v944_v5, %v712_v3  ;;  %v724_v7 = vadd.f32 %v944_v5, %v713_v4  ;;  %v959_v8 = vld [vmem:[%s1296_s3] sm:$0xff]   ;;  %v714_v9 = vld [vmem:[#allocation2 + $0x18] sm:$0xff] }
 0x120   : > { %v960_v11 = vunpack.c.l.bf16 %v959_v8  ;;  %v961_v12 = vunpack.c.h.bf16 %v959_v8  ;;  %v725_v13 = vadd.f32 %v944_v5, %v714_v9 }
 0x122   : > { %v735_v18 = vadd.f32 %v960_v11, %v723_v6  ;;  %v736_v19 = vadd.f32 %v961_v12, %v724_v7  ;;  %v737_v20 = vadd.f32 %v964_v16, %v725_v13 }
 0x123   : > { %v715_v10 = vld [vmem:[#allocation2 + $0x8] sm:$0xff] }
 0x124   : > { %v726_v14 = vadd.f32 %v944_v5, %v715_v10  ;;  %v739_v22 = vmax.f32 %v735_v18, 0.0  ;;  %v740_v23 = vmax.f32 %v736_v19, 0.0  ;;  %v741_v24 = vmax.f32 %v737_v20, 0.0 }
 0x126   : > { %v738_v21 = vadd.f32 %v965_v17, %v726_v14  ;;  %v969_v26 = vpack.c.bf16 %v740_v23, %v739_v22 }
 0x128   : > { %v742_v25 = vmax.f32 %v738_v21, 0.0  ;;  %970 = vst [vmem:[%s1297_s4] sm:$0xff] %v969_v26  }
 0x12a   : > { %v974_v27 = vpack.c.bf16 %v742_v25, %v741_v24 }
 0x12c   : > { %977 = vst [vmem:[%s1297_s4 + $0x8] sm:$0xff] %v974_v27  }
 0x12d PF: > { %s14_s19 = sadd.s32 1, %s1149_s19   ;;  %s1298_s15 = smov %s1137_s16 }
 0x12e   : > { %p11_p12 = scmp.ge.s32.totalorder %s14_s19, 5   ;;  %s1299_s16 = smov %s1212_s23 }
 0x12f   : > { %s1300_s17 = smov %s1145_s18  ;;  %s1301_s18 = smov %s1303_s20 }
 0x130   :  { %13 = sbr.rel (!%p11_p12) target bundleno = 3 (0x3), region = 120 }

// kernel: forward.31
= control target key start
LH: loop header
LB: loop body
LE: loop exit
PB: predicated region body
PF: predicated region fallthrough
CT: control target
= control target key end

     0   :  { %s1072_s12 = smov 0   ;;  %s1074_s13 = smov 0   ;;  %s1182_s0 = inlined_call_operand.vmem [shape: bf16[32,1152], index: 0, kind: input, shape index: {}]   ;;  %s1183_s1 = inlined_call_operand.vmem [shape: bf16[1152,128], index: 1, kind: input, shape index: {}]   ;;  %s1184_s2 = inlined_call_operand.vmem [shape: f32[1,128], index: 2, kind: input, shape index: {}]   ;;  %s1185_s3 = inlined_call_operand.vmem [shape: bf16[32,128], index: 3, kind: output, shape index: {}]  }
   0x1   :  { %s1076_s14 = smov 0   ;;  %s1078_s15 = smov 0  }
   0x2   :  { %s1080_s16 = smov 0  }
   0x3 LB: > { %s25_s17 = sadd.s32 1, %s1045_s15  ;;  %p48_p1 = scmp.ne.s32.totalorder %s1037_s13, %s1033_s12  ;;  %s1049_s16 = sphi %s1080_s16, %s13_s16   ;;  %s1045_s15 = sphi %s1078_s15, %s1189_s15   ;;  %s1041_s14 = sphi %s1076_s14, %s1188_s14   ;;  %s1037_s13 = sphi %s1074_s13, %s1187_s13   ;;  %s1033_s12 = sphi %s1072_s12, %s1186_s12  }
   0x4   : > { %p26_p0 = scmp.ge.s32.totalorder %s25_s17, 3  ;;  %p49_p2 = scmp.eq.s32.totalorder %s1049_s16, 0 }
   0x5   : > { %s41_s19 = sadd.s32 1, %s1037_s13  ;;  %p809_p5 = scmp.ge.s32.totalorder %s1049_s16, 3 }
   0x6   : > { %s1191_s17 = smov (%p26_p0, %s25_s17), 0  ;;  %p50_p3 = por %p49_p2, %p48_p1 }
   0x7   : > { %s37_s18 = ssub.s32 %s1045_s15, %s1191_s17  ;;  %162 = sbr.rel (%p809_p5) target bundleno = 21 (0x15), region = 20 }
   0x8   : > { %p39_p4 = scmp.eq.s32.totalorder %s37_s18, 0 }
   0xa   : > { %s1107_s20 = scalar_select %p39_p4, %s1037_s13, %s41_s19  }
   0xc   : > { %165 = sbr.rel (!%p50_p3) target bundleno = 21 (0x15), region = 24  ;;  %s167_s21 = sand.u32 (%p50_p3), 1, %s1037_s13  }
   0xd   : > { %s862_s22 = smul.u32 (%p50_p3), 12, %s1045_s15 }
   0xe   : > { %s936_s23 = smul.u32 (%p50_p3), 48, %s167_s21 }
   0xf   : > { %s175_s26 = scalar_lea.vmem (%p50_p3), %s1182_s0, %s862_s22 }
  0x10   : > { %v190_v0 = vld [vmem:[%s175_s26] sm:$0xff] (%p50_p3)  ;;  %v194_v2 = vld [vmem:[%s175_s26 + $0x48] sm:$0xff] (%p50_p3)  ;;  %s169_s27 = scalar_lea.vmem (%p50_p3), [#allocation3], %s936_s23  ;;  %v815_v6 = vld [vmem:[%s175_s26 + $0x50] sm:$0xf] (%p50_p3) }
  0x11   : > { %v192_v1 = vld [vmem:[%s175_s26 + $0x24] sm:$0xff]  ;;  %191 = vst [vmem:[%s169_s27] sm:$0xff] %v190_v0  ;;  %195 = vst [vmem:[%s169_s27 + $0x18] sm:$0xff] %v194_v2  ;;  %v196_v3 = vld [vmem:[%s175_s26 + $0x6c] sm:$0xff] }
  0x12   : > { %193 = vst [vmem:[%s169_s27 + $0xc] sm:$0xff] %v192_v1  ;;  %v811_v4 = vld [vmem:[%s175_s26 + $0x8] sm:$0xf]  ;;  %v813_v5 = vld [vmem:[%s175_s26 + $0x2c] sm:$0xf]  ;;  %197 = vst [vmem:[%s169_s27 + $0x24] sm:$0xff] %v196_v3 }
  0x13   : > { %812 = vst [vmem:[%s169_s27 + $0x8] sm:$0xf] %v811_v4  ;;  %814 = vst [vmem:[%s169_s27 + $0x14] sm:$0xf] %v813_v5  ;;  %v817_v7 = vld [vmem:[%s175_s26 + $0x74] sm:$0xf] }
  0x14   : > { %816 = vst [vmem:[%s169_s27 + $0x20] sm:$0xf] %v815_v6  ;;  %818 = vst [vmem:[%s169_s27 + $0x2c] sm:$0xf] %v817_v7 }
  0x15 PF: > { %p819_p6 = scmp.ge.s32.totalorder %s1049_s16, 1  ;;  %p230_p7 = scmp.lt.s32.totalorder %s1049_s16, 4 }
  0x17   : > { %p231_p8 = pnand %p819_p6, %p230_p7 }
  0x18   : > { %s237_s28 = sand.u32 (!%p231_p8), 1, %s1033_s12   ;;  %s276_s29 = smul.u32 (!%p231_p8), 48, %s1041_s14 }
  0x19   : > { %234 = sbr.rel (%p231_p8) target bundleno = 299 (0x12b), region = 54  ;;  %p821_p10 = scmp.ne.s32.totalorder (!%p231_p8), %s1041_s14, 0 }
  0x1a   : > { %s937_s30 = smul.u32 (!%p231_p8), 48, %s237_s28  ;;  %p277_p9 = scmp.lt.s32.totalorder (!%p231_p8), %s276_s29, 143 }
  0x1c   : > { %s1124_s8 = scalar_lea.vmem (!%p231_p8), [#allocation3], %s937_s30 }
  0x1e   : > { %s1193_s29 = smov (!%p277_p9, %s276_s29), 143  ;;  %301 = sbr.rel (%p821_p10) target bundleno = 38 (0x26), region = 62 }
  0x1f   : > { %s820_s4 = sshll.u32 %s1193_s29, 2 }
  0x20   : > { %s1122_s7 = scalar_lea.vmem %s1183_s1, %s820_s4 }
  0x23   : > { %v1051_v8 = vmov 0.0  }
  0x24   : > { %302 = vst [vmem:[#allocation2 + $0x10] sm:$0xff] %v1051_v8  ;;  %303 = vst [vmem:[#allocation2] sm:$0xff] %v1051_v8 }
  0x25   : > { %304 = vst [vmem:[#allocation2 + $0x18] sm:$0xff] %v1051_v8  ;;  %305 = vst [vmem:[#allocation2 + $0x8] sm:$0xff] %v1051_v8 }
  0x26 PF: > { %v979_v9 = vld [vmem:[%s1122_s7 + $0x78] sm:$0xff]   ;;  %v982_v12 = vld [vmem:[%s1122_s7 + $0x70] sm:$0xff]   ;;  %v985_v15 = vld [vmem:[%s1122_s7 + $0x68] sm:$0xff]   ;;  %p852_p11 = scmp.ne.s32.totalorder %s1041_s14, 2 }
  0x27   : > { %v980_v10 = vld [vmem:[%s1122_s7 + $0x38] sm:$0xff]   ;;  %878 = vmatprep.subr.bf16.mxu0 %v979_v9  ;;  %v983_v13 = vld [vmem:[%s1122_s7 + $0x30] sm:$0xff]   ;;  %v986_v16 = vld [vmem:[%s1122_s7 + $0x28] sm:$0xff]  }
  0x28   : > { %v981_v11 = vld [vmem:[%s1122_s7 + $0xb8] sm:$0xff]   ;;  %879 = vmatpush3.bf16.msra.mxu0 %v980_v10  ;;  %v984_v14 = vld [vmem:[%s1122_s7 + $0xb0] sm:$0xff]   ;;  %v987_v17 = vld [vmem:[%s1122_s7 + $0xa8] sm:$0xff]  }
  0x29   : > { %916 = vmatprep.subr.bf16.mxu1 %v981_v11  ;;  %880 = vmatprep.subr.bf16.mxu0 %v982_v12  ;;  %v988_v18 = vld [vmem:[%s1122_s7 + $0x60] sm:$0xff]   ;;  %v991_v21 = vld [vmem:[%s1122_s7 + $0x58] sm:$0xff]   ;;  %v994_v24 = vld [vmem:[%s1122_s7 + $0x50] sm:$0xff]  }
  0x2a   : > { %917 = vmatpush3.bf16.msra.mxu1 %v981_v11  ;;  %v989_v19 = vld [vmem:[%s1122_s7 + $0x20] sm:$0xff]   ;;  %v993_v22 = vld [vmem:[%s1122_s7 + $0x98] sm:$0xff]   ;;  %v996_v25 = vld [vmem:[%s1122_s7 + $0x90] sm:$0xff]  }
  0x2b   : > { %918 = vmatprep.subr.bf16.mxu1 %v984_v14  ;;  %v990_v20 = vld [vmem:[%s1122_s7 + $0xa0] sm:$0xff]   ;;  %v992_v23 = vld [vmem:[%s1122_s7 + $0x18] sm:$0xff]   ;;  %v995_v26 = vld [vmem:[%s1122_s7 + $0x10] sm:$0xff]  }
  0x2c   : > { %881 = vmatpush3.bf16.msra.mxu0 %v983_v13  ;;  %v997_v27 = vld [vmem:[%s1122_s7 + $0x48] sm:$0xff]   ;;  %v1000_v30 = vld [vmem:[%s1122_s7 + $0x40] sm:$0xff]   ;;  %v306_v44 = vld [vmem:[#allocation2 + $0x10] sm:$0xff] }
  0x2d   : > { %882 = vmatprep.subr.bf16.mxu0 %v985_v15  ;;  %v998_v28 = vld [vmem:[%s1122_s7 + $0x8] sm:$0xff]   ;;  %v1002_v31 = vld [vmem:[%s1122_s7 + $0x80] sm:$0xff]   ;;  %v308_v58 = vld [vmem:[#allocation2 + $0x18] sm:$0xff] }
  0x2e   : > { %919 = vmatpush3.bf16.msra.mxu1 %v984_v14  ;;  %v999_v29 = vld [vmem:[%s1122_s7 + $0x88] sm:$0xff]   ;;  %v1005_v32 = vld [vmem:[%s1124_s8 + $0x4] ss:$12 sps:$4 sm:$0xff]  }
  0x2f   : > { %920 = vmatprep.subr.bf16.mxu1 %v987_v17  ;;  %v1006_v33 = vld [vmem:[%s1124_s8 + $0x8] ss:$12 sps:$4 sm:$0xff]   ;;  %574 = vmatprep.mubr.bf16.mxu0 %v1005_v32  ;;  %v1003_v35 = vld [vmem:[%s1124_s8] ss:$12 sps:$4 sm:$0xff]   ;;  %v1010_v38 = vld [vmem:[%s1124_s8 + $0x18] ss:$12 sps:$4 sm:$0xff]  }
  0x30   : > { %883 = vmatpush3.bf16.msra.mxu0 %v986_v16  ;;  %v1001_v34 = vld [vmem:[%s1122_s7] sm:$0xff]   ;;  %932 = vmatprep.mubr.bf16.mxu1 %v1006_v33  ;;  %v1008_v36 = vld [vmem:[%s1124_s8 + $0x1c] ss:$12 sps:$4 sm:$0xff]  }
  0x31   : > { %884 = vmatprep.subr.bf16.mxu0 %v988_v18  ;;  %v1007_v37 = vld [vmem:[%s1124_s8 + $0x20] ss:$12 sps:$4 sm:$0xff]  }
  0x32   : > { %921 = vmatpush3.bf16.msra.mxu1 %v987_v17  ;;  %v307_v52 = vld [vmem:[#allocation2] sm:$0xff]  ;;  %v309_v0 = vld [vmem:[#allocation2 + $0x8] sm:$0xff] }
  0x33   : > { %922 = vmatprep.subr.bf16.mxu1 %v990_v20 }
  0x34   : > { %885 = vmatpush3.bf16.msra.mxu0 %v989_v19 }
  0x35   : > { %886 = vmatprep.subr.bf16.mxu0 %v991_v21 }
  0x36   : > { %923 = vmatpush3.bf16.msra.mxu1 %v990_v20 }
  0x37   : > { %924 = vmatprep.subr.bf16.mxu1 %v993_v22 }
  0x38   : > { %887 = vmatpush3.bf16.msra.mxu0 %v992_v23 }
  0x39   : > { %888 = vmatprep.subr.bf16.mxu0 %v994_v24 }
  0x3a   : > { %925 = vmatpush3.bf16.msra.mxu1 %v993_v22 }
  0x3b   : > { %926 = vmatprep.subr.bf16.mxu1 %v996_v25 }
  0x3c   : > { %889 = vmatpush3.bf16.msra.mxu0 %v995_v26 }
  0x3d   : > { %890 = vmatprep.subr.bf16.mxu0 %v997_v27 }
  0x3e   : > { %927 = vmatpush3.bf16.msra.mxu1 %v996_v25 }
  0x3f   : > { %928 = vmatprep.subr.bf16.mxu1 %v999_v29 }
  0x40   : > { %891 = vmatpush3.bf16.msra.mxu0 %v998_v28 }
  0x41   : > { %892 = vmatprep.subr.bf16.mxu0 %v1000_v30 }
  0x42   : > { %929 = vmatpush3.bf16.msra.mxu1 %v999_v29 }
  0x43   : > { %930 = vmatprep.subr.bf16.mxu1 %v1002_v31 }
  0x44   : > { %893 = vmatpush3.bf16.msra.mxu0 %v1001_v34 }
  0x46   : > { %931 = vmatpush3.bf16.msra.mxu1 %v1002_v31 }
  0x47   : > { %575 = vmatmul.mubr.bf16.vlgmr.msra.gmra.mxu0 %v1003_v35 }
  0x48   : > { %582 = vmatprep.mubr.bf16.mxu0 %v1008_v36 }
  0x49   : > { %933 = vmatmul.mubr.bf16.vlgmr.msra.gmra.mxu1 %v1007_v37 }
  0x4f   : > { %583 = vmatmul.mubr.bf16.gmra.mxu0 %v1010_v38 }
 0x107   : > { %v894_v39 = vpop.f32.mrf.mxu0 }
 0x109   : > { %v895_v40 = vpop.f32.mrf.mxu0  ;;  %v934_v41 = vpop.f32.mrf.mxu1 }
 0x10a   : > { %v896_v42 = vadd.f32 %v895_v40, %v894_v39 }
 0x10b   : > { %v897_v43 = vpop.f32.mrf.mxu0  ;;  %v625_v45 = vpop.f32.mrf.mxu1 }
 0x10c   : > { %v626_v46 = vadd.f32 %v896_v42, %v625_v45 }
 0x10d   : > { %v898_v47 = vpop.f32.mrf.mxu0  ;;  %v935_v48 = vpop.f32.mrf.mxu1 }
 0x10e   : > { %v640_v49 = vadd.f32 %v626_v46, %v306_v44  ;;  %v899_v50 = vadd.f32 %v898_v47, %v897_v43 }
 0x10f   : > { %v900_v51 = vpop.f32.mrf.mxu0  ;;  %v628_v53 = vpop.f32.mrf.mxu1 }
 0x110   : > { %644 = vst [vmem:[#allocation2 + $0x10] sm:$0xff] %v640_v49  ;;  %v629_v54 = vadd.f32 %v899_v50, %v628_v53 }
 0x111   : > { %v901_v55 = vpop.f32.mrf.mxu0 }
 0x112   : > { %v641_v56 = vadd.f32 %v629_v54, %v307_v52  ;;  %v902_v57 = vadd.f32 %v901_v55, %v900_v51 }
 0x113   : > { %v903_v59 = vpop.f32.mrf.mxu0 }
 0x114   : > { %645 = vst [vmem:[#allocation2] sm:$0xff] %v641_v56  ;;  %v634_v60 = vadd.f32 %v934_v41, %v902_v57 }
 0x115   : > { %v904_v61 = vpop.f32.mrf.mxu0 }
 0x116   : > { %v642_v62 = vadd.f32 %v634_v60, %v308_v58  ;;  %v905_v63 = vadd.f32 %v904_v61, %v903_v59 }
 0x118   : > { %646 = vst [vmem:[#allocation2 + $0x18] sm:$0xff] %v642_v62  ;;  %v637_v1 = vadd.f32 %v935_v48, %v905_v63  ;;  %651 = sbr.rel (%p852_p11) target bundleno = 299 (0x12b), region = 66 }
 0x11a   : > { %v643_v2 = vadd.f32 %v637_v1, %v309_v0 }
 0x11c   : > { %647 = vst [vmem:[#allocation2 + $0x8] sm:$0xff] %v643_v2 }
 0x11d   : > { %v652_v3 = vld [vmem:[#allocation2 + $0x10] sm:$0xff]  ;;  %v653_v4 = vld [vmem:[#allocation2] sm:$0xff] }
 0x11e   : > { %v853_v5 = vld [vmem:[%s1184_s2] ss:$0 sm:$0xff] }
 0x11f   : > { %v663_v6 = vadd.f32 %v853_v5, %v652_v3  ;;  %v664_v7 = vadd.f32 %v853_v5, %v653_v4  ;;  %v654_v8 = vld [vmem:[#allocation2 + $0x18] sm:$0xff] }
 0x120   : > { %v665_v10 = vadd.f32 %v853_v5, %v654_v8 }
 0x121   : > { %v667_v12 = vmax.f32 %v663_v6, 0.0  ;;  %v668_v13 = vmax.f32 %v664_v7, 0.0 }
 0x122   : > { %v669_v14 = vmax.f32 %v665_v10, 0.0 }
 0x123   : > { %v655_v9 = vld [vmem:[#allocation2 + $0x8] sm:$0xff]  ;;  %v870_v16 = vpack.c.bf16 %v668_v13, %v667_v12 }
 0x124   : > { %v666_v11 = vadd.f32 %v853_v5, %v655_v9 }
 0x125   : > { %871 = vst [vmem:[%s1185_s3] sm:$0xff] %v870_v16  }
 0x126   : > { %v670_v15 = vmax.f32 %v666_v11, 0.0 }
 0x128   : > { %v875_v17 = vpack.c.bf16 %v670_v15, %v669_v14 }
 0x12a   : > { %877 = vst [vmem:[%s1185_s3 + $0x8] sm:$0xff] %v875_v17  }
 0x12b PF: > { %s13_s16 = sadd.s32 1, %s1049_s16   ;;  %s1186_s12 = smov %s1037_s13 }
 0x12c   : > { %p10_p12 = scmp.ge.s32.totalorder %s13_s16, 5   ;;  %s1187_s13 = smov %s1107_s20 }
 0x12d   : > { %s1188_s14 = smov %s1045_s15  ;;  %s1189_s15 = smov %s1191_s17 }
 0x12e   :  { %12 = sbr.rel (!%p10_p12) target bundleno = 3 (0x3), region = 113 }

// kernel: forward.33
= control target key start
LH: loop header
LB: loop body
LE: loop exit
PB: predicated region body
PF: predicated region fallthrough
CT: control target
= control target key end

     0   :  { %s1036_s12 = smov 0   ;;  %s1038_s13 = smov 0   ;;  %s1135_s0 = inlined_call_operand.vmem [shape: bf16[8,1152], index: 0, kind: input, shape index: {}]   ;;  %s1136_s1 = inlined_call_operand.vmem [shape: bf16[1152,256], index: 1, kind: input, shape index: {}]   ;;  %s1137_s2 = inlined_call_operand.vmem [shape: f32[1,256], index: 2, kind: input, shape index: {}]   ;;  %s1138_s3 = inlined_call_operand.vmem [shape: bf16[8,256], index: 3, kind: output, shape index: {}]  }
   0x1   :  { %s1040_s14 = smov 0  }
   0x2 LB: > { %s25_s15 = sadd.s32 1, %s1008_s13  ;;  %p825_p0 = scmp.ge.s32.totalorder %s1012_s14, 1  ;;  %s1012_s14 = sphi %s1040_s14, %s13_s14   ;;  %s1008_s13 = sphi %s1038_s13, %s1140_s13   ;;  %s1004_s12 = sphi %s1036_s12, %s1139_s12  }
   0x3   : > { %p26_p1 = scmp.ge.s32.totalorder %s25_s15, 3  ;;  %p194_p2 = scmp.lt.s32.totalorder %s1012_s14, 4 }
   0x5   : > { %s1142_s15 = smov (%p26_p1, %s25_s15), 0  ;;  %p195_p3 = pnand %p825_p0, %p194_p2 }
   0x6   : > { %s240_s16 = smul.u32 (!%p195_p3), 3, %s1004_s12  ;;  %p829_p6 = scmp.ne.s32.totalorder (!%p195_p3), %s1004_s12, 0 }
   0x7   : > { %198 = sbr.rel (%p195_p3) target bundleno = 302 (0x12e), region = 32 }
   0x8   : > { %s250_s17 = smul.u32 (!%p195_p3), 48, %s1004_s12  ;;  %p243_p4 = scmp.lt.s32.totalorder (!%p195_p3), %s240_s16, 8 }
   0xa   : > { %p252_p5 = scmp.lt.s32.totalorder (!%p195_p3), %s250_s17, 143 }
   0xc   : > { %s1144_s16 = smov (!%p243_p4, %s240_s16), 8  ;;  %s1146_s17 = smov (!%p252_p5, %s250_s17), 143 }
   0xd   : > { %s826_s18 = sshll.u32 %s1144_s16, 2  ;;  %s887_s22 = sshll.u32 %s1146_s17, 3 }
   0xe   : > { %s1061_s21 = scalar_lea.vmem %s1135_s0, %s826_s18  ;;  %s1066_s25 = scalar_lea.vmem %s1136_s1, %s887_s22 }
   0xf   : > { %281 = sbr.rel (%p829_p6) target bundleno = 22 (0x16), region = 36 }
  0x14   : > { %v1014_v0 = vmov 0.0  }
  0x15   : > { %282 = vst [vmem:[#allocation2] sm:$0xff] %v1014_v0  ;;  %283 = vst [vmem:[#allocation2 + $0x8] sm:$0xff] %v1014_v0 }
  0x16 PF: > { %v915_v1 = vld [vmem:[%s1066_s25 + $0x74] ss:$8 sps:$4 sm:$0xff]   ;;  %v917_v2 = vld [vmem:[%s1066_s25 + $0x70] ss:$8 sps:$4 sm:$0xff]   ;;  %v1015_v3 = vmov 0   ;;  %v286_v34 = vld [vmem:[%s1061_s21] sm:$0xff] }
  0x17   : > { %660 = vmatprep.mubr.bf16.mxu1 %v1015_v3  ;;  %587 = vmatprep.subr.bf16.mxu0 %v915_v1  ;;  %v918_v4 = vld [vmem:[%s1066_s25 + $0x64] ss:$8 sps:$4 sm:$0xff]   ;;  %v920_v5 = vld [vmem:[%s1066_s25 + $0x60] ss:$8 sps:$4 sm:$0xff]   ;;  %v921_v6 = vld [vmem:[%s1066_s25 + $0x54] ss:$8 sps:$4 sm:$0xff]   ;;  %v831_v36 = vcombine.high %v286_v34, %v286_v34  ;;  %v830_v53 = vcombine.low %v286_v34, %v286_v34 }
  0x18   : > { %588 = vmatpush1.bf16.msra.mxu0 %v917_v2  ;;  %v923_v7 = vld [vmem:[%s1066_s25 + $0x50] ss:$8 sps:$4 sm:$0xff]   ;;  %v924_v8 = vld [vmem:[%s1066_s25 + $0x44] ss:$8 sps:$4 sm:$0xff]   ;;  %v936_v9 = vld [vmem:[%s1066_s25 + $0x174] ss:$8 sps:$4 sm:$0xff]  }
  0x19   : > { %589 = vmatprep.subr.bf16.mxu0 %v918_v4  ;;  %v938_v10 = vld [vmem:[%s1066_s25 + $0x170] ss:$8 sps:$4 sm:$0xff]   ;;  %v926_v11 = vld [vmem:[%s1066_s25 + $0x40] ss:$8 sps:$4 sm:$0xff]   ;;  %v927_v12 = vld [vmem:[%s1066_s25 + $0x34] ss:$8 sps:$4 sm:$0xff]   ;;  %628 = vmatprep.subr.bf16.mxu1 %v936_v9 }
  0x1a   : > { %v942_v13 = vld [vmem:[%s1066_s25 + $0x164] ss:$8 sps:$4 sm:$0xff]   ;;  %629 = vmatpush1.bf16.msra.mxu1 %v938_v10  ;;  %v944_v14 = vld [vmem:[%s1066_s25 + $0x160] ss:$8 sps:$4 sm:$0xff]   ;;  %v929_v15 = vld [vmem:[%s1066_s25 + $0x30] ss:$8 sps:$4 sm:$0xff]   ;;  %619 = vmatprep.mubr.bf16.mxu0 %v831_v36 }
  0x1b   : > { %630 = vmatprep.subr.bf16.mxu1 %v942_v13  ;;  %v948_v16 = vld [vmem:[%s1066_s25 + $0x154] ss:$8 sps:$4 sm:$0xff]   ;;  %v930_v17 = vld [vmem:[%s1066_s25 + $0x24] ss:$8 sps:$4 sm:$0xff]   ;;  %v950_v18 = vld [vmem:[%s1066_s25 + $0x150] ss:$8 sps:$4 sm:$0xff]  }
  0x1c   : > { %590 = vmatpush1.bf16.msra.mxu0 %v920_v5  ;;  %v954_v19 = vld [vmem:[%s1066_s25 + $0x144] ss:$8 sps:$4 sm:$0xff]   ;;  %v932_v20 = vld [vmem:[%s1066_s25 + $0x20] ss:$8 sps:$4 sm:$0xff]   ;;  %v933_v21 = vld [vmem:[%s1066_s25 + $0x14] ss:$8 sps:$4 sm:$0xff]  }
  0x1d   : > { %591 = vmatprep.subr.bf16.mxu0 %v921_v6  ;;  %v956_v22 = vld [vmem:[%s1066_s25 + $0x140] ss:$8 sps:$4 sm:$0xff]   ;;  %v960_v23 = vld [vmem:[%s1066_s25 + $0x134] ss:$8 sps:$4 sm:$0xff]   ;;  %v935_v24 = vld [vmem:[%s1066_s25 + $0x10] ss:$8 sps:$4 sm:$0xff]  }
  0x1e   : > { %631 = vmatpush1.bf16.msra.mxu1 %v944_v14  ;;  %v939_v25 = vld [vmem:[%s1066_s25 + $0x4] ss:$8 sps:$4 sm:$0xff]   ;;  %v962_v26 = vld [vmem:[%s1066_s25 + $0x130] ss:$8 sps:$4 sm:$0xff]   ;;  %v941_v28 = vld [vmem:[%s1066_s25] ss:$8 sps:$4 sm:$0xff]  }
  0x1f   : > { %632 = vmatprep.subr.bf16.mxu1 %v948_v16  ;;  %v966_v27 = vld [vmem:[%s1066_s25 + $0x124] ss:$8 sps:$4 sm:$0xff]   ;;  %v945_v29 = vld [vmem:[%s1066_s25 + $0xf4] ss:$8 sps:$4 sm:$0xff]   ;;  %v968_v30 = vld [vmem:[%s1066_s25 + $0x120] ss:$8 sps:$4 sm:$0xff]  }
  0x20   : > { %592 = vmatpush1.bf16.msra.mxu0 %v923_v7  ;;  %v972_v31 = vld [vmem:[%s1066_s25 + $0x114] ss:$8 sps:$4 sm:$0xff]   ;;  %v947_v32 = vld [vmem:[%s1066_s25 + $0xf0] ss:$8 sps:$4 sm:$0xff]   ;;  %v951_v33 = vld [vmem:[%s1066_s25 + $0xe4] ss:$8 sps:$4 sm:$0xff]  }
  0x21   : > { %593 = vmatprep.subr.bf16.mxu0 %v924_v8  ;;  %v974_v35 = vld [vmem:[%s1066_s25 + $0x110] ss:$8 sps:$4 sm:$0xff]   ;;  %v978_v37 = vld [vmem:[%s1066_s25 + $0x104] ss:$8 sps:$4 sm:$0xff]   ;;  %v953_v38 = vld [vmem:[%s1066_s25 + $0xe0] ss:$8 sps:$4 sm:$0xff]  }
  0x22   : > { %633 = vmatpush1.bf16.msra.mxu1 %v950_v18  ;;  %v957_v39 = vld [vmem:[%s1066_s25 + $0xd4] ss:$8 sps:$4 sm:$0xff]   ;;  %v980_v40 = vld [vmem:[%s1066_s25 + $0x100] ss:$8 sps:$4 sm:$0xff]   ;;  %v959_v41 = vld [vmem:[%s1066_s25 + $0xd0] ss:$8 sps:$4 sm:$0xff]  }
  0x23   : > { %634 = vmatprep.subr.bf16.mxu1 %v954_v19  ;;  %v963_v42 = vld [vmem:[%s1066_s25 + $0xc4] ss:$8 sps:$4 sm:$0xff]   ;;  %v984_v43 = vld [vmem:[%s1061_s21 + $0x8] ss:$0 sps:$4 sm:$0xff]   ;;  %v969_v45 = vld [vmem:[%s1066_s25 + $0xb4] ss:$8 sps:$4 sm:$0xff]  }
  0x24   : > { %594 = vmatpush1.bf16.msra.mxu0 %v926_v11  ;;  %v965_v44 = vld [vmem:[%s1066_s25 + $0xc0] ss:$8 sps:$4 sm:$0xff]   ;;  %v971_v46 = vld [vmem:[%s1066_s25 + $0xb0] ss:$8 sps:$4 sm:$0xff]   ;;  %v975_v47 = vld [vmem:[%s1066_s25 + $0xa4] ss:$8 sps:$4 sm:$0xff]  }
  0x25   : > { %595 = vmatprep.subr.bf16.mxu0 %v927_v12  ;;  %v977_v48 = vld [vmem:[%s1066_s25 + $0xa0] ss:$8 sps:$4 sm:$0xff]   ;;  %v981_v49 = vld [vmem:[%s1066_s25 + $0x94] ss:$8 sps:$4 sm:$0xff]   ;;  %v983_v50 = vld [vmem:[%s1066_s25 + $0x90] ss:$8 sps:$4 sm:$0xff]  }
  0x26   : > { %635 = vmatpush1.bf16.msra.mxu1 %v956_v22  ;;  %v985_v51 = vld [vmem:[%s1066_s25 + $0x84] ss:$8 sps:$4 sm:$0xff]   ;;  %v987_v52 = vld [vmem:[%s1066_s25 + $0x80] ss:$8 sps:$4 sm:$0xff]   ;;  %p881_p7 = scmp.ne.s32.totalorder %s1004_s12, 2 }
  0x27   : > { %636 = vmatprep.subr.bf16.mxu1 %v960_v23  ;;  %v284_v58 = vld [vmem:[#allocation2] sm:$0xff]  ;;  %v285_v61 = vld [vmem:[#allocation2 + $0x8] sm:$0xff] }
  0x28   : > { %596 = vmatpush1.bf16.msra.mxu0 %v929_v15 }
  0x29   : > { %597 = vmatprep.subr.bf16.mxu0 %v930_v17 }
  0x2a   : > { %637 = vmatpush1.bf16.msra.mxu1 %v962_v26 }
  0x2b   : > { %638 = vmatprep.subr.bf16.mxu1 %v966_v27 }
  0x2c   : > { %598 = vmatpush1.bf16.msra.mxu0 %v932_v20 }
  0x2d   : > { %599 = vmatprep.subr.bf16.mxu0 %v933_v21 }
  0x2e   : > { %639 = vmatpush1.bf16.msra.mxu1 %v968_v30 }
  0x2f   : > { %640 = vmatprep.subr.bf16.mxu1 %v972_v31 }
  0x30   : > { %600 = vmatpush1.bf16.msra.mxu0 %v935_v24 }
  0x31   : > { %601 = vmatprep.subr.bf16.mxu0 %v939_v25 }
  0x32   : > { %641 = vmatpush1.bf16.msra.mxu1 %v974_v35 }
  0x33   : > { %642 = vmatprep.subr.bf16.mxu1 %v978_v37 }
  0x34   : > { %602 = vmatpush1.bf16.msra.mxu0 %v941_v28 }
  0x35   : > { %603 = vmatprep.subr.bf16.mxu0 %v945_v29 }
  0x36   : > { %643 = vmatpush1.bf16.msra.mxu1 %v980_v40 }
  0x38   : > { %604 = vmatpush2.bf16.msra.mxu0 %v947_v32 }
  0x39   : > { %605 = vmatprep.subr.bf16.mxu0 %v951_v33  ;;  %661 = vmatmul.mubr.bf16.vlgmr.msra.gmra.mxu1 %v984_v43 }
  0x3c   : > { %606 = vmatpush2.bf16.msra.mxu0 %v953_v38 }
  0x3d   : > { %607 = vmatprep.subr.bf16.mxu0 %v957_v39 }
  0x40   : > { %608 = vmatpush2.bf16.msra.mxu0 %v959_v41 }
  0x41   : > { %609 = vmatprep.subr.bf16.mxu0 %v963_v42 }
  0x44   : > { %610 = vmatpush2.bf16.msra.mxu0 %v965_v44 }
  0x45   : > { %611 = vmatprep.subr.bf16.mxu0 %v969_v45 }
  0x48   : > { %612 = vmatpush2.bf16.msra.mxu0 %v971_v46 }
  0x49   : > { %613 = vmatprep.subr.bf16.mxu0 %v975_v47 }
  0x4c   : > { %614 = vmatpush2.bf16.msra.mxu0 %v977_v48 }
  0x4d   : > { %615 = vmatprep.subr.bf16.mxu0 %v981_v49 }
  0x50   : > { %616 = vmatpush2.bf16.msra.mxu0 %v983_v50 }
  0x51   : > { %617 = vmatprep.subr.bf16.mxu0 %v985_v51 }
  0x54   : > { %618 = vmatpush2.bf16.msra.mxu0 %v987_v52 }
  0x57   : > { %620 = vmatmul.mubr.bf16.vlgmr.msra.gmra.mxu0 %v830_v53 }
  0xf9   : > { %v662_v54 = vpop.f32.mrf.mxu1 }
  0xfb   : > { %v664_v55 = vpop.f32.mrf.mxu1 }
  0xfd   : > { %v666_v56 = vpop.f32.mrf.mxu1 }
  0xff   : > { %v667_v57 = vpop.f32.mrf.mxu1 }
 0x117   : > { %v621_v59 = vpop.f32.mrf.mxu0 }
 0x118   : > { %v663_v60 = vadd.f32 %v662_v54, %v621_v59 }
 0x119   : > { %v623_v62 = vpop.f32.mrf.mxu0 }
 0x11a   : > { %v669_v63 = vadd.f32 %v663_v60, %v284_v58  ;;  %v665_v0 = vadd.f32 %v664_v55, %v623_v62  ;;  %676 = sbr.rel (%p881_p7) target bundleno = 302 (0x12e), region = 40 }
 0x11b   : > { %v625_v1 = vpop.f32.mrf.mxu0 }
 0x11c   : > { %671 = vst [vmem:[#allocation2] sm:$0xff] %v669_v63  ;;  %v670_v2 = vadd.f32 %v665_v0, %v285_v61 }
 0x11d   : > { %v626_v3 = vpop.f32.mrf.mxu0 }
 0x11e   : > { %672 = vst [vmem:[#allocation2 + $0x8] sm:$0xff] %v670_v2 }
 0x11f   : > { %v681_v4 = vlaneseq  ;;  %v679_v6 = vld [vmem:[%s1137_s2] sm:$0x3] }
 0x121   : > { %v682_v5 = vshrl.u32 %v681_v4, 7 }
 0x123   : > { %v683_v7 = vsub.s32 0, %v682_v5  ;;  %v687_v8 = vsub.s32 1, %v682_v5  ;;  %v677_v9 = vld [vmem:[#allocation2] sm:$0xff] }
 0x125   : > { %v678_v10 = vld [vmem:[#allocation2 + $0x8] sm:$0xff]  ;;  %v684_v11 = vrot.slane %v679_v6, %v683_v7  ;;  %v688_v12 = vrot.slane %v679_v6, %v687_v8 }
 0x127   : > { %v691_v13 = vadd.f32 %v684_v11, %v677_v9  ;;  %v692_v14 = vadd.f32 %v688_v12, %v678_v10 }
 0x129   : > { %v693_v15 = vmax.f32 %v691_v13, 0.0  ;;  %v694_v16 = vmax.f32 %v692_v14, 0.0 }
 0x12b   : > { %v888_v17 = vpack.c.bf16 %v694_v16, %v693_v15 }
 0x12d   : > { %703 = vst [vmem:[%s1138_s3] sm:$0xff] %v888_v17 }
 0x12e PF: > { %s13_s14 = sadd.s32 1, %s1012_s14   ;;  %s1139_s12 = smov %s1008_s13 }
 0x12f   : > { %p10_p8 = scmp.ge.s32.totalorder %s13_s14, 5   ;;  %s1140_s13 = smov %s1142_s15 }
 0x131   :  { %12 = sbr.rel (!%p10_p8) target bundleno = 2 (0x2), region = 76 }

// kernel: forward.34
= control target key start
LH: loop header
LB: loop body
LE: loop exit
PB: predicated region body
PF: predicated region fallthrough
CT: control target
= control target key end

     0   :  { %v240_v1 = vmov 0   ;;  %v172_v18 = vlaneseq  ;;  %s318_s1 = inlined_call_operand.vmem [shape: bf16[128,256], index: 1, kind: input, shape index: {}]   ;;  %s319_s0 = inlined_call_operand.vmem [shape: bf16[8,128], index: 0, kind: input, shape index: {}]   ;;  %s320_s2 = inlined_call_operand.vmem [shape: f32[1,256], index: 2, kind: input, shape index: {}]   ;;  %s321_s3 = inlined_call_operand.vmem [shape: bf16[8,256], index: 3, kind: output, shape index: {}]  }
   0x1   :  { %v216_v0 = vld [vmem:[%s318_s1 + $0x74] ss:$8 sps:$4 sm:$0xff]   ;;  %152 = vmatprep.mubr.bf16.mxu0 %v240_v1  ;;  %v218_v2 = vld [vmem:[%s318_s1 + $0x70] ss:$8 sps:$4 sm:$0xff]   ;;  %v219_v3 = vld [vmem:[%s318_s1 + $0x64] ss:$8 sps:$4 sm:$0xff]  }
   0x2   :  { %120 = vmatprep.subr.bf16.mxu0 %v216_v0  ;;  %v221_v4 = vld [vmem:[%s318_s1 + $0x60] ss:$8 sps:$4 sm:$0xff]   ;;  %v222_v5 = vld [vmem:[%s318_s1 + $0x54] ss:$8 sps:$4 sm:$0xff]   ;;  %v224_v6 = vld [vmem:[%s318_s1 + $0x50] ss:$8 sps:$4 sm:$0xff]  }
   0x3   :  { %121 = vmatpush1.bf16.msra.mxu0 %v218_v2  ;;  %v225_v7 = vld [vmem:[%s318_s1 + $0x44] ss:$8 sps:$4 sm:$0xff]   ;;  %v227_v8 = vld [vmem:[%s318_s1 + $0x40] ss:$8 sps:$4 sm:$0xff]   ;;  %v228_v9 = vld [vmem:[%s318_s1 + $0x34] ss:$8 sps:$4 sm:$0xff]  }
   0x4   :  { %122 = vmatprep.subr.bf16.mxu0 %v219_v3  ;;  %v230_v10 = vld [vmem:[%s318_s1 + $0x30] ss:$8 sps:$4 sm:$0xff]   ;;  %v231_v11 = vld [vmem:[%s318_s1 + $0x24] ss:$8 sps:$4 sm:$0xff]   ;;  %v233_v12 = vld [vmem:[%s318_s1 + $0x20] ss:$8 sps:$4 sm:$0xff]  }
   0x5   :  { %v234_v13 = vld [vmem:[%s318_s1 + $0x14] ss:$8 sps:$4 sm:$0xff]   ;;  %v236_v14 = vld [vmem:[%s318_s1 + $0x10] ss:$8 sps:$4 sm:$0xff]   ;;  %v237_v15 = vld [vmem:[%s318_s1 + $0x4] ss:$8 sps:$4 sm:$0xff]  }
   0x6   :  { %v239_v16 = vld [vmem:[%s318_s1] ss:$8 sps:$4 sm:$0xff]   ;;  %v173_v19 = vshrl.u32 %v172_v18, 7 }
   0x7   :  { %123 = vmatpush1.bf16.msra.mxu0 %v221_v4  ;;  %v23_v17 = vld [vmem:[%s319_s0] sm:$0xf] }
   0x8   :  { %124 = vmatprep.subr.bf16.mxu0 %v222_v5  ;;  %v174_v20 = vsub.s32 0, %v173_v19  ;;  %v178_v21 = vsub.s32 1, %v173_v19  ;;  %v170_v22 = vld [vmem:[%s320_s2] sm:$0x3] }
   0xa   :  { %v175_v23 = vrot.slane %v170_v22, %v174_v20  ;;  %v179_v24 = vrot.slane %v170_v22, %v178_v21 }
   0xb   :  { %125 = vmatpush1.bf16.msra.mxu0 %v224_v6 }
   0xc   :  { %126 = vmatprep.subr.bf16.mxu0 %v225_v7 }
   0xf   :  { %127 = vmatpush1.bf16.msra.mxu0 %v227_v8 }
  0x10   :  { %128 = vmatprep.subr.bf16.mxu0 %v228_v9 }
  0x13   :  { %129 = vmatpush1.bf16.msra.mxu0 %v230_v10 }
  0x14   :  { %130 = vmatprep.subr.bf16.mxu0 %v231_v11 }
  0x17   :  { %131 = vmatpush1.bf16.msra.mxu0 %v233_v12 }
  0x18   :  { %132 = vmatprep.subr.bf16.mxu0 %v234_v13 }
  0x1b   :  { %133 = vmatpush1.bf16.msra.mxu0 %v236_v14 }
  0x1c   :  { %134 = vmatprep.subr.bf16.mxu0 %v237_v15 }
  0x1f   :  { %135 = vmatpush1.bf16.msra.mxu0 %v239_v16 }
  0x22   :  { %153 = vmatmul.mubr.bf16.vlgmr.msra.gmra.mxu0 %v23_v17 }
  0xe2   :  { %v154_v25 = vpop.f32.mrf.mxu0 }
  0xe3   :  { %v182_v27 = vadd.f32 %v175_v23, %v154_v25 }
  0xe4   :  { %v156_v26 = vpop.f32.mrf.mxu0 }
  0xe5   :  { %v183_v28 = vadd.f32 %v179_v24, %v156_v26 }
  0xe6   :  { %v158_v29 = vpop.f32.mrf.mxu0 }
  0xe7   :  { %v214_v30 = vpack.c.bf16 %v183_v28, %v182_v27 }
  0xe8   :  { %v159_v31 = vpop.f32.mrf.mxu0 }
  0xe9   :  { %192 = vst [vmem:[%s321_s3] sm:$0xff] %v214_v30 }

// kernel: forward.35
= control target key start
LH: loop header
LB: loop body
LE: loop exit
PB: predicated region body
PF: predicated region fallthrough
CT: control target
= control target key end

     0   :  { %s1131_s15 = smov 0   ;;  %s1133_s16 = smov 0   ;;  %s1233_s0 = inlined_call_operand.vmem [shape: bf16[8,2304], index: 0, kind: input, shape index: {}]   ;;  %s1234_s1 = inlined_call_operand.vmem [shape: bf16[2304,256], index: 1, kind: input, shape index: {}]   ;;  %s1235_s2 = inlined_call_operand.vmem [shape: f32[1,256], index: 2, kind: input, shape index: {}]   ;;  %s1236_s3 = inlined_call_operand.vmem [shape: bf16[8,256], index: 3, kind: input, shape index: {}]   ;;  %s1237_s4 = inlined_call_operand.vmem [shape: bf16[8,256], index: 4, kind: output, shape index: {}]  }
   0x1   :  { %s1135_s17 = smov 0  }
   0x2 LB: > { %s26_s18 = sadd.s32 1, %s1098_s16  ;;  %p915_p0 = scmp.ge.s32.totalorder %s1102_s17, 1  ;;  %s1102_s17 = sphi %s1135_s17, %s14_s17   ;;  %s1098_s16 = sphi %s1133_s16, %s1239_s16   ;;  %s1094_s15 = sphi %s1131_s15, %s1238_s15  }
   0x3   : > { %p27_p1 = scmp.ge.s32.totalorder %s26_s18, 6  ;;  %p236_p2 = scmp.lt.s32.totalorder %s1102_s17, 7 }
   0x5   : > { %s1241_s18 = smov (%p27_p1, %s26_s18), 0  ;;  %p237_p3 = pnand %p915_p0, %p236_p2 }
   0x6   : > { %s293_s19 = smul.u32 (!%p237_p3), 3, %s1094_s15  ;;  %p919_p6 = scmp.ne.s32.totalorder (!%p237_p3), %s1094_s15, 0 }
   0x7   : > { %240 = sbr.rel (%p237_p3) target bundleno = 304 (0x130), region = 36 }
   0x8   : > { %s303_s20 = smul.u32 (!%p237_p3), 48, %s1094_s15  ;;  %p296_p4 = scmp.lt.s32.totalorder (!%p237_p3), %s293_s19, 17 }
   0xa   : > { %p305_p5 = scmp.lt.s32.totalorder (!%p237_p3), %s303_s20, 287 }
   0xc   : > { %s1243_s19 = smov (!%p296_p4, %s293_s19), 17  ;;  %s1245_s20 = smov (!%p305_p5, %s303_s20), 287 }
   0xd   : > { %s916_s21 = sshll.u32 %s1243_s19, 2  ;;  %s977_s25 = sshll.u32 %s1245_s20, 3 }
   0xe   : > { %s1156_s24 = scalar_lea.vmem %s1233_s0, %s916_s21  ;;  %s1161_s28 = scalar_lea.vmem %s1234_s1, %s977_s25 }
   0xf   : > { %344 = sbr.rel (%p919_p6) target bundleno = 22 (0x16), region = 40 }
  0x14   : > { %v1104_v0 = vmov 0.0  }
  0x15   : > { %345 = vst [vmem:[#allocation2] sm:$0xff] %v1104_v0  ;;  %346 = vst [vmem:[#allocation2 + $0x8] sm:$0xff] %v1104_v0 }
  0x16 PF: > { %v1005_v1 = vld [vmem:[%s1161_s28 + $0x74] ss:$8 sps:$4 sm:$0xff]   ;;  %v1007_v2 = vld [vmem:[%s1161_s28 + $0x70] ss:$8 sps:$4 sm:$0xff]   ;;  %v1105_v3 = vmov 0   ;;  %v349_v34 = vld [vmem:[%s1156_s24] sm:$0xff] }
  0x17   : > { %723 = vmatprep.mubr.bf16.mxu1 %v1105_v3  ;;  %650 = vmatprep.subr.bf16.mxu0 %v1005_v1  ;;  %v1008_v4 = vld [vmem:[%s1161_s28 + $0x64] ss:$8 sps:$4 sm:$0xff]   ;;  %v1010_v5 = vld [vmem:[%s1161_s28 + $0x60] ss:$8 sps:$4 sm:$0xff]   ;;  %v1011_v6 = vld [vmem:[%s1161_s28 + $0x54] ss:$8 sps:$4 sm:$0xff]   ;;  %v921_v36 = vcombine.high %v349_v34, %v349_v34  ;;  %v920_v53 = vcombine.low %v349_v34, %v349_v34 }
  0x18   : > { %651 = vmatpush1.bf16.msra.mxu0 %v1007_v2  ;;  %v1013_v7 = vld [vmem:[%s1161_s28 + $0x50] ss:$8 sps:$4 sm:$0xff]   ;;  %v1014_v8 = vld [vmem:[%s1161_s28 + $0x44] ss:$8 sps:$4 sm:$0xff]   ;;  %v1026_v9 = vld [vmem:[%s1161_s28 + $0x174] ss:$8 sps:$4 sm:$0xff]  }
  0x19   : > { %652 = vmatprep.subr.bf16.mxu0 %v1008_v4  ;;  %v1028_v10 = vld [vmem:[%s1161_s28 + $0x170] ss:$8 sps:$4 sm:$0xff]   ;;  %v1016_v11 = vld [vmem:[%s1161_s28 + $0x40] ss:$8 sps:$4 sm:$0xff]   ;;  %v1017_v12 = vld [vmem:[%s1161_s28 + $0x34] ss:$8 sps:$4 sm:$0xff]   ;;  %691 = vmatprep.subr.bf16.mxu1 %v1026_v9 }
  0x1a   : > { %v1032_v13 = vld [vmem:[%s1161_s28 + $0x164] ss:$8 sps:$4 sm:$0xff]   ;;  %692 = vmatpush1.bf16.msra.mxu1 %v1028_v10  ;;  %v1034_v14 = vld [vmem:[%s1161_s28 + $0x160] ss:$8 sps:$4 sm:$0xff]   ;;  %v1019_v15 = vld [vmem:[%s1161_s28 + $0x30] ss:$8 sps:$4 sm:$0xff]   ;;  %682 = vmatprep.mubr.bf16.mxu0 %v921_v36 }
  0x1b   : > { %693 = vmatprep.subr.bf16.mxu1 %v1032_v13  ;;  %v1038_v16 = vld [vmem:[%s1161_s28 + $0x154] ss:$8 sps:$4 sm:$0xff]   ;;  %v1020_v17 = vld [vmem:[%s1161_s28 + $0x24] ss:$8 sps:$4 sm:$0xff]   ;;  %v1040_v18 = vld [vmem:[%s1161_s28 + $0x150] ss:$8 sps:$4 sm:$0xff]  }
  0x1c   : > { %653 = vmatpush1.bf16.msra.mxu0 %v1010_v5  ;;  %v1044_v19 = vld [vmem:[%s1161_s28 + $0x144] ss:$8 sps:$4 sm:$0xff]   ;;  %v1022_v20 = vld [vmem:[%s1161_s28 + $0x20] ss:$8 sps:$4 sm:$0xff]   ;;  %v1023_v21 = vld [vmem:[%s1161_s28 + $0x14] ss:$8 sps:$4 sm:$0xff]  }
  0x1d   : > { %654 = vmatprep.subr.bf16.mxu0 %v1011_v6  ;;  %v1046_v22 = vld [vmem:[%s1161_s28 + $0x140] ss:$8 sps:$4 sm:$0xff]   ;;  %v1050_v23 = vld [vmem:[%s1161_s28 + $0x134] ss:$8 sps:$4 sm:$0xff]   ;;  %v1025_v24 = vld [vmem:[%s1161_s28 + $0x10] ss:$8 sps:$4 sm:$0xff]  }
  0x1e   : > { %694 = vmatpush1.bf16.msra.mxu1 %v1034_v14  ;;  %v1029_v25 = vld [vmem:[%s1161_s28 + $0x4] ss:$8 sps:$4 sm:$0xff]   ;;  %v1052_v26 = vld [vmem:[%s1161_s28 + $0x130] ss:$8 sps:$4 sm:$0xff]   ;;  %v1031_v28 = vld [vmem:[%s1161_s28] ss:$8 sps:$4 sm:$0xff]  }
  0x1f   : > { %695 = vmatprep.subr.bf16.mxu1 %v1038_v16  ;;  %v1056_v27 = vld [vmem:[%s1161_s28 + $0x124] ss:$8 sps:$4 sm:$0xff]   ;;  %v1035_v29 = vld [vmem:[%s1161_s28 + $0xf4] ss:$8 sps:$4 sm:$0xff]   ;;  %v1058_v30 = vld [vmem:[%s1161_s28 + $0x120] ss:$8 sps:$4 sm:$0xff]  }
  0x20   : > { %655 = vmatpush1.bf16.msra.mxu0 %v1013_v7  ;;  %v1062_v31 = vld [vmem:[%s1161_s28 + $0x114] ss:$8 sps:$4 sm:$0xff]   ;;  %v1037_v32 = vld [vmem:[%s1161_s28 + $0xf0] ss:$8 sps:$4 sm:$0xff]   ;;  %v1041_v33 = vld [vmem:[%s1161_s28 + $0xe4] ss:$8 sps:$4 sm:$0xff]  }
  0x21   : > { %656 = vmatprep.subr.bf16.mxu0 %v1014_v8  ;;  %v1064_v35 = vld [vmem:[%s1161_s28 + $0x110] ss:$8 sps:$4 sm:$0xff]   ;;  %v1068_v37 = vld [vmem:[%s1161_s28 + $0x104] ss:$8 sps:$4 sm:$0xff]   ;;  %v1043_v38 = vld [vmem:[%s1161_s28 + $0xe0] ss:$8 sps:$4 sm:$0xff]  }
  0x22   : > { %696 = vmatpush1.bf16.msra.mxu1 %v1040_v18  ;;  %v1047_v39 = vld [vmem:[%s1161_s28 + $0xd4] ss:$8 sps:$4 sm:$0xff]   ;;  %v1070_v40 = vld [vmem:[%s1161_s28 + $0x100] ss:$8 sps:$4 sm:$0xff]   ;;  %v1049_v41 = vld [vmem:[%s1161_s28 + $0xd0] ss:$8 sps:$4 sm:$0xff]  }
  0x23   : > { %697 = vmatprep.subr.bf16.mxu1 %v1044_v19  ;;  %v1053_v42 = vld [vmem:[%s1161_s28 + $0xc4] ss:$8 sps:$4 sm:$0xff]   ;;  %v1074_v43 = vld [vmem:[%s1156_s24 + $0x8] ss:$0 sps:$4 sm:$0xff]   ;;  %v1059_v45 = vld [vmem:[%s1161_s28 + $0xb4] ss:$8 sps:$4 sm:$0xff]  }
  0x24   : > { %657 = vmatpush1.bf16.msra.mxu0 %v1016_v11  ;;  %v1055_v44 = vld [vmem:[%s1161_s28 + $0xc0] ss:$8 sps:$4 sm:$0xff]   ;;  %v1061_v46 = vld [vmem:[%s1161_s28 + $0xb0] ss:$8 sps:$4 sm:$0xff]   ;;  %v1065_v47 = vld [vmem:[%s1161_s28 + $0xa4] ss:$8 sps:$4 sm:$0xff]  }
  0x25   : > { %658 = vmatprep.subr.bf16.mxu0 %v1017_v12  ;;  %v1067_v48 = vld [vmem:[%s1161_s28 + $0xa0] ss:$8 sps:$4 sm:$0xff]   ;;  %v1071_v49 = vld [vmem:[%s1161_s28 + $0x94] ss:$8 sps:$4 sm:$0xff]   ;;  %v1073_v50 = vld [vmem:[%s1161_s28 + $0x90] ss:$8 sps:$4 sm:$0xff]  }
  0x26   : > { %698 = vmatpush1.bf16.msra.mxu1 %v1046_v22  ;;  %v1075_v51 = vld [vmem:[%s1161_s28 + $0x84] ss:$8 sps:$4 sm:$0xff]   ;;  %v1077_v52 = vld [vmem:[%s1161_s28 + $0x80] ss:$8 sps:$4 sm:$0xff]   ;;  %p971_p7 = scmp.ne.s32.totalorder %s1094_s15, 5 }
  0x27   : > { %699 = vmatprep.subr.bf16.mxu1 %v1050_v23  ;;  %v347_v58 = vld [vmem:[#allocation2] sm:$0xff]  ;;  %v348_v61 = vld [vmem:[#allocation2 + $0x8] sm:$0xff] }
  0x28   : > { %659 = vmatpush1.bf16.msra.mxu0 %v1019_v15 }
  0x29   : > { %660 = vmatprep.subr.bf16.mxu0 %v1020_v17 }
  0x2a   : > { %700 = vmatpush1.bf16.msra.mxu1 %v1052_v26 }
  0x2b   : > { %701 = vmatprep.subr.bf16.mxu1 %v1056_v27 }
  0x2c   : > { %661 = vmatpush1.bf16.msra.mxu0 %v1022_v20 }
  0x2d   : > { %662 = vmatprep.subr.bf16.mxu0 %v1023_v21 }
  0x2e   : > { %702 = vmatpush1.bf16.msra.mxu1 %v1058_v30 }
  0x2f   : > { %703 = vmatprep.subr.bf16.mxu1 %v1062_v31 }
  0x30   : > { %663 = vmatpush1.bf16.msra.mxu0 %v1025_v24 }
  0x31   : > { %664 = vmatprep.subr.bf16.mxu0 %v1029_v25 }
  0x32   : > { %704 = vmatpush1.bf16.msra.mxu1 %v1064_v35 }
  0x33   : > { %705 = vmatprep.subr.bf16.mxu1 %v1068_v37 }
  0x34   : > { %665 = vmatpush1.bf16.msra.mxu0 %v1031_v28 }
  0x35   : > { %666 = vmatprep.subr.bf16.mxu0 %v1035_v29 }
  0x36   : > { %706 = vmatpush1.bf16.msra.mxu1 %v1070_v40 }
  0x38   : > { %667 = vmatpush2.bf16.msra.mxu0 %v1037_v32 }
  0x39   : > { %668 = vmatprep.subr.bf16.mxu0 %v1041_v33  ;;  %724 = vmatmul.mubr.bf16.vlgmr.msra.gmra.mxu1 %v1074_v43 }
  0x3c   : > { %669 = vmatpush2.bf16.msra.mxu0 %v1043_v38 }
  0x3d   : > { %670 = vmatprep.subr.bf16.mxu0 %v1047_v39 }
  0x40   : > { %671 = vmatpush2.bf16.msra.mxu0 %v1049_v41 }
  0x41   : > { %672 = vmatprep.subr.bf16.mxu0 %v1053_v42 }
  0x44   : > { %673 = vmatpush2.bf16.msra.mxu0 %v1055_v44 }
  0x45   : > { %674 = vmatprep.subr.bf16.mxu0 %v1059_v45 }
  0x48   : > { %675 = vmatpush2.bf16.msra.mxu0 %v1061_v46 }
  0x49   : > { %676 = vmatprep.subr.bf16.mxu0 %v1065_v47 }
  0x4c   : > { %677 = vmatpush2.bf16.msra.mxu0 %v1067_v48 }
  0x4d   : > { %678 = vmatprep.subr.bf16.mxu0 %v1071_v49 }
  0x50   : > { %679 = vmatpush2.bf16.msra.mxu0 %v1073_v50 }
  0x51   : > { %680 = vmatprep.subr.bf16.mxu0 %v1075_v51 }
  0x54   : > { %681 = vmatpush2.bf16.msra.mxu0 %v1077_v52 }
  0x57   : > { %683 = vmatmul.mubr.bf16.vlgmr.msra.gmra.mxu0 %v920_v53 }
  0xf9   : > { %v725_v54 = vpop.f32.mrf.mxu1 }
  0xfb   : > { %v727_v55 = vpop.f32.mrf.mxu1 }
  0xfd   : > { %v729_v56 = vpop.f32.mrf.mxu1 }
  0xff   : > { %v730_v57 = vpop.f32.mrf.mxu1 }
 0x117   : > { %v684_v59 = vpop.f32.mrf.mxu0 }
 0x118   : > { %v726_v60 = vadd.f32 %v725_v54, %v684_v59 }
 0x119   : > { %v686_v62 = vpop.f32.mrf.mxu0 }
 0x11a   : > { %v732_v63 = vadd.f32 %v726_v60, %v347_v58  ;;  %v728_v0 = vadd.f32 %v727_v55, %v686_v62  ;;  %739 = sbr.rel (%p971_p7) target bundleno = 304 (0x130), region = 44 }
 0x11b   : > { %v688_v1 = vpop.f32.mrf.mxu0 }
 0x11c   : > { %734 = vst [vmem:[#allocation2] sm:$0xff] %v732_v63  ;;  %v733_v2 = vadd.f32 %v728_v0, %v348_v61 }
 0x11d   : > { %v689_v3 = vpop.f32.mrf.mxu0 }
 0x11e   : > { %735 = vst [vmem:[#allocation2 + $0x8] sm:$0xff] %v733_v2 }
 0x11f   : > { %v744_v4 = vlaneseq  ;;  %v742_v6 = vld [vmem:[%s1235_s2] sm:$0x3] }
 0x120   : > { %v756_v7 = vld [vmem:[%s1236_s3] sm:$0xff] }
 0x121   : > { %v745_v5 = vshrl.u32 %v744_v4, 7  ;;  %v757_v14 = vunpack.c.l.bf16 %v756_v7  ;;  %v758_v15 = vunpack.c.h.bf16 %v756_v7 }
 0x123   : > { %v746_v8 = vsub.s32 0, %v745_v5  ;;  %v750_v9 = vsub.s32 1, %v745_v5  ;;  %v740_v10 = vld [vmem:[#allocation2] sm:$0xff] }
 0x125   : > { %v741_v11 = vld [vmem:[#allocation2 + $0x8] sm:$0xff]  ;;  %v747_v12 = vrot.slane %v742_v6, %v746_v8  ;;  %v751_v13 = vrot.slane %v742_v6, %v750_v9 }
 0x127   : > { %v754_v16 = vadd.f32 %v747_v12, %v740_v10  ;;  %v755_v17 = vadd.f32 %v751_v13, %v741_v11 }
 0x129   : > { %v759_v18 = vadd.f32 %v757_v14, %v754_v16  ;;  %v760_v19 = vadd.f32 %v758_v15, %v755_v17 }
 0x12b   : > { %v761_v20 = vmax.f32 %v759_v18, 0.0  ;;  %v762_v21 = vmax.f32 %v760_v19, 0.0 }
 0x12d   : > { %v978_v22 = vpack.c.bf16 %v762_v21, %v761_v20 }
 0x12f   : > { %771 = vst [vmem:[%s1237_s4] sm:$0xff] %v978_v22 }
 0x130 PF: > { %s14_s17 = sadd.s32 1, %s1102_s17   ;;  %s1238_s15 = smov %s1098_s16 }
 0x131   : > { %p11_p8 = scmp.ge.s32.totalorder %s14_s17, 8   ;;  %s1239_s16 = smov %s1241_s18 }
 0x133   :  { %13 = sbr.rel (!%p11_p8) target bundleno = 2 (0x2), region = 83 }

// kernel: forward.36
= control target key start
LH: loop header
LB: loop body
LE: loop exit
PB: predicated region body
PF: predicated region fallthrough
CT: control target
= control target key end

     0   :  { %s1036_s12 = smov 0   ;;  %s1038_s13 = smov 0   ;;  %s1135_s0 = inlined_call_operand.vmem [shape: bf16[8,2304], index: 0, kind: input, shape index: {}]   ;;  %s1136_s1 = inlined_call_operand.vmem [shape: bf16[2304,256], index: 1, kind: input, shape index: {}]   ;;  %s1137_s2 = inlined_call_operand.vmem [shape: f32[1,256], index: 2, kind: input, shape index: {}]   ;;  %s1138_s3 = inlined_call_operand.vmem [shape: bf16[8,256], index: 3, kind: output, shape index: {}]  }
   0x1   :  { %s1040_s14 = smov 0  }
   0x2 LB: > { %s25_s15 = sadd.s32 1, %s1008_s13  ;;  %p825_p0 = scmp.ge.s32.totalorder %s1012_s14, 1  ;;  %s1012_s14 = sphi %s1040_s14, %s13_s14   ;;  %s1008_s13 = sphi %s1038_s13, %s1140_s13   ;;  %s1004_s12 = sphi %s1036_s12, %s1139_s12  }
   0x3   : > { %p26_p1 = scmp.ge.s32.totalorder %s25_s15, 6  ;;  %p194_p2 = scmp.lt.s32.totalorder %s1012_s14, 7 }
   0x5   : > { %s1142_s15 = smov (%p26_p1, %s25_s15), 0  ;;  %p195_p3 = pnand %p825_p0, %p194_p2 }
   0x6   : > { %s240_s16 = smul.u32 (!%p195_p3), 3, %s1004_s12  ;;  %p829_p6 = scmp.ne.s32.totalorder (!%p195_p3), %s1004_s12, 0 }
   0x7   : > { %198 = sbr.rel (%p195_p3) target bundleno = 302 (0x12e), region = 32 }
   0x8   : > { %s250_s17 = smul.u32 (!%p195_p3), 48, %s1004_s12  ;;  %p243_p4 = scmp.lt.s32.totalorder (!%p195_p3), %s240_s16, 17 }
   0xa   : > { %p252_p5 = scmp.lt.s32.totalorder (!%p195_p3), %s250_s17, 287 }
   0xc   : > { %s1144_s16 = smov (!%p243_p4, %s240_s16), 17  ;;  %s1146_s17 = smov (!%p252_p5, %s250_s17), 287 }
   0xd   : > { %s826_s18 = sshll.u32 %s1144_s16, 2  ;;  %s887_s22 = sshll.u32 %s1146_s17, 3 }
   0xe   : > { %s1061_s21 = scalar_lea.vmem %s1135_s0, %s826_s18  ;;  %s1066_s25 = scalar_lea.vmem %s1136_s1, %s887_s22 }
   0xf   : > { %281 = sbr.rel (%p829_p6) target bundleno = 22 (0x16), region = 36 }
  0x14   : > { %v1014_v0 = vmov 0.0  }
  0x15   : > { %282 = vst [vmem:[#allocation2] sm:$0xff] %v1014_v0  ;;  %283 = vst [vmem:[#allocation2 + $0x8] sm:$0xff] %v1014_v0 }
  0x16 PF: > { %v915_v1 = vld [vmem:[%s1066_s25 + $0x74] ss:$8 sps:$4 sm:$0xff]   ;;  %v917_v2 = vld [vmem:[%s1066_s25 + $0x70] ss:$8 sps:$4 sm:$0xff]   ;;  %v1015_v3 = vmov 0   ;;  %v286_v34 = vld [vmem:[%s1061_s21] sm:$0xff] }
  0x17   : > { %660 = vmatprep.mubr.bf16.mxu1 %v1015_v3  ;;  %587 = vmatprep.subr.bf16.mxu0 %v915_v1  ;;  %v918_v4 = vld [vmem:[%s1066_s25 + $0x64] ss:$8 sps:$4 sm:$0xff]   ;;  %v920_v5 = vld [vmem:[%s1066_s25 + $0x60] ss:$8 sps:$4 sm:$0xff]   ;;  %v921_v6 = vld [vmem:[%s1066_s25 + $0x54] ss:$8 sps:$4 sm:$0xff]   ;;  %v831_v36 = vcombine.high %v286_v34, %v286_v34  ;;  %v830_v53 = vcombine.low %v286_v34, %v286_v34 }
  0x18   : > { %588 = vmatpush1.bf16.msra.mxu0 %v917_v2  ;;  %v923_v7 = vld [vmem:[%s1066_s25 + $0x50] ss:$8 sps:$4 sm:$0xff]   ;;  %v924_v8 = vld [vmem:[%s1066_s25 + $0x44] ss:$8 sps:$4 sm:$0xff]   ;;  %v936_v9 = vld [vmem:[%s1066_s25 + $0x174] ss:$8 sps:$4 sm:$0xff]  }
  0x19   : > { %589 = vmatprep.subr.bf16.mxu0 %v918_v4  ;;  %v938_v10 = vld [vmem:[%s1066_s25 + $0x170] ss:$8 sps:$4 sm:$0xff]   ;;  %v926_v11 = vld [vmem:[%s1066_s25 + $0x40] ss:$8 sps:$4 sm:$0xff]   ;;  %v927_v12 = vld [vmem:[%s1066_s25 + $0x34] ss:$8 sps:$4 sm:$0xff]   ;;  %628 = vmatprep.subr.bf16.mxu1 %v936_v9 }
  0x1a   : > { %v942_v13 = vld [vmem:[%s1066_s25 + $0x164] ss:$8 sps:$4 sm:$0xff]   ;;  %629 = vmatpush1.bf16.msra.mxu1 %v938_v10  ;;  %v944_v14 = vld [vmem:[%s1066_s25 + $0x160] ss:$8 sps:$4 sm:$0xff]   ;;  %v929_v15 = vld [vmem:[%s1066_s25 + $0x30] ss:$8 sps:$4 sm:$0xff]   ;;  %619 = vmatprep.mubr.bf16.mxu0 %v831_v36 }
  0x1b   : > { %630 = vmatprep.subr.bf16.mxu1 %v942_v13  ;;  %v948_v16 = vld [vmem:[%s1066_s25 + $0x154] ss:$8 sps:$4 sm:$0xff]   ;;  %v930_v17 = vld [vmem:[%s1066_s25 + $0x24] ss:$8 sps:$4 sm:$0xff]   ;;  %v950_v18 = vld [vmem:[%s1066_s25 + $0x150] ss:$8 sps:$4 sm:$0xff]  }
  0x1c   : > { %590 = vmatpush1.bf16.msra.mxu0 %v920_v5  ;;  %v954_v19 = vld [vmem:[%s1066_s25 + $0x144] ss:$8 sps:$4 sm:$0xff]   ;;  %v932_v20 = vld [vmem:[%s1066_s25 + $0x20] ss:$8 sps:$4 sm:$0xff]   ;;  %v933_v21 = vld [vmem:[%s1066_s25 + $0x14] ss:$8 sps:$4 sm:$0xff]  }
  0x1d   : > { %591 = vmatprep.subr.bf16.mxu0 %v921_v6  ;;  %v956_v22 = vld [vmem:[%s1066_s25 + $0x140] ss:$8 sps:$4 sm:$0xff]   ;;  %v960_v23 = vld [vmem:[%s1066_s25 + $0x134] ss:$8 sps:$4 sm:$0xff]   ;;  %v935_v24 = vld [vmem:[%s1066_s25 + $0x10] ss:$8 sps:$4 sm:$0xff]  }
  0x1e   : > { %631 = vmatpush1.bf16.msra.mxu1 %v944_v14  ;;  %v939_v25 = vld [vmem:[%s1066_s25 + $0x4] ss:$8 sps:$4 sm:$0xff]   ;;  %v962_v26 = vld [vmem:[%s1066_s25 + $0x130] ss:$8 sps:$4 sm:$0xff]   ;;  %v941_v28 = vld [vmem:[%s1066_s25] ss:$8 sps:$4 sm:$0xff]  }
  0x1f   : > { %632 = vmatprep.subr.bf16.mxu1 %v948_v16  ;;  %v966_v27 = vld [vmem:[%s1066_s25 + $0x124] ss:$8 sps:$4 sm:$0xff]   ;;  %v945_v29 = vld [vmem:[%s1066_s25 + $0xf4] ss:$8 sps:$4 sm:$0xff]   ;;  %v968_v30 = vld [vmem:[%s1066_s25 + $0x120] ss:$8 sps:$4 sm:$0xff]  }
  0x20   : > { %592 = vmatpush1.bf16.msra.mxu0 %v923_v7  ;;  %v972_v31 = vld [vmem:[%s1066_s25 + $0x114] ss:$8 sps:$4 sm:$0xff]   ;;  %v947_v32 = vld [vmem:[%s1066_s25 + $0xf0] ss:$8 sps:$4 sm:$0xff]   ;;  %v951_v33 = vld [vmem:[%s1066_s25 + $0xe4] ss:$8 sps:$4 sm:$0xff]  }
  0x21   : > { %593 = vmatprep.subr.bf16.mxu0 %v924_v8  ;;  %v974_v35 = vld [vmem:[%s1066_s25 + $0x110] ss:$8 sps:$4 sm:$0xff]   ;;  %v978_v37 = vld [vmem:[%s1066_s25 + $0x104] ss:$8 sps:$4 sm:$0xff]   ;;  %v953_v38 = vld [vmem:[%s1066_s25 + $0xe0] ss:$8 sps:$4 sm:$0xff]  }
  0x22   : > { %633 = vmatpush1.bf16.msra.mxu1 %v950_v18  ;;  %v957_v39 = vld [vmem:[%s1066_s25 + $0xd4] ss:$8 sps:$4 sm:$0xff]   ;;  %v980_v40 = vld [vmem:[%s1066_s25 + $0x100] ss:$8 sps:$4 sm:$0xff]   ;;  %v959_v41 = vld [vmem:[%s1066_s25 + $0xd0] ss:$8 sps:$4 sm:$0xff]  }
  0x23   : > { %634 = vmatprep.subr.bf16.mxu1 %v954_v19  ;;  %v963_v42 = vld [vmem:[%s1066_s25 + $0xc4] ss:$8 sps:$4 sm:$0xff]   ;;  %v984_v43 = vld [vmem:[%s1061_s21 + $0x8] ss:$0 sps:$4 sm:$0xff]   ;;  %v969_v45 = vld [vmem:[%s1066_s25 + $0xb4] ss:$8 sps:$4 sm:$0xff]  }
  0x24   : > { %594 = vmatpush1.bf16.msra.mxu0 %v926_v11  ;;  %v965_v44 = vld [vmem:[%s1066_s25 + $0xc0] ss:$8 sps:$4 sm:$0xff]   ;;  %v971_v46 = vld [vmem:[%s1066_s25 + $0xb0] ss:$8 sps:$4 sm:$0xff]   ;;  %v975_v47 = vld [vmem:[%s1066_s25 + $0xa4] ss:$8 sps:$4 sm:$0xff]  }
  0x25   : > { %595 = vmatprep.subr.bf16.mxu0 %v927_v12  ;;  %v977_v48 = vld [vmem:[%s1066_s25 + $0xa0] ss:$8 sps:$4 sm:$0xff]   ;;  %v981_v49 = vld [vmem:[%s1066_s25 + $0x94] ss:$8 sps:$4 sm:$0xff]   ;;  %v983_v50 = vld [vmem:[%s1066_s25 + $0x90] ss:$8 sps:$4 sm:$0xff]  }
  0x26   : > { %635 = vmatpush1.bf16.msra.mxu1 %v956_v22  ;;  %v985_v51 = vld [vmem:[%s1066_s25 + $0x84] ss:$8 sps:$4 sm:$0xff]   ;;  %v987_v52 = vld [vmem:[%s1066_s25 + $0x80] ss:$8 sps:$4 sm:$0xff]   ;;  %p881_p7 = scmp.ne.s32.totalorder %s1004_s12, 5 }
  0x27   : > { %636 = vmatprep.subr.bf16.mxu1 %v960_v23  ;;  %v284_v58 = vld [vmem:[#allocation2] sm:$0xff]  ;;  %v285_v61 = vld [vmem:[#allocation2 + $0x8] sm:$0xff] }
  0x28   : > { %596 = vmatpush1.bf16.msra.mxu0 %v929_v15 }
  0x29   : > { %597 = vmatprep.subr.bf16.mxu0 %v930_v17 }
  0x2a   : > { %637 = vmatpush1.bf16.msra.mxu1 %v962_v26 }
  0x2b   : > { %638 = vmatprep.subr.bf16.mxu1 %v966_v27 }
  0x2c   : > { %598 = vmatpush1.bf16.msra.mxu0 %v932_v20 }
  0x2d   : > { %599 = vmatprep.subr.bf16.mxu0 %v933_v21 }
  0x2e   : > { %639 = vmatpush1.bf16.msra.mxu1 %v968_v30 }
  0x2f   : > { %640 = vmatprep.subr.bf16.mxu1 %v972_v31 }
  0x30   : > { %600 = vmatpush1.bf16.msra.mxu0 %v935_v24 }
  0x31   : > { %601 = vmatprep.subr.bf16.mxu0 %v939_v25 }
  0x32   : > { %641 = vmatpush1.bf16.msra.mxu1 %v974_v35 }
  0x33   : > { %642 = vmatprep.subr.bf16.mxu1 %v978_v37 }
  0x34   : > { %602 = vmatpush1.bf16.msra.mxu0 %v941_v28 }
  0x35   : > { %603 = vmatprep.subr.bf16.mxu0 %v945_v29 }
  0x36   : > { %643 = vmatpush1.bf16.msra.mxu1 %v980_v40 }
  0x38   : > { %604 = vmatpush2.bf16.msra.mxu0 %v947_v32 }
  0x39   : > { %605 = vmatprep.subr.bf16.mxu0 %v951_v33  ;;  %661 = vmatmul.mubr.bf16.vlgmr.msra.gmra.mxu1 %v984_v43 }
  0x3c   : > { %606 = vmatpush2.bf16.msra.mxu0 %v953_v38 }
  0x3d   : > { %607 = vmatprep.subr.bf16.mxu0 %v957_v39 }
  0x40   : > { %608 = vmatpush2.bf16.msra.mxu0 %v959_v41 }
  0x41   : > { %609 = vmatprep.subr.bf16.mxu0 %v963_v42 }
  0x44   : > { %610 = vmatpush2.bf16.msra.mxu0 %v965_v44 }
  0x45   : > { %611 = vmatprep.subr.bf16.mxu0 %v969_v45 }
  0x48   : > { %612 = vmatpush2.bf16.msra.mxu0 %v971_v46 }
  0x49   : > { %613 = vmatprep.subr.bf16.mxu0 %v975_v47 }
  0x4c   : > { %614 = vmatpush2.bf16.msra.mxu0 %v977_v48 }
  0x4d   : > { %615 = vmatprep.subr.bf16.mxu0 %v981_v49 }
  0x50   : > { %616 = vmatpush2.bf16.msra.mxu0 %v983_v50 }
  0x51   : > { %617 = vmatprep.subr.bf16.mxu0 %v985_v51 }
  0x54   : > { %618 = vmatpush2.bf16.msra.mxu0 %v987_v52 }
  0x57   : > { %620 = vmatmul.mubr.bf16.vlgmr.msra.gmra.mxu0 %v830_v53 }
  0xf9   : > { %v662_v54 = vpop.f32.mrf.mxu1 }
  0xfb   : > { %v664_v55 = vpop.f32.mrf.mxu1 }
  0xfd   : > { %v666_v56 = vpop.f32.mrf.mxu1 }
  0xff   : > { %v667_v57 = vpop.f32.mrf.mxu1 }
 0x117   : > { %v621_v59 = vpop.f32.mrf.mxu0 }
 0x118   : > { %v663_v60 = vadd.f32 %v662_v54, %v621_v59 }
 0x119   : > { %v623_v62 = vpop.f32.mrf.mxu0 }
 0x11a   : > { %v669_v63 = vadd.f32 %v663_v60, %v284_v58  ;;  %v665_v0 = vadd.f32 %v664_v55, %v623_v62  ;;  %676 = sbr.rel (%p881_p7) target bundleno = 302 (0x12e), region = 40 }
 0x11b   : > { %v625_v1 = vpop.f32.mrf.mxu0 }
 0x11c   : > { %671 = vst [vmem:[#allocation2] sm:$0xff] %v669_v63  ;;  %v670_v2 = vadd.f32 %v665_v0, %v285_v61 }
 0x11d   : > { %v626_v3 = vpop.f32.mrf.mxu0 }
 0x11e   : > { %672 = vst [vmem:[#allocation2 + $0x8] sm:$0xff] %v670_v2 }
 0x11f   : > { %v681_v4 = vlaneseq  ;;  %v679_v6 = vld [vmem:[%s1137_s2] sm:$0x3] }
 0x121   : > { %v682_v5 = vshrl.u32 %v681_v4, 7 }
 0x123   : > { %v683_v7 = vsub.s32 0, %v682_v5  ;;  %v687_v8 = vsub.s32 1, %v682_v5  ;;  %v677_v9 = vld [vmem:[#allocation2] sm:$0xff] }
 0x125   : > { %v678_v10 = vld [vmem:[#allocation2 + $0x8] sm:$0xff]  ;;  %v684_v11 = vrot.slane %v679_v6, %v683_v7  ;;  %v688_v12 = vrot.slane %v679_v6, %v687_v8 }
 0x127   : > { %v691_v13 = vadd.f32 %v684_v11, %v677_v9  ;;  %v692_v14 = vadd.f32 %v688_v12, %v678_v10 }
 0x129   : > { %v693_v15 = vmax.f32 %v691_v13, 0.0  ;;  %v694_v16 = vmax.f32 %v692_v14, 0.0 }
 0x12b   : > { %v888_v17 = vpack.c.bf16 %v694_v16, %v693_v15 }
 0x12d   : > { %703 = vst [vmem:[%s1138_s3] sm:$0xff] %v888_v17 }
 0x12e PF: > { %s13_s14 = sadd.s32 1, %s1012_s14   ;;  %s1139_s12 = smov %s1008_s13 }
 0x12f   : > { %p10_p8 = scmp.ge.s32.totalorder %s13_s14, 8   ;;  %s1140_s13 = smov %s1142_s15 }
 0x131   :  { %12 = sbr.rel (!%p10_p8) target bundleno = 2 (0x2), region = 76 }

// kernel: forward.38
= control target key start
LH: loop header
LB: loop body
LE: loop exit
PB: predicated region body
PF: predicated region fallthrough
CT: control target
= control target key end

     0   :  { %s1561_s12 = smov 0   ;;  %s1563_s13 = smov 0   ;;  %s1721_s0 = inlined_call_operand.vmem [shape: bf16[8,2304], index: 0, kind: input, shape index: {}]   ;;  %s1722_s1 = inlined_call_operand.vmem [shape: bf16[2304,512], index: 1, kind: input, shape index: {}]   ;;  %s1723_s2 = inlined_call_operand.vmem [shape: f32[1,512], index: 2, kind: input, shape index: {}]   ;;  %s1724_s3 = inlined_call_operand.vmem [shape: bf16[8,512], index: 3, kind: output, shape index: {}]  }
   0x1   :  { %s1565_s14 = smov 0  }
   0x2 LB: > { %s25_s15 = sadd.s32 1, %s1533_s13  ;;  %p1228_p0 = scmp.ge.s32.totalorder %s1537_s14, 1  ;;  %s1537_s14 = sphi %s1565_s14, %s13_s14   ;;  %s1533_s13 = sphi %s1563_s13, %s1726_s13   ;;  %s1529_s12 = sphi %s1561_s12, %s1725_s12  }
   0x3   : > { %p26_p1 = scmp.ge.s32.totalorder %s25_s15, 6  ;;  %p194_p2 = scmp.lt.s32.totalorder %s1537_s14, 7 }
   0x5   : > { %s1728_s15 = smov (%p26_p1, %s25_s15), 0  ;;  %p195_p3 = pnand %p1228_p0, %p194_p2 }
   0x6   : > { %s240_s16 = smul.u32 (!%p195_p3), 3, %s1529_s12  ;;  %p1232_p6 = scmp.ne.s32.totalorder (!%p195_p3), %s1529_s12, 0 }
   0x7   : > { %198 = sbr.rel (%p195_p3) target bundleno = 336 (0x150), region = 32 }
   0x8   : > { %s250_s17 = smul.u32 (!%p195_p3), 48, %s1529_s12  ;;  %p243_p4 = scmp.lt.s32.totalorder (!%p195_p3), %s240_s16, 17 }
   0xa   : > { %p252_p5 = scmp.lt.s32.totalorder (!%p195_p3), %s250_s17, 287 }
   0xc   : > { %s1730_s16 = smov (!%p243_p4, %s240_s16), 17  ;;  %s1732_s17 = smov (!%p252_p5, %s250_s17), 287 }
   0xd   : > { %s1229_s18 = sshll.u32 %s1730_s16, 2  ;;  %s1339_s22 = sshll.u32 %s1732_s17, 4 }
   0xe   : > { %s1586_s21 = scalar_lea.vmem %s1721_s0, %s1229_s18  ;;  %s1591_s25 = scalar_lea.vmem %s1722_s1, %s1339_s22 }
   0xf   : > { %281 = sbr.rel (%p1232_p6) target bundleno = 23 (0x17), region = 36 }
  0x14   : > { %v1539_v0 = vmov 0.0  }
  0x15   : > { %282 = vst [vmem:[#allocation2 + $0x10] sm:$0xff] %v1539_v0  ;;  %283 = vst [vmem:[#allocation2] sm:$0xff] %v1539_v0 }
  0x16   : > { %284 = vst [vmem:[#allocation2 + $0x18] sm:$0xff] %v1539_v0  ;;  %285 = vst [vmem:[#allocation2 + $0x8] sm:$0xff] %v1539_v0 }
  0x17 PF: > { %v1368_v1 = vld [vmem:[%s1591_s25 + $0xe4] ss:$16 sps:$4 sm:$0xff]   ;;  %v1540_v3 = vmov 0   ;;  %v1372_v4 = vld [vmem:[%s1591_s25 + $0xe0] ss:$16 sps:$4 sm:$0xff]   ;;  %p1332_p7 = scmp.ne.s32.totalorder %s1529_s12, 5 }
  0x18   : > { %v1370_v2 = vld [vmem:[%s1591_s25 + $0x2e4] ss:$16 sps:$4 sm:$0xff]   ;;  %952 = vmatprep.mubr.bf16.mxu1 %v1540_v3  ;;  %879 = vmatprep.subr.bf16.mxu0 %v1368_v1  ;;  %v1373_v5 = vld [vmem:[%s1591_s25 + $0x2e0] ss:$16 sps:$4 sm:$0xff]   ;;  %v1421_v35 = vld [vmem:[%s1591_s25 + $0xec] ss:$16 sps:$4 sm:$0xff]  }
  0x19   : > { %920 = vmatprep.subr.bf16.mxu1 %v1370_v2  ;;  %v1374_v6 = vld [vmem:[%s1591_s25 + $0xc4] ss:$16 sps:$4 sm:$0xff]   ;;  %880 = vmatpush1.bf16.msra.mxu0 %v1372_v4  ;;  %v1378_v8 = vld [vmem:[%s1591_s25 + $0xc0] ss:$16 sps:$4 sm:$0xff]   ;;  %v1630_v36 = vld [vmem:[%s1586_s21 + $0x8] ss:$0 sps:$4 sm:$0xff]  }
  0x1a   : > { %921 = vmatpush1.bf16.msra.mxu1 %v1373_v5  ;;  %v1376_v7 = vld [vmem:[%s1591_s25 + $0x2c4] ss:$16 sps:$4 sm:$0xff]   ;;  %881 = vmatprep.subr.bf16.mxu0 %v1374_v6  ;;  %v1379_v9 = vld [vmem:[%s1591_s25 + $0x2c0] ss:$16 sps:$4 sm:$0xff]   ;;  %v1419_v37 = vld [vmem:[%s1591_s25 + $0xe8] ss:$16 sps:$4 sm:$0xff]  }
  0x1b   : > { %922 = vmatprep.subr.bf16.mxu1 %v1376_v7  ;;  %v1380_v10 = vld [vmem:[%s1591_s25 + $0xa4] ss:$16 sps:$4 sm:$0xff]   ;;  %v1384_v12 = vld [vmem:[%s1591_s25 + $0xa0] ss:$16 sps:$4 sm:$0xff]   ;;  %v1427_v40 = vld [vmem:[%s1591_s25 + $0xcc] ss:$16 sps:$4 sm:$0xff]  }
  0x1c   : > { %v1382_v11 = vld [vmem:[%s1591_s25 + $0x2a4] ss:$16 sps:$4 sm:$0xff]   ;;  %v1385_v13 = vld [vmem:[%s1591_s25 + $0x2a0] ss:$16 sps:$4 sm:$0xff]   ;;  %v1425_v41 = vld [vmem:[%s1591_s25 + $0xc8] ss:$16 sps:$4 sm:$0xff]  }
  0x1d   : > { %882 = vmatpush1.bf16.msra.mxu0 %v1378_v8  ;;  %v1386_v14 = vld [vmem:[%s1591_s25 + $0x84] ss:$16 sps:$4 sm:$0xff]   ;;  %v1390_v16 = vld [vmem:[%s1591_s25 + $0x80] ss:$16 sps:$4 sm:$0xff]   ;;  %v1433_v44 = vld [vmem:[%s1591_s25 + $0xac] ss:$16 sps:$4 sm:$0xff]  }
  0x1e   : > { %923 = vmatpush1.bf16.msra.mxu1 %v1379_v9  ;;  %883 = vmatprep.subr.bf16.mxu0 %v1380_v10  ;;  %v1388_v15 = vld [vmem:[%s1591_s25 + $0x284] ss:$16 sps:$4 sm:$0xff]   ;;  %v1391_v17 = vld [vmem:[%s1591_s25 + $0x280] ss:$16 sps:$4 sm:$0xff]   ;;  %v1431_v45 = vld [vmem:[%s1591_s25 + $0xa8] ss:$16 sps:$4 sm:$0xff]  }
  0x1f   : > { %924 = vmatprep.subr.bf16.mxu1 %v1382_v11  ;;  %v1392_v18 = vld [vmem:[%s1591_s25 + $0x64] ss:$16 sps:$4 sm:$0xff]   ;;  %v1396_v20 = vld [vmem:[%s1591_s25 + $0x60] ss:$16 sps:$4 sm:$0xff]   ;;  %v1439_v48 = vld [vmem:[%s1591_s25 + $0x8c] ss:$16 sps:$4 sm:$0xff]  }
  0x20   : > { %v1394_v19 = vld [vmem:[%s1591_s25 + $0x264] ss:$16 sps:$4 sm:$0xff]   ;;  %v1397_v21 = vld [vmem:[%s1591_s25 + $0x260] ss:$16 sps:$4 sm:$0xff]   ;;  %v1437_v49 = vld [vmem:[%s1591_s25 + $0x88] ss:$16 sps:$4 sm:$0xff]  }
  0x21   : > { %884 = vmatpush1.bf16.msra.mxu0 %v1384_v12  ;;  %v1398_v22 = vld [vmem:[%s1591_s25 + $0x44] ss:$16 sps:$4 sm:$0xff]   ;;  %v1402_v24 = vld [vmem:[%s1591_s25 + $0x40] ss:$16 sps:$4 sm:$0xff]   ;;  %v1445_v54 = vld [vmem:[%s1591_s25 + $0x6c] ss:$16 sps:$4 sm:$0xff]  }
  0x22   : > { %925 = vmatpush1.bf16.msra.mxu1 %v1385_v13  ;;  %885 = vmatprep.subr.bf16.mxu0 %v1386_v14  ;;  %v1400_v23 = vld [vmem:[%s1591_s25 + $0x244] ss:$16 sps:$4 sm:$0xff]   ;;  %v1403_v25 = vld [vmem:[%s1591_s25 + $0x240] ss:$16 sps:$4 sm:$0xff]   ;;  %v1443_v55 = vld [vmem:[%s1591_s25 + $0x68] ss:$16 sps:$4 sm:$0xff]  }
  0x23   : > { %926 = vmatprep.subr.bf16.mxu1 %v1388_v15  ;;  %v1404_v26 = vld [vmem:[%s1591_s25 + $0x24] ss:$16 sps:$4 sm:$0xff]   ;;  %v1408_v28 = vld [vmem:[%s1591_s25 + $0x20] ss:$16 sps:$4 sm:$0xff]   ;;  %v1451_v58 = vld [vmem:[%s1591_s25 + $0x4c] ss:$16 sps:$4 sm:$0xff]  }
  0x24   : > { %v1406_v27 = vld [vmem:[%s1591_s25 + $0x224] ss:$16 sps:$4 sm:$0xff]   ;;  %v1409_v29 = vld [vmem:[%s1591_s25 + $0x220] ss:$16 sps:$4 sm:$0xff]   ;;  %v1449_v59 = vld [vmem:[%s1591_s25 + $0x48] ss:$16 sps:$4 sm:$0xff]  }
  0x25   : > { %886 = vmatpush1.bf16.msra.mxu0 %v1390_v16  ;;  %v1410_v30 = vld [vmem:[%s1591_s25 + $0x4] ss:$16 sps:$4 sm:$0xff]   ;;  %v1414_v32 = vld [vmem:[%s1591_s25] ss:$16 sps:$4 sm:$0xff]   ;;  %v1457_v62 = vld [vmem:[%s1591_s25 + $0x2c] ss:$16 sps:$4 sm:$0xff]  }
  0x26   : > { %927 = vmatpush1.bf16.msra.mxu1 %v1391_v17  ;;  %887 = vmatprep.subr.bf16.mxu0 %v1392_v18  ;;  %v1412_v31 = vld [vmem:[%s1591_s25 + $0x204] ss:$16 sps:$4 sm:$0xff]   ;;  %v1415_v33 = vld [vmem:[%s1591_s25 + $0x200] ss:$16 sps:$4 sm:$0xff]   ;;  %v1455_v63 = vld [vmem:[%s1591_s25 + $0x28] ss:$16 sps:$4 sm:$0xff]  }
  0x27   : > { %928 = vmatprep.subr.bf16.mxu1 %v1394_v19  ;;  %v1416_v34 = vld [vmem:[%s1591_s25 + $0x1e4] ss:$16 sps:$4 sm:$0xff]   ;;  %v1422_v38 = vld [vmem:[%s1591_s25 + $0x1e0] ss:$16 sps:$4 sm:$0xff]   ;;  %v1463_v2 = vld [vmem:[%s1591_s25 + $0xc] ss:$16 sps:$4 sm:$0xff]  }
  0x28   : > { %v1423_v39 = vld [vmem:[%s1591_s25 + $0x1c4] ss:$16 sps:$4 sm:$0xff]   ;;  %v1428_v42 = vld [vmem:[%s1591_s25 + $0x1c0] ss:$16 sps:$4 sm:$0xff]   ;;  %v1461_v4 = vld [vmem:[%s1591_s25 + $0x8] ss:$16 sps:$4 sm:$0xff]  }
  0x29   : > { %888 = vmatpush1.bf16.msra.mxu0 %v1396_v20  ;;  %v1429_v43 = vld [vmem:[%s1591_s25 + $0x1a4] ss:$16 sps:$4 sm:$0xff]   ;;  %v1434_v46 = vld [vmem:[%s1591_s25 + $0x1a0] ss:$16 sps:$4 sm:$0xff]   ;;  %v1469_v6 = vld [vmem:[%s1591_s25 + $0x1ec] ss:$16 sps:$4 sm:$0xff]  }
  0x2a   : > { %929 = vmatpush1.bf16.msra.mxu1 %v1397_v21  ;;  %889 = vmatprep.subr.bf16.mxu0 %v1398_v22  ;;  %v1435_v47 = vld [vmem:[%s1591_s25 + $0x184] ss:$16 sps:$4 sm:$0xff]   ;;  %v1440_v51 = vld [vmem:[%s1591_s25 + $0x180] ss:$16 sps:$4 sm:$0xff]   ;;  %v1472_v7 = vld [vmem:[%s1591_s25 + $0x2ec] ss:$16 sps:$4 sm:$0xff]  }
  0x2b   : > { %930 = vmatprep.subr.bf16.mxu1 %v1400_v23  ;;  %v290_v50 = vld [vmem:[%s1586_s21] sm:$0xff]  ;;  %v1467_v9 = vld [vmem:[%s1591_s25 + $0x1e8] ss:$16 sps:$4 sm:$0xff]   ;;  %v1475_v11 = vld [vmem:[%s1591_s25 + $0x1cc] ss:$16 sps:$4 sm:$0xff]  }
  0x2c   : > { %v1441_v52 = vld [vmem:[%s1591_s25 + $0x164] ss:$16 sps:$4 sm:$0xff]   ;;  %v1234_v53 = vcombine.high %v290_v50, %v290_v50  ;;  %v1446_v56 = vld [vmem:[%s1591_s25 + $0x160] ss:$16 sps:$4 sm:$0xff]   ;;  %v1666_v8 = vcombine.low %v290_v50, %v290_v50  ;;  %v1470_v10 = vld [vmem:[%s1591_s25 + $0x2e8] ss:$16 sps:$4 sm:$0xff]  }
  0x2d   : > { %890 = vmatpush1.bf16.msra.mxu0 %v1402_v24  ;;  %v1447_v57 = vld [vmem:[%s1591_s25 + $0x144] ss:$16 sps:$4 sm:$0xff]   ;;  %v1452_v60 = vld [vmem:[%s1591_s25 + $0x140] ss:$16 sps:$4 sm:$0xff]   ;;  %v1478_v12 = vld [vmem:[%s1591_s25 + $0x2cc] ss:$16 sps:$4 sm:$0xff]  }
  0x2e   : > { %931 = vmatpush1.bf16.msra.mxu1 %v1403_v25  ;;  %891 = vmatprep.subr.bf16.mxu0 %v1404_v26  ;;  %v1453_v61 = vld [vmem:[%s1591_s25 + $0x124] ss:$16 sps:$4 sm:$0xff]   ;;  %v1458_v0 = vld [vmem:[%s1591_s25 + $0x120] ss:$16 sps:$4 sm:$0xff]   ;;  %v1473_v13 = vld [vmem:[%s1591_s25 + $0x1c8] ss:$16 sps:$4 sm:$0xff]  }
  0x2f   : > { %932 = vmatprep.subr.bf16.mxu1 %v1406_v27  ;;  %911 = vmatprep.mubr.bf16.mxu0 %v1234_v53  ;;  %v1459_v1 = vld [vmem:[%s1591_s25 + $0x104] ss:$16 sps:$4 sm:$0xff]   ;;  %v1464_v5 = vld [vmem:[%s1591_s25 + $0x100] ss:$16 sps:$4 sm:$0xff]   ;;  %v1476_v14 = vld [vmem:[%s1591_s25 + $0x2c8] ss:$16 sps:$4 sm:$0xff]  }
  0x30   : > { %v1481_v15 = vld [vmem:[%s1591_s25 + $0x1ac] ss:$16 sps:$4 sm:$0xff]   ;;  %v1479_v17 = vld [vmem:[%s1591_s25 + $0x1a8] ss:$16 sps:$4 sm:$0xff]  }
  0x31   : > { %892 = vmatpush1.bf16.msra.mxu0 %v1408_v28  ;;  %v1484_v16 = vld [vmem:[%s1591_s25 + $0x2ac] ss:$16 sps:$4 sm:$0xff]   ;;  %v1482_v18 = vld [vmem:[%s1591_s25 + $0x2a8] ss:$16 sps:$4 sm:$0xff]  }
  0x32   : > { %933 = vmatpush1.bf16.msra.mxu1 %v1409_v29  ;;  %893 = vmatprep.subr.bf16.mxu0 %v1410_v30  ;;  %v1487_v19 = vld [vmem:[%s1591_s25 + $0x18c] ss:$16 sps:$4 sm:$0xff]   ;;  %v1485_v21 = vld [vmem:[%s1591_s25 + $0x188] ss:$16 sps:$4 sm:$0xff]  }
  0x33   : > { %934 = vmatprep.subr.bf16.mxu1 %v1412_v31  ;;  %v1490_v20 = vld [vmem:[%s1591_s25 + $0x28c] ss:$16 sps:$4 sm:$0xff]   ;;  %v1488_v22 = vld [vmem:[%s1591_s25 + $0x288] ss:$16 sps:$4 sm:$0xff]  }
  0x34   : > { %v1496_v23 = vld [vmem:[%s1591_s25 + $0x26c] ss:$16 sps:$4 sm:$0xff]   ;;  %v1491_v24 = vld [vmem:[%s1591_s25 + $0x168] ss:$16 sps:$4 sm:$0xff]  }
  0x35   : > { %894 = vmatpush1.bf16.msra.mxu0 %v1414_v32  ;;  %v1494_v25 = vld [vmem:[%s1591_s25 + $0x268] ss:$16 sps:$4 sm:$0xff]   ;;  %v1499_v26 = vld [vmem:[%s1591_s25 + $0x14c] ss:$16 sps:$4 sm:$0xff]  }
  0x36   : > { %935 = vmatpush1.bf16.msra.mxu1 %v1415_v33  ;;  %895 = vmatprep.subr.bf16.mxu0 %v1416_v34  ;;  %v1502_v27 = vld [vmem:[%s1591_s25 + $0x24c] ss:$16 sps:$4 sm:$0xff]   ;;  %v1497_v28 = vld [vmem:[%s1591_s25 + $0x148] ss:$16 sps:$4 sm:$0xff]  }
  0x37   : > { %961 = vmatprep.subr.bf16.mxu1 %v1421_v35  ;;  %v1500_v29 = vld [vmem:[%s1591_s25 + $0x248] ss:$16 sps:$4 sm:$0xff]   ;;  %v1505_v30 = vld [vmem:[%s1591_s25 + $0x12c] ss:$16 sps:$4 sm:$0xff]  }
  0x38   : > { %v1508_v31 = vld [vmem:[%s1591_s25 + $0x22c] ss:$16 sps:$4 sm:$0xff]   ;;  %v1503_v32 = vld [vmem:[%s1591_s25 + $0x128] ss:$16 sps:$4 sm:$0xff]  }
  0x39   : > { %953 = vmatmul.mubr.bf16.vlgmr.msra.gmra.mxu1 %v1630_v36  ;;  %896 = vmatpush2.bf16.msra.mxu0 %v1422_v38  ;;  %v1506_v33 = vld [vmem:[%s1591_s25 + $0x228] ss:$16 sps:$4 sm:$0xff]   ;;  %v1511_v34 = vld [vmem:[%s1591_s25 + $0x10c] ss:$16 sps:$4 sm:$0xff]  }
  0x3a   : > { %962 = vmatpush1.bf16.msra.mxu1 %v1419_v37  ;;  %897 = vmatprep.subr.bf16.mxu0 %v1423_v39  ;;  %v1514_v35 = vld [vmem:[%s1591_s25 + $0x20c] ss:$16 sps:$4 sm:$0xff]   ;;  %v1509_v37 = vld [vmem:[%s1591_s25 + $0x108] ss:$16 sps:$4 sm:$0xff]  }
  0x3b   : > { %963 = vmatprep.subr.bf16.mxu1 %v1427_v40  ;;  %993 = vmatprep.mubr.bf16.mxu1 %v1234_v53  ;;  %v1512_v38 = vld [vmem:[%s1591_s25 + $0x208] ss:$16 sps:$4 sm:$0xff]  }
  0x3d   : > { %898 = vmatpush2.bf16.msra.mxu0 %v1428_v42 }
  0x3e   : > { %964 = vmatpush1.bf16.msra.mxu1 %v1425_v41  ;;  %899 = vmatprep.subr.bf16.mxu0 %v1429_v43  ;;  %v286_v43 = vld [vmem:[#allocation2 + $0x10] sm:$0xff] }
  0x3f   : > { %965 = vmatprep.subr.bf16.mxu1 %v1433_v44 }
  0x41   : > { %900 = vmatpush2.bf16.msra.mxu0 %v1434_v46  ;;  %v287_v46 = vld [vmem:[#allocation2] sm:$0xff] }
  0x42   : > { %966 = vmatpush1.bf16.msra.mxu1 %v1431_v45  ;;  %901 = vmatprep.subr.bf16.mxu0 %v1435_v47 }
  0x43   : > { %967 = vmatprep.subr.bf16.mxu1 %v1439_v48 }
  0x45   : > { %902 = vmatpush2.bf16.msra.mxu0 %v1440_v51 }
  0x46   : > { %968 = vmatpush1.bf16.msra.mxu1 %v1437_v49  ;;  %903 = vmatprep.subr.bf16.mxu0 %v1441_v52 }
  0x47   : > { %969 = vmatprep.subr.bf16.mxu1 %v1445_v54  ;;  %v288_v54 = vld [vmem:[#allocation2 + $0x18] sm:$0xff] }
  0x49   : > { %904 = vmatpush2.bf16.msra.mxu0 %v1446_v56 }
  0x4a   : > { %970 = vmatpush1.bf16.msra.mxu1 %v1443_v55  ;;  %905 = vmatprep.subr.bf16.mxu0 %v1447_v57  ;;  %v289_v57 = vld [vmem:[#allocation2 + $0x8] sm:$0xff] }
  0x4b   : > { %971 = vmatprep.subr.bf16.mxu1 %v1451_v58 }
  0x4d   : > { %906 = vmatpush2.bf16.msra.mxu0 %v1452_v60 }
  0x4e   : > { %972 = vmatpush1.bf16.msra.mxu1 %v1449_v59  ;;  %907 = vmatprep.subr.bf16.mxu0 %v1453_v61 }
  0x4f   : > { %973 = vmatprep.subr.bf16.mxu1 %v1457_v62 }
  0x51   : > { %908 = vmatpush2.bf16.msra.mxu0 %v1458_v0 }
  0x52   : > { %974 = vmatpush1.bf16.msra.mxu1 %v1455_v63  ;;  %909 = vmatprep.subr.bf16.mxu0 %v1459_v1 }
  0x53   : > { %975 = vmatprep.subr.bf16.mxu1 %v1463_v2 }
  0x55   : > { %910 = vmatpush2.bf16.msra.mxu0 %v1464_v5 }
  0x56   : > { %976 = vmatpush1.bf16.msra.mxu1 %v1461_v4  ;;  %1002 = vmatprep.subr.bf16.mxu0 %v1472_v7 }
  0x57   : > { %977 = vmatprep.subr.bf16.mxu1 %v1469_v6 }
  0x58   : > { %912 = vmatmul.mubr.bf16.vlgmr.msra.gmra.mxu0 %v1666_v8 }
  0x59   : > { %1003 = vmatpush1.bf16.msra.mxu0 %v1470_v10  ;;  %1034 = vmatprep.mubr.bf16.mxu0 %v1540_v3  ;;  %v1493_v3 = vld [vmem:[%s1591_s25 + $0x16c] ss:$16 sps:$4 sm:$0xff]  }
  0x5a   : > { %978 = vmatpush2.bf16.msra.mxu1 %v1467_v9  ;;  %1004 = vmatprep.subr.bf16.mxu0 %v1478_v12 }
  0x5b   : > { %979 = vmatprep.subr.bf16.mxu1 %v1475_v11 }
  0x5d   : > { %1005 = vmatpush1.bf16.msra.mxu0 %v1476_v14 }
  0x5e   : > { %980 = vmatpush2.bf16.msra.mxu1 %v1473_v13  ;;  %1006 = vmatprep.subr.bf16.mxu0 %v1484_v16 }
  0x5f   : > { %981 = vmatprep.subr.bf16.mxu1 %v1481_v15 }
  0x61   : > { %1007 = vmatpush1.bf16.msra.mxu0 %v1482_v18 }
  0x62   : > { %982 = vmatpush2.bf16.msra.mxu1 %v1479_v17  ;;  %1008 = vmatprep.subr.bf16.mxu0 %v1490_v20 }
  0x63   : > { %983 = vmatprep.subr.bf16.mxu1 %v1487_v19 }
  0x65   : > { %1009 = vmatpush1.bf16.msra.mxu0 %v1488_v22 }
  0x66   : > { %984 = vmatpush2.bf16.msra.mxu1 %v1485_v21  ;;  %1010 = vmatprep.subr.bf16.mxu0 %v1496_v23 }
  0x67   : > { %985 = vmatprep.subr.bf16.mxu1 %v1493_v3 }
  0x69   : > { %1011 = vmatpush1.bf16.msra.mxu0 %v1494_v25 }
  0x6a   : > { %986 = vmatpush2.bf16.msra.mxu1 %v1491_v24  ;;  %1012 = vmatprep.subr.bf16.mxu0 %v1502_v27 }
  0x6b   : > { %987 = vmatprep.subr.bf16.mxu1 %v1499_v26 }
  0x6d   : > { %1013 = vmatpush1.bf16.msra.mxu0 %v1500_v29 }
  0x6e   : > { %988 = vmatpush2.bf16.msra.mxu1 %v1497_v28  ;;  %1014 = vmatprep.subr.bf16.mxu0 %v1508_v31 }
  0x6f   : > { %989 = vmatprep.subr.bf16.mxu1 %v1505_v30 }
  0x71   : > { %1015 = vmatpush1.bf16.msra.mxu0 %v1506_v33 }
  0x72   : > { %990 = vmatpush2.bf16.msra.mxu1 %v1503_v32  ;;  %1016 = vmatprep.subr.bf16.mxu0 %v1514_v35 }
  0x73   : > { %991 = vmatprep.subr.bf16.mxu1 %v1511_v34 }
  0x75   : > { %1017 = vmatpush1.bf16.msra.mxu0 %v1512_v38 }
  0x76   : > { %992 = vmatpush2.bf16.msra.mxu1 %v1509_v37 }
  0x78   : > { %1035 = vmatmul.mubr.bf16.vlgmr.msra.gmra.mxu0 %v1630_v36 }
  0x79   : > { %994 = vmatmul.mubr.bf16.vlgmr.msra.gmra.mxu1 %v1666_v8 }
  0xf9   : > { %v954_v39 = vpop.f32.mrf.mxu1 }
  0xfb   : > { %v956_v40 = vpop.f32.mrf.mxu1 }
  0xfd   : > { %v958_v41 = vpop.f32.mrf.mxu1 }
  0xff   : > { %v959_v42 = vpop.f32.mrf.mxu1 }
 0x118   : > { %v913_v44 = vpop.f32.mrf.mxu0 }
 0x119   : > { %v955_v45 = vadd.f32 %v954_v39, %v913_v44 }
 0x11a   : > { %v915_v47 = vpop.f32.mrf.mxu0 }
 0x11b   : > { %v1043_v48 = vadd.f32 %v955_v45, %v286_v43  ;;  %v957_v49 = vadd.f32 %v956_v40, %v915_v47 }
 0x11c   : > { %v917_v50 = vpop.f32.mrf.mxu0 }
 0x11d   : > { %1047 = vst [vmem:[#allocation2 + $0x10] sm:$0xff] %v1043_v48  ;;  %v1044_v51 = vadd.f32 %v957_v49, %v287_v46 }
 0x11e   : > { %v918_v52 = vpop.f32.mrf.mxu0 }
 0x11f   : > { %1048 = vst [vmem:[#allocation2] sm:$0xff] %v1044_v51 }
 0x138   : > { %v1036_v55 = vpop.f32.mrf.mxu0 }
 0x139   : > { %v995_v53 = vpop.f32.mrf.mxu1 }
 0x13a   : > { %v1037_v36 = vadd.f32 %v1036_v55, %v995_v53  ;;  %v1038_v58 = vpop.f32.mrf.mxu0 }
 0x13b   : > { %v997_v56 = vpop.f32.mrf.mxu1 }
 0x13c   : > { %v1045_v59 = vadd.f32 %v1037_v36, %v288_v54  ;;  %v1039_v60 = vadd.f32 %v1038_v58, %v997_v56  ;;  %v1040_v62 = vpop.f32.mrf.mxu0  ;;  %1054 = sbr.rel (%p1332_p7) target bundleno = 336 (0x150), region = 40 }
 0x13d   : > { %v999_v61 = vpop.f32.mrf.mxu1 }
 0x13e   : > { %1049 = vst [vmem:[#allocation2 + $0x18] sm:$0xff] %v1045_v59  ;;  %v1046_v63 = vadd.f32 %v1039_v60, %v289_v57  ;;  %v1041_v1 = vpop.f32.mrf.mxu0 }
 0x13f   : > { %v1000_v0 = vpop.f32.mrf.mxu1 }
 0x140   : > { %1050 = vst [vmem:[#allocation2 + $0x8] sm:$0xff] %v1046_v63 }
 0x141   : > { %v1061_v2 = vlaneseq  ;;  %v1059_v5 = vld [vmem:[%s1723_s2] sm:$0xf]  ;;  %v1055_v6 = vld [vmem:[#allocation2 + $0x10] sm:$0xff] }
 0x142   : > { %v1056_v11 = vld [vmem:[#allocation2] sm:$0xff] }
 0x143   : > { %v1062_v4 = vshrl.u32 %v1061_v2, 7 }
 0x145   : > { %v1063_v7 = vsub.s32 0, %v1062_v4  ;;  %v1067_v8 = vsub.s32 1, %v1062_v4  ;;  %v1071_v9 = vsub.s32 2, %v1062_v4  ;;  %v1075_v10 = vsub.s32 3, %v1062_v4  ;;  %v1057_v12 = vld [vmem:[#allocation2 + $0x18] sm:$0xff] }
 0x147   : > { %v1058_v13 = vld [vmem:[#allocation2 + $0x8] sm:$0xff]  ;;  %v1064_v14 = vrot.slane %v1059_v5, %v1063_v7  ;;  %v1068_v15 = vrot.slane %v1059_v5, %v1067_v8  ;;  %v1072_v16 = vrot.slane %v1059_v5, %v1071_v9  ;;  %v1076_v17 = vrot.slane %v1059_v5, %v1075_v10 }
 0x149   : > { %v1081_v18 = vadd.f32 %v1064_v14, %v1055_v6  ;;  %v1082_v19 = vadd.f32 %v1068_v15, %v1056_v11  ;;  %v1083_v20 = vadd.f32 %v1072_v16, %v1057_v12  ;;  %v1084_v21 = vadd.f32 %v1076_v17, %v1058_v13 }
 0x14b   : > { %v1085_v22 = vmax.f32 %v1081_v18, 0.0  ;;  %v1086_v3 = vmax.f32 %v1082_v19, 0.0  ;;  %v1087_v23 = vmax.f32 %v1083_v20, 0.0  ;;  %v1088_v24 = vmax.f32 %v1084_v21, 0.0 }
 0x14d   : > { %v1340_v25 = vpack.c.bf16 %v1086_v3, %v1085_v22  ;;  %v1341_v26 = vpack.c.bf16 %v1088_v24, %v1087_v23 }
 0x14f   : > { %1105 = vst [vmem:[%s1724_s3] sm:$0xff] %v1340_v25  ;;  %1106 = vst [vmem:[%s1724_s3 + $0x8] sm:$0xff] %v1341_v26 }
 0x150 PF: > { %s13_s14 = sadd.s32 1, %s1537_s14   ;;  %s1725_s12 = smov %s1533_s13 }
 0x151   : > { %p10_p8 = scmp.ge.s32.totalorder %s13_s14, 8   ;;  %s1726_s13 = smov %s1728_s15 }
 0x153   :  { %12 = sbr.rel (!%p10_p8) target bundleno = 2 (0x2), region = 76 }

// kernel: forward.39
= control target key start
LH: loop header
LB: loop body
LE: loop exit
PB: predicated region body
PF: predicated region fallthrough
CT: control target
= control target key end

     0   :  { %s955_s1 = inlined_call_operand.vmem [shape: bf16[256,512], index: 1, kind: input, shape index: {}]   ;;  %s956_s0 = inlined_call_operand.vmem [shape: bf16[8,256], index: 0, kind: input, shape index: {}]   ;;  %s957_s2 = inlined_call_operand.vmem [shape: f32[1,512], index: 2, kind: input, shape index: {}]   ;;  %s958_s3 = inlined_call_operand.vmem [shape: bf16[8,512], index: 3, kind: output, shape index: {}]  }
   0x1   :  { %v633_v0 = vld [vmem:[%s955_s1 + $0xe4] ss:$16 sps:$4 sm:$0xff]   ;;  %v635_v1 = vld [vmem:[%s955_s1 + $0xec] ss:$16 sps:$4 sm:$0xff]   ;;  %v637_v2 = vld [vmem:[%s955_s1 + $0xe0] ss:$16 sps:$4 sm:$0xff]  }
   0x2   :  { %418 = vmatprep.subr.bf16.mxu0 %v633_v0  ;;  %v638_v3 = vld [vmem:[%s955_s1 + $0xe8] ss:$16 sps:$4 sm:$0xff]   ;;  %459 = vmatprep.subr.bf16.mxu1 %v635_v1  ;;  %v639_v4 = vld [vmem:[%s955_s1 + $0xc4] ss:$16 sps:$4 sm:$0xff]   ;;  %v641_v5 = vld [vmem:[%s955_s1 + $0xcc] ss:$16 sps:$4 sm:$0xff]  }
   0x3   :  { %419 = vmatpush1.bf16.msra.mxu0 %v637_v2  ;;  %460 = vmatpush1.bf16.msra.mxu1 %v638_v3  ;;  %v643_v6 = vld [vmem:[%s955_s1 + $0xc0] ss:$16 sps:$4 sm:$0xff]   ;;  %v644_v7 = vld [vmem:[%s955_s1 + $0xc8] ss:$16 sps:$4 sm:$0xff]   ;;  %v645_v8 = vld [vmem:[%s955_s1 + $0xa4] ss:$16 sps:$4 sm:$0xff]   ;;  %v517_v3 = vlaneseq }
   0x4   :  { %420 = vmatprep.subr.bf16.mxu0 %v639_v4  ;;  %461 = vmatprep.subr.bf16.mxu1 %v641_v5  ;;  %v647_v9 = vld [vmem:[%s955_s1 + $0xac] ss:$16 sps:$4 sm:$0xff]   ;;  %v649_v10 = vld [vmem:[%s955_s1 + $0xa0] ss:$16 sps:$4 sm:$0xff]   ;;  %v650_v11 = vld [vmem:[%s955_s1 + $0xa8] ss:$16 sps:$4 sm:$0xff]  }
   0x5   :  { %v651_v12 = vld [vmem:[%s955_s1 + $0x84] ss:$16 sps:$4 sm:$0xff]   ;;  %v653_v13 = vld [vmem:[%s955_s1 + $0x8c] ss:$16 sps:$4 sm:$0xff]   ;;  %v655_v14 = vld [vmem:[%s955_s1 + $0x80] ss:$16 sps:$4 sm:$0xff]  }
   0x6   :  { %v656_v15 = vld [vmem:[%s955_s1 + $0x88] ss:$16 sps:$4 sm:$0xff]   ;;  %v657_v16 = vld [vmem:[%s955_s1 + $0x64] ss:$16 sps:$4 sm:$0xff]   ;;  %v659_v17 = vld [vmem:[%s955_s1 + $0x6c] ss:$16 sps:$4 sm:$0xff]  }
   0x7   :  { %421 = vmatpush1.bf16.msra.mxu0 %v643_v6  ;;  %462 = vmatpush1.bf16.msra.mxu1 %v644_v7  ;;  %v661_v18 = vld [vmem:[%s955_s1 + $0x60] ss:$16 sps:$4 sm:$0xff]   ;;  %v662_v19 = vld [vmem:[%s955_s1 + $0x68] ss:$16 sps:$4 sm:$0xff]   ;;  %v663_v20 = vld [vmem:[%s955_s1 + $0x44] ss:$16 sps:$4 sm:$0xff]  }
   0x8   :  { %422 = vmatprep.subr.bf16.mxu0 %v645_v8  ;;  %463 = vmatprep.subr.bf16.mxu1 %v647_v9  ;;  %v665_v21 = vld [vmem:[%s955_s1 + $0x4c] ss:$16 sps:$4 sm:$0xff]   ;;  %v667_v22 = vld [vmem:[%s955_s1 + $0x40] ss:$16 sps:$4 sm:$0xff]   ;;  %v668_v23 = vld [vmem:[%s955_s1 + $0x48] ss:$16 sps:$4 sm:$0xff]  }
   0x9   :  { %v669_v24 = vld [vmem:[%s955_s1 + $0x24] ss:$16 sps:$4 sm:$0xff]   ;;  %v671_v25 = vld [vmem:[%s955_s1 + $0x2c] ss:$16 sps:$4 sm:$0xff]   ;;  %v673_v26 = vld [vmem:[%s955_s1 + $0x20] ss:$16 sps:$4 sm:$0xff]  }
   0xa   :  { %v674_v27 = vld [vmem:[%s955_s1 + $0x28] ss:$16 sps:$4 sm:$0xff]   ;;  %v675_v28 = vld [vmem:[%s955_s1 + $0x4] ss:$16 sps:$4 sm:$0xff]   ;;  %v677_v29 = vld [vmem:[%s955_s1 + $0xc] ss:$16 sps:$4 sm:$0xff]  }
   0xb   :  { %423 = vmatpush1.bf16.msra.mxu0 %v649_v10  ;;  %464 = vmatpush1.bf16.msra.mxu1 %v650_v11  ;;  %v679_v30 = vld [vmem:[%s955_s1] ss:$16 sps:$4 sm:$0xff]   ;;  %v680_v31 = vld [vmem:[%s955_s1 + $0x8] ss:$16 sps:$4 sm:$0xff]   ;;  %v681_v32 = vld [vmem:[%s955_s1 + $0x1e4] ss:$16 sps:$4 sm:$0xff]  }
   0xc   :  { %424 = vmatprep.subr.bf16.mxu0 %v651_v12  ;;  %465 = vmatprep.subr.bf16.mxu1 %v653_v13  ;;  %v683_v33 = vld [vmem:[%s955_s1 + $0x1ec] ss:$16 sps:$4 sm:$0xff]   ;;  %v685_v34 = vld [vmem:[%s955_s1 + $0x1e0] ss:$16 sps:$4 sm:$0xff]   ;;  %v686_v35 = vld [vmem:[%s955_s1 + $0x1e8] ss:$16 sps:$4 sm:$0xff]  }
   0xd   :  { %v687_v36 = vld [vmem:[%s955_s1 + $0x1c4] ss:$16 sps:$4 sm:$0xff]   ;;  %v689_v37 = vld [vmem:[%s955_s1 + $0x1cc] ss:$16 sps:$4 sm:$0xff]   ;;  %v691_v38 = vld [vmem:[%s955_s1 + $0x1c0] ss:$16 sps:$4 sm:$0xff]  }
   0xe   :  { %v692_v39 = vld [vmem:[%s955_s1 + $0x1c8] ss:$16 sps:$4 sm:$0xff]   ;;  %v693_v40 = vld [vmem:[%s955_s1 + $0x1a4] ss:$16 sps:$4 sm:$0xff]   ;;  %v695_v41 = vld [vmem:[%s955_s1 + $0x1ac] ss:$16 sps:$4 sm:$0xff]  }
   0xf   :  { %425 = vmatpush1.bf16.msra.mxu0 %v655_v14  ;;  %466 = vmatpush1.bf16.msra.mxu1 %v656_v15  ;;  %v697_v42 = vld [vmem:[%s955_s1 + $0x1a0] ss:$16 sps:$4 sm:$0xff]   ;;  %v698_v43 = vld [vmem:[%s955_s1 + $0x1a8] ss:$16 sps:$4 sm:$0xff]   ;;  %v699_v44 = vld [vmem:[%s955_s1 + $0x184] ss:$16 sps:$4 sm:$0xff]  }
  0x10   :  { %426 = vmatprep.subr.bf16.mxu0 %v657_v16  ;;  %467 = vmatprep.subr.bf16.mxu1 %v659_v17  ;;  %v701_v45 = vld [vmem:[%s955_s1 + $0x18c] ss:$16 sps:$4 sm:$0xff]   ;;  %v26_v46 = vld [vmem:[%s956_s0] sm:$0xff]  ;;  %v704_v49 = vld [vmem:[%s955_s1 + $0x188] ss:$16 sps:$4 sm:$0xff]   ;;  %v518_v4 = vshrl.u32 %v517_v3, 7 }
  0x11   :  { %v564_v47 = vcombine.high %v26_v46, %v26_v46  ;;  %v703_v48 = vld [vmem:[%s955_s1 + $0x180] ss:$16 sps:$4 sm:$0xff]   ;;  %v705_v50 = vld [vmem:[%s955_s1 + $0x164] ss:$16 sps:$4 sm:$0xff]   ;;  %v707_v51 = vld [vmem:[%s955_s1 + $0x16c] ss:$16 sps:$4 sm:$0xff]   ;;  %v563_v2 = vcombine.low %v26_v46, %v26_v46 }
  0x12   :  { %v709_v52 = vld [vmem:[%s955_s1 + $0x160] ss:$16 sps:$4 sm:$0xff]   ;;  %v710_v53 = vld [vmem:[%s955_s1 + $0x168] ss:$16 sps:$4 sm:$0xff]   ;;  %v711_v54 = vld [vmem:[%s955_s1 + $0x144] ss:$16 sps:$4 sm:$0xff]  }
  0x13   :  { %427 = vmatpush1.bf16.msra.mxu0 %v661_v18  ;;  %468 = vmatpush1.bf16.msra.mxu1 %v662_v19  ;;  %v713_v55 = vld [vmem:[%s955_s1 + $0x14c] ss:$16 sps:$4 sm:$0xff]   ;;  %v715_v56 = vld [vmem:[%s955_s1 + $0x140] ss:$16 sps:$4 sm:$0xff]   ;;  %v716_v57 = vld [vmem:[%s955_s1 + $0x148] ss:$16 sps:$4 sm:$0xff]  }
  0x14   :  { %428 = vmatprep.subr.bf16.mxu0 %v663_v20  ;;  %469 = vmatprep.subr.bf16.mxu1 %v665_v21  ;;  %v717_v58 = vld [vmem:[%s955_s1 + $0x124] ss:$16 sps:$4 sm:$0xff]   ;;  %v719_v59 = vld [vmem:[%s955_s1 + $0x12c] ss:$16 sps:$4 sm:$0xff]   ;;  %v721_v60 = vld [vmem:[%s955_s1 + $0x120] ss:$16 sps:$4 sm:$0xff]  }
  0x15   :  { %450 = vmatprep.mubr.bf16.mxu0 %v564_v47  ;;  %491 = vmatprep.mubr.bf16.mxu1 %v564_v47  ;;  %v722_v61 = vld [vmem:[%s955_s1 + $0x128] ss:$16 sps:$4 sm:$0xff]   ;;  %v723_v62 = vld [vmem:[%s955_s1 + $0x104] ss:$16 sps:$4 sm:$0xff]   ;;  %v725_v63 = vld [vmem:[%s955_s1 + $0x10c] ss:$16 sps:$4 sm:$0xff]  }
  0x16   :  { %v727_v0 = vld [vmem:[%s955_s1 + $0x100] ss:$16 sps:$4 sm:$0xff]   ;;  %v728_v1 = vld [vmem:[%s955_s1 + $0x108] ss:$16 sps:$4 sm:$0xff]   ;;  %v519_v5 = vsub.s32 0, %v518_v4  ;;  %v527_v6 = vsub.s32 2, %v518_v4 }
  0x17   :  { %429 = vmatpush1.bf16.msra.mxu0 %v667_v22  ;;  %470 = vmatpush1.bf16.msra.mxu1 %v668_v23  ;;  %v523_v7 = vsub.s32 1, %v518_v4  ;;  %v531_v8 = vsub.s32 3, %v518_v4  ;;  %v515_v9 = vld [vmem:[%s957_s2] sm:$0xf] }
  0x18   :  { %430 = vmatprep.subr.bf16.mxu0 %v669_v24  ;;  %471 = vmatprep.subr.bf16.mxu1 %v671_v25  ;;  %v520_v10 = vrot.slane %v515_v9, %v519_v5  ;;  %v528_v11 = vrot.slane %v515_v9, %v527_v6 }
  0x19   :  { %v524_v12 = vrot.slane %v515_v9, %v523_v7  ;;  %v532_v13 = vrot.slane %v515_v9, %v531_v8 }
  0x1b   :  { %431 = vmatpush1.bf16.msra.mxu0 %v673_v26  ;;  %472 = vmatpush1.bf16.msra.mxu1 %v674_v27 }
  0x1c   :  { %432 = vmatprep.subr.bf16.mxu0 %v675_v28  ;;  %473 = vmatprep.subr.bf16.mxu1 %v677_v29 }
  0x1f   :  { %433 = vmatpush1.bf16.msra.mxu0 %v679_v30  ;;  %474 = vmatpush1.bf16.msra.mxu1 %v680_v31 }
  0x20   :  { %434 = vmatprep.subr.bf16.mxu0 %v681_v32  ;;  %475 = vmatprep.subr.bf16.mxu1 %v683_v33 }
  0x23   :  { %435 = vmatpush2.bf16.msra.mxu0 %v685_v34  ;;  %476 = vmatpush2.bf16.msra.mxu1 %v686_v35 }
  0x24   :  { %436 = vmatprep.subr.bf16.mxu0 %v687_v36  ;;  %477 = vmatprep.subr.bf16.mxu1 %v689_v37 }
  0x27   :  { %437 = vmatpush2.bf16.msra.mxu0 %v691_v38  ;;  %478 = vmatpush2.bf16.msra.mxu1 %v692_v39 }
  0x28   :  { %438 = vmatprep.subr.bf16.mxu0 %v693_v40  ;;  %479 = vmatprep.subr.bf16.mxu1 %v695_v41 }
  0x2b   :  { %439 = vmatpush2.bf16.msra.mxu0 %v697_v42  ;;  %480 = vmatpush2.bf16.msra.mxu1 %v698_v43 }
  0x2c   :  { %440 = vmatprep.subr.bf16.mxu0 %v699_v44  ;;  %481 = vmatprep.subr.bf16.mxu1 %v701_v45 }
  0x2f   :  { %441 = vmatpush2.bf16.msra.mxu0 %v703_v48  ;;  %482 = vmatpush2.bf16.msra.mxu1 %v704_v49 }
  0x30   :  { %442 = vmatprep.subr.bf16.mxu0 %v705_v50  ;;  %483 = vmatprep.subr.bf16.mxu1 %v707_v51 }
  0x33   :  { %443 = vmatpush2.bf16.msra.mxu0 %v709_v52  ;;  %484 = vmatpush2.bf16.msra.mxu1 %v710_v53 }
  0x34   :  { %444 = vmatprep.subr.bf16.mxu0 %v711_v54  ;;  %485 = vmatprep.subr.bf16.mxu1 %v713_v55 }
  0x37   :  { %445 = vmatpush2.bf16.msra.mxu0 %v715_v56  ;;  %486 = vmatpush2.bf16.msra.mxu1 %v716_v57 }
  0x38   :  { %446 = vmatprep.subr.bf16.mxu0 %v717_v58  ;;  %487 = vmatprep.subr.bf16.mxu1 %v719_v59 }
  0x3b   :  { %447 = vmatpush2.bf16.msra.mxu0 %v721_v60  ;;  %488 = vmatpush2.bf16.msra.mxu1 %v722_v61 }
  0x3c   :  { %448 = vmatprep.subr.bf16.mxu0 %v723_v62  ;;  %489 = vmatprep.subr.bf16.mxu1 %v725_v63 }
  0x3f   :  { %449 = vmatpush2.bf16.msra.mxu0 %v727_v0  ;;  %490 = vmatpush2.bf16.msra.mxu1 %v728_v1 }
  0x42   :  { %451 = vmatmul.mubr.bf16.vlgmr.msra.gmra.mxu0 %v563_v2  ;;  %492 = vmatmul.mubr.bf16.vlgmr.msra.gmra.mxu1 %v563_v2 }
 0x102   :  { %v452_v14 = vpop.f32.mrf.mxu0  ;;  %v493_v15 = vpop.f32.mrf.mxu1 }
 0x103   :  { %v537_v18 = vadd.f32 %v520_v10, %v452_v14  ;;  %v539_v19 = vadd.f32 %v528_v11, %v493_v15 }
 0x104   :  { %v454_v16 = vpop.f32.mrf.mxu0  ;;  %v495_v17 = vpop.f32.mrf.mxu1 }
 0x105   :  { %v538_v20 = vadd.f32 %v524_v12, %v454_v16  ;;  %v540_v21 = vadd.f32 %v532_v13, %v495_v17 }
 0x106   :  { %v456_v22 = vpop.f32.mrf.mxu0  ;;  %v497_v23 = vpop.f32.mrf.mxu1 }
 0x107   :  { %v631_v24 = vpack.c.bf16 %v538_v20, %v537_v18  ;;  %v632_v25 = vpack.c.bf16 %v540_v21, %v539_v19 }
 0x108   :  { %v457_v26 = vpop.f32.mrf.mxu0  ;;  %v498_v27 = vpop.f32.mrf.mxu1 }
 0x109   :  { %557 = vst [vmem:[%s958_s3] sm:$0xff] %v631_v24  ;;  %558 = vst [vmem:[%s958_s3 + $0x8] sm:$0xff] %v632_v25 }

// kernel: forward.40
= control target key start
LH: loop header
LB: loop body
LE: loop exit
PB: predicated region body
PF: predicated region fallthrough
CT: control target
= control target key end

     0   :  { %s1937_s15 = smov 0   ;;  %s1939_s16 = smov 0   ;;  %s2137_s0 = inlined_call_operand.vmem [shape: bf16[8,4608], index: 0, kind: input, shape index: {}]   ;;  %s2138_s1 = inlined_call_operand.vmem [shape: bf16[4608,512], index: 1, kind: input, shape index: {}]   ;;  %s2139_s2 = inlined_call_operand.vmem [shape: f32[1,512], index: 2, kind: input, shape index: {}]   ;;  %s2140_s3 = inlined_call_operand.vmem [shape: bf16[8,512], index: 3, kind: input, shape index: {}]   ;;  %s2141_s4 = inlined_call_operand.vmem [shape: bf16[8,512], index: 4, kind: output, shape index: {}]  }
   0x1   :  { %s1941_s17 = smov 0  }
   0x2 LB: > { %s26_s18 = sadd.s32 1, %s1905_s16  ;;  %p1517_p0 = scmp.ge.s32.totalorder %s1909_s17, 1  ;;  %s1909_s17 = sphi %s1941_s17, %s14_s17   ;;  %s1905_s16 = sphi %s1939_s16, %s2143_s16   ;;  %s1901_s15 = sphi %s1937_s15, %s2142_s15  }
   0x3   : > { %p27_p1 = scmp.ge.s32.totalorder %s26_s18, 9  ;;  %p236_p2 = scmp.lt.s32.totalorder %s1909_s17, 10 }
   0x5   : > { %s2145_s18 = smov (%p27_p1, %s26_s18), 0  ;;  %p237_p3 = pnand %p1517_p0, %p236_p2 }
   0x6   : > { %s1518_s19 = sshll.u32 (!%p237_p3), %s1901_s15, 2  ;;  %s1520_s20 = sshll.u32 (!%p237_p3), %s1901_s15, 6 }
   0x7   : > { %240 = sbr.rel (%p237_p3) target bundleno = 370 (0x172), region = 36  ;;  %p296_p4 = scmp.lt.s32.totalorder (!%p237_p3), %s1518_s19, 35 }
   0x8   : > { %p305_p5 = scmp.lt.s32.totalorder (!%p237_p3), %s1520_s20, 575  ;;  %p1523_p6 = scmp.ne.s32.totalorder (!%p237_p3), %s1901_s15, 0 }
   0xc   : > { %s2147_s19 = smov (!%p296_p4, %s1518_s19), 35  ;;  %s2149_s20 = smov (!%p305_p5, %s1520_s20), 575 }
   0xd   : > { %s1519_s21 = sshll.u32 %s2147_s19, 2  ;;  %s1663_s25 = sshll.u32 %s2149_s20, 4 }
   0xe   : > { %s1962_s24 = scalar_lea.vmem %s2137_s0, %s1519_s21  ;;  %s1967_s28 = scalar_lea.vmem %s2138_s1, %s1663_s25 }
   0xf   : > { %343 = sbr.rel (%p1523_p6) target bundleno = 23 (0x17), region = 40 }
  0x14   : > { %v1911_v0 = vmov 0.0  }
  0x15   : > { %344 = vst [vmem:[#allocation2 + $0x10] sm:$0xff] %v1911_v0  ;;  %345 = vst [vmem:[#allocation2] sm:$0xff] %v1911_v0 }
  0x16   : > { %346 = vst [vmem:[#allocation2 + $0x18] sm:$0xff] %v1911_v0  ;;  %347 = vst [vmem:[#allocation2 + $0x8] sm:$0xff] %v1911_v0 }
  0x17 PF: > { %v1691_v1 = vld [vmem:[%s1967_s28 + $0xe4] ss:$16 sps:$4 sm:$0xff]   ;;  %v1695_v3 = vld [vmem:[%s1967_s28 + $0xe0] ss:$16 sps:$4 sm:$0xff]   ;;  %v353_v49 = vld [vmem:[%s1962_s24 + $0x8] sm:$0xff]  ;;  %p1656_p7 = scmp.ne.s32.totalorder %s1901_s15, 8 }
  0x18   : > { %v1693_v2 = vld [vmem:[%s1967_s28 + $0x2e4] ss:$16 sps:$4 sm:$0xff]   ;;  %1136 = vmatprep.subr.bf16.mxu0 %v1691_v1  ;;  %v1696_v4 = vld [vmem:[%s1967_s28 + $0x2e0] ss:$16 sps:$4 sm:$0xff]   ;;  %v1527_v52 = vcombine.high %v353_v49, %v353_v49 }
  0x19   : > { %1177 = vmatprep.subr.bf16.mxu1 %v1693_v2  ;;  %v1697_v5 = vld [vmem:[%s1967_s28 + $0xc4] ss:$16 sps:$4 sm:$0xff]   ;;  %1137 = vmatpush1.bf16.msra.mxu0 %v1695_v3  ;;  %v1701_v7 = vld [vmem:[%s1967_s28 + $0xc0] ss:$16 sps:$4 sm:$0xff]  }
  0x1a   : > { %1178 = vmatpush1.bf16.msra.mxu1 %v1696_v4  ;;  %v1699_v6 = vld [vmem:[%s1967_s28 + $0x2c4] ss:$16 sps:$4 sm:$0xff]   ;;  %1138 = vmatprep.subr.bf16.mxu0 %v1697_v5  ;;  %v1702_v8 = vld [vmem:[%s1967_s28 + $0x2c0] ss:$16 sps:$4 sm:$0xff]   ;;  %v1793_v5 = vld [vmem:[%s1967_s28 + $0xec] ss:$16 sps:$4 sm:$0xff]  }
  0x1b   : > { %1179 = vmatprep.subr.bf16.mxu1 %v1699_v6  ;;  %v1703_v9 = vld [vmem:[%s1967_s28 + $0xa4] ss:$16 sps:$4 sm:$0xff]   ;;  %v1707_v11 = vld [vmem:[%s1967_s28 + $0xa0] ss:$16 sps:$4 sm:$0xff]   ;;  %1209 = vmatprep.mubr.bf16.mxu1 %v1527_v52  ;;  %v1796_v6 = vld [vmem:[%s1967_s28 + $0x2ec] ss:$16 sps:$4 sm:$0xff]  }
  0x1c   : > { %v1705_v10 = vld [vmem:[%s1967_s28 + $0x2a4] ss:$16 sps:$4 sm:$0xff]   ;;  %v1708_v12 = vld [vmem:[%s1967_s28 + $0x2a0] ss:$16 sps:$4 sm:$0xff]  }
  0x1d   : > { %1139 = vmatpush1.bf16.msra.mxu0 %v1701_v7  ;;  %v1709_v13 = vld [vmem:[%s1967_s28 + $0x84] ss:$16 sps:$4 sm:$0xff]   ;;  %v1713_v15 = vld [vmem:[%s1967_s28 + $0x80] ss:$16 sps:$4 sm:$0xff]  }
  0x1e   : > { %1180 = vmatpush1.bf16.msra.mxu1 %v1702_v8  ;;  %1140 = vmatprep.subr.bf16.mxu0 %v1703_v9  ;;  %v1711_v14 = vld [vmem:[%s1967_s28 + $0x284] ss:$16 sps:$4 sm:$0xff]   ;;  %v1714_v16 = vld [vmem:[%s1967_s28 + $0x280] ss:$16 sps:$4 sm:$0xff]   ;;  %v2043_v8 = vcombine.low %v353_v49, %v353_v49  ;;  %v1791_v9 = vld [vmem:[%s1967_s28 + $0xe8] ss:$16 sps:$4 sm:$0xff]  }
  0x1f   : > { %1181 = vmatprep.subr.bf16.mxu1 %v1705_v10  ;;  %v1715_v17 = vld [vmem:[%s1967_s28 + $0x64] ss:$16 sps:$4 sm:$0xff]   ;;  %v1719_v19 = vld [vmem:[%s1967_s28 + $0x60] ss:$16 sps:$4 sm:$0xff]   ;;  %v1794_v10 = vld [vmem:[%s1967_s28 + $0x2e8] ss:$16 sps:$4 sm:$0xff]  }
  0x20   : > { %v1717_v18 = vld [vmem:[%s1967_s28 + $0x264] ss:$16 sps:$4 sm:$0xff]   ;;  %v1720_v20 = vld [vmem:[%s1967_s28 + $0x260] ss:$16 sps:$4 sm:$0xff]   ;;  %v1851_v49 = vld [vmem:[%s1967_s28 + $0x1a8] ss:$16 sps:$4 sm:$0xff]  }
  0x21   : > { %1141 = vmatpush1.bf16.msra.mxu0 %v1707_v11  ;;  %v1721_v21 = vld [vmem:[%s1967_s28 + $0x44] ss:$16 sps:$4 sm:$0xff]   ;;  %v1725_v23 = vld [vmem:[%s1967_s28 + $0x40] ss:$16 sps:$4 sm:$0xff]   ;;  %v1799_v11 = vld [vmem:[%s1967_s28 + $0xcc] ss:$16 sps:$4 sm:$0xff]  }
  0x22   : > { %1182 = vmatpush1.bf16.msra.mxu1 %v1708_v12  ;;  %1142 = vmatprep.subr.bf16.mxu0 %v1709_v13  ;;  %v1723_v22 = vld [vmem:[%s1967_s28 + $0x244] ss:$16 sps:$4 sm:$0xff]   ;;  %v1726_v24 = vld [vmem:[%s1967_s28 + $0x240] ss:$16 sps:$4 sm:$0xff]   ;;  %v1802_v12 = vld [vmem:[%s1967_s28 + $0x2cc] ss:$16 sps:$4 sm:$0xff]  }
  0x23   : > { %1183 = vmatprep.subr.bf16.mxu1 %v1711_v14  ;;  %v1727_v25 = vld [vmem:[%s1967_s28 + $0x24] ss:$16 sps:$4 sm:$0xff]   ;;  %v1731_v27 = vld [vmem:[%s1967_s28 + $0x20] ss:$16 sps:$4 sm:$0xff]   ;;  %v1797_v13 = vld [vmem:[%s1967_s28 + $0xc8] ss:$16 sps:$4 sm:$0xff]  }
  0x24   : > { %v1729_v26 = vld [vmem:[%s1967_s28 + $0x224] ss:$16 sps:$4 sm:$0xff]   ;;  %v1732_v28 = vld [vmem:[%s1967_s28 + $0x220] ss:$16 sps:$4 sm:$0xff]   ;;  %v1800_v14 = vld [vmem:[%s1967_s28 + $0x2c8] ss:$16 sps:$4 sm:$0xff]  }
  0x25   : > { %1143 = vmatpush1.bf16.msra.mxu0 %v1713_v15  ;;  %v1733_v29 = vld [vmem:[%s1967_s28 + $0x4] ss:$16 sps:$4 sm:$0xff]   ;;  %v1737_v31 = vld [vmem:[%s1967_s28] ss:$16 sps:$4 sm:$0xff]   ;;  %v1805_v15 = vld [vmem:[%s1967_s28 + $0xac] ss:$16 sps:$4 sm:$0xff]  }
  0x26   : > { %1184 = vmatpush1.bf16.msra.mxu1 %v1714_v16  ;;  %1144 = vmatprep.subr.bf16.mxu0 %v1715_v17  ;;  %v1735_v30 = vld [vmem:[%s1967_s28 + $0x204] ss:$16 sps:$4 sm:$0xff]   ;;  %v1738_v32 = vld [vmem:[%s1967_s28 + $0x200] ss:$16 sps:$4 sm:$0xff]   ;;  %v1808_v16 = vld [vmem:[%s1967_s28 + $0x2ac] ss:$16 sps:$4 sm:$0xff]  }
  0x27   : > { %1185 = vmatprep.subr.bf16.mxu1 %v1717_v18  ;;  %v1739_v33 = vld [vmem:[%s1967_s28 + $0x1e4] ss:$16 sps:$4 sm:$0xff]   ;;  %v1743_v35 = vld [vmem:[%s1967_s28 + $0x1e0] ss:$16 sps:$4 sm:$0xff]   ;;  %v1803_v17 = vld [vmem:[%s1967_s28 + $0xa8] ss:$16 sps:$4 sm:$0xff]  }
  0x28   : > { %v1741_v34 = vld [vmem:[%s1967_s28 + $0x3e4] ss:$16 sps:$4 sm:$0xff]   ;;  %v1744_v36 = vld [vmem:[%s1967_s28 + $0x3e0] ss:$16 sps:$4 sm:$0xff]   ;;  %v1806_v18 = vld [vmem:[%s1967_s28 + $0x2a8] ss:$16 sps:$4 sm:$0xff]  }
  0x29   : > { %1145 = vmatpush1.bf16.msra.mxu0 %v1719_v19  ;;  %v1745_v37 = vld [vmem:[%s1967_s28 + $0x1c4] ss:$16 sps:$4 sm:$0xff]   ;;  %v1749_v39 = vld [vmem:[%s1967_s28 + $0x1c0] ss:$16 sps:$4 sm:$0xff]   ;;  %v1811_v19 = vld [vmem:[%s1967_s28 + $0x8c] ss:$16 sps:$4 sm:$0xff]  }
  0x2a   : > { %1186 = vmatpush1.bf16.msra.mxu1 %v1720_v20  ;;  %1146 = vmatprep.subr.bf16.mxu0 %v1721_v21  ;;  %v1747_v38 = vld [vmem:[%s1967_s28 + $0x3c4] ss:$16 sps:$4 sm:$0xff]   ;;  %v1750_v40 = vld [vmem:[%s1967_s28 + $0x3c0] ss:$16 sps:$4 sm:$0xff]   ;;  %v1814_v20 = vld [vmem:[%s1967_s28 + $0x28c] ss:$16 sps:$4 sm:$0xff]  }
  0x2b   : > { %1187 = vmatprep.subr.bf16.mxu1 %v1723_v22  ;;  %v1751_v41 = vld [vmem:[%s1967_s28 + $0x1a4] ss:$16 sps:$4 sm:$0xff]   ;;  %v1755_v43 = vld [vmem:[%s1967_s28 + $0x1a0] ss:$16 sps:$4 sm:$0xff]   ;;  %v1809_v21 = vld [vmem:[%s1967_s28 + $0x88] ss:$16 sps:$4 sm:$0xff]  }
  0x2c   : > { %v1753_v42 = vld [vmem:[%s1967_s28 + $0x3a4] ss:$16 sps:$4 sm:$0xff]   ;;  %v1756_v44 = vld [vmem:[%s1967_s28 + $0x3a0] ss:$16 sps:$4 sm:$0xff]   ;;  %v1812_v22 = vld [vmem:[%s1967_s28 + $0x288] ss:$16 sps:$4 sm:$0xff]  }
  0x2d   : > { %1147 = vmatpush1.bf16.msra.mxu0 %v1725_v23  ;;  %v1757_v45 = vld [vmem:[%s1967_s28 + $0x184] ss:$16 sps:$4 sm:$0xff]   ;;  %v1761_v50 = vld [vmem:[%s1967_s28 + $0x180] ss:$16 sps:$4 sm:$0xff]   ;;  %v1817_v23 = vld [vmem:[%s1967_s28 + $0x6c] ss:$16 sps:$4 sm:$0xff]  }
  0x2e   : > { %1188 = vmatpush1.bf16.msra.mxu1 %v1726_v24  ;;  %1148 = vmatprep.subr.bf16.mxu0 %v1727_v25  ;;  %v1759_v46 = vld [vmem:[%s1967_s28 + $0x384] ss:$16 sps:$4 sm:$0xff]   ;;  %v1762_v51 = vld [vmem:[%s1967_s28 + $0x380] ss:$16 sps:$4 sm:$0xff]   ;;  %v1820_v24 = vld [vmem:[%s1967_s28 + $0x26c] ss:$16 sps:$4 sm:$0xff]  }
  0x2f   : > { %1189 = vmatprep.subr.bf16.mxu1 %v1729_v26  ;;  %v352_v47 = vld [vmem:[%s1962_s24] sm:$0xff]  ;;  %v1815_v25 = vld [vmem:[%s1967_s28 + $0x68] ss:$16 sps:$4 sm:$0xff]  }
  0x30   : > { %v2017_v48 = vcombine.high %v352_v47, %v352_v47  ;;  %v1763_v53 = vld [vmem:[%s1967_s28 + $0x164] ss:$16 sps:$4 sm:$0xff]   ;;  %v1767_v55 = vld [vmem:[%s1967_s28 + $0x160] ss:$16 sps:$4 sm:$0xff]   ;;  %v2041_v7 = vcombine.low %v352_v47, %v352_v47  ;;  %v1818_v26 = vld [vmem:[%s1967_s28 + $0x268] ss:$16 sps:$4 sm:$0xff]  }
  0x31   : > { %1149 = vmatpush1.bf16.msra.mxu0 %v1731_v27  ;;  %v1765_v54 = vld [vmem:[%s1967_s28 + $0x364] ss:$16 sps:$4 sm:$0xff]   ;;  %v1768_v56 = vld [vmem:[%s1967_s28 + $0x360] ss:$16 sps:$4 sm:$0xff]   ;;  %v1823_v27 = vld [vmem:[%s1967_s28 + $0x4c] ss:$16 sps:$4 sm:$0xff]  }
  0x32   : > { %1190 = vmatpush1.bf16.msra.mxu1 %v1732_v28  ;;  %1150 = vmatprep.subr.bf16.mxu0 %v1733_v29  ;;  %v1769_v57 = vld [vmem:[%s1967_s28 + $0x144] ss:$16 sps:$4 sm:$0xff]   ;;  %v1773_v59 = vld [vmem:[%s1967_s28 + $0x140] ss:$16 sps:$4 sm:$0xff]   ;;  %v1826_v28 = vld [vmem:[%s1967_s28 + $0x24c] ss:$16 sps:$4 sm:$0xff]  }
  0x33   : > { %1191 = vmatprep.subr.bf16.mxu1 %v1735_v30  ;;  %1168 = vmatprep.mubr.bf16.mxu0 %v2017_v48  ;;  %v1771_v58 = vld [vmem:[%s1967_s28 + $0x344] ss:$16 sps:$4 sm:$0xff]   ;;  %v1774_v60 = vld [vmem:[%s1967_s28 + $0x340] ss:$16 sps:$4 sm:$0xff]   ;;  %v1821_v29 = vld [vmem:[%s1967_s28 + $0x48] ss:$16 sps:$4 sm:$0xff]  }
  0x34   : > { %v1775_v61 = vld [vmem:[%s1967_s28 + $0x124] ss:$16 sps:$4 sm:$0xff]   ;;  %v1779_v63 = vld [vmem:[%s1967_s28 + $0x120] ss:$16 sps:$4 sm:$0xff]   ;;  %v1824_v30 = vld [vmem:[%s1967_s28 + $0x248] ss:$16 sps:$4 sm:$0xff]  }
  0x35   : > { %1151 = vmatpush1.bf16.msra.mxu0 %v1737_v31  ;;  %v1777_v62 = vld [vmem:[%s1967_s28 + $0x324] ss:$16 sps:$4 sm:$0xff]   ;;  %v1780_v0 = vld [vmem:[%s1967_s28 + $0x320] ss:$16 sps:$4 sm:$0xff]   ;;  %v1829_v31 = vld [vmem:[%s1967_s28 + $0x2c] ss:$16 sps:$4 sm:$0xff]  }
  0x36   : > { %1192 = vmatpush1.bf16.msra.mxu1 %v1738_v32  ;;  %1152 = vmatprep.subr.bf16.mxu0 %v1739_v33  ;;  %v1781_v1 = vld [vmem:[%s1967_s28 + $0x104] ss:$16 sps:$4 sm:$0xff]   ;;  %v1785_v3 = vld [vmem:[%s1967_s28 + $0x100] ss:$16 sps:$4 sm:$0xff]   ;;  %v1832_v32 = vld [vmem:[%s1967_s28 + $0x22c] ss:$16 sps:$4 sm:$0xff]  }
  0x37   : > { %1193 = vmatprep.subr.bf16.mxu1 %v1741_v34  ;;  %v1783_v2 = vld [vmem:[%s1967_s28 + $0x304] ss:$16 sps:$4 sm:$0xff]   ;;  %v1786_v4 = vld [vmem:[%s1967_s28 + $0x300] ss:$16 sps:$4 sm:$0xff]   ;;  %v1827_v33 = vld [vmem:[%s1967_s28 + $0x28] ss:$16 sps:$4 sm:$0xff]  }
  0x38   : > { %v1830_v34 = vld [vmem:[%s1967_s28 + $0x228] ss:$16 sps:$4 sm:$0xff]   ;;  %v1853_v47 = vld [vmem:[%s1967_s28 + $0x1ac] ss:$16 sps:$4 sm:$0xff]  }
  0x39   : > { %1153 = vmatpush2.bf16.msra.mxu0 %v1743_v35  ;;  %v1835_v35 = vld [vmem:[%s1967_s28 + $0xc] ss:$16 sps:$4 sm:$0xff]  }
  0x3a   : > { %1194 = vmatpush2.bf16.msra.mxu1 %v1744_v36  ;;  %1154 = vmatprep.subr.bf16.mxu0 %v1745_v37  ;;  %v1838_v36 = vld [vmem:[%s1967_s28 + $0x20c] ss:$16 sps:$4 sm:$0xff]   ;;  %v1833_v37 = vld [vmem:[%s1967_s28 + $0x8] ss:$16 sps:$4 sm:$0xff]  }
  0x3b   : > { %1195 = vmatprep.subr.bf16.mxu1 %v1747_v38  ;;  %v1836_v38 = vld [vmem:[%s1967_s28 + $0x208] ss:$16 sps:$4 sm:$0xff]  }
  0x3d   : > { %1155 = vmatpush2.bf16.msra.mxu0 %v1749_v39  ;;  %v1841_v39 = vld [vmem:[%s1967_s28 + $0x1ec] ss:$16 sps:$4 sm:$0xff]  }
  0x3e   : > { %1196 = vmatpush2.bf16.msra.mxu1 %v1750_v40  ;;  %1156 = vmatprep.subr.bf16.mxu0 %v1751_v41  ;;  %v1844_v40 = vld [vmem:[%s1967_s28 + $0x3ec] ss:$16 sps:$4 sm:$0xff]   ;;  %v1839_v41 = vld [vmem:[%s1967_s28 + $0x1e8] ss:$16 sps:$4 sm:$0xff]  }
  0x3f   : > { %1197 = vmatprep.subr.bf16.mxu1 %v1753_v42  ;;  %v1842_v42 = vld [vmem:[%s1967_s28 + $0x3e8] ss:$16 sps:$4 sm:$0xff]  }
  0x41   : > { %1157 = vmatpush2.bf16.msra.mxu0 %v1755_v43  ;;  %v1847_v43 = vld [vmem:[%s1967_s28 + $0x1cc] ss:$16 sps:$4 sm:$0xff]  }
  0x42   : > { %1198 = vmatpush2.bf16.msra.mxu1 %v1756_v44  ;;  %1158 = vmatprep.subr.bf16.mxu0 %v1757_v45  ;;  %v1850_v44 = vld [vmem:[%s1967_s28 + $0x3cc] ss:$16 sps:$4 sm:$0xff]   ;;  %v1845_v45 = vld [vmem:[%s1967_s28 + $0x1c8] ss:$16 sps:$4 sm:$0xff]  }
  0x43   : > { %1199 = vmatprep.subr.bf16.mxu1 %v1759_v46  ;;  %v1848_v46 = vld [vmem:[%s1967_s28 + $0x3c8] ss:$16 sps:$4 sm:$0xff]  }
  0x45   : > { %1159 = vmatpush2.bf16.msra.mxu0 %v1761_v50  ;;  %v1854_v50 = vld [vmem:[%s1967_s28 + $0x3a8] ss:$16 sps:$4 sm:$0xff]  }
  0x46   : > { %1200 = vmatpush2.bf16.msra.mxu1 %v1762_v51  ;;  %1160 = vmatprep.subr.bf16.mxu0 %v1763_v53  ;;  %v1859_v51 = vld [vmem:[%s1967_s28 + $0x18c] ss:$16 sps:$4 sm:$0xff]   ;;  %v1857_v53 = vld [vmem:[%s1967_s28 + $0x188] ss:$16 sps:$4 sm:$0xff]  }
  0x47   : > { %1201 = vmatprep.subr.bf16.mxu1 %v1765_v54  ;;  %v1860_v54 = vld [vmem:[%s1967_s28 + $0x388] ss:$16 sps:$4 sm:$0xff]  }
  0x49   : > { %1161 = vmatpush2.bf16.msra.mxu0 %v1767_v55  ;;  %v1865_v55 = vld [vmem:[%s1967_s28 + $0x16c] ss:$16 sps:$4 sm:$0xff]  }
  0x4a   : > { %1202 = vmatpush2.bf16.msra.mxu1 %v1768_v56  ;;  %1162 = vmatprep.subr.bf16.mxu0 %v1769_v57  ;;  %v1868_v56 = vld [vmem:[%s1967_s28 + $0x36c] ss:$16 sps:$4 sm:$0xff]   ;;  %v1863_v57 = vld [vmem:[%s1967_s28 + $0x168] ss:$16 sps:$4 sm:$0xff]  }
  0x4b   : > { %1203 = vmatprep.subr.bf16.mxu1 %v1771_v58  ;;  %v1866_v58 = vld [vmem:[%s1967_s28 + $0x368] ss:$16 sps:$4 sm:$0xff]  }
  0x4d   : > { %1163 = vmatpush2.bf16.msra.mxu0 %v1773_v59  ;;  %v1871_v59 = vld [vmem:[%s1967_s28 + $0x14c] ss:$16 sps:$4 sm:$0xff]  }
  0x4e   : > { %1204 = vmatpush2.bf16.msra.mxu1 %v1774_v60  ;;  %1164 = vmatprep.subr.bf16.mxu0 %v1775_v61  ;;  %v1874_v60 = vld [vmem:[%s1967_s28 + $0x34c] ss:$16 sps:$4 sm:$0xff]   ;;  %v1869_v61 = vld [vmem:[%s1967_s28 + $0x148] ss:$16 sps:$4 sm:$0xff]  }
  0x4f   : > { %1205 = vmatprep.subr.bf16.mxu1 %v1777_v62  ;;  %v1872_v62 = vld [vmem:[%s1967_s28 + $0x348] ss:$16 sps:$4 sm:$0xff]  }
  0x51   : > { %1165 = vmatpush2.bf16.msra.mxu0 %v1779_v63  ;;  %v1877_v63 = vld [vmem:[%s1967_s28 + $0x12c] ss:$16 sps:$4 sm:$0xff]  }
  0x52   : > { %1206 = vmatpush2.bf16.msra.mxu1 %v1780_v0  ;;  %1166 = vmatprep.subr.bf16.mxu0 %v1781_v1  ;;  %v1880_v0 = vld [vmem:[%s1967_s28 + $0x32c] ss:$16 sps:$4 sm:$0xff]   ;;  %v1875_v1 = vld [vmem:[%s1967_s28 + $0x128] ss:$16 sps:$4 sm:$0xff]  }
  0x53   : > { %1207 = vmatprep.subr.bf16.mxu1 %v1783_v2  ;;  %v1878_v2 = vld [vmem:[%s1967_s28 + $0x328] ss:$16 sps:$4 sm:$0xff]  }
  0x55   : > { %1167 = vmatpush2.bf16.msra.mxu0 %v1785_v3  ;;  %v1883_v3 = vld [vmem:[%s1967_s28 + $0x10c] ss:$16 sps:$4 sm:$0xff]  }
  0x56   : > { %1208 = vmatpush2.bf16.msra.mxu1 %v1786_v4  ;;  %1218 = vmatprep.subr.bf16.mxu0 %v1793_v5  ;;  %v1886_v4 = vld [vmem:[%s1967_s28 + $0x30c] ss:$16 sps:$4 sm:$0xff]   ;;  %v1881_v5 = vld [vmem:[%s1967_s28 + $0x108] ss:$16 sps:$4 sm:$0xff]  }
  0x57   : > { %1259 = vmatprep.subr.bf16.mxu1 %v1796_v6  ;;  %v1884_v6 = vld [vmem:[%s1967_s28 + $0x308] ss:$16 sps:$4 sm:$0xff]  }
  0x58   : > { %1169 = vmatmul.mubr.bf16.vlgmr.msra.gmra.mxu0 %v2041_v7 }
  0x59   : > { %1210 = vmatmul.mubr.bf16.vlgmr.msra.gmra.mxu1 %v2043_v8  ;;  %1219 = vmatpush1.bf16.msra.mxu0 %v1791_v9 }
  0x5a   : > { %1260 = vmatpush1.bf16.msra.mxu1 %v1794_v10  ;;  %1220 = vmatprep.subr.bf16.mxu0 %v1799_v11  ;;  %v348_v10 = vld [vmem:[#allocation2 + $0x10] sm:$0xff] }
  0x5b   : > { %1261 = vmatprep.subr.bf16.mxu1 %v1802_v12  ;;  %1250 = vmatprep.mubr.bf16.mxu0 %v2017_v48  ;;  %v1856_v48 = vld [vmem:[%s1967_s28 + $0x3ac] ss:$16 sps:$4 sm:$0xff]  }
  0x5c   : > { %1291 = vmatprep.mubr.bf16.mxu1 %v1527_v52  ;;  %v1862_v52 = vld [vmem:[%s1967_s28 + $0x38c] ss:$16 sps:$4 sm:$0xff]  }
  0x5d   : > { %1221 = vmatpush1.bf16.msra.mxu0 %v1797_v13 }
  0x5e   : > { %1262 = vmatpush1.bf16.msra.mxu1 %v1800_v14  ;;  %1222 = vmatprep.subr.bf16.mxu0 %v1805_v15  ;;  %v349_v14 = vld [vmem:[#allocation2] sm:$0xff] }
  0x5f   : > { %1263 = vmatprep.subr.bf16.mxu1 %v1808_v16 }
  0x61   : > { %1223 = vmatpush1.bf16.msra.mxu0 %v1803_v17 }
  0x62   : > { %1264 = vmatpush1.bf16.msra.mxu1 %v1806_v18  ;;  %1224 = vmatprep.subr.bf16.mxu0 %v1811_v19 }
  0x63   : > { %1265 = vmatprep.subr.bf16.mxu1 %v1814_v20 }
  0x65   : > { %1225 = vmatpush1.bf16.msra.mxu0 %v1809_v21 }
  0x66   : > { %1266 = vmatpush1.bf16.msra.mxu1 %v1812_v22  ;;  %1226 = vmatprep.subr.bf16.mxu0 %v1817_v23 }
  0x67   : > { %1267 = vmatprep.subr.bf16.mxu1 %v1820_v24 }
  0x69   : > { %1227 = vmatpush1.bf16.msra.mxu0 %v1815_v25 }
  0x6a   : > { %1268 = vmatpush1.bf16.msra.mxu1 %v1818_v26  ;;  %1228 = vmatprep.subr.bf16.mxu0 %v1823_v27  ;;  %v351_v26 = vld [vmem:[#allocation2 + $0x8] sm:$0xff] }
  0x6b   : > { %1269 = vmatprep.subr.bf16.mxu1 %v1826_v28 }
  0x6d   : > { %1229 = vmatpush1.bf16.msra.mxu0 %v1821_v29 }
  0x6e   : > { %1270 = vmatpush1.bf16.msra.mxu1 %v1824_v30  ;;  %1230 = vmatprep.subr.bf16.mxu0 %v1829_v31 }
  0x6f   : > { %1271 = vmatprep.subr.bf16.mxu1 %v1832_v32 }
  0x71   : > { %1231 = vmatpush1.bf16.msra.mxu0 %v1827_v33 }
  0x72   : > { %1272 = vmatpush1.bf16.msra.mxu1 %v1830_v34  ;;  %1232 = vmatprep.subr.bf16.mxu0 %v1835_v35 }
  0x73   : > { %1273 = vmatprep.subr.bf16.mxu1 %v1838_v36 }
  0x75   : > { %1233 = vmatpush1.bf16.msra.mxu0 %v1833_v37 }
  0x76   : > { %1274 = vmatpush1.bf16.msra.mxu1 %v1836_v38  ;;  %1234 = vmatprep.subr.bf16.mxu0 %v1841_v39 }
  0x77   : > { %1275 = vmatprep.subr.bf16.mxu1 %v1844_v40 }
  0x79   : > { %1235 = vmatpush2.bf16.msra.mxu0 %v1839_v41 }
  0x7a   : > { %1276 = vmatpush2.bf16.msra.mxu1 %v1842_v42  ;;  %1236 = vmatprep.subr.bf16.mxu0 %v1847_v43 }
  0x7b   : > { %1277 = vmatprep.subr.bf16.mxu1 %v1850_v44 }
  0x7d   : > { %1237 = vmatpush2.bf16.msra.mxu0 %v1845_v45 }
  0x7e   : > { %1278 = vmatpush2.bf16.msra.mxu1 %v1848_v46  ;;  %1238 = vmatprep.subr.bf16.mxu0 %v1853_v47 }
  0x7f   : > { %1279 = vmatprep.subr.bf16.mxu1 %v1856_v48 }
  0x81   : > { %1239 = vmatpush2.bf16.msra.mxu0 %v1851_v49 }
  0x82   : > { %1280 = vmatpush2.bf16.msra.mxu1 %v1854_v50  ;;  %1240 = vmatprep.subr.bf16.mxu0 %v1859_v51 }
  0x83   : > { %1281 = vmatprep.subr.bf16.mxu1 %v1862_v52 }
  0x85   : > { %1241 = vmatpush2.bf16.msra.mxu0 %v1857_v53 }
  0x86   : > { %1282 = vmatpush2.bf16.msra.mxu1 %v1860_v54  ;;  %1242 = vmatprep.subr.bf16.mxu0 %v1865_v55 }
  0x87   : > { %1283 = vmatprep.subr.bf16.mxu1 %v1868_v56 }
  0x89   : > { %1243 = vmatpush2.bf16.msra.mxu0 %v1863_v57 }
  0x8a   : > { %1284 = vmatpush2.bf16.msra.mxu1 %v1866_v58  ;;  %1244 = vmatprep.subr.bf16.mxu0 %v1871_v59 }
  0x8b   : > { %1285 = vmatprep.subr.bf16.mxu1 %v1874_v60 }
  0x8d   : > { %1245 = vmatpush2.bf16.msra.mxu0 %v1869_v61 }
  0x8e   : > { %1286 = vmatpush2.bf16.msra.mxu1 %v1872_v62  ;;  %1246 = vmatprep.subr.bf16.mxu0 %v1877_v63 }
  0x8f   : > { %1287 = vmatprep.subr.bf16.mxu1 %v1880_v0 }
  0x91   : > { %1247 = vmatpush2.bf16.msra.mxu0 %v1875_v1 }
  0x92   : > { %1288 = vmatpush2.bf16.msra.mxu1 %v1878_v2  ;;  %1248 = vmatprep.subr.bf16.mxu0 %v1883_v3 }
  0x93   : > { %1289 = vmatprep.subr.bf16.mxu1 %v1886_v4 }
  0x95   : > { %1249 = vmatpush2.bf16.msra.mxu0 %v1881_v5 }
  0x96   : > { %1290 = vmatpush2.bf16.msra.mxu1 %v1884_v6 }
  0x98   : > { %1251 = vmatmul.mubr.bf16.vlgmr.msra.gmra.mxu0 %v2041_v7  ;;  %v350_v7 = vld [vmem:[#allocation2 + $0x18] sm:$0xff] }
  0x99   : > { %1292 = vmatmul.mubr.bf16.vlgmr.msra.gmra.mxu1 %v2043_v8 }
 0x118   : > { %v1170_v9 = vpop.f32.mrf.mxu0 }
 0x119   : > { %v1211_v11 = vpop.f32.mrf.mxu1 }
 0x11a   : > { %v1212_v12 = vadd.f32 %v1211_v11, %v1170_v9  ;;  %v1172_v13 = vpop.f32.mrf.mxu0 }
 0x11b   : > { %v1213_v15 = vpop.f32.mrf.mxu1 }
 0x11c   : > { %v1300_v16 = vadd.f32 %v1212_v12, %v348_v10  ;;  %v1214_v17 = vadd.f32 %v1213_v15, %v1172_v13  ;;  %v1174_v18 = vpop.f32.mrf.mxu0 }
 0x11d   : > { %v1215_v19 = vpop.f32.mrf.mxu1 }
 0x11e   : > { %1304 = vst [vmem:[#allocation2 + $0x10] sm:$0xff] %v1300_v16  ;;  %v1301_v20 = vadd.f32 %v1214_v17, %v349_v14  ;;  %v1175_v21 = vpop.f32.mrf.mxu0 }
 0x11f   : > { %v1216_v22 = vpop.f32.mrf.mxu1 }
 0x120   : > { %1305 = vst [vmem:[#allocation2] sm:$0xff] %v1301_v20 }
 0x158   : > { %v1252_v23 = vpop.f32.mrf.mxu0 }
 0x159   : > { %v1293_v24 = vpop.f32.mrf.mxu1 }
 0x15a   : > { %v1294_v8 = vadd.f32 %v1293_v24, %v1252_v23  ;;  %v1254_v25 = vpop.f32.mrf.mxu0 }
 0x15b   : > { %v1295_v27 = vpop.f32.mrf.mxu1 }
 0x15c   : > { %v1302_v28 = vadd.f32 %v1294_v8, %v350_v7  ;;  %v1296_v29 = vadd.f32 %v1295_v27, %v1254_v25  ;;  %v1256_v30 = vpop.f32.mrf.mxu0  ;;  %1311 = sbr.rel (%p1656_p7) target bundleno = 370 (0x172), region = 44 }
 0x15d   : > { %v1297_v31 = vpop.f32.mrf.mxu1 }
 0x15e   : > { %1306 = vst [vmem:[#allocation2 + $0x18] sm:$0xff] %v1302_v28  ;;  %v1303_v32 = vadd.f32 %v1296_v29, %v351_v26  ;;  %v1257_v33 = vpop.f32.mrf.mxu0 }
 0x15f   : > { %v1298_v34 = vpop.f32.mrf.mxu1 }
 0x160   : > { %1307 = vst [vmem:[#allocation2 + $0x8] sm:$0xff] %v1303_v32 }
 0x161   : > { %v1318_v35 = vlaneseq  ;;  %v1342_v37 = vld [vmem:[%s2140_s3] sm:$0xff]  ;;  %v1343_v38 = vld [vmem:[%s2140_s3 + $0x8] sm:$0xff]  ;;  %v1312_v40 = vld [vmem:[#allocation2 + $0x10] sm:$0xff] }
 0x162   : > { %v1316_v39 = vld [vmem:[%s2139_s2] sm:$0xf]  ;;  %v1344_v46 = vunpack.c.l.bf16 %v1342_v37  ;;  %v1345_v47 = vunpack.c.h.bf16 %v1342_v37  ;;  %v1346_v50 = vunpack.c.l.bf16 %v1343_v38  ;;  %v1347_v51 = vunpack.c.h.bf16 %v1343_v38 }
 0x163   : > { %v1319_v36 = vshrl.u32 %v1318_v35, 7  ;;  %v1313_v45 = vld [vmem:[#allocation2] sm:$0xff] }
 0x165   : > { %v1320_v41 = vsub.s32 0, %v1319_v36  ;;  %v1324_v42 = vsub.s32 1, %v1319_v36  ;;  %v1328_v43 = vsub.s32 2, %v1319_v36  ;;  %v1332_v44 = vsub.s32 3, %v1319_v36  ;;  %v1314_v48 = vld [vmem:[#allocation2 + $0x18] sm:$0xff] }
 0x167   : > { %v1315_v49 = vld [vmem:[#allocation2 + $0x8] sm:$0xff]  ;;  %v1321_v52 = vrot.slane %v1316_v39, %v1320_v41  ;;  %v1325_v53 = vrot.slane %v1316_v39, %v1324_v42  ;;  %v1329_v54 = vrot.slane %v1316_v39, %v1328_v43  ;;  %v1333_v55 = vrot.slane %v1316_v39, %v1332_v44 }
 0x169   : > { %v1338_v56 = vadd.f32 %v1321_v52, %v1312_v40  ;;  %v1339_v57 = vadd.f32 %v1325_v53, %v1313_v45  ;;  %v1340_v58 = vadd.f32 %v1329_v54, %v1314_v48  ;;  %v1341_v59 = vadd.f32 %v1333_v55, %v1315_v49 }
 0x16b   : > { %v1348_v60 = vadd.f32 %v1344_v46, %v1338_v56  ;;  %v1349_v61 = vadd.f32 %v1345_v47, %v1339_v57  ;;  %v1350_v62 = vadd.f32 %v1346_v50, %v1340_v58  ;;  %v1351_v63 = vadd.f32 %v1347_v51, %v1341_v59 }
 0x16d   : > { %v1352_v0 = vmax.f32 %v1348_v60, 0.0  ;;  %v1353_v1 = vmax.f32 %v1349_v61, 0.0  ;;  %v1354_v2 = vmax.f32 %v1350_v62, 0.0  ;;  %v1355_v3 = vmax.f32 %v1351_v63, 0.0 }
 0x16f   : > { %v1664_v4 = vpack.c.bf16 %v1353_v1, %v1352_v0  ;;  %v1665_v5 = vpack.c.bf16 %v1355_v3, %v1354_v2 }
 0x171   : > { %1372 = vst [vmem:[%s2141_s4] sm:$0xff] %v1664_v4  ;;  %1373 = vst [vmem:[%s2141_s4 + $0x8] sm:$0xff] %v1665_v5 }
 0x172 PF: > { %s14_s17 = sadd.s32 1, %s1909_s17   ;;  %s2142_s15 = smov %s1905_s16 }
 0x173   : > { %p11_p8 = scmp.ge.s32.totalorder %s14_s17, 11   ;;  %s2143_s16 = smov %s2145_s18 }
 0x175   :  { %13 = sbr.rel (!%p11_p8) target bundleno = 2 (0x2), region = 83 }

// kernel: forward.41
= control target key start
LH: loop header
LB: loop body
LE: loop exit
PB: predicated region body
PF: predicated region fallthrough
CT: control target
= control target key end

     0   :  { %s1837_s12 = smov 0   ;;  %s1839_s13 = smov 0   ;;  %s2031_s0 = inlined_call_operand.vmem [shape: bf16[8,4608], index: 0, kind: input, shape index: {}]   ;;  %s2032_s1 = inlined_call_operand.vmem [shape: bf16[4608,512], index: 1, kind: input, shape index: {}]   ;;  %s2033_s2 = inlined_call_operand.vmem [shape: f32[1,512], index: 2, kind: input, shape index: {}]   ;;  %s2034_s3 = inlined_call_operand.vmem [shape: bf16[8,512], index: 3, kind: output, shape index: {}]  }
   0x1   :  { %s1841_s14 = smov 0  }
   0x2 LB: > { %s25_s15 = sadd.s32 1, %s1810_s13  ;;  %p1422_p0 = scmp.ge.s32.totalorder %s1814_s14, 1  ;;  %s1814_s14 = sphi %s1841_s14, %s13_s14   ;;  %s1810_s13 = sphi %s1839_s13, %s2036_s13   ;;  %s1806_s12 = sphi %s1837_s12, %s2035_s12  }
   0x3   : > { %p26_p1 = scmp.ge.s32.totalorder %s25_s15, 9  ;;  %p194_p2 = scmp.lt.s32.totalorder %s1814_s14, 10 }
   0x5   : > { %s2038_s15 = smov (%p26_p1, %s25_s15), 0  ;;  %p195_p3 = pnand %p1422_p0, %p194_p2 }
   0x6   : > { %s1423_s16 = sshll.u32 (!%p195_p3), %s1806_s12, 2  ;;  %s1425_s17 = sshll.u32 (!%p195_p3), %s1806_s12, 6 }
   0x7   : > { %198 = sbr.rel (%p195_p3) target bundleno = 368 (0x170), region = 32  ;;  %p243_p4 = scmp.lt.s32.totalorder (!%p195_p3), %s1423_s16, 35 }
   0x8   : > { %p252_p5 = scmp.lt.s32.totalorder (!%p195_p3), %s1425_s17, 575  ;;  %p1428_p6 = scmp.ne.s32.totalorder (!%p195_p3), %s1806_s12, 0 }
   0xc   : > { %s2040_s16 = smov (!%p243_p4, %s1423_s16), 35  ;;  %s2042_s17 = smov (!%p252_p5, %s1425_s17), 575 }
   0xd   : > { %s1424_s18 = sshll.u32 %s2040_s16, 2  ;;  %s1568_s22 = sshll.u32 %s2042_s17, 4 }
   0xe   : > { %s1862_s21 = scalar_lea.vmem %s2031_s0, %s1424_s18  ;;  %s1867_s25 = scalar_lea.vmem %s2032_s1, %s1568_s22 }
   0xf   : > { %280 = sbr.rel (%p1428_p6) target bundleno = 23 (0x17), region = 36 }
  0x14   : > { %v1816_v0 = vmov 0.0  }
  0x15   : > { %281 = vst [vmem:[#allocation2 + $0x10] sm:$0xff] %v1816_v0  ;;  %282 = vst [vmem:[#allocation2] sm:$0xff] %v1816_v0 }
  0x16   : > { %283 = vst [vmem:[#allocation2 + $0x18] sm:$0xff] %v1816_v0  ;;  %284 = vst [vmem:[#allocation2 + $0x8] sm:$0xff] %v1816_v0 }
  0x17 PF: > { %v1596_v1 = vld [vmem:[%s1867_s25 + $0xe4] ss:$16 sps:$4 sm:$0xff]   ;;  %v1600_v3 = vld [vmem:[%s1867_s25 + $0xe0] ss:$16 sps:$4 sm:$0xff]   ;;  %v290_v49 = vld [vmem:[%s1862_s21 + $0x8] sm:$0xff]  ;;  %p1561_p7 = scmp.ne.s32.totalorder %s1806_s12, 8 }
  0x18   : > { %v1598_v2 = vld [vmem:[%s1867_s25 + $0x2e4] ss:$16 sps:$4 sm:$0xff]   ;;  %1073 = vmatprep.subr.bf16.mxu0 %v1596_v1  ;;  %v1601_v4 = vld [vmem:[%s1867_s25 + $0x2e0] ss:$16 sps:$4 sm:$0xff]   ;;  %v1432_v52 = vcombine.high %v290_v49, %v290_v49 }
  0x19   : > { %1114 = vmatprep.subr.bf16.mxu1 %v1598_v2  ;;  %v1602_v5 = vld [vmem:[%s1867_s25 + $0xc4] ss:$16 sps:$4 sm:$0xff]   ;;  %1074 = vmatpush1.bf16.msra.mxu0 %v1600_v3  ;;  %v1606_v7 = vld [vmem:[%s1867_s25 + $0xc0] ss:$16 sps:$4 sm:$0xff]  }
  0x1a   : > { %1115 = vmatpush1.bf16.msra.mxu1 %v1601_v4  ;;  %v1604_v6 = vld [vmem:[%s1867_s25 + $0x2c4] ss:$16 sps:$4 sm:$0xff]   ;;  %1075 = vmatprep.subr.bf16.mxu0 %v1602_v5  ;;  %v1607_v8 = vld [vmem:[%s1867_s25 + $0x2c0] ss:$16 sps:$4 sm:$0xff]   ;;  %v1698_v5 = vld [vmem:[%s1867_s25 + $0xec] ss:$16 sps:$4 sm:$0xff]  }
  0x1b   : > { %1116 = vmatprep.subr.bf16.mxu1 %v1604_v6  ;;  %v1608_v9 = vld [vmem:[%s1867_s25 + $0xa4] ss:$16 sps:$4 sm:$0xff]   ;;  %v1612_v11 = vld [vmem:[%s1867_s25 + $0xa0] ss:$16 sps:$4 sm:$0xff]   ;;  %1146 = vmatprep.mubr.bf16.mxu1 %v1432_v52  ;;  %v1701_v6 = vld [vmem:[%s1867_s25 + $0x2ec] ss:$16 sps:$4 sm:$0xff]  }
  0x1c   : > { %v1610_v10 = vld [vmem:[%s1867_s25 + $0x2a4] ss:$16 sps:$4 sm:$0xff]   ;;  %v1613_v12 = vld [vmem:[%s1867_s25 + $0x2a0] ss:$16 sps:$4 sm:$0xff]  }
  0x1d   : > { %1076 = vmatpush1.bf16.msra.mxu0 %v1606_v7  ;;  %v1614_v13 = vld [vmem:[%s1867_s25 + $0x84] ss:$16 sps:$4 sm:$0xff]   ;;  %v1618_v15 = vld [vmem:[%s1867_s25 + $0x80] ss:$16 sps:$4 sm:$0xff]  }
  0x1e   : > { %1117 = vmatpush1.bf16.msra.mxu1 %v1607_v8  ;;  %1077 = vmatprep.subr.bf16.mxu0 %v1608_v9  ;;  %v1616_v14 = vld [vmem:[%s1867_s25 + $0x284] ss:$16 sps:$4 sm:$0xff]   ;;  %v1619_v16 = vld [vmem:[%s1867_s25 + $0x280] ss:$16 sps:$4 sm:$0xff]   ;;  %v1943_v8 = vcombine.low %v290_v49, %v290_v49  ;;  %v1696_v9 = vld [vmem:[%s1867_s25 + $0xe8] ss:$16 sps:$4 sm:$0xff]  }
  0x1f   : > { %1118 = vmatprep.subr.bf16.mxu1 %v1610_v10  ;;  %v1620_v17 = vld [vmem:[%s1867_s25 + $0x64] ss:$16 sps:$4 sm:$0xff]   ;;  %v1624_v19 = vld [vmem:[%s1867_s25 + $0x60] ss:$16 sps:$4 sm:$0xff]   ;;  %v1699_v10 = vld [vmem:[%s1867_s25 + $0x2e8] ss:$16 sps:$4 sm:$0xff]  }
  0x20   : > { %v1622_v18 = vld [vmem:[%s1867_s25 + $0x264] ss:$16 sps:$4 sm:$0xff]   ;;  %v1625_v20 = vld [vmem:[%s1867_s25 + $0x260] ss:$16 sps:$4 sm:$0xff]   ;;  %v1756_v49 = vld [vmem:[%s1867_s25 + $0x1a8] ss:$16 sps:$4 sm:$0xff]  }
  0x21   : > { %1078 = vmatpush1.bf16.msra.mxu0 %v1612_v11  ;;  %v1626_v21 = vld [vmem:[%s1867_s25 + $0x44] ss:$16 sps:$4 sm:$0xff]   ;;  %v1630_v23 = vld [vmem:[%s1867_s25 + $0x40] ss:$16 sps:$4 sm:$0xff]   ;;  %v1704_v11 = vld [vmem:[%s1867_s25 + $0xcc] ss:$16 sps:$4 sm:$0xff]  }
  0x22   : > { %1119 = vmatpush1.bf16.msra.mxu1 %v1613_v12  ;;  %1079 = vmatprep.subr.bf16.mxu0 %v1614_v13  ;;  %v1628_v22 = vld [vmem:[%s1867_s25 + $0x244] ss:$16 sps:$4 sm:$0xff]   ;;  %v1631_v24 = vld [vmem:[%s1867_s25 + $0x240] ss:$16 sps:$4 sm:$0xff]   ;;  %v1707_v12 = vld [vmem:[%s1867_s25 + $0x2cc] ss:$16 sps:$4 sm:$0xff]  }
  0x23   : > { %1120 = vmatprep.subr.bf16.mxu1 %v1616_v14  ;;  %v1632_v25 = vld [vmem:[%s1867_s25 + $0x24] ss:$16 sps:$4 sm:$0xff]   ;;  %v1636_v27 = vld [vmem:[%s1867_s25 + $0x20] ss:$16 sps:$4 sm:$0xff]   ;;  %v1702_v13 = vld [vmem:[%s1867_s25 + $0xc8] ss:$16 sps:$4 sm:$0xff]  }
  0x24   : > { %v1634_v26 = vld [vmem:[%s1867_s25 + $0x224] ss:$16 sps:$4 sm:$0xff]   ;;  %v1637_v28 = vld [vmem:[%s1867_s25 + $0x220] ss:$16 sps:$4 sm:$0xff]   ;;  %v1705_v14 = vld [vmem:[%s1867_s25 + $0x2c8] ss:$16 sps:$4 sm:$0xff]  }
  0x25   : > { %1080 = vmatpush1.bf16.msra.mxu0 %v1618_v15  ;;  %v1638_v29 = vld [vmem:[%s1867_s25 + $0x4] ss:$16 sps:$4 sm:$0xff]   ;;  %v1642_v31 = vld [vmem:[%s1867_s25] ss:$16 sps:$4 sm:$0xff]   ;;  %v1710_v15 = vld [vmem:[%s1867_s25 + $0xac] ss:$16 sps:$4 sm:$0xff]  }
  0x26   : > { %1121 = vmatpush1.bf16.msra.mxu1 %v1619_v16  ;;  %1081 = vmatprep.subr.bf16.mxu0 %v1620_v17  ;;  %v1640_v30 = vld [vmem:[%s1867_s25 + $0x204] ss:$16 sps:$4 sm:$0xff]   ;;  %v1643_v32 = vld [vmem:[%s1867_s25 + $0x200] ss:$16 sps:$4 sm:$0xff]   ;;  %v1713_v16 = vld [vmem:[%s1867_s25 + $0x2ac] ss:$16 sps:$4 sm:$0xff]  }
  0x27   : > { %1122 = vmatprep.subr.bf16.mxu1 %v1622_v18  ;;  %v1644_v33 = vld [vmem:[%s1867_s25 + $0x1e4] ss:$16 sps:$4 sm:$0xff]   ;;  %v1648_v35 = vld [vmem:[%s1867_s25 + $0x1e0] ss:$16 sps:$4 sm:$0xff]   ;;  %v1708_v17 = vld [vmem:[%s1867_s25 + $0xa8] ss:$16 sps:$4 sm:$0xff]  }
  0x28   : > { %v1646_v34 = vld [vmem:[%s1867_s25 + $0x3e4] ss:$16 sps:$4 sm:$0xff]   ;;  %v1649_v36 = vld [vmem:[%s1867_s25 + $0x3e0] ss:$16 sps:$4 sm:$0xff]   ;;  %v1711_v18 = vld [vmem:[%s1867_s25 + $0x2a8] ss:$16 sps:$4 sm:$0xff]  }
  0x29   : > { %1082 = vmatpush1.bf16.msra.mxu0 %v1624_v19  ;;  %v1650_v37 = vld [vmem:[%s1867_s25 + $0x1c4] ss:$16 sps:$4 sm:$0xff]   ;;  %v1654_v39 = vld [vmem:[%s1867_s25 + $0x1c0] ss:$16 sps:$4 sm:$0xff]   ;;  %v1716_v19 = vld [vmem:[%s1867_s25 + $0x8c] ss:$16 sps:$4 sm:$0xff]  }
  0x2a   : > { %1123 = vmatpush1.bf16.msra.mxu1 %v1625_v20  ;;  %1083 = vmatprep.subr.bf16.mxu0 %v1626_v21  ;;  %v1652_v38 = vld [vmem:[%s1867_s25 + $0x3c4] ss:$16 sps:$4 sm:$0xff]   ;;  %v1655_v40 = vld [vmem:[%s1867_s25 + $0x3c0] ss:$16 sps:$4 sm:$0xff]   ;;  %v1719_v20 = vld [vmem:[%s1867_s25 + $0x28c] ss:$16 sps:$4 sm:$0xff]  }
  0x2b   : > { %1124 = vmatprep.subr.bf16.mxu1 %v1628_v22  ;;  %v1656_v41 = vld [vmem:[%s1867_s25 + $0x1a4] ss:$16 sps:$4 sm:$0xff]   ;;  %v1660_v43 = vld [vmem:[%s1867_s25 + $0x1a0] ss:$16 sps:$4 sm:$0xff]   ;;  %v1714_v21 = vld [vmem:[%s1867_s25 + $0x88] ss:$16 sps:$4 sm:$0xff]  }
  0x2c   : > { %v1658_v42 = vld [vmem:[%s1867_s25 + $0x3a4] ss:$16 sps:$4 sm:$0xff]   ;;  %v1661_v44 = vld [vmem:[%s1867_s25 + $0x3a0] ss:$16 sps:$4 sm:$0xff]   ;;  %v1717_v22 = vld [vmem:[%s1867_s25 + $0x288] ss:$16 sps:$4 sm:$0xff]  }
  0x2d   : > { %1084 = vmatpush1.bf16.msra.mxu0 %v1630_v23  ;;  %v1662_v45 = vld [vmem:[%s1867_s25 + $0x184] ss:$16 sps:$4 sm:$0xff]   ;;  %v1666_v50 = vld [vmem:[%s1867_s25 + $0x180] ss:$16 sps:$4 sm:$0xff]   ;;  %v1722_v23 = vld [vmem:[%s1867_s25 + $0x6c] ss:$16 sps:$4 sm:$0xff]  }
  0x2e   : > { %1125 = vmatpush1.bf16.msra.mxu1 %v1631_v24  ;;  %1085 = vmatprep.subr.bf16.mxu0 %v1632_v25  ;;  %v1664_v46 = vld [vmem:[%s1867_s25 + $0x384] ss:$16 sps:$4 sm:$0xff]   ;;  %v1667_v51 = vld [vmem:[%s1867_s25 + $0x380] ss:$16 sps:$4 sm:$0xff]   ;;  %v1725_v24 = vld [vmem:[%s1867_s25 + $0x26c] ss:$16 sps:$4 sm:$0xff]  }
  0x2f   : > { %1126 = vmatprep.subr.bf16.mxu1 %v1634_v26  ;;  %v289_v47 = vld [vmem:[%s1862_s21] sm:$0xff]  ;;  %v1720_v25 = vld [vmem:[%s1867_s25 + $0x68] ss:$16 sps:$4 sm:$0xff]  }
  0x30   : > { %v1917_v48 = vcombine.high %v289_v47, %v289_v47  ;;  %v1668_v53 = vld [vmem:[%s1867_s25 + $0x164] ss:$16 sps:$4 sm:$0xff]   ;;  %v1672_v55 = vld [vmem:[%s1867_s25 + $0x160] ss:$16 sps:$4 sm:$0xff]   ;;  %v1941_v7 = vcombine.low %v289_v47, %v289_v47  ;;  %v1723_v26 = vld [vmem:[%s1867_s25 + $0x268] ss:$16 sps:$4 sm:$0xff]  }
  0x31   : > { %1086 = vmatpush1.bf16.msra.mxu0 %v1636_v27  ;;  %v1670_v54 = vld [vmem:[%s1867_s25 + $0x364] ss:$16 sps:$4 sm:$0xff]   ;;  %v1673_v56 = vld [vmem:[%s1867_s25 + $0x360] ss:$16 sps:$4 sm:$0xff]   ;;  %v1728_v27 = vld [vmem:[%s1867_s25 + $0x4c] ss:$16 sps:$4 sm:$0xff]  }
  0x32   : > { %1127 = vmatpush1.bf16.msra.mxu1 %v1637_v28  ;;  %1087 = vmatprep.subr.bf16.mxu0 %v1638_v29  ;;  %v1674_v57 = vld [vmem:[%s1867_s25 + $0x144] ss:$16 sps:$4 sm:$0xff]   ;;  %v1678_v59 = vld [vmem:[%s1867_s25 + $0x140] ss:$16 sps:$4 sm:$0xff]   ;;  %v1731_v28 = vld [vmem:[%s1867_s25 + $0x24c] ss:$16 sps:$4 sm:$0xff]  }
  0x33   : > { %1128 = vmatprep.subr.bf16.mxu1 %v1640_v30  ;;  %1105 = vmatprep.mubr.bf16.mxu0 %v1917_v48  ;;  %v1676_v58 = vld [vmem:[%s1867_s25 + $0x344] ss:$16 sps:$4 sm:$0xff]   ;;  %v1679_v60 = vld [vmem:[%s1867_s25 + $0x340] ss:$16 sps:$4 sm:$0xff]   ;;  %v1726_v29 = vld [vmem:[%s1867_s25 + $0x48] ss:$16 sps:$4 sm:$0xff]  }
  0x34   : > { %v1680_v61 = vld [vmem:[%s1867_s25 + $0x124] ss:$16 sps:$4 sm:$0xff]   ;;  %v1684_v63 = vld [vmem:[%s1867_s25 + $0x120] ss:$16 sps:$4 sm:$0xff]   ;;  %v1729_v30 = vld [vmem:[%s1867_s25 + $0x248] ss:$16 sps:$4 sm:$0xff]  }
  0x35   : > { %1088 = vmatpush1.bf16.msra.mxu0 %v1642_v31  ;;  %v1682_v62 = vld [vmem:[%s1867_s25 + $0x324] ss:$16 sps:$4 sm:$0xff]   ;;  %v1685_v0 = vld [vmem:[%s1867_s25 + $0x320] ss:$16 sps:$4 sm:$0xff]   ;;  %v1734_v31 = vld [vmem:[%s1867_s25 + $0x2c] ss:$16 sps:$4 sm:$0xff]  }
  0x36   : > { %1129 = vmatpush1.bf16.msra.mxu1 %v1643_v32  ;;  %1089 = vmatprep.subr.bf16.mxu0 %v1644_v33  ;;  %v1686_v1 = vld [vmem:[%s1867_s25 + $0x104] ss:$16 sps:$4 sm:$0xff]   ;;  %v1690_v3 = vld [vmem:[%s1867_s25 + $0x100] ss:$16 sps:$4 sm:$0xff]   ;;  %v1737_v32 = vld [vmem:[%s1867_s25 + $0x22c] ss:$16 sps:$4 sm:$0xff]  }
  0x37   : > { %1130 = vmatprep.subr.bf16.mxu1 %v1646_v34  ;;  %v1688_v2 = vld [vmem:[%s1867_s25 + $0x304] ss:$16 sps:$4 sm:$0xff]   ;;  %v1691_v4 = vld [vmem:[%s1867_s25 + $0x300] ss:$16 sps:$4 sm:$0xff]   ;;  %v1732_v33 = vld [vmem:[%s1867_s25 + $0x28] ss:$16 sps:$4 sm:$0xff]  }
  0x38   : > { %v1735_v34 = vld [vmem:[%s1867_s25 + $0x228] ss:$16 sps:$4 sm:$0xff]   ;;  %v1758_v47 = vld [vmem:[%s1867_s25 + $0x1ac] ss:$16 sps:$4 sm:$0xff]  }
  0x39   : > { %1090 = vmatpush2.bf16.msra.mxu0 %v1648_v35  ;;  %v1740_v35 = vld [vmem:[%s1867_s25 + $0xc] ss:$16 sps:$4 sm:$0xff]  }
  0x3a   : > { %1131 = vmatpush2.bf16.msra.mxu1 %v1649_v36  ;;  %1091 = vmatprep.subr.bf16.mxu0 %v1650_v37  ;;  %v1743_v36 = vld [vmem:[%s1867_s25 + $0x20c] ss:$16 sps:$4 sm:$0xff]   ;;  %v1738_v37 = vld [vmem:[%s1867_s25 + $0x8] ss:$16 sps:$4 sm:$0xff]  }
  0x3b   : > { %1132 = vmatprep.subr.bf16.mxu1 %v1652_v38  ;;  %v1741_v38 = vld [vmem:[%s1867_s25 + $0x208] ss:$16 sps:$4 sm:$0xff]  }
  0x3d   : > { %1092 = vmatpush2.bf16.msra.mxu0 %v1654_v39  ;;  %v1746_v39 = vld [vmem:[%s1867_s25 + $0x1ec] ss:$16 sps:$4 sm:$0xff]  }
  0x3e   : > { %1133 = vmatpush2.bf16.msra.mxu1 %v1655_v40  ;;  %1093 = vmatprep.subr.bf16.mxu0 %v1656_v41  ;;  %v1749_v40 = vld [vmem:[%s1867_s25 + $0x3ec] ss:$16 sps:$4 sm:$0xff]   ;;  %v1744_v41 = vld [vmem:[%s1867_s25 + $0x1e8] ss:$16 sps:$4 sm:$0xff]  }
  0x3f   : > { %1134 = vmatprep.subr.bf16.mxu1 %v1658_v42  ;;  %v1747_v42 = vld [vmem:[%s1867_s25 + $0x3e8] ss:$16 sps:$4 sm:$0xff]  }
  0x41   : > { %1094 = vmatpush2.bf16.msra.mxu0 %v1660_v43  ;;  %v1752_v43 = vld [vmem:[%s1867_s25 + $0x1cc] ss:$16 sps:$4 sm:$0xff]  }
  0x42   : > { %1135 = vmatpush2.bf16.msra.mxu1 %v1661_v44  ;;  %1095 = vmatprep.subr.bf16.mxu0 %v1662_v45  ;;  %v1755_v44 = vld [vmem:[%s1867_s25 + $0x3cc] ss:$16 sps:$4 sm:$0xff]   ;;  %v1750_v45 = vld [vmem:[%s1867_s25 + $0x1c8] ss:$16 sps:$4 sm:$0xff]  }
  0x43   : > { %1136 = vmatprep.subr.bf16.mxu1 %v1664_v46  ;;  %v1753_v46 = vld [vmem:[%s1867_s25 + $0x3c8] ss:$16 sps:$4 sm:$0xff]  }
  0x45   : > { %1096 = vmatpush2.bf16.msra.mxu0 %v1666_v50  ;;  %v1759_v50 = vld [vmem:[%s1867_s25 + $0x3a8] ss:$16 sps:$4 sm:$0xff]  }
  0x46   : > { %1137 = vmatpush2.bf16.msra.mxu1 %v1667_v51  ;;  %1097 = vmatprep.subr.bf16.mxu0 %v1668_v53  ;;  %v1764_v51 = vld [vmem:[%s1867_s25 + $0x18c] ss:$16 sps:$4 sm:$0xff]   ;;  %v1762_v53 = vld [vmem:[%s1867_s25 + $0x188] ss:$16 sps:$4 sm:$0xff]  }
  0x47   : > { %1138 = vmatprep.subr.bf16.mxu1 %v1670_v54  ;;  %v1765_v54 = vld [vmem:[%s1867_s25 + $0x388] ss:$16 sps:$4 sm:$0xff]  }
  0x49   : > { %1098 = vmatpush2.bf16.msra.mxu0 %v1672_v55  ;;  %v1770_v55 = vld [vmem:[%s1867_s25 + $0x16c] ss:$16 sps:$4 sm:$0xff]  }
  0x4a   : > { %1139 = vmatpush2.bf16.msra.mxu1 %v1673_v56  ;;  %1099 = vmatprep.subr.bf16.mxu0 %v1674_v57  ;;  %v1773_v56 = vld [vmem:[%s1867_s25 + $0x36c] ss:$16 sps:$4 sm:$0xff]   ;;  %v1768_v57 = vld [vmem:[%s1867_s25 + $0x168] ss:$16 sps:$4 sm:$0xff]  }
  0x4b   : > { %1140 = vmatprep.subr.bf16.mxu1 %v1676_v58  ;;  %v1771_v58 = vld [vmem:[%s1867_s25 + $0x368] ss:$16 sps:$4 sm:$0xff]  }
  0x4d   : > { %1100 = vmatpush2.bf16.msra.mxu0 %v1678_v59  ;;  %v1776_v59 = vld [vmem:[%s1867_s25 + $0x14c] ss:$16 sps:$4 sm:$0xff]  }
  0x4e   : > { %1141 = vmatpush2.bf16.msra.mxu1 %v1679_v60  ;;  %1101 = vmatprep.subr.bf16.mxu0 %v1680_v61  ;;  %v1779_v60 = vld [vmem:[%s1867_s25 + $0x34c] ss:$16 sps:$4 sm:$0xff]   ;;  %v1774_v61 = vld [vmem:[%s1867_s25 + $0x148] ss:$16 sps:$4 sm:$0xff]  }
  0x4f   : > { %1142 = vmatprep.subr.bf16.mxu1 %v1682_v62  ;;  %v1777_v62 = vld [vmem:[%s1867_s25 + $0x348] ss:$16 sps:$4 sm:$0xff]  }
  0x51   : > { %1102 = vmatpush2.bf16.msra.mxu0 %v1684_v63  ;;  %v1782_v63 = vld [vmem:[%s1867_s25 + $0x12c] ss:$16 sps:$4 sm:$0xff]  }
  0x52   : > { %1143 = vmatpush2.bf16.msra.mxu1 %v1685_v0  ;;  %1103 = vmatprep.subr.bf16.mxu0 %v1686_v1  ;;  %v1785_v0 = vld [vmem:[%s1867_s25 + $0x32c] ss:$16 sps:$4 sm:$0xff]   ;;  %v1780_v1 = vld [vmem:[%s1867_s25 + $0x128] ss:$16 sps:$4 sm:$0xff]  }
  0x53   : > { %1144 = vmatprep.subr.bf16.mxu1 %v1688_v2  ;;  %v1783_v2 = vld [vmem:[%s1867_s25 + $0x328] ss:$16 sps:$4 sm:$0xff]  }
  0x55   : > { %1104 = vmatpush2.bf16.msra.mxu0 %v1690_v3  ;;  %v1788_v3 = vld [vmem:[%s1867_s25 + $0x10c] ss:$16 sps:$4 sm:$0xff]  }
  0x56   : > { %1145 = vmatpush2.bf16.msra.mxu1 %v1691_v4  ;;  %1155 = vmatprep.subr.bf16.mxu0 %v1698_v5  ;;  %v1791_v4 = vld [vmem:[%s1867_s25 + $0x30c] ss:$16 sps:$4 sm:$0xff]   ;;  %v1786_v5 = vld [vmem:[%s1867_s25 + $0x108] ss:$16 sps:$4 sm:$0xff]  }
  0x57   : > { %1196 = vmatprep.subr.bf16.mxu1 %v1701_v6  ;;  %v1789_v6 = vld [vmem:[%s1867_s25 + $0x308] ss:$16 sps:$4 sm:$0xff]  }
  0x58   : > { %1106 = vmatmul.mubr.bf16.vlgmr.msra.gmra.mxu0 %v1941_v7 }
  0x59   : > { %1147 = vmatmul.mubr.bf16.vlgmr.msra.gmra.mxu1 %v1943_v8  ;;  %1156 = vmatpush1.bf16.msra.mxu0 %v1696_v9 }
  0x5a   : > { %1197 = vmatpush1.bf16.msra.mxu1 %v1699_v10  ;;  %1157 = vmatprep.subr.bf16.mxu0 %v1704_v11  ;;  %v285_v10 = vld [vmem:[#allocation2 + $0x10] sm:$0xff] }
  0x5b   : > { %1198 = vmatprep.subr.bf16.mxu1 %v1707_v12  ;;  %1187 = vmatprep.mubr.bf16.mxu0 %v1917_v48  ;;  %v1761_v48 = vld [vmem:[%s1867_s25 + $0x3ac] ss:$16 sps:$4 sm:$0xff]  }
  0x5c   : > { %1228 = vmatprep.mubr.bf16.mxu1 %v1432_v52  ;;  %v1767_v52 = vld [vmem:[%s1867_s25 + $0x38c] ss:$16 sps:$4 sm:$0xff]  }
  0x5d   : > { %1158 = vmatpush1.bf16.msra.mxu0 %v1702_v13 }
  0x5e   : > { %1199 = vmatpush1.bf16.msra.mxu1 %v1705_v14  ;;  %1159 = vmatprep.subr.bf16.mxu0 %v1710_v15  ;;  %v286_v14 = vld [vmem:[#allocation2] sm:$0xff] }
  0x5f   : > { %1200 = vmatprep.subr.bf16.mxu1 %v1713_v16 }
  0x61   : > { %1160 = vmatpush1.bf16.msra.mxu0 %v1708_v17 }
  0x62   : > { %1201 = vmatpush1.bf16.msra.mxu1 %v1711_v18  ;;  %1161 = vmatprep.subr.bf16.mxu0 %v1716_v19 }
  0x63   : > { %1202 = vmatprep.subr.bf16.mxu1 %v1719_v20 }
  0x65   : > { %1162 = vmatpush1.bf16.msra.mxu0 %v1714_v21 }
  0x66   : > { %1203 = vmatpush1.bf16.msra.mxu1 %v1717_v22  ;;  %1163 = vmatprep.subr.bf16.mxu0 %v1722_v23 }
  0x67   : > { %1204 = vmatprep.subr.bf16.mxu1 %v1725_v24 }
  0x69   : > { %1164 = vmatpush1.bf16.msra.mxu0 %v1720_v25 }
  0x6a   : > { %1205 = vmatpush1.bf16.msra.mxu1 %v1723_v26  ;;  %1165 = vmatprep.subr.bf16.mxu0 %v1728_v27  ;;  %v288_v26 = vld [vmem:[#allocation2 + $0x8] sm:$0xff] }
  0x6b   : > { %1206 = vmatprep.subr.bf16.mxu1 %v1731_v28 }
  0x6d   : > { %1166 = vmatpush1.bf16.msra.mxu0 %v1726_v29 }
  0x6e   : > { %1207 = vmatpush1.bf16.msra.mxu1 %v1729_v30  ;;  %1167 = vmatprep.subr.bf16.mxu0 %v1734_v31 }
  0x6f   : > { %1208 = vmatprep.subr.bf16.mxu1 %v1737_v32 }
  0x71   : > { %1168 = vmatpush1.bf16.msra.mxu0 %v1732_v33 }
  0x72   : > { %1209 = vmatpush1.bf16.msra.mxu1 %v1735_v34  ;;  %1169 = vmatprep.subr.bf16.mxu0 %v1740_v35 }
  0x73   : > { %1210 = vmatprep.subr.bf16.mxu1 %v1743_v36 }
  0x75   : > { %1170 = vmatpush1.bf16.msra.mxu0 %v1738_v37 }
  0x76   : > { %1211 = vmatpush1.bf16.msra.mxu1 %v1741_v38  ;;  %1171 = vmatprep.subr.bf16.mxu0 %v1746_v39 }
  0x77   : > { %1212 = vmatprep.subr.bf16.mxu1 %v1749_v40 }
  0x79   : > { %1172 = vmatpush2.bf16.msra.mxu0 %v1744_v41 }
  0x7a   : > { %1213 = vmatpush2.bf16.msra.mxu1 %v1747_v42  ;;  %1173 = vmatprep.subr.bf16.mxu0 %v1752_v43 }
  0x7b   : > { %1214 = vmatprep.subr.bf16.mxu1 %v1755_v44 }
  0x7d   : > { %1174 = vmatpush2.bf16.msra.mxu0 %v1750_v45 }
  0x7e   : > { %1215 = vmatpush2.bf16.msra.mxu1 %v1753_v46  ;;  %1175 = vmatprep.subr.bf16.mxu0 %v1758_v47 }
  0x7f   : > { %1216 = vmatprep.subr.bf16.mxu1 %v1761_v48 }
  0x81   : > { %1176 = vmatpush2.bf16.msra.mxu0 %v1756_v49 }
  0x82   : > { %1217 = vmatpush2.bf16.msra.mxu1 %v1759_v50  ;;  %1177 = vmatprep.subr.bf16.mxu0 %v1764_v51 }
  0x83   : > { %1218 = vmatprep.subr.bf16.mxu1 %v1767_v52 }
  0x85   : > { %1178 = vmatpush2.bf16.msra.mxu0 %v1762_v53 }
  0x86   : > { %1219 = vmatpush2.bf16.msra.mxu1 %v1765_v54  ;;  %1179 = vmatprep.subr.bf16.mxu0 %v1770_v55 }
  0x87   : > { %1220 = vmatprep.subr.bf16.mxu1 %v1773_v56 }
  0x89   : > { %1180 = vmatpush2.bf16.msra.mxu0 %v1768_v57 }
  0x8a   : > { %1221 = vmatpush2.bf16.msra.mxu1 %v1771_v58  ;;  %1181 = vmatprep.subr.bf16.mxu0 %v1776_v59 }
  0x8b   : > { %1222 = vmatprep.subr.bf16.mxu1 %v1779_v60 }
  0x8d   : > { %1182 = vmatpush2.bf16.msra.mxu0 %v1774_v61 }
  0x8e   : > { %1223 = vmatpush2.bf16.msra.mxu1 %v1777_v62  ;;  %1183 = vmatprep.subr.bf16.mxu0 %v1782_v63 }
  0x8f   : > { %1224 = vmatprep.subr.bf16.mxu1 %v1785_v0 }
  0x91   : > { %1184 = vmatpush2.bf16.msra.mxu0 %v1780_v1 }
  0x92   : > { %1225 = vmatpush2.bf16.msra.mxu1 %v1783_v2  ;;  %1185 = vmatprep.subr.bf16.mxu0 %v1788_v3 }
  0x93   : > { %1226 = vmatprep.subr.bf16.mxu1 %v1791_v4 }
  0x95   : > { %1186 = vmatpush2.bf16.msra.mxu0 %v1786_v5 }
  0x96   : > { %1227 = vmatpush2.bf16.msra.mxu1 %v1789_v6 }
  0x98   : > { %1188 = vmatmul.mubr.bf16.vlgmr.msra.gmra.mxu0 %v1941_v7  ;;  %v287_v7 = vld [vmem:[#allocation2 + $0x18] sm:$0xff] }
  0x99   : > { %1229 = vmatmul.mubr.bf16.vlgmr.msra.gmra.mxu1 %v1943_v8 }
 0x118   : > { %v1107_v9 = vpop.f32.mrf.mxu0 }
 0x119   : > { %v1148_v11 = vpop.f32.mrf.mxu1 }
 0x11a   : > { %v1149_v12 = vadd.f32 %v1148_v11, %v1107_v9  ;;  %v1109_v13 = vpop.f32.mrf.mxu0 }
 0x11b   : > { %v1150_v15 = vpop.f32.mrf.mxu1 }
 0x11c   : > { %v1237_v16 = vadd.f32 %v1149_v12, %v285_v10  ;;  %v1151_v17 = vadd.f32 %v1150_v15, %v1109_v13  ;;  %v1111_v18 = vpop.f32.mrf.mxu0 }
 0x11d   : > { %v1152_v19 = vpop.f32.mrf.mxu1 }
 0x11e   : > { %1241 = vst [vmem:[#allocation2 + $0x10] sm:$0xff] %v1237_v16  ;;  %v1238_v20 = vadd.f32 %v1151_v17, %v286_v14  ;;  %v1112_v21 = vpop.f32.mrf.mxu0 }
 0x11f   : > { %v1153_v22 = vpop.f32.mrf.mxu1 }
 0x120   : > { %1242 = vst [vmem:[#allocation2] sm:$0xff] %v1238_v20 }
 0x158   : > { %v1189_v23 = vpop.f32.mrf.mxu0 }
 0x159   : > { %v1230_v24 = vpop.f32.mrf.mxu1 }
 0x15a   : > { %v1231_v8 = vadd.f32 %v1230_v24, %v1189_v23  ;;  %v1191_v25 = vpop.f32.mrf.mxu0 }
 0x15b   : > { %v1232_v27 = vpop.f32.mrf.mxu1 }
 0x15c   : > { %v1239_v28 = vadd.f32 %v1231_v8, %v287_v7  ;;  %v1233_v29 = vadd.f32 %v1232_v27, %v1191_v25  ;;  %v1193_v30 = vpop.f32.mrf.mxu0  ;;  %1248 = sbr.rel (%p1561_p7) target bundleno = 368 (0x170), region = 40 }
 0x15d   : > { %v1234_v31 = vpop.f32.mrf.mxu1 }
 0x15e   : > { %1243 = vst [vmem:[#allocation2 + $0x18] sm:$0xff] %v1239_v28  ;;  %v1240_v32 = vadd.f32 %v1233_v29, %v288_v26  ;;  %v1194_v33 = vpop.f32.mrf.mxu0 }
 0x15f   : > { %v1235_v34 = vpop.f32.mrf.mxu1 }
 0x160   : > { %1244 = vst [vmem:[#allocation2 + $0x8] sm:$0xff] %v1240_v32 }
 0x161   : > { %v1255_v35 = vlaneseq  ;;  %v1253_v37 = vld [vmem:[%s2033_s2] sm:$0xf]  ;;  %v1249_v38 = vld [vmem:[#allocation2 + $0x10] sm:$0xff] }
 0x162   : > { %v1250_v43 = vld [vmem:[#allocation2] sm:$0xff] }
 0x163   : > { %v1256_v36 = vshrl.u32 %v1255_v35, 7 }
 0x165   : > { %v1257_v39 = vsub.s32 0, %v1256_v36  ;;  %v1261_v40 = vsub.s32 1, %v1256_v36  ;;  %v1265_v41 = vsub.s32 2, %v1256_v36  ;;  %v1269_v42 = vsub.s32 3, %v1256_v36  ;;  %v1251_v44 = vld [vmem:[#allocation2 + $0x18] sm:$0xff] }
 0x167   : > { %v1252_v45 = vld [vmem:[#allocation2 + $0x8] sm:$0xff]  ;;  %v1258_v46 = vrot.slane %v1253_v37, %v1257_v39  ;;  %v1262_v47 = vrot.slane %v1253_v37, %v1261_v40  ;;  %v1266_v48 = vrot.slane %v1253_v37, %v1265_v41  ;;  %v1270_v49 = vrot.slane %v1253_v37, %v1269_v42 }
 0x169   : > { %v1275_v50 = vadd.f32 %v1258_v46, %v1249_v38  ;;  %v1276_v51 = vadd.f32 %v1262_v47, %v1250_v43  ;;  %v1277_v52 = vadd.f32 %v1266_v48, %v1251_v44  ;;  %v1278_v53 = vadd.f32 %v1270_v49, %v1252_v45 }
 0x16b   : > { %v1279_v54 = vmax.f32 %v1275_v50, 0.0  ;;  %v1280_v55 = vmax.f32 %v1276_v51, 0.0  ;;  %v1281_v56 = vmax.f32 %v1277_v52, 0.0  ;;  %v1282_v57 = vmax.f32 %v1278_v53, 0.0 }
 0x16d   : > { %v1569_v58 = vpack.c.bf16 %v1280_v55, %v1279_v54  ;;  %v1570_v59 = vpack.c.bf16 %v1282_v57, %v1281_v56 }
 0x16f   : > { %1299 = vst [vmem:[%s2034_s3] sm:$0xff] %v1569_v58  ;;  %1300 = vst [vmem:[%s2034_s3 + $0x8] sm:$0xff] %v1570_v59 }
 0x170 PF: > { %s13_s14 = sadd.s32 1, %s1814_s14   ;;  %s2035_s12 = smov %s1810_s13 }
 0x171   : > { %p10_p8 = scmp.ge.s32.totalorder %s13_s14, 11   ;;  %s2036_s13 = smov %s2038_s15 }
 0x173   :  { %12 = sbr.rel (!%p10_p8) target bundleno = 2 (0x2), region = 76 }

// kernel: forward.43
= control target key start
LH: loop header
LB: loop body
LE: loop exit
PB: predicated region body
PF: predicated region fallthrough
CT: control target
= control target key end

     0   :  { %vm226_vm0 = vcmask 1041409   ;;  %vm1281_vm1 = vmmov 0   ;;  %vm582_vm2 = vcmask 9216   ;;  %vm1071_vm3 = vcmask 17408   ;;  %s2516_s1 = inlined_call_operand.vmem [shape: f32[512,256], index: 1, kind: input, shape index: {}]   ;;  %s2517_s0 = inlined_call_operand.vmem [shape: bf16[2,1,512], index: 0, kind: input, shape index: {}]   ;;  %s2518_s3 = inlined_call_operand.vmem [shape: f32[256,128], index: 3, kind: input, shape index: {}]   ;;  %s2519_s5 = inlined_call_operand.vmem [shape: f32[128,2], index: 5, kind: input, shape index: {}]   ;;  %s2520_s2 = inlined_call_operand.vmem [shape: f32[1,256], index: 2, kind: input, shape index: {}]   ;;  %s2521_s7 = inlined_call_operand.vmem [shape: f32[512,256], index: 7, kind: input, shape index: {}]   ;;  %s2522_s4 = inlined_call_operand.vmem [shape: f32[1,128], index: 4, kind: input, shape index: {}]   ;;  %s2523_s9 = inlined_call_operand.vmem [shape: f32[256,128], index: 9, kind: input, shape index: {}]   ;;  %s2524_s11 = inlined_call_operand.vmem [shape: f32[128,3], index: 11, kind: input, shape index: {}]   ;;  %s2525_s6 = inlined_call_operand.vmem [shape: f32[1,2], index: 6, kind: input, shape index: {}]   ;;  %s2526_s13 = inlined_call_operand.vmem [shape: f32[2,2], index: 13, kind: output, shape index: {0}]   ;;  %s2527_s8 = inlined_call_operand.vmem [shape: f32[1,256], index: 8, kind: input, shape index: {}]   ;;  %s2528_s10 = inlined_call_operand.vmem [shape: f32[1,128], index: 10, kind: input, shape index: {}]   ;;  %s2529_s12 = inlined_call_operand.vmem [shape: f32[1,3], index: 12, kind: input, shape index: {}]   ;;  %s2530_s14 = inlined_call_operand.vmem [shape: f32[2,3], index: 14, kind: output, shape index: {1}]  }
   0x1   :  { %v83_v0 = vld [vmem:[%s2516_s1 + $0xf8] sm:$0xff]  ;;  %v82_v2 = vld [vmem:[%s2516_s1 + $0xf0] sm:$0xff]  ;;  %v81_v4 = vld [vmem:[%s2516_s1 + $0xe8] sm:$0xff] }
   0x2   :  { %v147_v1 = vld [vmem:[%s2516_s1 + $0x2f8] sm:$0xff]  ;;  %235 = vmatprep.subr.mxu0 %v83_v0  ;;  %v146_v3 = vld [vmem:[%s2516_s1 + $0x2f0] sm:$0xff]  ;;  %v145_v5 = vld [vmem:[%s2516_s1 + $0x2e8] sm:$0xff] }
   0x3   :  { %306 = vmatprep.subr.mxu1 %v147_v1  ;;  %236 = vmatpush1.msra.mxu0 %v82_v2  ;;  %v80_v6 = vld [vmem:[%s2516_s1 + $0xe0] sm:$0xff]  ;;  %v79_v8 = vld [vmem:[%s2516_s1 + $0xd8] sm:$0xff]  ;;  %v78_v10 = vld [vmem:[%s2516_s1 + $0xd0] sm:$0xff] }
   0x4   :  { %307 = vmatpush1.msra.mxu1 %v146_v3  ;;  %v144_v7 = vld [vmem:[%s2516_s1 + $0x2e0] sm:$0xff]  ;;  %237 = vmatprep.subr.mxu0 %v81_v4  ;;  %v143_v9 = vld [vmem:[%s2516_s1 + $0x2d8] sm:$0xff]  ;;  %v142_v11 = vld [vmem:[%s2516_s1 + $0x2d0] sm:$0xff] }
   0x5   :  { %308 = vmatprep.subr.mxu1 %v145_v5  ;;  %238 = vmatpush1.msra.mxu0 %v80_v6  ;;  %v77_v12 = vld [vmem:[%s2516_s1 + $0xc8] sm:$0xff]  ;;  %v76_v14 = vld [vmem:[%s2516_s1 + $0xc0] sm:$0xff]  ;;  %v75_v16 = vld [vmem:[%s2516_s1 + $0xb8] sm:$0xff] }
   0x6   :  { %309 = vmatpush1.msra.mxu1 %v144_v7  ;;  %v141_v13 = vld [vmem:[%s2516_s1 + $0x2c8] sm:$0xff]  ;;  %239 = vmatprep.subr.mxu0 %v79_v8  ;;  %v140_v15 = vld [vmem:[%s2516_s1 + $0x2c0] sm:$0xff]  ;;  %v139_v17 = vld [vmem:[%s2516_s1 + $0x2b8] sm:$0xff] }
   0x7   :  { %310 = vmatprep.subr.mxu1 %v143_v9  ;;  %240 = vmatpush1.msra.mxu0 %v78_v10  ;;  %v74_v18 = vld [vmem:[%s2516_s1 + $0xb0] sm:$0xff]  ;;  %v73_v20 = vld [vmem:[%s2516_s1 + $0xa8] sm:$0xff]  ;;  %v72_v22 = vld [vmem:[%s2516_s1 + $0xa0] sm:$0xff] }
   0x8   :  { %311 = vmatpush1.msra.mxu1 %v142_v11  ;;  %241 = vmatprep.subr.mxu0 %v77_v12  ;;  %v138_v19 = vld [vmem:[%s2516_s1 + $0x2b0] sm:$0xff]  ;;  %v137_v21 = vld [vmem:[%s2516_s1 + $0x2a8] sm:$0xff]  ;;  %v136_v23 = vld [vmem:[%s2516_s1 + $0x2a0] sm:$0xff] }
   0x9   :  { %312 = vmatprep.subr.mxu1 %v141_v13  ;;  %242 = vmatpush1.msra.mxu0 %v76_v14  ;;  %v71_v24 = vld [vmem:[%s2516_s1 + $0x98] sm:$0xff]  ;;  %v70_v26 = vld [vmem:[%s2516_s1 + $0x90] sm:$0xff]  ;;  %v69_v28 = vld [vmem:[%s2516_s1 + $0x88] sm:$0xff] }
   0xa   :  { %313 = vmatpush1.msra.mxu1 %v140_v15  ;;  %243 = vmatprep.subr.mxu0 %v75_v16  ;;  %v135_v25 = vld [vmem:[%s2516_s1 + $0x298] sm:$0xff]  ;;  %v134_v27 = vld [vmem:[%s2516_s1 + $0x290] sm:$0xff]  ;;  %v133_v29 = vld [vmem:[%s2516_s1 + $0x288] sm:$0xff] }
   0xb   :  { %314 = vmatprep.subr.mxu1 %v139_v17  ;;  %244 = vmatpush1.msra.mxu0 %v74_v18  ;;  %v68_v30 = vld [vmem:[%s2516_s1 + $0x80] sm:$0xff]  ;;  %v67_v32 = vld [vmem:[%s2516_s1 + $0x78] sm:$0xff]  ;;  %v66_v34 = vld [vmem:[%s2516_s1 + $0x70] sm:$0xff] }
   0xc   :  { %315 = vmatpush1.msra.mxu1 %v138_v19  ;;  %245 = vmatprep.subr.mxu0 %v73_v20  ;;  %v132_v31 = vld [vmem:[%s2516_s1 + $0x280] sm:$0xff]  ;;  %v131_v33 = vld [vmem:[%s2516_s1 + $0x278] sm:$0xff]  ;;  %v130_v35 = vld [vmem:[%s2516_s1 + $0x270] sm:$0xff] }
   0xd   :  { %316 = vmatprep.subr.mxu1 %v137_v21  ;;  %246 = vmatpush1.msra.mxu0 %v72_v22  ;;  %v65_v36 = vld [vmem:[%s2516_s1 + $0x68] sm:$0xff]  ;;  %v64_v38 = vld [vmem:[%s2516_s1 + $0x60] sm:$0xff]  ;;  %v63_v40 = vld [vmem:[%s2516_s1 + $0x58] sm:$0xff] }
   0xe   :  { %317 = vmatpush1.msra.mxu1 %v136_v23  ;;  %247 = vmatprep.subr.mxu0 %v71_v24  ;;  %v129_v37 = vld [vmem:[%s2516_s1 + $0x268] sm:$0xff]  ;;  %v128_v39 = vld [vmem:[%s2516_s1 + $0x260] sm:$0xff]  ;;  %v127_v41 = vld [vmem:[%s2516_s1 + $0x258] sm:$0xff] }
   0xf   :  { %318 = vmatprep.subr.mxu1 %v135_v25  ;;  %248 = vmatpush1.msra.mxu0 %v70_v26  ;;  %v62_v42 = vld [vmem:[%s2516_s1 + $0x50] sm:$0xff]  ;;  %v61_v44 = vld [vmem:[%s2516_s1 + $0x48] sm:$0xff]  ;;  %v60_v46 = vld [vmem:[%s2516_s1 + $0x40] sm:$0xff] }
  0x10   :  { %319 = vmatpush1.msra.mxu1 %v134_v27  ;;  %249 = vmatprep.subr.mxu0 %v69_v28  ;;  %v126_v43 = vld [vmem:[%s2516_s1 + $0x250] sm:$0xff]  ;;  %v125_v45 = vld [vmem:[%s2516_s1 + $0x248] sm:$0xff]  ;;  %v124_v47 = vld [vmem:[%s2516_s1 + $0x240] sm:$0xff] }
  0x11   :  { %320 = vmatprep.subr.mxu1 %v133_v29  ;;  %250 = vmatpush1.msra.mxu0 %v68_v30  ;;  %v59_v48 = vld [vmem:[%s2516_s1 + $0x38] sm:$0xff]  ;;  %v58_v50 = vld [vmem:[%s2516_s1 + $0x30] sm:$0xff]  ;;  %v57_v52 = vld [vmem:[%s2516_s1 + $0x28] sm:$0xff] }
  0x12   :  { %321 = vmatpush1.msra.mxu1 %v132_v31  ;;  %251 = vmatprep.subr.mxu0 %v67_v32  ;;  %v123_v49 = vld [vmem:[%s2516_s1 + $0x238] sm:$0xff]  ;;  %v122_v51 = vld [vmem:[%s2516_s1 + $0x230] sm:$0xff]  ;;  %v121_v53 = vld [vmem:[%s2516_s1 + $0x228] sm:$0xff]  ;;  %v182_v32 = vlaneseq }
  0x13   :  { %322 = vmatprep.subr.mxu1 %v131_v33  ;;  %252 = vmatpush1.msra.mxu0 %v66_v34  ;;  %v56_v54 = vld [vmem:[%s2516_s1 + $0x20] sm:$0xff]  ;;  %v55_v56 = vld [vmem:[%s2516_s1 + $0x18] sm:$0xff]  ;;  %v54_v58 = vld [vmem:[%s2516_s1 + $0x10] sm:$0xff] }
  0x14   :  { %323 = vmatpush1.msra.mxu1 %v130_v35  ;;  %253 = vmatprep.subr.mxu0 %v65_v36  ;;  %v120_v55 = vld [vmem:[%s2516_s1 + $0x220] sm:$0xff]  ;;  %v119_v57 = vld [vmem:[%s2516_s1 + $0x218] sm:$0xff]  ;;  %v118_v59 = vld [vmem:[%s2516_s1 + $0x210] sm:$0xff] }
  0x15   :  { %324 = vmatprep.subr.mxu1 %v129_v37  ;;  %254 = vmatpush1.msra.mxu0 %v64_v38  ;;  %v53_v60 = vld [vmem:[%s2516_s1 + $0x8] sm:$0xff]  ;;  %v52_v62 = vld [vmem:[%s2516_s1] sm:$0xff]  ;;  %v115_v0 = vld [vmem:[%s2516_s1 + $0x1f8] sm:$0xff] }
  0x16   :  { %325 = vmatpush1.msra.mxu1 %v128_v39  ;;  %255 = vmatprep.subr.mxu0 %v63_v40  ;;  %v117_v61 = vld [vmem:[%s2516_s1 + $0x208] sm:$0xff]  ;;  %v116_v63 = vld [vmem:[%s2516_s1 + $0x200] sm:$0xff]  ;;  %v179_v1 = vld [vmem:[%s2516_s1 + $0x3f8] sm:$0xff] }
  0x17   :  { %326 = vmatprep.subr.mxu1 %v127_v41  ;;  %256 = vmatpush1.msra.mxu0 %v62_v42  ;;  %v114_v2 = vld [vmem:[%s2516_s1 + $0x1f0] sm:$0xff]  ;;  %v113_v4 = vld [vmem:[%s2516_s1 + $0x1e8] sm:$0xff]  ;;  %v112_v6 = vld [vmem:[%s2516_s1 + $0x1e0] sm:$0xff]  ;;  %v1669_v41 = vshrl.u32 %v182_v32, 7 }
  0x18   :  { %327 = vmatpush1.msra.mxu1 %v126_v43  ;;  %257 = vmatprep.subr.mxu0 %v61_v44  ;;  %v178_v3 = vld [vmem:[%s2516_s1 + $0x3f0] sm:$0xff]  ;;  %v177_v5 = vld [vmem:[%s2516_s1 + $0x3e8] sm:$0xff]  ;;  %v176_v7 = vld [vmem:[%s2516_s1 + $0x3e0] sm:$0xff] }
  0x19   :  { %328 = vmatprep.subr.mxu1 %v125_v45  ;;  %258 = vmatpush1.msra.mxu0 %v60_v46  ;;  %v111_v8 = vld [vmem:[%s2516_s1 + $0x1d8] sm:$0xff]  ;;  %v110_v10 = vld [vmem:[%s2516_s1 + $0x1d0] sm:$0xff]  ;;  %v109_v12 = vld [vmem:[%s2516_s1 + $0x1c8] sm:$0xff] }
  0x1a   :  { %329 = vmatpush1.msra.mxu1 %v124_v47  ;;  %259 = vmatprep.subr.mxu0 %v59_v48  ;;  %v175_v9 = vld [vmem:[%s2516_s1 + $0x3d8] sm:$0xff]  ;;  %v174_v11 = vld [vmem:[%s2516_s1 + $0x3d0] sm:$0xff]  ;;  %v173_v13 = vld [vmem:[%s2516_s1 + $0x3c8] sm:$0xff] }
  0x1b   :  { %330 = vmatprep.subr.mxu1 %v123_v49  ;;  %260 = vmatpush1.msra.mxu0 %v58_v50  ;;  %v108_v14 = vld [vmem:[%s2516_s1 + $0x1c0] sm:$0xff]  ;;  %v107_v16 = vld [vmem:[%s2516_s1 + $0x1b8] sm:$0xff]  ;;  %v106_v18 = vld [vmem:[%s2516_s1 + $0x1b0] sm:$0xff] }
  0x1c   :  { %331 = vmatpush1.msra.mxu1 %v122_v51  ;;  %261 = vmatprep.subr.mxu0 %v57_v52  ;;  %v172_v15 = vld [vmem:[%s2516_s1 + $0x3c0] sm:$0xff]  ;;  %v171_v17 = vld [vmem:[%s2516_s1 + $0x3b8] sm:$0xff]  ;;  %v170_v19 = vld [vmem:[%s2516_s1 + $0x3b0] sm:$0xff] }
  0x1d   :  { %332 = vmatprep.subr.mxu1 %v121_v53  ;;  %262 = vmatpush1.msra.mxu0 %v56_v54  ;;  %v105_v20 = vld [vmem:[%s2516_s1 + $0x1a8] sm:$0xff]  ;;  %v104_v22 = vld [vmem:[%s2516_s1 + $0x1a0] sm:$0xff]  ;;  %v103_v24 = vld [vmem:[%s2516_s1 + $0x198] sm:$0xff]  ;;  %v200_v53 = vsub.s32 2, %v1669_v41 }
  0x1e   :  { %333 = vmatpush1.msra.mxu1 %v120_v55  ;;  %263 = vmatprep.subr.mxu0 %v55_v56  ;;  %v169_v21 = vld [vmem:[%s2516_s1 + $0x3a8] sm:$0xff]  ;;  %v168_v23 = vld [vmem:[%s2516_s1 + $0x3a0] sm:$0xff]  ;;  %v167_v25 = vld [vmem:[%s2516_s1 + $0x398] sm:$0xff]  ;;  %v208_v56 = vsub.s32 6, %v1669_v41 }
  0x1f   :  { %334 = vmatprep.subr.mxu1 %v119_v57  ;;  %264 = vmatpush1.msra.mxu0 %v54_v58  ;;  %v102_v26 = vld [vmem:[%s2516_s1 + $0x190] sm:$0xff]  ;;  %v101_v28 = vld [vmem:[%s2516_s1 + $0x188] sm:$0xff]  ;;  %v100_v30 = vld [vmem:[%s2516_s1 + $0x180] sm:$0xff]  ;;  %v1707_v57 = vsub.s32 0, %v1669_v41 }
  0x20   :  { %335 = vmatpush1.msra.mxu1 %v118_v59  ;;  %265 = vmatprep.subr.mxu0 %v53_v60  ;;  %v166_v27 = vld [vmem:[%s2516_s1 + $0x390] sm:$0xff]  ;;  %v165_v29 = vld [vmem:[%s2516_s1 + $0x388] sm:$0xff]  ;;  %v164_v31 = vld [vmem:[%s2516_s1 + $0x380] sm:$0xff]  ;;  %v204_v60 = vsub.s32 4, %v1669_v41 }
  0x21   :  { %336 = vmatprep.subr.mxu1 %v117_v61  ;;  %266 = vmatpush1.msra.mxu0 %v52_v62  ;;  %v99_v33 = vld [vmem:[%s2516_s1 + $0x178] sm:$0xff]  ;;  %v98_v35 = vld [vmem:[%s2516_s1 + $0x170] sm:$0xff]  ;;  %v97_v37 = vld [vmem:[%s2516_s1 + $0x168] sm:$0xff] }
  0x22   :  { %337 = vmatpush1.msra.mxu1 %v116_v63  ;;  %267 = vmatprep.subr.mxu0 %v115_v0  ;;  %v163_v34 = vld [vmem:[%s2516_s1 + $0x378] sm:$0xff]  ;;  %v162_v36 = vld [vmem:[%s2516_s1 + $0x370] sm:$0xff]  ;;  %v161_v38 = vld [vmem:[%s2516_s1 + $0x368] sm:$0xff] }
  0x23   :  { %338 = vmatprep.subr.mxu1 %v179_v1  ;;  %268 = vmatpush2.msra.mxu0 %v114_v2  ;;  %v96_v39 = vld [vmem:[%s2516_s1 + $0x160] sm:$0xff]  ;;  %v95_v42 = vld [vmem:[%s2516_s1 + $0x158] sm:$0xff]  ;;  %v94_v45 = vld [vmem:[%s2516_s1 + $0x150] sm:$0xff] }
  0x24   :  { %339 = vmatpush2.msra.mxu1 %v178_v3  ;;  %269 = vmatprep.subr.mxu0 %v113_v4  ;;  %v160_v40 = vld [vmem:[%s2516_s1 + $0x360] sm:$0xff]  ;;  %v159_v43 = vld [vmem:[%s2516_s1 + $0x358] sm:$0xff]  ;;  %v158_v46 = vld [vmem:[%s2516_s1 + $0x350] sm:$0xff] }
  0x25   :  { %340 = vmatprep.subr.mxu1 %v177_v5  ;;  %270 = vmatpush2.msra.mxu0 %v112_v6  ;;  %v1097_v44 = vld [vmem:[%s2517_s0] sm:$0xff]   ;;  %v93_v47 = vld [vmem:[%s2516_s1 + $0x148] sm:$0xff]  ;;  %v91_v54 = vld [vmem:[%s2516_s1 + $0x138] sm:$0xff] }
  0x26   :  { %341 = vmatpush2.msra.mxu1 %v176_v7  ;;  %271 = vmatprep.subr.mxu0 %v111_v8  ;;  %v157_v48 = vld [vmem:[%s2516_s1 + $0x348] sm:$0xff]  ;;  %v92_v49 = vld [vmem:[%s2516_s1 + $0x140] sm:$0xff]  ;;  %v1098_v51 = vunpack.c.l.bf16 %v1097_v44  ;;  %v1099_v52 = vunpack.c.h.bf16 %v1097_v44  ;;  %v155_v55 = vld [vmem:[%s2516_s1 + $0x338] sm:$0xff] }
  0x27   :  { %342 = vmatprep.subr.mxu1 %v175_v9  ;;  %272 = vmatpush2.msra.mxu0 %v110_v10  ;;  %v156_v50 = vld [vmem:[%s2516_s1 + $0x340] sm:$0xff]  ;;  %v90_v58 = vld [vmem:[%s2516_s1 + $0x130] sm:$0xff]  ;;  %v89_v61 = vld [vmem:[%s2516_s1 + $0x128] sm:$0xff] }
  0x28   :  { %343 = vmatpush2.msra.mxu1 %v174_v11  ;;  %273 = vmatprep.subr.mxu0 %v109_v12  ;;  %v154_v59 = vld [vmem:[%s2516_s1 + $0x330] sm:$0xff]  ;;  %v153_v62 = vld [vmem:[%s2516_s1 + $0x328] sm:$0xff]  ;;  %v88_v63 = vld [vmem:[%s2516_s1 + $0x120] sm:$0xff]  ;;  %v201_v1 = vrot.slane %v1098_v51, %v200_v53  ;;  %v217_v2 = vrot.slane %v1099_v52, %v200_v53  ;;  %v209_v5 = vrot.slane %v1098_v51, %v208_v56 }
  0x29   :  { %344 = vmatprep.subr.mxu1 %v173_v13  ;;  %274 = vmatpush2.msra.mxu0 %v108_v14  ;;  %v152_v0 = vld [vmem:[%s2516_s1 + $0x320] sm:$0xff]  ;;  %v87_v3 = vld [vmem:[%s2516_s1 + $0x118] sm:$0xff]  ;;  %v225_v6 = vrot.slane %v1099_v52, %v208_v56  ;;  %v197_v7 = vrot.slane %v1098_v51, %v1707_v57  ;;  %v86_v8 = vld [vmem:[%s2516_s1 + $0x110] sm:$0xff]  ;;  %v213_v10 = vrot.slane %v1099_v52, %v1707_v57 }
  0x2a   :  { %345 = vmatpush2.msra.mxu1 %v172_v15  ;;  %275 = vmatprep.subr.mxu0 %v107_v16  ;;  %v151_v4 = vld [vmem:[%s2516_s1 + $0x318] sm:$0xff]  ;;  %v150_v9 = vld [vmem:[%s2516_s1 + $0x310] sm:$0xff]  ;;  %v205_v11 = vrot.slane %v1098_v51, %v204_v60  ;;  %v221_v12 = vrot.slane %v1099_v52, %v204_v60  ;;  %v85_v13 = vld [vmem:[%s2516_s1 + $0x108] sm:$0xff]  ;;  %v1752_v16 = vsel %vm226_vm0, %v217_v2, %v201_v1 }
  0x2b   :  { %346 = vmatprep.subr.mxu1 %v171_v17  ;;  %276 = vmatpush2.msra.mxu0 %v106_v18  ;;  %v149_v14 = vld [vmem:[%s2516_s1 + $0x308] sm:$0xff]  ;;  %v84_v15 = vld [vmem:[%s2516_s1 + $0x100] sm:$0xff]  ;;  %v1758_v18 = vsel %vm226_vm0, %v225_v6, %v209_v5  ;;  %v389_v32 = vld [vmem:[%s2518_s3 + $0x50] sm:$0xff]  ;;  %v188_v5 = vsub.s32 1, %v1669_v41 }
  0x2c   :  { %347 = vmatpush2.msra.mxu1 %v170_v19  ;;  %277 = vmatprep.subr.mxu0 %v105_v20  ;;  %v148_v17 = vld [vmem:[%s2516_s1 + $0x300] sm:$0xff]  ;;  %v1761_v19 = vsel %vm226_vm0, %v213_v10, %v197_v7  ;;  %v1764_v20 = vsel %vm226_vm0, %v221_v12, %v205_v11  ;;  %v380_v51 = vld [vmem:[%s2518_s3 + $0x8] sm:$0xff]  ;;  %v503_v56 = vld [vmem:[%s2519_s5 + $0x70] sm:$0xff] }
  0x2d   :  { %348 = vmatprep.subr.mxu1 %v169_v21  ;;  %278 = vmatpush2.msra.mxu0 %v104_v22  ;;  %v410_v21 = vld [vmem:[%s2518_s3 + $0xf8] sm:$0xff]  ;;  %v399_v44 = vld [vmem:[%s2518_s3 + $0xa0] sm:$0xff]  ;;  %v495_v1 = vld [vmem:[%s2519_s5 + $0x30] sm:$0xff] }
  0x2e   :  { %349 = vmatpush2.msra.mxu1 %v168_v23  ;;  %279 = vmatprep.subr.mxu0 %v103_v24  ;;  %v394_v22 = vld [vmem:[%s2518_s3 + $0x78] sm:$0xff]  ;;  %v409_v23 = vld [vmem:[%s2518_s3 + $0xf0] sm:$0xff]  ;;  %v395_v52 = vld [vmem:[%s2518_s3 + $0x80] sm:$0xff] }
  0x2f   :  { %350 = vmatprep.subr.mxu1 %v167_v25  ;;  %280 = vmatpush2.msra.mxu0 %v102_v26  ;;  %v393_v24 = vld [vmem:[%s2518_s3 + $0x70] sm:$0xff]  ;;  %v408_v25 = vld [vmem:[%s2518_s3 + $0xe8] sm:$0xff]  ;;  %v379_v53 = vld [vmem:[%s2518_s3] sm:$0xff] }
  0x30   :  { %351 = vmatpush2.msra.mxu1 %v166_v27  ;;  %281 = vmatprep.subr.mxu0 %v101_v28  ;;  %v392_v26 = vld [vmem:[%s2518_s3 + $0x68] sm:$0xff]  ;;  %v407_v27 = vld [vmem:[%s2518_s3 + $0xe0] sm:$0xff]  ;;  %v500_v60 = vld [vmem:[%s2519_s5 + $0x58] sm:$0xff] }
  0x31   :  { %352 = vmatprep.subr.mxu1 %v165_v29  ;;  %282 = vmatpush2.msra.mxu0 %v100_v30  ;;  %v391_v28 = vld [vmem:[%s2518_s3 + $0x60] sm:$0xff]  ;;  %v406_v29 = vld [vmem:[%s2518_s3 + $0xd8] sm:$0xff]  ;;  %v494_v2 = vld [vmem:[%s2519_s5 + $0x28] sm:$0xff] }
  0x32   :  { %353 = vmatpush2.msra.mxu1 %v164_v31  ;;  %283 = vmatprep.subr.mxu0 %v99_v33  ;;  %v390_v30 = vld [vmem:[%s2518_s3 + $0x58] sm:$0xff]  ;;  %v405_v31 = vld [vmem:[%s2518_s3 + $0xd0] sm:$0xff]  ;;  %v404_v33 = vld [vmem:[%s2518_s3 + $0xc8] sm:$0xff] }
  0x33   :  { %354 = vmatprep.subr.mxu1 %v163_v34  ;;  %284 = vmatpush2.msra.mxu0 %v98_v35  ;;  %v388_v34 = vld [vmem:[%s2518_s3 + $0x48] sm:$0xff]  ;;  %v403_v35 = vld [vmem:[%s2518_s3 + $0xc0] sm:$0xff]  ;;  %v981_v41 = vld [vmem:[%s2524_s11 + $0x18] sm:$0xff] }
  0x34   :  { %355 = vmatpush2.msra.mxu1 %v162_v36  ;;  %285 = vmatprep.subr.mxu0 %v97_v37  ;;  %v387_v36 = vld [vmem:[%s2518_s3 + $0x40] sm:$0xff]  ;;  %v402_v37 = vld [vmem:[%s2518_s3 + $0xb8] sm:$0xff] }
  0x35   :  { %356 = vmatprep.subr.mxu1 %v161_v38  ;;  %286 = vmatpush2.msra.mxu0 %v96_v39  ;;  %v386_v38 = vld [vmem:[%s2518_s3 + $0x38] sm:$0xff]  ;;  %v401_v39 = vld [vmem:[%s2518_s3 + $0xb0] sm:$0xff] }
  0x36   :  { %357 = vmatpush2.msra.mxu1 %v160_v40  ;;  %287 = vmatprep.subr.mxu0 %v95_v42  ;;  %v385_v40 = vld [vmem:[%s2518_s3 + $0x30] sm:$0xff]  ;;  %v400_v42 = vld [vmem:[%s2518_s3 + $0xa8] sm:$0xff] }
  0x37   :  { %358 = vmatprep.subr.mxu1 %v159_v43  ;;  %288 = vmatpush2.msra.mxu0 %v94_v45  ;;  %v384_v43 = vld [vmem:[%s2518_s3 + $0x28] sm:$0xff]  ;;  %v383_v45 = vld [vmem:[%s2518_s3 + $0x20] sm:$0xff] }
  0x38   :  { %359 = vmatpush2.msra.mxu1 %v158_v46  ;;  %289 = vmatprep.subr.mxu0 %v93_v47  ;;  %v398_v46 = vld [vmem:[%s2518_s3 + $0x98] sm:$0xff] }
  0x39   :  { %360 = vmatprep.subr.mxu1 %v157_v48  ;;  %290 = vmatpush2.msra.mxu0 %v92_v49  ;;  %v382_v47 = vld [vmem:[%s2518_s3 + $0x18] sm:$0xff]  ;;  %v397_v48 = vld [vmem:[%s2518_s3 + $0x90] sm:$0xff] }
  0x3a   :  { %361 = vmatpush2.msra.mxu1 %v156_v50  ;;  %291 = vmatprep.subr.mxu0 %v91_v54  ;;  %v381_v49 = vld [vmem:[%s2518_s3 + $0x10] sm:$0xff]  ;;  %v396_v50 = vld [vmem:[%s2518_s3 + $0x88] sm:$0xff]  ;;  %v1280_v54 = vmov 0.0  }
  0x3b   :  { %362 = vmatprep.subr.mxu1 %v155_v55  ;;  %292 = vmatpush2.msra.mxu0 %v90_v58  ;;  %v504_v55 = vld [vmem:[%s2519_s5 + $0x78] sm:$0xff]  ;;  %v502_v58 = vld [vmem:[%s2519_s5 + $0x68] sm:$0xff] }
  0x3c   :  { %363 = vmatpush2.msra.mxu1 %v154_v59  ;;  %293 = vmatprep.subr.mxu0 %v89_v61  ;;  %v501_v59 = vld [vmem:[%s2519_s5 + $0x60] sm:$0xff]  ;;  %v499_v61 = vld [vmem:[%s2519_s5 + $0x50] sm:$0xff] }
  0x3d   :  { %364 = vmatprep.subr.mxu1 %v153_v62  ;;  %294 = vmatpush2.msra.mxu0 %v88_v63  ;;  %v498_v62 = vld [vmem:[%s2519_s5 + $0x48] sm:$0xff]  ;;  %v497_v63 = vld [vmem:[%s2519_s5 + $0x40] sm:$0xff] }
  0x3e   :  { %365 = vmatpush2.msra.mxu1 %v152_v0  ;;  %295 = vmatprep.subr.mxu0 %v87_v3  ;;  %v496_v0 = vld [vmem:[%s2519_s5 + $0x38] sm:$0xff]  ;;  %v493_v3 = vld [vmem:[%s2519_s5 + $0x20] sm:$0xff] }
  0x3f   :  { %366 = vmatprep.subr.mxu1 %v151_v4  ;;  %296 = vmatpush2.msra.mxu0 %v86_v8  ;;  %v180_v4 = vld [vmem:[%s2520_s2] sm:$0x3] }
  0x40   :  { %367 = vmatpush2.msra.mxu1 %v150_v9  ;;  %297 = vmatprep.subr.mxu0 %v85_v13  ;;  %v185_v6 = vrot.slane %v180_v4, %v1707_v57  ;;  %v189_v7 = vrot.slane %v180_v4, %v188_v5  ;;  %v640_v4 = vld [vmem:[%s2521_s7 + $0x1c0] sm:$0xff] }
  0x41   :  { %368 = vmatprep.subr.mxu1 %v149_v14  ;;  %298 = vmatpush2.msra.mxu0 %v84_v15 }
  0x42   :  { %299 = vmatprep.mubr.f32.mxu0 %v1752_v16  ;;  %369 = vmatpush2.msra.mxu1 %v148_v17 }
  0x43   :  { %370 = vmatprep.mubr.f32.mxu1 %v1758_v18  ;;  %300 = vmatmul.mubr.f32.vlgmr.msra.gmra.mxu0 %v1761_v19 }
  0x44   :  { %371 = vmatmul.mubr.f32.vlgmr.msra.gmra.mxu1 %v1764_v20  ;;  %1100 = vmatprep.subr.mxu0 %v410_v21 }
  0x45   :  { %1101 = vmatpush3.msra.mxu0 %v394_v22  ;;  %1204 = vmatprep.subr.mxu1 %v1280_v54  ;;  %v492_v22 = vld [vmem:[%s2519_s5 + $0x18] sm:$0xff] }
  0x46   :  { %1102 = vmatprep.subr.mxu0 %v409_v23  ;;  %1205 = vmatpush3.msra.mxu1 %v504_v55  ;;  %v491_v23 = vld [vmem:[%s2519_s5 + $0x10] sm:$0xff]  ;;  %v588_v55 = vld [vmem:[%s2521_s7 + $0x20] sm:$0xff] }
  0x47   :  { %1103 = vmatpush3.msra.mxu0 %v393_v24  ;;  %1206 = vmatprep.subr.mxu1 %v1280_v54  ;;  %v615_v24 = vld [vmem:[%s2521_s7 + $0xf8] sm:$0xff] }
  0x48   :  { %1104 = vmatprep.subr.mxu0 %v408_v25  ;;  %1207 = vmatpush3.msra.mxu1 %v503_v56  ;;  %v614_v25 = vld [vmem:[%s2521_s7 + $0xf0] sm:$0xff]  ;;  %v587_v56 = vld [vmem:[%s2521_s7 + $0x18] sm:$0xff] }
  0x49   :  { %1105 = vmatpush3.msra.mxu0 %v392_v26  ;;  %1208 = vmatprep.subr.mxu1 %v1280_v54  ;;  %v613_v26 = vld [vmem:[%s2521_s7 + $0xe8] sm:$0xff] }
  0x4a   :  { %1106 = vmatprep.subr.mxu0 %v407_v27  ;;  %1209 = vmatpush3.msra.mxu1 %v502_v58  ;;  %v489_v27 = vld [vmem:[%s2519_s5] sm:$0xff]  ;;  %v586_v58 = vld [vmem:[%s2521_s7 + $0x10] sm:$0xff] }
  0x4b   :  { %1107 = vmatpush3.msra.mxu0 %v391_v28  ;;  %1210 = vmatprep.subr.mxu1 %v1280_v54  ;;  %v612_v28 = vld [vmem:[%s2521_s7 + $0xe0] sm:$0xff] }
  0x4c   :  { %1108 = vmatprep.subr.mxu0 %v406_v29  ;;  %1211 = vmatpush3.msra.mxu1 %v501_v59  ;;  %v611_v29 = vld [vmem:[%s2521_s7 + $0xd8] sm:$0xff]  ;;  %v585_v59 = vld [vmem:[%s2521_s7 + $0x8] sm:$0xff] }
  0x4d   :  { %1109 = vmatpush3.msra.mxu0 %v390_v30  ;;  %1212 = vmatprep.subr.mxu1 %v1280_v54  ;;  %v679_v30 = vld [vmem:[%s2521_s7 + $0x2f8] sm:$0xff] }
  0x4e   :  { %1110 = vmatprep.subr.mxu0 %v405_v31  ;;  %1213 = vmatpush3.msra.mxu1 %v500_v60  ;;  %v610_v31 = vld [vmem:[%s2521_s7 + $0xd0] sm:$0xff]  ;;  %v584_v60 = vld [vmem:[%s2521_s7] sm:$0xff] }
  0x4f   :  { %1111 = vmatpush3.msra.mxu0 %v389_v32  ;;  %1214 = vmatprep.subr.mxu1 %v1280_v54  ;;  %v609_v32 = vld [vmem:[%s2521_s7 + $0xc8] sm:$0xff] }
  0x50   :  { %1112 = vmatprep.subr.mxu0 %v404_v33  ;;  %1215 = vmatpush3.msra.mxu1 %v499_v61  ;;  %v608_v33 = vld [vmem:[%s2521_s7 + $0xc0] sm:$0xff]  ;;  %v647_v61 = vld [vmem:[%s2521_s7 + $0x1f8] sm:$0xff] }
  0x51   :  { %1113 = vmatpush3.msra.mxu0 %v388_v34  ;;  %1216 = vmatprep.subr.mxu1 %v1280_v54  ;;  %v607_v34 = vld [vmem:[%s2521_s7 + $0xb8] sm:$0xff] }
  0x52   :  { %1114 = vmatprep.subr.mxu0 %v403_v35  ;;  %1217 = vmatpush3.msra.mxu1 %v498_v62  ;;  %v606_v35 = vld [vmem:[%s2521_s7 + $0xb0] sm:$0xff] }
  0x53   :  { %1115 = vmatpush3.msra.mxu0 %v387_v36  ;;  %1218 = vmatprep.subr.mxu1 %v1280_v54  ;;  %v605_v36 = vld [vmem:[%s2521_s7 + $0xa8] sm:$0xff]  ;;  %v646_v62 = vld [vmem:[%s2521_s7 + $0x1f0] sm:$0xff] }
  0x54   :  { %1116 = vmatprep.subr.mxu0 %v402_v37  ;;  %1219 = vmatpush3.msra.mxu1 %v497_v63  ;;  %v604_v37 = vld [vmem:[%s2521_s7 + $0xa0] sm:$0xff]  ;;  %v645_v63 = vld [vmem:[%s2521_s7 + $0x1e8] sm:$0xff] }
  0x55   :  { %1117 = vmatpush3.msra.mxu0 %v386_v38  ;;  %1220 = vmatprep.subr.mxu1 %v1280_v54  ;;  %v603_v38 = vld [vmem:[%s2521_s7 + $0x98] sm:$0xff] }
  0x56   :  { %1118 = vmatprep.subr.mxu0 %v401_v39  ;;  %1221 = vmatpush3.msra.mxu1 %v496_v0  ;;  %v602_v39 = vld [vmem:[%s2521_s7 + $0x90] sm:$0xff]  ;;  %v644_v0 = vld [vmem:[%s2521_s7 + $0x1e0] sm:$0xff] }
  0x57   :  { %1119 = vmatpush3.msra.mxu0 %v385_v40  ;;  %1222 = vmatprep.subr.mxu1 %v1280_v54  ;;  %v601_v40 = vld [vmem:[%s2521_s7 + $0x88] sm:$0xff] }
  0x58   :  { %1120 = vmatprep.subr.mxu0 %v400_v42  ;;  %1223 = vmatpush3.msra.mxu1 %v495_v1  ;;  %v600_v42 = vld [vmem:[%s2521_s7 + $0x80] sm:$0xff]  ;;  %v643_v1 = vld [vmem:[%s2521_s7 + $0x1d8] sm:$0xff] }
  0x59   :  { %1121 = vmatpush3.msra.mxu0 %v384_v43  ;;  %1224 = vmatprep.subr.mxu1 %v1280_v54  ;;  %v599_v43 = vld [vmem:[%s2521_s7 + $0x78] sm:$0xff] }
  0x5a   :  { %1122 = vmatprep.subr.mxu0 %v399_v44  ;;  %1225 = vmatpush3.msra.mxu1 %v494_v2  ;;  %v598_v44 = vld [vmem:[%s2521_s7 + $0x70] sm:$0xff] }
  0x5b   :  { %1123 = vmatpush3.msra.mxu0 %v383_v45  ;;  %1226 = vmatprep.subr.mxu1 %v1280_v54  ;;  %v597_v45 = vld [vmem:[%s2521_s7 + $0x68] sm:$0xff]  ;;  %v642_v2 = vld [vmem:[%s2521_s7 + $0x1d0] sm:$0xff] }
  0x5c   :  { %1124 = vmatprep.subr.mxu0 %v398_v46  ;;  %1227 = vmatpush3.msra.mxu1 %v493_v3  ;;  %v596_v46 = vld [vmem:[%s2521_s7 + $0x60] sm:$0xff]  ;;  %v641_v3 = vld [vmem:[%s2521_s7 + $0x1c8] sm:$0xff] }
  0x5d   :  { %1125 = vmatpush3.msra.mxu0 %v382_v47  ;;  %1228 = vmatprep.subr.mxu1 %v1280_v54  ;;  %v595_v47 = vld [vmem:[%s2521_s7 + $0x58] sm:$0xff] }
  0x5e   :  { %1126 = vmatprep.subr.mxu0 %v397_v48  ;;  %1229 = vmatpush3.msra.mxu1 %v492_v22  ;;  %v594_v48 = vld [vmem:[%s2521_s7 + $0x50] sm:$0xff]  ;;  %v627_v22 = vld [vmem:[%s2521_s7 + $0x158] sm:$0xff] }
  0x5f   :  { %1127 = vmatpush3.msra.mxu0 %v381_v49  ;;  %1230 = vmatprep.subr.mxu1 %v1280_v54  ;;  %v593_v49 = vld [vmem:[%s2521_s7 + $0x48] sm:$0xff] }
  0x60   :  { %1128 = vmatprep.subr.mxu0 %v396_v50  ;;  %1231 = vmatpush3.msra.mxu1 %v491_v23  ;;  %v592_v50 = vld [vmem:[%s2521_s7 + $0x40] sm:$0xff]  ;;  %v626_v23 = vld [vmem:[%s2521_s7 + $0x150] sm:$0xff] }
  0x61   :  { %1129 = vmatpush3.msra.mxu0 %v380_v51  ;;  %1232 = vmatprep.subr.mxu1 %v1280_v54  ;;  %v591_v51 = vld [vmem:[%s2521_s7 + $0x38] sm:$0xff] }
  0x62   :  { %1130 = vmatprep.subr.mxu0 %v395_v52  ;;  %1236 = vmatprep.mubr.msk.f32.mxu1 %vm1281_vm1, %v1280_v54  ;;  %v590_v52 = vld [vmem:[%s2521_s7 + $0x30] sm:$0xff] }
  0x63   :  { %1131 = vmatpush3.msra.mxu0 %v379_v53  ;;  %v589_v53 = vld [vmem:[%s2521_s7 + $0x28] sm:$0xff] }
  0x64   :  { %724 = vmatprep.subr.mxu0 %v615_v24  ;;  %v625_v24 = vld [vmem:[%s2521_s7 + $0x148] sm:$0xff] }
 0x103   :  { %v301_v8 = vpop.f32.mrf.mxu0 }
 0x104   :  { %v372_v9 = vpop.f32.mrf.mxu1  ;;  %v302_v10 = vadd.f32 %v301_v8, %v185_v6  ;;  %v639_v6 = vld [vmem:[%s2521_s7 + $0x1b8] sm:$0xff]  ;;  %v637_v8 = vld [vmem:[%s2521_s7 + $0x1a8] sm:$0xff] }
 0x105   :  { %v303_v11 = vpop.f32.mrf.mxu0 }
 0x106   :  { %v304_v12 = vadd.f32 %v303_v11, %v189_v7  ;;  %v373_v13 = vadd.f32 %v372_v9, %v302_v10  ;;  %v374_v14 = vpop.f32.mrf.mxu1  ;;  %v638_v7 = vld [vmem:[%s2521_s7 + $0x1b0] sm:$0xff]  ;;  %v636_v9 = vld [vmem:[%s2521_s7 + $0x1a0] sm:$0xff]  ;;  %v635_v10 = vld [vmem:[%s2521_s7 + $0x198] sm:$0xff] }
 0x107   :  { %v634_v11 = vld [vmem:[%s2521_s7 + $0x190] sm:$0xff] }
 0x108   :  { %v375_v15 = vadd.f32 %v374_v14, %v304_v12  ;;  %v377_v21 = vmax.f32 %v373_v13, 0.0  ;;  %v633_v12 = vld [vmem:[%s2521_s7 + $0x188] sm:$0xff]  ;;  %v632_v13 = vld [vmem:[%s2521_s7 + $0x180] sm:$0xff]  ;;  %v631_v14 = vld [vmem:[%s2521_s7 + $0x178] sm:$0xff] }
 0x10a   :  { %v378_v17 = vmax.f32 %v375_v15, 0.0  ;;  %v630_v15 = vld [vmem:[%s2521_s7 + $0x170] sm:$0xff] }
 0x10c   :  { %482 = vmatprep.mubr.f32.mxu0 %v378_v17  ;;  %v629_v17 = vld [vmem:[%s2521_s7 + $0x168] sm:$0xff] }
 0x10d   :  { %483 = vmatmul.mubr.f32.vlgmr.msra.gmra.mxu0 %v377_v21  ;;  %v628_v21 = vld [vmem:[%s2521_s7 + $0x160] sm:$0xff] }
 0x10e   :  { %788 = vmatprep.mubr.f32.mxu0 %v1752_v16  ;;  %v490_v16 = vld [vmem:[%s2519_s5 + $0x8] sm:$0xff]  ;;  %725 = vmatpush1.msra.mxu0 %v614_v25  ;;  %v623_v25 = vld [vmem:[%s2521_s7 + $0x138] sm:$0xff] }
 0x10f   :  { %1233 = vmatpush3.msra.mxu1 %v490_v16  ;;  %726 = vmatprep.subr.mxu0 %v613_v26  ;;  %v624_v16 = vld [vmem:[%s2521_s7 + $0x140] sm:$0xff]  ;;  %v622_v26 = vld [vmem:[%s2521_s7 + $0x130] sm:$0xff] }
 0x110   :  { %1234 = vmatprep.subr.mxu1 %v1280_v54  ;;  %727 = vmatpush1.msra.mxu0 %v612_v28  ;;  %v620_v28 = vld [vmem:[%s2521_s7 + $0x120] sm:$0xff] }
 0x111   :  { %1235 = vmatpush3.msra.mxu1 %v489_v27  ;;  %728 = vmatprep.subr.mxu0 %v611_v29  ;;  %v621_v27 = vld [vmem:[%s2521_s7 + $0x128] sm:$0xff]  ;;  %v619_v29 = vld [vmem:[%s2521_s7 + $0x118] sm:$0xff] }
 0x112   :  { %795 = vmatprep.subr.mxu1 %v679_v30  ;;  %729 = vmatpush1.msra.mxu0 %v610_v31  ;;  %v618_v30 = vld [vmem:[%s2521_s7 + $0x110] sm:$0xff]  ;;  %v617_v31 = vld [vmem:[%s2521_s7 + $0x108] sm:$0xff] }
 0x113   :  { %730 = vmatprep.subr.mxu0 %v609_v32  ;;  %v616_v32 = vld [vmem:[%s2521_s7 + $0x100] sm:$0xff] }
 0x114   :  { %731 = vmatpush1.msra.mxu0 %v608_v33 }
 0x115   :  { %732 = vmatprep.subr.mxu0 %v607_v34  ;;  %v1092_v34 = vld [vmem:[%s2522_s4] ss:$0 sm:$0xff] }
 0x116   :  { %733 = vmatpush1.msra.mxu0 %v606_v35 }
 0x117   :  { %734 = vmatprep.subr.mxu0 %v605_v36 }
 0x118   :  { %735 = vmatpush1.msra.mxu0 %v604_v37 }
 0x119   :  { %736 = vmatprep.subr.mxu0 %v603_v38 }
 0x11a   :  { %737 = vmatpush1.msra.mxu0 %v602_v39  ;;  %v678_v39 = vld [vmem:[%s2521_s7 + $0x2f0] sm:$0xff] }
 0x11b   :  { %738 = vmatprep.subr.mxu0 %v601_v40  ;;  %v677_v40 = vld [vmem:[%s2521_s7 + $0x2e8] sm:$0xff] }
 0x11c   :  { %739 = vmatpush1.msra.mxu0 %v600_v42  ;;  %v675_v42 = vld [vmem:[%s2521_s7 + $0x2d8] sm:$0xff] }
 0x11d   :  { %740 = vmatprep.subr.mxu0 %v599_v43  ;;  %v674_v43 = vld [vmem:[%s2521_s7 + $0x2d0] sm:$0xff] }
 0x11e   :  { %741 = vmatpush1.msra.mxu0 %v598_v44  ;;  %v673_v44 = vld [vmem:[%s2521_s7 + $0x2c8] sm:$0xff] }
 0x11f   :  { %742 = vmatprep.subr.mxu0 %v597_v45  ;;  %v672_v45 = vld [vmem:[%s2521_s7 + $0x2c0] sm:$0xff] }
 0x120   :  { %743 = vmatpush1.msra.mxu0 %v596_v46  ;;  %v670_v46 = vld [vmem:[%s2521_s7 + $0x2b0] sm:$0xff] }
 0x121   :  { %744 = vmatprep.subr.mxu0 %v595_v47  ;;  %v669_v47 = vld [vmem:[%s2521_s7 + $0x2a8] sm:$0xff] }
 0x122   :  { %745 = vmatpush1.msra.mxu0 %v594_v48  ;;  %v668_v48 = vld [vmem:[%s2521_s7 + $0x2a0] sm:$0xff] }
 0x123   :  { %746 = vmatprep.subr.mxu0 %v593_v49  ;;  %v667_v49 = vld [vmem:[%s2521_s7 + $0x298] sm:$0xff] }
 0x124   :  { %747 = vmatpush1.msra.mxu0 %v592_v50  ;;  %v666_v50 = vld [vmem:[%s2521_s7 + $0x290] sm:$0xff] }
 0x125   :  { %748 = vmatprep.subr.mxu0 %v591_v51  ;;  %v665_v51 = vld [vmem:[%s2521_s7 + $0x288] sm:$0xff] }
 0x126   :  { %749 = vmatpush1.msra.mxu0 %v590_v52  ;;  %v664_v52 = vld [vmem:[%s2521_s7 + $0x280] sm:$0xff] }
 0x127   :  { %750 = vmatprep.subr.mxu0 %v589_v53  ;;  %v663_v53 = vld [vmem:[%s2521_s7 + $0x278] sm:$0xff] }
 0x128   :  { %751 = vmatpush1.msra.mxu0 %v588_v55  ;;  %v662_v55 = vld [vmem:[%s2521_s7 + $0x270] sm:$0xff] }
 0x129   :  { %752 = vmatprep.subr.mxu0 %v587_v56  ;;  %v661_v56 = vld [vmem:[%s2521_s7 + $0x268] sm:$0xff] }
 0x12a   :  { %753 = vmatpush1.msra.mxu0 %v586_v58  ;;  %v660_v58 = vld [vmem:[%s2521_s7 + $0x260] sm:$0xff] }
 0x12b   :  { %754 = vmatprep.subr.mxu0 %v585_v59  ;;  %v659_v59 = vld [vmem:[%s2521_s7 + $0x258] sm:$0xff] }
 0x12c   :  { %755 = vmatpush1.msra.mxu0 %v584_v60  ;;  %v658_v60 = vld [vmem:[%s2521_s7 + $0x250] sm:$0xff] }
 0x12d   :  { %756 = vmatprep.subr.mxu0 %v647_v61  ;;  %v657_v61 = vld [vmem:[%s2521_s7 + $0x248] sm:$0xff] }
 0x12e   :  { %757 = vmatpush2.msra.mxu0 %v646_v62  ;;  %v656_v62 = vld [vmem:[%s2521_s7 + $0x240] sm:$0xff] }
 0x12f   :  { %758 = vmatprep.subr.mxu0 %v645_v63  ;;  %v655_v63 = vld [vmem:[%s2521_s7 + $0x238] sm:$0xff] }
 0x130   :  { %759 = vmatpush2.msra.mxu0 %v644_v0  ;;  %v654_v0 = vld [vmem:[%s2521_s7 + $0x230] sm:$0xff] }
 0x131   :  { %760 = vmatprep.subr.mxu0 %v643_v1  ;;  %v653_v1 = vld [vmem:[%s2521_s7 + $0x228] sm:$0xff] }
 0x132   :  { %761 = vmatpush2.msra.mxu0 %v642_v2  ;;  %v652_v2 = vld [vmem:[%s2521_s7 + $0x220] sm:$0xff] }
 0x133   :  { %762 = vmatprep.subr.mxu0 %v641_v3  ;;  %v651_v3 = vld [vmem:[%s2521_s7 + $0x218] sm:$0xff] }
 0x134   :  { %763 = vmatpush2.msra.mxu0 %v640_v4  ;;  %v650_v4 = vld [vmem:[%s2521_s7 + $0x210] sm:$0xff] }
 0x135   :  { %764 = vmatprep.subr.mxu0 %v639_v6  ;;  %v649_v6 = vld [vmem:[%s2521_s7 + $0x208] sm:$0xff] }
 0x136   :  { %765 = vmatpush2.msra.mxu0 %v638_v7  ;;  %v648_v7 = vld [vmem:[%s2521_s7 + $0x200] sm:$0xff] }
 0x137   :  { %766 = vmatprep.subr.mxu0 %v637_v8  ;;  %v711_v8 = vld [vmem:[%s2521_s7 + $0x3f8] sm:$0xff] }
 0x138   :  { %767 = vmatpush2.msra.mxu0 %v636_v9  ;;  %v710_v9 = vld [vmem:[%s2521_s7 + $0x3f0] sm:$0xff] }
 0x139   :  { %768 = vmatprep.subr.mxu0 %v635_v10  ;;  %v709_v10 = vld [vmem:[%s2521_s7 + $0x3e8] sm:$0xff] }
 0x13a   :  { %769 = vmatpush2.msra.mxu0 %v634_v11  ;;  %v708_v11 = vld [vmem:[%s2521_s7 + $0x3e0] sm:$0xff] }
 0x13b   :  { %770 = vmatprep.subr.mxu0 %v633_v12  ;;  %v707_v12 = vld [vmem:[%s2521_s7 + $0x3d8] sm:$0xff] }
 0x13c   :  { %771 = vmatpush2.msra.mxu0 %v632_v13  ;;  %v706_v13 = vld [vmem:[%s2521_s7 + $0x3d0] sm:$0xff] }
 0x13d   :  { %772 = vmatprep.subr.mxu0 %v631_v14  ;;  %v705_v14 = vld [vmem:[%s2521_s7 + $0x3c8] sm:$0xff] }
 0x13e   :  { %773 = vmatpush2.msra.mxu0 %v630_v15  ;;  %v704_v15 = vld [vmem:[%s2521_s7 + $0x3c0] sm:$0xff] }
 0x13f   :  { %774 = vmatprep.subr.mxu0 %v629_v17  ;;  %v703_v17 = vld [vmem:[%s2521_s7 + $0x3b8] sm:$0xff] }
 0x140   :  { %775 = vmatpush2.msra.mxu0 %v628_v21  ;;  %v702_v21 = vld [vmem:[%s2521_s7 + $0x3b0] sm:$0xff] }
 0x141   :  { %776 = vmatprep.subr.mxu0 %v627_v22  ;;  %v701_v22 = vld [vmem:[%s2521_s7 + $0x3a8] sm:$0xff] }
 0x142   :  { %777 = vmatpush2.msra.mxu0 %v626_v23  ;;  %v700_v23 = vld [vmem:[%s2521_s7 + $0x3a0] sm:$0xff] }
 0x143   :  { %778 = vmatprep.subr.mxu0 %v625_v24  ;;  %v699_v24 = vld [vmem:[%s2521_s7 + $0x398] sm:$0xff] }
 0x144   :  { %779 = vmatpush2.msra.mxu0 %v624_v16  ;;  %v698_v16 = vld [vmem:[%s2521_s7 + $0x390] sm:$0xff] }
 0x145   :  { %780 = vmatprep.subr.mxu0 %v623_v25  ;;  %v697_v25 = vld [vmem:[%s2521_s7 + $0x388] sm:$0xff] }
 0x146   :  { %781 = vmatpush2.msra.mxu0 %v622_v26  ;;  %v696_v26 = vld [vmem:[%s2521_s7 + $0x380] sm:$0xff] }
 0x147   :  { %782 = vmatprep.subr.mxu0 %v621_v27  ;;  %v695_v27 = vld [vmem:[%s2521_s7 + $0x378] sm:$0xff] }
 0x148   :  { %783 = vmatpush2.msra.mxu0 %v620_v28  ;;  %v694_v28 = vld [vmem:[%s2521_s7 + $0x370] sm:$0xff] }
 0x149   :  { %784 = vmatprep.subr.mxu0 %v619_v29  ;;  %v693_v29 = vld [vmem:[%s2521_s7 + $0x368] sm:$0xff] }
 0x14a   :  { %785 = vmatpush2.msra.mxu0 %v618_v30  ;;  %v692_v30 = vld [vmem:[%s2521_s7 + $0x360] sm:$0xff] }
 0x14b   :  { %786 = vmatprep.subr.mxu0 %v617_v31  ;;  %v691_v31 = vld [vmem:[%s2521_s7 + $0x358] sm:$0xff] }
 0x14c   :  { %787 = vmatpush2.msra.mxu0 %v616_v32  ;;  %v690_v32 = vld [vmem:[%s2521_s7 + $0x350] sm:$0xff] }
 0x14d   :  { %789 = vmatmul.mubr.f32.vlgmr.msra.gmra.mxu0 %v1761_v19  ;;  %v676_v19 = vld [vmem:[%s2521_s7 + $0x2e0] sm:$0xff] }
 0x1cd   :  { %v1132_v33 = vpop.f32.mrf.mxu0 }
 0x1cf   :  { %v1133_v35 = vpop.f32.mrf.mxu0 }
 0x1d0   :  { %v1134_v36 = vadd.f32 %v1133_v35, %v1132_v33  ;;  %v689_v33 = vld [vmem:[%s2521_s7 + $0x348] sm:$0xff]  ;;  %v687_v35 = vld [vmem:[%s2521_s7 + $0x338] sm:$0xff] }
 0x1d2   :  { %v485_v37 = vadd.f32 %v1134_v36, %v1092_v34  ;;  %v688_v34 = vld [vmem:[%s2521_s7 + $0x340] sm:$0xff]  ;;  %v686_v36 = vld [vmem:[%s2521_s7 + $0x330] sm:$0xff] }
 0x1d4   :  { %v488_v38 = vmax.f32 %v485_v37, 0.0  ;;  %v685_v37 = vld [vmem:[%s2521_s7 + $0x328] sm:$0xff] }
 0x1d6   :  { %1237 = vmatmul.mubr.f32.vlgmr.msra.gmra.mxu1 %v488_v38  ;;  %v684_v38 = vld [vmem:[%s2521_s7 + $0x320] sm:$0xff] }
 0x1d7   :  { %796 = vmatpush1.msra.mxu1 %v678_v39  ;;  %859 = vmatprep.mubr.f32.mxu1 %v1758_v18  ;;  %v671_v18 = vld [vmem:[%s2521_s7 + $0x2b8] sm:$0xff] }
 0x1d8   :  { %797 = vmatprep.subr.mxu1 %v677_v40  ;;  %v683_v39 = vld [vmem:[%s2521_s7 + $0x318] sm:$0xff]  ;;  %v682_v40 = vld [vmem:[%s2521_s7 + $0x310] sm:$0xff] }
 0x1d9   :  { %798 = vmatpush1.msra.mxu1 %v676_v19  ;;  %v681_v19 = vld [vmem:[%s2521_s7 + $0x308] sm:$0xff] }
 0x1da   :  { %799 = vmatprep.subr.mxu1 %v675_v42  ;;  %v680_v42 = vld [vmem:[%s2521_s7 + $0x300] sm:$0xff] }
 0x1db   :  { %800 = vmatpush1.msra.mxu1 %v674_v43  ;;  %v899_v43 = vld [vmem:[%s2523_s9 + $0xf8] sm:$0xff] }
 0x1dc   :  { %801 = vmatprep.subr.mxu1 %v673_v44  ;;  %v883_v44 = vld [vmem:[%s2523_s9 + $0x78] sm:$0xff]  ;;  %1152 = vmatprep.subr.mxu0 %v899_v43  ;;  %v982_v43 = vld [vmem:[%s2524_s11 + $0x20] sm:$0xff] }
 0x1dd   :  { %802 = vmatpush1.msra.mxu1 %v672_v45  ;;  %v898_v45 = vld [vmem:[%s2523_s9 + $0xf0] sm:$0xff]  ;;  %1153 = vmatpush3.msra.mxu0 %v883_v44  ;;  %v978_v44 = vld [vmem:[%s2524_s11] sm:$0xff] }
 0x1de   :  { %803 = vmatprep.subr.mxu1 %v671_v18  ;;  %v897_v18 = vld [vmem:[%s2523_s9 + $0xe8] sm:$0xff]  ;;  %1154 = vmatprep.subr.mxu0 %v898_v45 }
 0x1df   :  { %804 = vmatpush1.msra.mxu1 %v670_v46  ;;  %v881_v46 = vld [vmem:[%s2523_s9 + $0x68] sm:$0xff] }
 0x1e0   :  { %805 = vmatprep.subr.mxu1 %v669_v47  ;;  %v896_v47 = vld [vmem:[%s2523_s9 + $0xe0] sm:$0xff] }
 0x1e1   :  { %806 = vmatpush1.msra.mxu1 %v668_v48  ;;  %v880_v48 = vld [vmem:[%s2523_s9 + $0x60] sm:$0xff] }
 0x1e2   :  { %807 = vmatprep.subr.mxu1 %v667_v49  ;;  %v895_v49 = vld [vmem:[%s2523_s9 + $0xd8] sm:$0xff] }
 0x1e3   :  { %808 = vmatpush1.msra.mxu1 %v666_v50  ;;  %v879_v50 = vld [vmem:[%s2523_s9 + $0x58] sm:$0xff] }
 0x1e4   :  { %809 = vmatprep.subr.mxu1 %v665_v51  ;;  %v894_v51 = vld [vmem:[%s2523_s9 + $0xd0] sm:$0xff] }
 0x1e5   :  { %810 = vmatpush1.msra.mxu1 %v664_v52  ;;  %v878_v52 = vld [vmem:[%s2523_s9 + $0x50] sm:$0xff] }
 0x1e6   :  { %811 = vmatprep.subr.mxu1 %v663_v53  ;;  %v893_v53 = vld [vmem:[%s2523_s9 + $0xc8] sm:$0xff] }
 0x1e7   :  { %812 = vmatpush1.msra.mxu1 %v662_v55  ;;  %v877_v55 = vld [vmem:[%s2523_s9 + $0x48] sm:$0xff] }
 0x1e8   :  { %813 = vmatprep.subr.mxu1 %v661_v56  ;;  %v892_v56 = vld [vmem:[%s2523_s9 + $0xc0] sm:$0xff] }
 0x1e9   :  { %814 = vmatpush1.msra.mxu1 %v660_v58  ;;  %v876_v58 = vld [vmem:[%s2523_s9 + $0x40] sm:$0xff] }
 0x1ea   :  { %815 = vmatprep.subr.mxu1 %v659_v59  ;;  %v891_v59 = vld [vmem:[%s2523_s9 + $0xb8] sm:$0xff] }
 0x1eb   :  { %816 = vmatpush1.msra.mxu1 %v658_v60  ;;  %v875_v60 = vld [vmem:[%s2523_s9 + $0x38] sm:$0xff] }
 0x1ec   :  { %817 = vmatprep.subr.mxu1 %v657_v61  ;;  %v890_v61 = vld [vmem:[%s2523_s9 + $0xb0] sm:$0xff] }
 0x1ed   :  { %818 = vmatpush1.msra.mxu1 %v656_v62  ;;  %v874_v62 = vld [vmem:[%s2523_s9 + $0x30] sm:$0xff] }
 0x1ee   :  { %819 = vmatprep.subr.mxu1 %v655_v63  ;;  %v889_v63 = vld [vmem:[%s2523_s9 + $0xa8] sm:$0xff] }
 0x1ef   :  { %820 = vmatpush1.msra.mxu1 %v654_v0  ;;  %v873_v0 = vld [vmem:[%s2523_s9 + $0x28] sm:$0xff] }
 0x1f0   :  { %821 = vmatprep.subr.mxu1 %v653_v1  ;;  %v888_v1 = vld [vmem:[%s2523_s9 + $0xa0] sm:$0xff] }
 0x1f1   :  { %822 = vmatpush1.msra.mxu1 %v652_v2  ;;  %v872_v2 = vld [vmem:[%s2523_s9 + $0x20] sm:$0xff] }
 0x1f2   :  { %823 = vmatprep.subr.mxu1 %v651_v3  ;;  %v887_v3 = vld [vmem:[%s2523_s9 + $0x98] sm:$0xff] }
 0x1f3   :  { %824 = vmatpush1.msra.mxu1 %v650_v4  ;;  %v871_v4 = vld [vmem:[%s2523_s9 + $0x18] sm:$0xff] }
 0x1f4   :  { %825 = vmatprep.subr.mxu1 %v649_v6  ;;  %v886_v6 = vld [vmem:[%s2523_s9 + $0x90] sm:$0xff] }
 0x1f5   :  { %826 = vmatpush1.msra.mxu1 %v648_v7  ;;  %v870_v7 = vld [vmem:[%s2523_s9 + $0x10] sm:$0xff] }
 0x1f6   :  { %827 = vmatprep.subr.mxu1 %v711_v8  ;;  %v885_v8 = vld [vmem:[%s2523_s9 + $0x88] sm:$0xff] }
 0x1f7   :  { %828 = vmatpush2.msra.mxu1 %v710_v9  ;;  %v869_v9 = vld [vmem:[%s2523_s9 + $0x8] sm:$0xff] }
 0x1f8   :  { %829 = vmatprep.subr.mxu1 %v709_v10  ;;  %v884_v10 = vld [vmem:[%s2523_s9 + $0x80] sm:$0xff] }
 0x1f9   :  { %830 = vmatpush2.msra.mxu1 %v708_v11  ;;  %v868_v11 = vld [vmem:[%s2523_s9] sm:$0xff] }
 0x1fa   :  { %831 = vmatprep.subr.mxu1 %v707_v12  ;;  %v993_v12 = vld [vmem:[%s2524_s11 + $0x78] sm:$0xff] }
 0x1fb   :  { %832 = vmatpush2.msra.mxu1 %v706_v13  ;;  %v992_v13 = vld [vmem:[%s2524_s11 + $0x70] sm:$0xff] }
 0x1fc   :  { %833 = vmatprep.subr.mxu1 %v705_v14  ;;  %v991_v14 = vld [vmem:[%s2524_s11 + $0x68] sm:$0xff] }
 0x1fd   :  { %834 = vmatpush2.msra.mxu1 %v704_v15  ;;  %v990_v15 = vld [vmem:[%s2524_s11 + $0x60] sm:$0xff] }
 0x1fe   :  { %835 = vmatprep.subr.mxu1 %v703_v17  ;;  %v989_v17 = vld [vmem:[%s2524_s11 + $0x58] sm:$0xff] }
 0x1ff   :  { %836 = vmatpush2.msra.mxu1 %v702_v21  ;;  %v988_v21 = vld [vmem:[%s2524_s11 + $0x50] sm:$0xff] }
 0x200   :  { %837 = vmatprep.subr.mxu1 %v701_v22  ;;  %v987_v22 = vld [vmem:[%s2524_s11 + $0x48] sm:$0xff] }
 0x201   :  { %838 = vmatpush2.msra.mxu1 %v700_v23  ;;  %v986_v23 = vld [vmem:[%s2524_s11 + $0x40] sm:$0xff] }
 0x202   :  { %839 = vmatprep.subr.mxu1 %v699_v24  ;;  %v985_v24 = vld [vmem:[%s2524_s11 + $0x38] sm:$0xff] }
 0x203   :  { %840 = vmatpush2.msra.mxu1 %v698_v16  ;;  %v984_v16 = vld [vmem:[%s2524_s11 + $0x30] sm:$0xff] }
 0x204   :  { %841 = vmatprep.subr.mxu1 %v697_v25  ;;  %v983_v25 = vld [vmem:[%s2524_s11 + $0x28] sm:$0xff] }
 0x205   :  { %842 = vmatpush2.msra.mxu1 %v696_v26  ;;  %v1093_v26 = vld [vmem:[%s2525_s6] ss:$0 sm:$0xff] }
 0x206   :  { %843 = vmatprep.subr.mxu1 %v695_v27 }
 0x207   :  { %844 = vmatpush2.msra.mxu1 %v694_v28 }
 0x208   :  { %845 = vmatprep.subr.mxu1 %v693_v29 }
 0x209   :  { %846 = vmatpush2.msra.mxu1 %v692_v30  ;;  %v712_v30 = vld [vmem:[%s2527_s8] sm:$0x3] }
 0x20a   :  { %847 = vmatprep.subr.mxu1 %v691_v31  ;;  %v717_v31 = vrot.slane %v712_v30, %v1707_v57  ;;  %v980_v57 = vld [vmem:[%s2524_s11 + $0x10] sm:$0xff] }
 0x20b   :  { %848 = vmatpush2.msra.mxu1 %v690_v32 }
 0x20c   :  { %849 = vmatprep.subr.mxu1 %v689_v33  ;;  %v721_v33 = vrot.slane %v712_v30, %v188_v5  ;;  %v979_v5 = vld [vmem:[%s2524_s11 + $0x8] sm:$0xff] }
 0x20d   :  { %850 = vmatpush2.msra.mxu1 %v688_v34  ;;  %v790_v32 = vpop.f32.mrf.mxu0 }
 0x20e   :  { %851 = vmatprep.subr.mxu1 %v687_v35  ;;  %v791_v34 = vadd.f32 %v790_v32, %v717_v31 }
 0x20f   :  { %852 = vmatpush2.msra.mxu1 %v686_v36  ;;  %v792_v35 = vpop.f32.mrf.mxu0 }
 0x210   :  { %853 = vmatprep.subr.mxu1 %v685_v37  ;;  %v793_v37 = vadd.f32 %v792_v35, %v721_v33 }
 0x211   :  { %854 = vmatpush2.msra.mxu1 %v684_v38 }
 0x212   :  { %855 = vmatprep.subr.mxu1 %v683_v39 }
 0x213   :  { %856 = vmatpush2.msra.mxu1 %v682_v40 }
 0x214   :  { %857 = vmatprep.subr.mxu1 %v681_v19 }
 0x215   :  { %858 = vmatpush2.msra.mxu1 %v680_v42 }
 0x216   :  { %860 = vmatmul.mubr.f32.vlgmr.msra.gmra.mxu1 %v1764_v20  ;;  %1239 = vmatprep.subr.mxu1 %v1280_v54  ;;  %v882_v20 = vld [vmem:[%s2523_s9 + $0x70] sm:$0xff] }
 0x217   :  { %1271 = vmatprep.mubr.msk.f32.mxu1 %vm1281_vm1, %v1280_v54  ;;  %1155 = vmatpush3.msra.mxu0 %v882_v20  ;;  %v1094_v20 = vld [vmem:[%s2528_s10] ss:$0 sm:$0xff] }
 0x218   :  { %1156 = vmatprep.subr.mxu0 %v897_v18  ;;  %1240 = vmatpush3.msra.mxu1 %v993_v12 }
 0x219   :  { %1157 = vmatpush3.msra.mxu0 %v881_v46  ;;  %1241 = vmatprep.subr.mxu1 %v1280_v54 }
 0x21a   :  { %1158 = vmatprep.subr.mxu0 %v896_v47  ;;  %1242 = vmatpush3.msra.mxu1 %v992_v13 }
 0x21b   :  { %1159 = vmatpush3.msra.mxu0 %v880_v48  ;;  %1243 = vmatprep.subr.mxu1 %v1280_v54 }
 0x21c   :  { %1160 = vmatprep.subr.mxu0 %v895_v49  ;;  %1244 = vmatpush3.msra.mxu1 %v991_v14  ;;  %v1095_v49 = vld [vmem:[%s2529_s12] ss:$0 sm:$0xff] }
 0x21d   :  { %1161 = vmatpush3.msra.mxu0 %v879_v50  ;;  %1245 = vmatprep.subr.mxu1 %v1280_v54 }
 0x21e   :  { %1162 = vmatprep.subr.mxu0 %v894_v51  ;;  %1246 = vmatpush3.msra.mxu1 %v990_v15 }
 0x21f   :  { %1163 = vmatpush3.msra.mxu0 %v878_v52  ;;  %1247 = vmatprep.subr.mxu1 %v1280_v54 }
 0x220   :  { %1164 = vmatprep.subr.mxu0 %v893_v53  ;;  %1248 = vmatpush3.msra.mxu1 %v989_v17 }
 0x221   :  { %1165 = vmatpush3.msra.mxu0 %v877_v55  ;;  %1249 = vmatprep.subr.mxu1 %v1280_v54 }
 0x222   :  { %1166 = vmatprep.subr.mxu0 %v892_v56  ;;  %1250 = vmatpush3.msra.mxu1 %v988_v21 }
 0x223   :  { %1167 = vmatpush3.msra.mxu0 %v876_v58  ;;  %1251 = vmatprep.subr.mxu1 %v1280_v54 }
 0x224   :  { %1168 = vmatprep.subr.mxu0 %v891_v59  ;;  %1252 = vmatpush3.msra.mxu1 %v987_v22 }
 0x225   :  { %1169 = vmatpush3.msra.mxu0 %v875_v60  ;;  %1253 = vmatprep.subr.mxu1 %v1280_v54 }
 0x226   :  { %1170 = vmatprep.subr.mxu0 %v890_v61  ;;  %1254 = vmatpush3.msra.mxu1 %v986_v23 }
 0x227   :  { %1171 = vmatpush3.msra.mxu0 %v874_v62  ;;  %1255 = vmatprep.subr.mxu1 %v1280_v54 }
 0x228   :  { %1172 = vmatprep.subr.mxu0 %v889_v63  ;;  %1256 = vmatpush3.msra.mxu1 %v985_v24 }
 0x229   :  { %1173 = vmatpush3.msra.mxu0 %v873_v0  ;;  %1257 = vmatprep.subr.mxu1 %v1280_v54 }
 0x22a   :  { %1174 = vmatprep.subr.mxu0 %v888_v1  ;;  %1258 = vmatpush3.msra.mxu1 %v984_v16 }
 0x22b   :  { %1175 = vmatpush3.msra.mxu0 %v872_v2  ;;  %1259 = vmatprep.subr.mxu1 %v1280_v54 }
 0x22c   :  { %1176 = vmatprep.subr.mxu0 %v887_v3  ;;  %1260 = vmatpush3.msra.mxu1 %v983_v25 }
 0x22d   :  { %1177 = vmatpush3.msra.mxu0 %v871_v4  ;;  %1261 = vmatprep.subr.mxu1 %v1280_v54 }
 0x22e   :  { %1178 = vmatprep.subr.mxu0 %v886_v6  ;;  %1262 = vmatpush3.msra.mxu1 %v982_v43 }
 0x22f   :  { %1179 = vmatpush3.msra.mxu0 %v870_v7  ;;  %1263 = vmatprep.subr.mxu1 %v1280_v54 }
 0x230   :  { %1180 = vmatprep.subr.mxu0 %v885_v8  ;;  %1264 = vmatpush3.msra.mxu1 %v981_v41 }
 0x231   :  { %1181 = vmatpush3.msra.mxu0 %v869_v9  ;;  %1265 = vmatprep.subr.mxu1 %v1280_v54 }
 0x232   :  { %1182 = vmatprep.subr.mxu0 %v884_v10  ;;  %1266 = vmatpush3.msra.mxu1 %v980_v57 }
 0x233   :  { %1183 = vmatpush3.msra.mxu0 %v868_v11  ;;  %1267 = vmatprep.subr.mxu1 %v1280_v54 }
 0x234   :  { %1268 = vmatpush3.msra.mxu1 %v979_v5 }
 0x235   :  { %1269 = vmatprep.subr.mxu1 %v1280_v54 }
 0x236   :  { %1270 = vmatpush3.msra.mxu1 %v978_v44 }
 0x296   :  { %v578_v27 = vpop.f32.mrf.mxu1 }
 0x297   :  { %v579_v28 = vadd.f32 %v1093_v26, %v578_v27 }
 0x298   :  { %v1238_v29 = vpop.f32.mrf.mxu1 }
 0x299   :  { %583 = vst.msk [vmem:[%s2526_s13] sm:$0x3] %vm582_vm2, %v579_v28 }
 0x2d6   :  { %v861_v36 = vpop.f32.mrf.mxu1 }
 0x2d7   :  { %v862_v38 = vadd.f32 %v861_v36, %v791_v34 }
 0x2d8   :  { %v863_v39 = vpop.f32.mrf.mxu1 }
 0x2d9   :  { %v864_v40 = vadd.f32 %v863_v39, %v793_v37  ;;  %v866_v42 = vmax.f32 %v862_v38, 0.0 }
 0x2db   :  { %v867_v19 = vmax.f32 %v864_v40, 0.0 }
 0x2dd   :  { %971 = vmatprep.mubr.f32.mxu0 %v867_v19 }
 0x2de   :  { %972 = vmatmul.mubr.f32.vlgmr.msra.gmra.mxu0 %v866_v42 }
 0x39e   :  { %v1184_v45 = vpop.f32.mrf.mxu0 }
 0x3a0   :  { %v1185_v18 = vpop.f32.mrf.mxu0 }
 0x3a1   :  { %v1186_v46 = vadd.f32 %v1185_v18, %v1184_v45 }
 0x3a3   :  { %v974_v47 = vadd.f32 %v1186_v46, %v1094_v20 }
 0x3a5   :  { %v977_v48 = vmax.f32 %v974_v47, 0.0 }
 0x3a7   :  { %1272 = vmatmul.mubr.f32.vlgmr.msra.gmra.mxu1 %v977_v48 }
 0x467   :  { %v1067_v54 = vpop.f32.mrf.mxu1 }
 0x468   :  { %v1068_v50 = vadd.f32 %v1095_v49, %v1067_v54 }
 0x469   :  { %v1273_v51 = vpop.f32.mrf.mxu1 }
 0x46a   :  { %v1072_v52 = vsel %vm1071_vm3, %v1068_v50, -inf }
 0x46b   :  { %1073 = vmax.xlane.f32.xlu0 %v1072_v52 }
 0x4f4   :  { %v1074_v53 = vpop.xlane.xlu0 %1073 }
 0x4f5   :  { %v1075_v55 = vsub.f32 %v1068_v50, %v1074_v53 }
 0x4f7   :  { %v1076_v56 = vmul.f32 1.442695, %v1075_v55 }
 0x4f9   :  { %1276 = vpow2.f32 %v1076_v56 }
 0x506   :  { %v1277_v58 = vpop.eup %1276 }
 0x507   :  { %v1078_v59 = vsel %vm1071_vm3, %v1277_v58, 0.0 }
 0x508   :  { %1079 = vadd.xlane.f32.xlu0 %v1078_v59 }
 0x591   :  { %v1080_v60 = vpop.xlane.xlu0 %1079 }
 0x592   :  { %1278 = vrcp.f32 %v1080_v60 }
 0x59f   :  { %v1279_v61 = vpop.eup %1278 }
 0x5a0   :  { %v1082_v62 = vmul.f32 %v1279_v61, %v1277_v58 }
 0x5a2   :  { %1083 = vst.msk [vmem:[%s2530_s14] sm:$0x3] %vm1071_vm3, %v1082_v62 }

</bundles_post_ra>
